<compile_context>
chip_gen: v7x
topology: tpu7x:2x2x1
jax: 0.10.0
libtpu: 0.0.40
codegen_flags: <defaults>
</compile_context>

<pallas_src>
import functools

import jax
import jax.numpy as jnp
from jax import lax
from jax.experimental import pallas as pl
from jax.experimental.pallas import tpu as pltpu


def _default_vmem_limit():
    # v5e/v6e have 128 MiB physical VMEM, v7x 64 MiB; raise the scoped limit where there
    # is headroom, fall back to a safe 32 MiB if the query is unavailable.
    try:
        cap = pltpu.get_tpu_info().vmem_capacity_bytes
        return int(min(cap * 3 // 4, 96 * 1024 * 1024))
    except Exception:
        return 32 * 1024 * 1024


_VMEM_LIMIT = _default_vmem_limit()


def _cparams(sem):
    return pltpu.CompilerParams(dimension_semantics=sem, vmem_limit_bytes=_VMEM_LIMIT)


def _const_spec(arr):
    zeros = (0,) * arr.ndim
    return pl.BlockSpec(arr.shape, lambda *_: zeros)


def _eye(n, dtype=jnp.float32):
    r = lax.broadcasted_iota(jnp.int32, (n, n), 0)
    c = lax.broadcasted_iota(jnp.int32, (n, n), 1)
    return (r == c).astype(dtype)


def _elu(h):
    return jnp.where(h > 0, h, jnp.exp(jnp.minimum(h, 0.0)) - 1.0)


def _silu(h):
    return h * (1.0 / (1.0 + jnp.exp(-h)))


def _pair_tiling(n, max_lanes=8192):
    """Pick (rows_per_tile, n_tiles) so each tile covers rows_per_tile*n pair columns
    (a multiple of 128 lanes, whole i-rows) of the flattened N*N pair axis."""
    nn = n * n
    if nn <= max_lanes:
        return n, 1
    best = None
    for rt in range(1, n + 1):
        if n % rt:
            continue
        t = rt * n
        if t > max_lanes:
            break
        if t % 128 or (rt % 8 and rt != n):
            continue
        best = rt
    if best is None:
        return n, 1
    return best, n // best


# ----------------------------------------------------------------------------
# Kernel 1: adjacency powers (pow_tensor) -- adj resident in VMEM
# ----------------------------------------------------------------------------

def _pow_kernel(adj_ref, out_ref, *, cnum):
    a = adj_ref[0]                                     # (N, N)
    out_ref[0, 0] = a
    cur = a
    for p in range(1, cnum):
        cur = jnp.dot(cur, a, preferred_element_type=jnp.float32)
        out_ref[0, p] = cur


def pow_tensor_pallas(adj, cnum):
    B, N, _ = adj.shape
    return pl.pallas_call(
        functools.partial(_pow_kernel, cnum=cnum),
        out_shape=jax.ShapeDtypeStruct((B, cnum, N, N), jnp.float32),
        grid=(B,),
        in_specs=[pl.BlockSpec((1, N, N), lambda b: (b, 0, 0))],
        out_specs=pl.BlockSpec((1, cnum, N, N), lambda b: (b, 0, 0, 0)),
        compiler_params=_cparams(("parallel",)),
    )(adj)


# ----------------------------------------------------------------------------
# Kernel 2: fused per-batch layer kernel
#   all channels: GCN norm + Q|K / V projections + multi-head tanh attention,
#   plus the node multi_channel MLP (* flags, tanh).  grid = (B,)
# ----------------------------------------------------------------------------

def _attn_layer_kernel(x_ref, adj_ref, flags_ref, wqk_ref, bqk_ref, wv_ref, bv_ref,
                       wm1_ref, bm1_ref, wm2_ref, bm2_ref, a_out_ref, x_out_ref,
                       *, num_heads, attn_dim):
    n = x_ref.shape[1]
    n_ch = adj_ref.shape[1]
    x = x_ref[0]                                       # (N, Fi)
    eye = _eye(n)                                      # built once per batch step
    d = attn_dim // num_heads

    v_list = []
    for c in range(n_ch):
        adj_c = adj_ref[0, c]                          # (N, N)
        # DenseGCNConv normalization (PyG/GDSS "set diagonal to 1" semantics), in VMEM:
        #   D^-1/2 A' D^-1/2 H == dinv * (A' @ (dinv * H)), no adj_norm materialized.
        adj_sl = adj_c * (1.0 - eye) + eye
        deg = jnp.sum(adj_sl, axis=-1, keepdims=True)
        dinv = lax.rsqrt(jnp.maximum(deg, 1.0))

        hqk = jnp.dot(x, wqk_ref[c], preferred_element_type=jnp.float32)
        hqk = jnp.dot(adj_sl, hqk * dinv,
                      preferred_element_type=jnp.float32) * dinv + bqk_ref[c]
        hv = jnp.dot(x, wv_ref[c], preferred_element_type=jnp.float32)
        hv = jnp.dot(adj_sl, hv * dinv,
                     preferred_element_type=jnp.float32) * dinv + bv_ref[c]
        v_list.append(hv)

        # multi-head tanh attention; the 1/sqrt(conv_out) logit scale is folded into Wq.
        q = hqk[:, :attn_dim]
        k = hqk[:, attn_dim:]
        acc = None
        for hh in range(num_heads):
            s = lax.dot_general(q[:, hh * d:(hh + 1) * d], k[:, hh * d:(hh + 1) * d],
                                (((1,), (1,)), ((), ())),
                                preferred_element_type=jnp.float32)
            t = jnp.tanh(s)
            acc = t if acc is None else acc + t
        a = acc * (1.0 / num_heads)
        a_out_ref[0, c] = 0.5 * (a + a.T)

    # node branch (multi_channel MLP + mask_x + tanh) fused: V never leaves VMEM and the
    # node output is written channels-last directly.
    v = jnp.concatenate(v_list, axis=-1)               # (N, C*conv_out)
    hmc = jnp.dot(v, wm1_ref[...], preferred_element_type=jnp.float32) + bm1_ref[...]
    hmc = _elu(hmc)
    y = jnp.dot(hmc, wm2_ref[...], preferred_element_type=jnp.float32) + bm2_ref[...]
    x_out_ref[0] = jnp.tanh(y * flags_ref[0])


def attention_layer(x, adjc, flags3, p, num_heads):
    B, N, Fi = x.shape
    C = adjc.shape[1]
    attn_dim = p["Wqk"].shape[-1] // 2
    Co = p["Wv"].shape[-1]

    kern = functools.partial(_attn_layer_kernel, num_heads=num_heads, attn_dim=attn_dim)
    weights = [p["Wqk"], p["bqk"], p["Wv"], p["bv"],
               p["Wm1"], p["bm1"], p["Wm2"], p["bm2"]]
    return pl.pallas_call(
        kern,
        out_shape=(jax.ShapeDtypeStruct((B, C, N, N), jnp.float32),
                   jax.ShapeDtypeStruct((B, N, Co), jnp.float32)),
        grid=(B,),
        in_specs=[pl.BlockSpec((1, N, Fi), lambda b: (b, 0, 0)),
                  pl.BlockSpec((1, C, N, N), lambda b: (b, 0, 0, 0)),
                  pl.BlockSpec((1, N, 1), lambda b: (b, 0, 0))]
                 + [_const_spec(w) for w in weights],
        out_specs=(pl.BlockSpec((1, C, N, N), lambda b: (b, 0, 0, 0)),
                   pl.BlockSpec((1, N, Co), lambda b: (b, 0, 0))),
        compiler_params=_cparams(("parallel",)),
    )(x, adjc, flags3, *weights)


# ----------------------------------------------------------------------------
# Kernel 3: edge MLP in transposed layout (features on sublanes, N*N pairs on lanes)
#   inputs A / adj consumed as free (B, C, N*N) reshapes; pair-3D term built per tile.
# ----------------------------------------------------------------------------

def _edge_mlp_kernel(a_ref, adj_ref, x3i_ref, x3j_ref, w3d_ref, b3d_ref,
                     w1a_ref, w1adj_ref, w1p_ref, b1_ref, *rest):
    tail = rest[:-1]
    out_ref = rest[-1]

    # 3D conditioning (reconstructed "_03" path): h3 = node_3D_repr @ W3d + b;
    # pairwise h3[i]*h3[j] built for this tile's i-rows in the (feat, pairs) layout.
    h3_i = jnp.dot(x3i_ref[0], w3d_ref[...],
                   preferred_element_type=jnp.float32) + b3d_ref[...]
    h3_j = jnp.dot(x3j_ref[0], w3d_ref[...],
                   preferred_element_type=jnp.float32) + b3d_ref[...]
    h3_i = h3_i.T                                      # (emb3d, rows_per_tile)
    h3_j = h3_j.T                                      # (emb3d, N)
    rt = h3_i.shape[1]
    p3 = jnp.concatenate([h3_i[:, r:r + 1] * h3_j for r in range(rt)], axis=1)

    # first layer: tiny channel groups accumulated as VPU broadcasts (no lane-sparse
    # concat block, no tiny-K MXU pushes); pair-3D block via one MXU matmul.
    a_blk = a_ref[0]                                   # (C, T)
    adj_blk = adj_ref[0]                               # (C, T)
    w1a = w1a_ref[...]                                 # (H1, C)
    w1adj = w1adj_ref[...]
    h = b1_ref[...]                                    # (H1, 1)
    for c in range(a_blk.shape[0]):
        h = h + w1a[:, c:c + 1] * a_blk[c:c + 1, :]
        h = h + w1adj[:, c:c + 1] * adj_blk[c:c + 1, :]
    h = h + jnp.dot(w1p_ref[...], p3, preferred_element_type=jnp.float32)

    for li in range(len(tail) // 2):
        h = _elu(h)
        h = jnp.dot(tail[2 * li][...], h,
                    preferred_element_type=jnp.float32) + tail[2 * li + 1][...]
    out_ref[0] = h                                     # (c_out, T) channels-first-flat


def edge_mlp(A_flat, adj_flat, node_3D, p, N):
    B, C, NN = A_flat.shape
    dim3D = node_3D.shape[-1]
    rt, n_tiles = _pair_tiling(N)
    T = rt * N
    c_out = p["tail"][-1][0].shape[0] if p["tail"] else p["W1a_T"].shape[0]

    weights = [p["W3d"], p["b3d"], p["W1a_T"], p["W1adj_T"], p["W1p_T"], p["b1"]]
    for wt, bt in p["tail"]:
        weights += [wt, bt]

    in_specs = ([pl.BlockSpec((1, C, T), lambda b, t: (b, 0, t)),
                 pl.BlockSpec((1, C, T), lambda b, t: (b, 0, t)),
                 pl.BlockSpec((1, rt, dim3D), lambda b, t: (b, t, 0)),
                 pl.BlockSpec((1, N, dim3D), lambda b, t: (b, 0, 0))]
                + [_const_spec(w) for w in weights])

    return pl.pallas_call(
        _edge_mlp_kernel,
        out_shape=jax.ShapeDtypeStruct((B, c_out, NN), jnp.float32),
        grid=(B, n_tiles),
        in_specs=in_specs,
        out_specs=pl.BlockSpec((1, c_out, T), lambda b, t: (b, 0, t)),
        compiler_params=_cparams(("parallel", "parallel")),
    )(A_flat, adj_flat, node_3D, node_3D, *weights)


# ----------------------------------------------------------------------------
# Kernel 4: final MLP (silu, silu, linear) in transposed layout, per-layer adjacency
#   groups contracted in-kernel (no (B, fdim, N, N) concat / permute in HBM)
# ----------------------------------------------------------------------------

def _final_mlp_kernel(*refs, n_groups):
    group_refs = refs[:n_groups]
    mask_ref = refs[n_groups]
    w1_parts = refs[n_groups + 1:2 * n_groups + 1]
    b1_ref, w2_ref, b2_ref, w3_ref, b3_ref, out_ref = refs[2 * n_groups + 1:]

    h = b1_ref[...]                                    # (2*fdim, 1)
    for g in range(n_groups):
        wg = w1_parts[g][...]                          # (2*fdim, Cg)
        ag = group_refs[g][0]                          # (Cg, T)
        for c in range(ag.shape[0]):
            h = h + wg[:, c:c + 1] * ag[c:c + 1, :]
    h = _silu(h)
    h = jnp.dot(w2_ref[...], h, preferred_element_type=jnp.float32) + b2_ref[...]
    h = _silu(h)
    # last (2*fdim -> 1) layer as a sublane reduction; stored tile stays lane-dense.
    s = jnp.sum(h * w3_ref[...], axis=0, keepdims=True) + b3_ref[...]
    out_ref[0] = s * mask_ref[0]                       # diagonal kill + mask_adjs fused


def final_mlp(groups_flat, mask_flat, fp, N):
    B = groups_flat[0].shape[0]
    NN = N * N
    rt, n_tiles = _pair_tiling(N)
    T = rt * N
    n_groups = len(groups_flat)

    weights = list(fp["W1_parts"]) + [fp["b1"], fp["W2_T"], fp["b2"], fp["W3"], fp["b3"]]
    in_specs = ([pl.BlockSpec((1, g.shape[1], T), lambda b, t: (b, 0, t))
                 for g in groups_flat]
                + [pl.BlockSpec((1, 1, T), lambda b, t: (b, 0, t))]
                + [_const_spec(w) for w in weights])

    out = pl.pallas_call(
        functools.partial(_final_mlp_kernel, n_groups=n_groups),
        out_shape=jax.ShapeDtypeStruct((B, 1, NN), jnp.float32),
        grid=(B, n_tiles),
        in_specs=in_specs,
        out_specs=pl.BlockSpec((1, 1, T), lambda b, t: (b, 0, t)),
        compiler_params=_cparams(("parallel", "parallel")),
    )(*groups_flat, mask_flat, *weights)
    return out.reshape(B, N, N)


# ----------------------------------------------------------------------------
# Plain-JAX glue (only free reshapes + one symmetrize/mask pass per layer)
# ----------------------------------------------------------------------------

def mask_adjs_jax(adjs, flags):
    if flags is None:
        flags = jnp.ones((adjs.shape[0], adjs.shape[-1]), dtype=adjs.dtype)
    f = flags[:, None] if adjs.ndim == 4 else flags
    adjs = adjs * f[..., None]
    adjs = adjs * f[..., None, :]
    return adjs


def edge_network_forward(p, x, adjc, node_3D_repr, flags3, pair_mask, num_heads):
    """One EdgeNetwork_dense_03 layer -> (x_out [B,N,Co], adj_out [B,c_out,N,N])."""
    B, C, N, _ = adjc.shape
    A, x_out = attention_layer(x, adjc, flags3, p, num_heads)

    NN = N * N
    # (B, C, N, N) -> (B, C, N*N) are free reshapes; channels contracted in-kernel.
    edge_cf = edge_mlp(A.reshape(B, C, NN), adjc.reshape(B, C, NN),
                       node_3D_repr, p, N)                        # (B, c_out, N*N)
    _adj = edge_cf.reshape(B, -1, N, N)
    _adj = _adj + jnp.swapaxes(_adj, -1, -2)                      # symmetrize
    adj_out = _adj * pair_mask[:, None]                           # mask_adjs
    return x_out, adj_out


def edge_score_network_forward(params, x, adj, node_3D_repr, flags, cfg):
    B, N, _ = x.shape
    pair_mask = flags[:, :, None] * flags[:, None, :]             # (B, N, N)
    flags3 = flags[:, :, None]                                    # (B, N, 1)

    adjc = pow_tensor_pallas(adj, cfg["c_init"])                  # (B, c_init, N, N)
    adj_groups = [adjc]
    h = x
    for lp in params["layers"]:
        h, adjc = edge_network_forward(lp, h, adjc, node_3D_repr, flags3, pair_mask,
                                       cfg["num_heads"])
        adj_groups.append(adjc)

    NN = N * N
    groups_flat = [g.reshape(B, g.shape[1], NN) for g in adj_groups]   # free reshapes
    mask_noeye = pair_mask * (1.0 - jnp.eye(N, dtype=jnp.float32))[None]
    return final_mlp(groups_flat, mask_noeye.reshape(B, 1, NN), params["final"], N)


# ----------------------------------------------------------------------------
# Deterministic parameter construction (shapes follow the module's __init__);
# weights are stored pre-transposed / pre-split / scale-folded for the kernels.
# ----------------------------------------------------------------------------

def init_params(key, cfg):
    dim3D, nhid = cfg["dim3D"], cfg["nhid"]
    L, num_linears = cfg["num_layers"], cfg["num_linears"]
    c_init, c_hid, c_final, adim = cfg["c_init"], cfg["c_hid"], cfg["c_final"], cfg["adim"]
    emb3d = dim3D // 2

    def lin(k, fi, fo):
        k1, k2 = jax.random.split(k)
        s = 1.0 / (fi ** 0.5)
        W = jax.random.uniform(k1, (fi, fo), minval=-s, maxval=s, dtype=jnp.float32)
        b = jax.random.uniform(k2, (fo,), minval=-s, maxval=s, dtype=jnp.float32)
        return W, b

    def glorot(k, fi, fo):
        s = (6.0 / (fi + fo)) ** 0.5
        return jax.random.uniform(k, (fi, fo), minval=-s, maxval=s, dtype=jnp.float32)

    layer_cfgs = []
    for l in range(L):
        if l == 0:
            layer_cfgs.append((dim3D, nhid, nhid, c_init, c_hid))
        elif l == L - 1:
            layer_cfgs.append((nhid, adim, nhid, c_hid, c_final))
        else:
            layer_cfgs.append((nhid, adim, nhid, c_hid, c_hid))

    keys = jax.random.split(key, L + 1)
    layers = []
    for l, (f_in, attn_dim, conv_out, c_in, c_out) in enumerate(layer_cfgs):
        lk = jax.random.split(keys[l], c_in + 8)
        # GDSS Attention divides logits by sqrt(out_dim) (the conv output dim);
        # folded into the Q projection weight (bias is zero, GDSS DenseGCNConv init).
        scale = 1.0 / float(conv_out) ** 0.5
        wqk, wv = [], []
        for c in range(c_in):
            ck = jax.random.split(lk[c], 3)
            wq = glorot(ck[0], f_in, attn_dim) * scale
            wk = glorot(ck[1], f_in, attn_dim)
            wqk.append(jnp.concatenate([wq, wk], axis=1))
            wv.append(glorot(ck[2], f_in, conv_out))
        Wqk = jnp.stack(wqk, 0)                               # (C, Fi, 2*attn_dim)
        Wv = jnp.stack(wv, 0)                                 # (C, Fi, conv_out)
        bqk = jnp.zeros((c_in, 1, 2 * attn_dim), jnp.float32)
        bv = jnp.zeros((c_in, 1, conv_out), jnp.float32)

        hidden = 2 * max(c_in, c_out)
        Wm1, bm1 = lin(lk[c_in], c_in * conv_out, hidden)
        Wm2, bm2 = lin(lk[c_in + 1], hidden, conv_out)
        W3d, b3d = lin(lk[c_in + 2], dim3D, emb3d)

        # edge MLP: input rows = [A channels | adj channels | pair3d]
        mlp_dims = [2 * c_in + emb3d] + [hidden] * (num_linears - 1) + [c_out]
        mk = jax.random.split(lk[c_in + 3], num_linears)
        W1, b1 = lin(mk[0], mlp_dims[0], mlp_dims[1])
        tail = []
        for i in range(1, num_linears):
            Wt, bt = lin(mk[i], mlp_dims[i], mlp_dims[i + 1])
            tail.append((Wt.T, bt.reshape(-1, 1)))

        layers.append(dict(
            Wqk=Wqk, bqk=bqk, Wv=Wv, bv=bv,
            Wm1=Wm1, bm1=bm1.reshape(1, -1), Wm2=Wm2, bm2=bm2.reshape(1, -1),
            W3d=W3d, b3d=b3d.reshape(1, -1),
            W1a_T=W1[:c_in].T, W1adj_T=W1[c_in:2 * c_in].T, W1p_T=W1[2 * c_in:].T,
            b1=b1.reshape(-1, 1),
            tail=tail,
        ))

    fdim = c_hid * (L - 1) + c_final + c_init
    group_sizes = [c_init] + [lc[4] for lc in layer_cfgs]
    fk = jax.random.split(keys[-1], 3)
    Wf1, bf1 = lin(fk[0], fdim, 2 * fdim)
    Wf2, bf2 = lin(fk[1], 2 * fdim, 2 * fdim)
    Wf3, bf3 = lin(fk[2], 2 * fdim, 1)
    W1_parts, o = [], 0
    for g in group_sizes:
        W1_parts.append(Wf1[o:o + g].T)                      # (2*fdim, Cg)
        o += g
    final = dict(W1_parts=W1_parts, b1=bf1.reshape(-1, 1),
                 W2_T=Wf2.T, b2=bf2.reshape(-1, 1),
                 W3=Wf3, b3=bf3.reshape(1, 1))
    return {"layers": layers, "final": final}


# ----------------------------------------------------------------------------
# Demo
# ----------------------------------------------------------------------------

if __name__ == "__main__":
    cfg = dict(dim3D=16, nhid=16, num_layers=3, num_linears=2,
               c_init=2, c_hid=4, c_final=4, adim=16, num_heads=4, conv="GCN")
    B, N = 2, 16

    root = jax.random.PRNGKey(0)
    kp, kx, ka, k3 = jax.random.split(root, 4)

    params = init_params(kp, cfg)

    x = jax.random.normal(kx, (B, N, cfg["dim3D"]), dtype=jnp.float32)
    node_3D_repr = jax.random.normal(k3, (B, N, cfg["dim3D"]), dtype=jnp.float32)

    a = jax.random.uniform(ka, (B, N, N), dtype=jnp.float32)
    adj = ((a + jnp.swapaxes(a, 1, 2)) * 0.5 > 0.5).astype(jnp.float32)
    adj = adj * (1.0 - jnp.eye(N, dtype=jnp.float32))
    lens = jnp.array([N, N - 3])
    flags = (jnp.arange(N)[None, :] < lens[:, None]).astype(jnp.float32)
    adj = mask_adjs_jax(adj, flags)

    fwd = jax.jit(functools.partial(edge_score_network_forward, cfg=cfg))
    score = fwd(params, x, adj, node_3D_repr, flags)
    jax.block_until_ready(score)

    assert score.shape == (B, N, N), score.shape
    assert bool(jnp.all(jnp.isfinite(score)))
    print("KERNEL_OK")
</pallas_src>

<mosaic_0001>
module attributes {stable_mosaic.version = 11 : i64} {
  func.func @_pow_kernel(%arg0: i32, %arg1: memref<1x16x16xf32, #tpu.memory_space<vmem>>, %arg2: memref<1x2x16x16xf32, #tpu.memory_space<vmem>>) attributes {dimension_semantics = [#tpu.dimension_semantics<parallel>], iteration_bounds = array<i64: 2>, scalar_prefetch = 0 : i64, scratch_operands = 0 : i64, tpu.core_type = #tpu.core_type<tc>, window_params = [{transform_indices = @transform_0, window_bounds = array<i64: 1, 16, 16>}, {transform_indices = @transform_1, window_bounds = array<i64: 1, 2, 16, 16>}]} {
    %c0 = arith.constant 0 : index
    %c0_0 = arith.constant 0 : index
    %c0_1 = arith.constant 0 : index
    %0 = vector.load %arg1[%c0, %c0_0, %c0_1] : memref<1x16x16xf32, #tpu.memory_space<vmem>>, vector<1x16x16xf32>
    %1 = vector.shape_cast %0 : vector<1x16x16xf32> to vector<16x16xf32>
    %c0_2 = arith.constant 0 : index
    %c0_3 = arith.constant 0 : index
    %c0_4 = arith.constant 0 : index
    %c0_5 = arith.constant 0 : index
    %2 = vector.load %arg2[%c0_2, %c0_3, %c0_4, %c0_5] : memref<1x2x16x16xf32, #tpu.memory_space<vmem>>, vector<1x1x16x16xf32>
    %3 = vector.shape_cast %2 : vector<1x1x16x16xf32> to vector<16x16xf32>
    %4 = vector.shape_cast %1 : vector<16x16xf32> to vector<1x1x16x16xf32>
    tpu.vector_store %arg2[%c0_2, %c0_3, %c0_4, %c0_5], %4 {strides = array<i32>} : memref<1x2x16x16xf32, #tpu.memory_space<vmem>>, vector<1x1x16x16xf32>,
    %cst = arith.constant dense<0.000000e+00> : vector<16x16xf32>
    %5 = tpu.matmul %1, %1, %cst {dimension_numbers = #tpu.dot_dimension_numbers<[1], [0], [0], [1], [0, 0, 1, 1], [], []>} : vector<16x16xf32>, vector<16x16xf32>, vector<16x16xf32> -> vector<16x16xf32>
    %c0_6 = arith.constant 0 : index
    %c1 = arith.constant 1 : index
    %c0_7 = arith.constant 0 : index
    %c0_8 = arith.constant 0 : index
    %6 = vector.load %arg2[%c0_6, %c1, %c0_7, %c0_8] : memref<1x2x16x16xf32, #tpu.memory_space<vmem>>, vector<1x1x16x16xf32>
    %7 = vector.shape_cast %6 : vector<1x1x16x16xf32> to vector<16x16xf32>
    %8 = vector.shape_cast %5 : vector<16x16xf32> to vector<1x1x16x16xf32>
    tpu.vector_store %arg2[%c0_6, %c1, %c0_7, %c0_8], %8 {strides = array<i32>} : memref<1x2x16x16xf32, #tpu.memory_space<vmem>>, vector<1x1x16x16xf32>,
    return
  }
  func.func @transform_0(%arg0: i32) -> (i32, i32, i32) {
    %c0_i32 = arith.constant 0 : i32
    %c0_i32_0 = arith.constant 0 : i32
    %c0_i32_1 = arith.constant 0 : i32
    return %arg0, %c0_i32, %c0_i32_0 : i32, i32, i32
  }
  func.func @transform_1(%arg0: i32) -> (i32, i32, i32, i32) {
    %c0_i32 = arith.constant 0 : i32
    %c0_i32_0 = arith.constant 0 : i32
    %c0_i32_1 = arith.constant 0 : i32
    %c0_i32_2 = arith.constant 0 : i32
    return %arg0, %c0_i32, %c0_i32_0, %c0_i32_1 : i32, i32, i32, i32
  }
}

module attributes {stable_mosaic.version = 11 : i64} {
  func.func @_attn_layer_kernel(%arg0: i32, %arg1: memref<1x16x16xf32, #tpu.memory_space<vmem>>, %arg2: memref<1x2x16x16xf32, #tpu.memory_space<vmem>>, %arg3: memref<1x16x1xf32, #tpu.memory_space<vmem>>, %arg4: memref<2x16x32xf32, #tpu.memory_space<vmem>>, %arg5: memref<2x1x32xf32, #tpu.memory_space<vmem>>, %arg6: memref<2x16x16xf32, #tpu.memory_space<vmem>>, %arg7: memref<2x1x16xf32, #tpu.memory_space<vmem>>, %arg8: memref<32x8xf32, #tpu.memory_space<vmem>>, %arg9: memref<1x8xf32, #tpu.memory_space<vmem>>, %arg10: memref<8x16xf32, #tpu.memory_space<vmem>>, %arg11: memref<1x16xf32, #tpu.memory_space<vmem>>, %arg12: memref<1x2x16x16xf32, #tpu.memory_space<vmem>>, %arg13: memref<1x16x16xf32, #tpu.memory_space<vmem>>) attributes {dimension_semantics = [#tpu.dimension_semantics<parallel>], iteration_bounds = array<i64: 2>, scalar_prefetch = 0 : i64, scratch_operands = 0 : i64, tpu.core_type = #tpu.core_type<tc>, window_params = [{transform_indices = @transform_0, window_bounds = array<i64: 1, 16, 16>}, {transform_indices = @transform_1, window_bounds = array<i64: 1, 2, 16, 16>}, {transform_indices = @transform_2, window_bounds = array<i64: 1, 16, 1>}, {pipeline_mode = #tpu.pipeline_mode<synchronous>, transform_indices = @transform_3, window_bounds = array<i64: 2, 16, 32>}, {pipeline_mode = #tpu.pipeline_mode<synchronous>, transform_indices = @transform_4, window_bounds = array<i64: 2, 1, 32>}, {pipeline_mode = #tpu.pipeline_mode<synchronous>, transform_indices = @transform_5, window_bounds = array<i64: 2, 16, 16>}, {pipeline_mode = #tpu.pipeline_mode<synchronous>, transform_indices = @transform_6, window_bounds = array<i64: 2, 1, 16>}, {pipeline_mode = #tpu.pipeline_mode<synchronous>, transform_indices = @transform_7, window_bounds = array<i64: 32, 8>}, {pipeline_mode = #tpu.pipeline_mode<synchronous>, transform_indices = @transform_8, window_bounds = array<i64: 1, 8>}, {pipeline_mode = #tpu.pipeline_mode<synchronous>, transform_indices = @transform_9, window_bounds = array<i64: 8, 16>}, {pipeline_mode = #tpu.pipeline_mode<synchronous>, transform_indices = @transform_10, window_bounds = array<i64: 1, 16>}, {transform_indices = @transform_11, window_bounds = array<i64: 1, 2, 16, 16>}, {transform_indices = @transform_12, window_bounds = array<i64: 1, 16, 16>}]} {
    %c0 = arith.constant 0 : index
    %c0_0 = arith.constant 0 : index
    %c0_1 = arith.constant 0 : index
    %0 = vector.load %arg1[%c0, %c0_0, %c0_1] : memref<1x16x16xf32, #tpu.memory_space<vmem>>, vector<1x16x16xf32>
    %1 = vector.shape_cast %0 : vector<1x16x16xf32> to vector<16x16xf32>
    %2 = tpu.iota {dimensions = array<i32: 0>} : vector<16x16xi32>
    %3 = tpu.iota {dimensions = array<i32: 1>} : vector<16x16xi32>
    %4 = arith.cmpi eq, %2, %3 : vector<16x16xi32>
    %5 = arith.extui %4 : vector<16x16xi1> to vector<16x16xi32>
    %6 = arith.sitofp %5 : vector<16x16xi32> to vector<16x16xf32>
    %c0_2 = arith.constant 0 : index
    %c0_3 = arith.constant 0 : index
    %c0_4 = arith.constant 0 : index
    %c0_5 = arith.constant 0 : index
    %7 = vector.load %arg2[%c0_2, %c0_3, %c0_4, %c0_5] : memref<1x2x16x16xf32, #tpu.memory_space<vmem>>, vector<1x1x16x16xf32>
    %8 = vector.shape_cast %7 : vector<1x1x16x16xf32> to vector<16x16xf32>
    %cst = arith.constant 1.000000e+00 : f32
    %9 = vector.broadcast %cst : f32 to vector<16x16xf32>
    %10 = arith.subf %9, %6 : vector<16x16xf32>
    %11 = arith.mulf %8, %10 : vector<16x16xf32>
    %12 = arith.addf %11, %6 : vector<16x16xf32>
    %cst_6 = arith.constant dense<0.000000e+00> : vector<16xf32>
    %13 = vector.multi_reduction <add>, %12, %cst_6 [1] : vector<16x16xf32> to vector<16xf32>
    %14 = vector.shape_cast %13 : vector<16xf32> to vector<16x1xf32>
    %cst_7 = arith.constant 1.000000e+00 : f32
    %15 = vector.broadcast %cst_7 : f32 to vector<16x1xf32>
    %16 = arith.maximumf %14, %15 : vector<16x1xf32>
    %17 = math.rsqrt %16 : vector<16x1xf32>
    %c0_8 = arith.constant 0 : index
    %c0_9 = arith.constant 0 : index
    %c0_10 = arith.constant 0 : index
    %18 = vector.load %arg4[%c0_8, %c0_9, %c0_10] : memref<2x16x32xf32, #tpu.memory_space<vmem>>, vector<1x16x32xf32>
    %19 = vector.shape_cast %18 : vector<1x16x32xf32> to vector<16x32xf32>
    %cst_11 = arith.constant dense<0.000000e+00> : vector<16x32xf32>
    %20 = tpu.matmul %1, %19, %cst_11 {dimension_numbers = #tpu.dot_dimension_numbers<[1], [0], [0], [1], [0, 0, 1, 1], [], []>} : vector<16x16xf32>, vector<16x32xf32>, vector<16x32xf32> -> vector<16x32xf32>
    %21 = vector.broadcast %17 : vector<16x1xf32> to vector<16x32xf32>
    %22 = arith.mulf %20, %21 : vector<16x32xf32>
    %cst_12 = arith.constant dense<0.000000e+00> : vector<16x32xf32>
    %23 = tpu.matmul %12, %22, %cst_12 {dimension_numbers = #tpu.dot_dimension_numbers<[1], [0], [0], [1], [0, 0, 1, 1], [], []>} : vector<16x16xf32>, vector<16x32xf32>, vector<16x32xf32> -> vector<16x32xf32>
    %24 = vector.broadcast %17 : vector<16x1xf32> to vector<16x32xf32>
    %25 = arith.mulf %23, %24 : vector<16x32xf32>
    %c0_13 = arith.constant 0 : index
    %c0_14 = arith.constant 0 : index
    %c0_15 = arith.constant 0 : index
    %26 = vector.load %arg5[%c0_13, %c0_14, %c0_15] : memref<2x1x32xf32, #tpu.memory_space<vmem>>, vector<1x1x32xf32>
    %27 = vector.shape_cast %26 : vector<1x1x32xf32> to vector<1x32xf32>
    %28 = vector.broadcast %27 : vector<1x32xf32> to vector<16x32xf32>
    %29 = arith.addf %25, %28 : vector<16x32xf32>
    %c0_16 = arith.constant 0 : index
    %c0_17 = arith.constant 0 : index
    %c0_18 = arith.constant 0 : index
    %30 = vector.load %arg6[%c0_16, %c0_17, %c0_18] : memref<2x16x16xf32, #tpu.memory_space<vmem>>, vector<1x16x16xf32>
    %31 = vector.shape_cast %30 : vector<1x16x16xf32> to vector<16x16xf32>
    %cst_19 = arith.constant dense<0.000000e+00> : vector<16x16xf32>
    %32 = tpu.matmul %1, %31, %cst_19 {dimension_numbers = #tpu.dot_dimension_numbers<[1], [0], [0], [1], [0, 0, 1, 1], [], []>} : vector<16x16xf32>, vector<16x16xf32>, vector<16x16xf32> -> vector<16x16xf32>
    %33 = vector.broadcast %17 : vector<16x1xf32> to vector<16x16xf32>
    %34 = arith.mulf %32, %33 : vector<16x16xf32>
    %cst_20 = arith.constant dense<0.000000e+00> : vector<16x16xf32>
    %35 = tpu.matmul %12, %34, %cst_20 {dimension_numbers = #tpu.dot_dimension_numbers<[1], [0], [0], [1], [0, 0, 1, 1], [], []>} : vector<16x16xf32>, vector<16x16xf32>, vector<16x16xf32> -> vector<16x16xf32>
    %36 = vector.broadcast %17 : vector<16x1xf32> to vector<16x16xf32>
    %37 = arith.mulf %35, %36 : vector<16x16xf32>
    %c0_21 = arith.constant 0 : index
    %c0_22 = arith.constant 0 : index
    %c0_23 = arith.constant 0 : index
    %38 = vector.load %arg7[%c0_21, %c0_22, %c0_23] : memref<2x1x16xf32, #tpu.memory_space<vmem>>, vector<1x1x16xf32>
    %39 = vector.shape_cast %38 : vector<1x1x16xf32> to vector<1x16xf32>
    %40 = vector.broadcast %39 : vector<1x16xf32> to vector<16x16xf32>
    %41 = arith.addf %37, %40 : vector<16x16xf32>
    %42 = vector.extract_strided_slice %29 {offsets = [0, 0], sizes = [16, 16], strides = [1, 1]} : vector<16x32xf32> to vector<16x16xf32>
    %43 = vector.extract_strided_slice %29 {offsets = [0, 16], sizes = [16, 16], strides = [1, 1]} : vector<16x32xf32> to vector<16x16xf32>
    %44 = vector.extract_strided_slice %42 {offsets = [0, 0], sizes = [16, 4], strides = [1, 1]} : vector<16x16xf32> to vector<16x4xf32>
    %45 = vector.extract_strided_slice %43 {offsets = [0, 0], sizes = [16, 4], strides = [1, 1]} : vector<16x16xf32> to vector<16x4xf32>
    %cst_24 = arith.constant dense<0.000000e+00> : vector<16x16xf32>
    %46 = tpu.matmul %44, %45, %cst_24 {dimension_numbers = #tpu.dot_dimension_numbers<[1], [1], [0], [0], [0, 0, 1, 0], [], []>} : vector<16x4xf32>, vector<16x4xf32>, vector<16x16xf32> -> vector<16x16xf32>
    %47 = math.tanh %46 : vector<16x16xf32>
    %48 = vector.extract_strided_slice %42 {offsets = [0, 4], sizes = [16, 4], strides = [1, 1]} : vector<16x16xf32> to vector<16x4xf32>
    %49 = vector.extract_strided_slice %43 {offsets = [0, 4], sizes = [16, 4], strides = [1, 1]} : vector<16x16xf32> to vector<16x4xf32>
    %cst_25 = arith.constant dense<0.000000e+00> : vector<16x16xf32>
    %50 = tpu.matmul %48, %49, %cst_25 {dimension_numbers = #tpu.dot_dimension_numbers<[1], [1], [0], [0], [0, 0, 1, 0], [], []>} : vector<16x4xf32>, vector<16x4xf32>, vector<16x16xf32> -> vector<16x16xf32>
    %51 = math.tanh %50 : vector<16x16xf32>
    %52 = arith.addf %47, %51 : vector<16x16xf32>
    %53 = vector.extract_strided_slice %42 {offsets = [0, 8], sizes = [16, 4], strides = [1, 1]} : vector<16x16xf32> to vector<16x4xf32>
    %54 = vector.extract_strided_slice %43 {offsets = [0, 8], sizes = [16, 4], strides = [1, 1]} : vector<16x16xf32> to vector<16x4xf32>
    %cst_26 = arith.constant dense<0.000000e+00> : vector<16x16xf32>
    %55 = tpu.matmul %53, %54, %cst_26 {dimension_numbers = #tpu.dot_dimension_numbers<[1], [1], [0], [0], [0, 0, 1, 0], [], []>} : vector<16x4xf32>, vector<16x4xf32>, vector<16x16xf32> -> vector<16x16xf32>
    %56 = math.tanh %55 : vector<16x16xf32>
    %57 = arith.addf %52, %56 : vector<16x16xf32>
    %58 = vector.extract_strided_slice %42 {offsets = [0, 12], sizes = [16, 4], strides = [1, 1]} : vector<16x16xf32> to vector<16x4xf32>
    %59 = vector.extract_strided_slice %43 {offsets = [0, 12], sizes = [16, 4], strides = [1, 1]} : vector<16x16xf32> to vector<16x4xf32>
    %cst_27 = arith.constant dense<0.000000e+00> : vector<16x16xf32>
    %60 = tpu.matmul %58, %59, %cst_27 {dimension_numbers = #tpu.dot_dimension_numbers<[1], [1], [0], [0], [0, 0, 1, 0], [], []>} : vector<16x4xf32>, vector<16x4xf32>, vector<16x16xf32> -> vector<16x16xf32>
    %61 = math.tanh %60 : vector<16x16xf32>
    %62 = arith.addf %57, %61 : vector<16x16xf32>
    %cst_28 = arith.constant 2.500000e-01 : f32
    %63 = vector.broadcast %cst_28 : f32 to vector<16x16xf32>
    %64 = arith.mulf %62, %63 : vector<16x16xf32>
    %65 = tpu.transpose %64, [1, 0] : vector<16x16xf32> -> vector<16x16xf32>
    %66 = arith.addf %64, %65 : vector<16x16xf32>
    %cst_29 = arith.constant 5.000000e-01 : f32
    %67 = vector.broadcast %cst_29 : f32 to vector<16x16xf32>
    %68 = arith.mulf %67, %66 : vector<16x16xf32>
    %c0_30 = arith.constant 0 : index
    %c0_31 = arith.constant 0 : index
    %c0_32 = arith.constant 0 : index
    %c0_33 = arith.constant 0 : index
    %69 = vector.load %arg12[%c0_30, %c0_31, %c0_32, %c0_33] : memref<1x2x16x16xf32, #tpu.memory_space<vmem>>, vector<1x1x16x16xf32>
    %70 = vector.shape_cast %69 : vector<1x1x16x16xf32> to vector<16x16xf32>
    %71 = vector.shape_cast %68 : vector<16x16xf32> to vector<1x1x16x16xf32>
    tpu.vector_store %arg12[%c0_30, %c0_31, %c0_32, %c0_33], %71 {strides = array<i32>} : memref<1x2x16x16xf32, #tpu.memory_space<vmem>>, vector<1x1x16x16xf32>,
    %c0_34 = arith.constant 0 : index
    %c1 = arith.constant 1 : index
    %c0_35 = arith.constant 0 : index
    %c0_36 = arith.constant 0 : index
    %72 = vector.load %arg2[%c0_34, %c1, %c0_35, %c0_36] : memref<1x2x16x16xf32, #tpu.memory_space<vmem>>, vector<1x1x16x16xf32>
    %73 = vector.shape_cast %72 : vector<1x1x16x16xf32> to vector<16x16xf32>
    %cst_37 = arith.constant 1.000000e+00 : f32
    %74 = vector.broadcast %cst_37 : f32 to vector<16x16xf32>
    %75 = arith.subf %74, %6 : vector<16x16xf32>
    %76 = arith.mulf %73, %75 : vector<16x16xf32>
    %77 = arith.addf %76, %6 : vector<16x16xf32>
    %cst_38 = arith.constant dense<0.000000e+00> : vector<16xf32>
    %78 = vector.multi_reduction <add>, %77, %cst_38 [1] : vector<16x16xf32> to vector<16xf32>
    %79 = vector.shape_cast %78 : vector<16xf32> to vector<16x1xf32>
    %cst_39 = arith.constant 1.000000e+00 : f32
    %80 = vector.broadcast %cst_39 : f32 to vector<16x1xf32>
    %81 = arith.maximumf %79, %80 : vector<16x1xf32>
    %82 = math.rsqrt %81 : vector<16x1xf32>
    %c1_40 = arith.constant 1 : index
    %c0_41 = arith.constant 0 : index
    %c0_42 = arith.constant 0 : index
    %83 = vector.load %arg4[%c1_40, %c0_41, %c0_42] : memref<2x16x32xf32, #tpu.memory_space<vmem>>, vector<1x16x32xf32>
    %84 = vector.shape_cast %83 : vector<1x16x32xf32> to vector<16x32xf32>
    %cst_43 = arith.constant dense<0.000000e+00> : vector<16x32xf32>
    %85 = tpu.matmul %1, %84, %cst_43 {dimension_numbers = #tpu.dot_dimension_numbers<[1], [0], [0], [1], [0, 0, 1, 1], [], []>} : vector<16x16xf32>, vector<16x32xf32>, vector<16x32xf32> -> vector<16x32xf32>
    %86 = vector.broadcast %82 : vector<16x1xf32> to vector<16x32xf32>
    %87 = arith.mulf %85, %86 : vector<16x32xf32>
    %cst_44 = arith.constant dense<0.000000e+00> : vector<16x32xf32>
    %88 = tpu.matmul %77, %87, %cst_44 {dimension_numbers = #tpu.dot_dimension_numbers<[1], [0], [0], [1], [0, 0, 1, 1], [], []>} : vector<16x16xf32>, vector<16x32xf32>, vector<16x32xf32> -> vector<16x32xf32>
    %89 = vector.broadcast %82 : vector<16x1xf32> to vector<16x32xf32>
    %90 = arith.mulf %88, %89 : vector<16x32xf32>
    %c1_45 = arith.constant 1 : index
    %c0_46 = arith.constant 0 : index
    %c0_47 = arith.constant 0 : index
    %91 = vector.load %arg5[%c1_45, %c0_46, %c0_47] : memref<2x1x32xf32, #tpu.memory_space<vmem>>, vector<1x1x32xf32>
    %92 = vector.shape_cast %91 : vector<1x1x32xf32> to vector<1x32xf32>
    %93 = vector.broadcast %92 : vector<1x32xf32> to vector<16x32xf32>
    %94 = arith.addf %90, %93 : vector<16x32xf32>
    %c1_48 = arith.constant 1 : index
    %c0_49 = arith.constant 0 : index
    %c0_50 = arith.constant 0 : index
    %95 = vector.load %arg6[%c1_48, %c0_49, %c0_50] : memref<2x16x16xf32, #tpu.memory_space<vmem>>, vector<1x16x16xf32>
    %96 = vector.shape_cast %95 : vector<1x16x16xf32> to vector<16x16xf32>
    %cst_51 = arith.constant dense<0.000000e+00> : vector<16x16xf32>
    %97 = tpu.matmul %1, %96, %cst_51 {dimension_numbers = #tpu.dot_dimension_numbers<[1], [0], [0], [1], [0, 0, 1, 1], [], []>} : vector<16x16xf32>, vector<16x16xf32>, vector<16x16xf32> -> vector<16x16xf32>
    %98 = vector.broadcast %82 : vector<16x1xf32> to vector<16x16xf32>
    %99 = arith.mulf %97, %98 : vector<16x16xf32>
    %cst_52 = arith.constant dense<0.000000e+00> : vector<16x16xf32>
    %100 = tpu.matmul %77, %99, %cst_52 {dimension_numbers = #tpu.dot_dimension_numbers<[1], [0], [0], [1], [0, 0, 1, 1], [], []>} : vector<16x16xf32>, vector<16x16xf32>, vector<16x16xf32> -> vector<16x16xf32>
    %101 = vector.broadcast %82 : vector<16x1xf32> to vector<16x16xf32>
    %102 = arith.mulf %100, %101 : vector<16x16xf32>
    %c1_53 = arith.constant 1 : index
    %c0_54 = arith.constant 0 : index
    %c0_55 = arith.constant 0 : index
    %103 = vector.load %arg7[%c1_53, %c0_54, %c0_55] : memref<2x1x16xf32, #tpu.memory_space<vmem>>, vector<1x1x16xf32>
    %104 = vector.shape_cast %103 : vector<1x1x16xf32> to vector<1x16xf32>
    %105 = vector.broadcast %104 : vector<1x16xf32> to vector<16x16xf32>
    %106 = arith.addf %102, %105 : vector<16x16xf32>
    %107 = vector.extract_strided_slice %94 {offsets = [0, 0], sizes = [16, 16], strides = [1, 1]} : vector<16x32xf32> to vector<16x16xf32>
    %108 = vector.extract_strided_slice %94 {offsets = [0, 16], sizes = [16, 16], strides = [1, 1]} : vector<16x32xf32> to vector<16x16xf32>
    %109 = vector.extract_strided_slice %107 {offsets = [0, 0], sizes = [16, 4], strides = [1, 1]} : vector<16x16xf32> to vector<16x4xf32>
    %110 = vector.extract_strided_slice %108 {offsets = [0, 0], sizes = [16, 4], strides = [1, 1]} : vector<16x16xf32> to vector<16x4xf32>
    %cst_56 = arith.constant dense<0.000000e+00> : vector<16x16xf32>
    %111 = tpu.matmul %109, %110, %cst_56 {dimension_numbers = #tpu.dot_dimension_numbers<[1], [1], [0], [0], [0, 0, 1, 0], [], []>} : vector<16x4xf32>, vector<16x4xf32>, vector<16x16xf32> -> vector<16x16xf32>
    %112 = math.tanh %111 : vector<16x16xf32>
    %113 = vector.extract_strided_slice %107 {offsets = [0, 4], sizes = [16, 4], strides = [1, 1]} : vector<16x16xf32> to vector<16x4xf32>
    %114 = vector.extract_strided_slice %108 {offsets = [0, 4], sizes = [16, 4], strides = [1, 1]} : vector<16x16xf32> to vector<16x4xf32>
    %cst_57 = arith.constant dense<0.000000e+00> : vector<16x16xf32>
    %115 = tpu.matmul %113, %114, %cst_57 {dimension_numbers = #tpu.dot_dimension_numbers<[1], [1], [0], [0], [0, 0, 1, 0], [], []>} : vector<16x4xf32>, vector<16x4xf32>, vector<16x16xf32> -> vector<16x16xf32>
    %116 = math.tanh %115 : vector<16x16xf32>
    %117 = arith.addf %112, %116 : vector<16x16xf32>
    %118 = vector.extract_strided_slice %107 {offsets = [0, 8], sizes = [16, 4], strides = [1, 1]} : vector<16x16xf32> to vector<16x4xf32>
    %119 = vector.extract_strided_slice %108 {offsets = [0, 8], sizes = [16, 4], strides = [1, 1]} : vector<16x16xf32> to vector<16x4xf32>
    %cst_58 = arith.constant dense<0.000000e+00> : vector<16x16xf32>
    %120 = tpu.matmul %118, %119, %cst_58 {dimension_numbers = #tpu.dot_dimension_numbers<[1], [1], [0], [0], [0, 0, 1, 0], [], []>} : vector<16x4xf32>, vector<16x4xf32>, vector<16x16xf32> -> vector<16x16xf32>
    %121 = math.tanh %120 : vector<16x16xf32>
    %122 = arith.addf %117, %121 : vector<16x16xf32>
    %123 = vector.extract_strided_slice %107 {offsets = [0, 12], sizes = [16, 4], strides = [1, 1]} : vector<16x16xf32> to vector<16x4xf32>
    %124 = vector.extract_strided_slice %108 {offsets = [0, 12], sizes = [16, 4], strides = [1, 1]} : vector<16x16xf32> to vector<16x4xf32>
    %cst_59 = arith.constant dense<0.000000e+00> : vector<16x16xf32>
    %125 = tpu.matmul %123, %124, %cst_59 {dimension_numbers = #tpu.dot_dimension_numbers<[1], [1], [0], [0], [0, 0, 1, 0], [], []>} : vector<16x4xf32>, vector<16x4xf32>, vector<16x16xf32> -> vector<16x16xf32>
    %126 = math.tanh %125 : vector<16x16xf32>
    %127 = arith.addf %122, %126 : vector<16x16xf32>
    %cst_60 = arith.constant 2.500000e-01 : f32
    %128 = vector.broadcast %cst_60 : f32 to vector<16x16xf32>
    %129 = arith.mulf %127, %128 : vector<16x16xf32>
    %130 = tpu.transpose %129, [1, 0] : vector<16x16xf32> -> vector<16x16xf32>
    %131 = arith.addf %129, %130 : vector<16x16xf32>
    %cst_61 = arith.constant 5.000000e-01 : f32
    %132 = vector.broadcast %cst_61 : f32 to vector<16x16xf32>
    %133 = arith.mulf %132, %131 : vector<16x16xf32>
    %c0_62 = arith.constant 0 : index
    %c1_63 = arith.constant 1 : index
    %c0_64 = arith.constant 0 : index
    %c0_65 = arith.constant 0 : index
    %134 = vector.load %arg12[%c0_62, %c1_63, %c0_64, %c0_65] : memref<1x2x16x16xf32, #tpu.memory_space<vmem>>, vector<1x1x16x16xf32>
    %135 = vector.shape_cast %134 : vector<1x1x16x16xf32> to vector<16x16xf32>
    %136 = vector.shape_cast %133 : vector<16x16xf32> to vector<1x1x16x16xf32>
    tpu.vector_store %arg12[%c0_62, %c1_63, %c0_64, %c0_65], %136 {strides = array<i32>} : memref<1x2x16x16xf32, #tpu.memory_space<vmem>>, vector<1x1x16x16xf32>,
    %137 = tpu.concatenate %41, %106 in 1 : vector<16x16xf32>, vector<16x16xf32> -> vector<16x32xf32>
    %c0_66 = arith.constant 0 : index
    %c0_67 = arith.constant 0 : index
    %138 = vector.load %arg8[%c0_66, %c0_67] : memref<32x8xf32, #tpu.memory_space<vmem>>, vector<32x8xf32>
    %cst_68 = arith.constant dense<0.000000e+00> : vector<16x8xf32>
    %139 = tpu.matmul %137, %138, %cst_68 {dimension_numbers = #tpu.dot_dimension_numbers<[1], [0], [0], [1], [0, 0, 1, 1], [], []>} : vector<16x32xf32>, vector<32x8xf32>, vector<16x8xf32> -> vector<16x8xf32>
    %c0_69 = arith.constant 0 : index
    %c0_70 = arith.constant 0 : index
    %140 = vector.load %arg9[%c0_69, %c0_70] : memref<1x8xf32, #tpu.memory_space<vmem>>, vector<1x8xf32>
    %141 = vector.broadcast %140 : vector<1x8xf32> to vector<16x8xf32>
    %142 = arith.addf %139, %141 : vector<16x8xf32>
    %cst_71 = arith.constant 0.000000e+00 : f32
    %143 = vector.broadcast %cst_71 : f32 to vector<16x8xf32>
    %144 = arith.cmpf ogt, %142, %143 : vector<16x8xf32>
    %cst_72 = arith.constant 0.000000e+00 : f32
    %145 = vector.broadcast %cst_72 : f32 to vector<16x8xf32>
    %146 = arith.minimumf %142, %145 : vector<16x8xf32>
    %147 = math.exp %146 : vector<16x8xf32>
    %cst_73 = arith.constant 1.000000e+00 : f32
    %148 = vector.broadcast %cst_73 : f32 to vector<16x8xf32>
    %149 = arith.subf %147, %148 : vector<16x8xf32>
    %150 = arith.select %144, %142, %149 : vector<16x8xi1>, vector<16x8xf32>
    %c0_74 = arith.constant 0 : index
    %c0_75 = arith.constant 0 : index
    %151 = vector.load %arg10[%c0_74, %c0_75] : memref<8x16xf32, #tpu.memory_space<vmem>>, vector<8x16xf32>
    %cst_76 = arith.constant dense<0.000000e+00> : vector<16x16xf32>
    %152 = tpu.matmul %150, %151, %cst_76 {dimension_numbers = #tpu.dot_dimension_numbers<[1], [0], [0], [1], [0, 0, 1, 1], [], []>} : vector<16x8xf32>, vector<8x16xf32>, vector<16x16xf32> -> vector<16x16xf32>
    %c0_77 = arith.constant 0 : index
    %c0_78 = arith.constant 0 : index
    %153 = vector.load %arg11[%c0_77, %c0_78] : memref<1x16xf32, #tpu.memory_space<vmem>>, vector<1x16xf32>
    %154 = vector.broadcast %153 : vector<1x16xf32> to vector<16x16xf32>
    %155 = arith.addf %152, %154 : vector<16x16xf32>
    %c0_79 = arith.constant 0 : index
    %c0_80 = arith.constant 0 : index
    %c0_81 = arith.constant 0 : index
    %156 = vector.load %arg3[%c0_79, %c0_80, %c0_81] : memref<1x16x1xf32, #tpu.memory_space<vmem>>, vector<1x16x1xf32>
    %157 = vector.shape_cast %156 : vector<1x16x1xf32> to vector<16x1xf32>
    %158 = vector.broadcast %157 : vector<16x1xf32> to vector<16x16xf32>
    %159 = arith.mulf %155, %158 : vector<16x16xf32>
    %160 = math.tanh %159 : vector<16x16xf32>
    %c0_82 = arith.constant 0 : index
    %c0_83 = arith.constant 0 : index
    %c0_84 = arith.constant 0 : index
    %161 = vector.load %arg13[%c0_82, %c0_83, %c0_84] : memref<1x16x16xf32, #tpu.memory_space<vmem>>, vector<1x16x16xf32>
    %162 = vector.shape_cast %161 : vector<1x16x16xf32> to vector<16x16xf32>
    %163 = vector.shape_cast %160 : vector<16x16xf32> to vector<1x16x16xf32>
    tpu.vector_store %arg13[%c0_82, %c0_83, %c0_84], %163 {strides = array<i32>} : memref<1x16x16xf32, #tpu.memory_space<vmem>>, vector<1x16x16xf32>,
    return
  }
  func.func @transform_0(%arg0: i32) -> (i32, i32, i32) {
    %c0_i32 = arith.constant 0 : i32
    %c0_i32_0 = arith.constant 0 : i32
    %c0_i32_1 = arith.constant 0 : i32
    return %arg0, %c0_i32, %c0_i32_0 : i32, i32, i32
  }
  func.func @transform_1(%arg0: i32) -> (i32, i32, i32, i32) {
    %c0_i32 = arith.constant 0 : i32
    %c0_i32_0 = arith.constant 0 : i32
    %c0_i32_1 = arith.constant 0 : i32
    %c0_i32_2 = arith.constant 0 : i32
    return %arg0, %c0_i32, %c0_i32_0, %c0_i32_1 : i32, i32, i32, i32
  }
  func.func @transform_2(%arg0: i32) -> (i32, i32, i32) {
    %c0_i32 = arith.constant 0 : i32
    %c0_i32_0 = arith.constant 0 : i32
    %c0_i32_1 = arith.constant 0 : i32
    return %arg0, %c0_i32, %c0_i32_0 : i32, i32, i32
  }
  func.func @transform_3(%arg0: i32) -> (i32, i32, i32) {
    %c0_i32 = arith.constant 0 : i32
    %c0_i32_0 = arith.constant 0 : i32
    %c0_i32_1 = arith.constant 0 : i32
    %c0_i32_2 = arith.constant 0 : i32
    return %c0_i32, %c0_i32_0, %c0_i32_1 : i32, i32, i32
  }
  func.func @transform_4(%arg0: i32) -> (i32, i32, i32) {
    %c0_i32 = arith.constant 0 : i32
    %c0_i32_0 = arith.constant 0 : i32
    %c0_i32_1 = arith.constant 0 : i32
    %c0_i32_2 = arith.constant 0 : i32
    return %c0_i32, %c0_i32_0, %c0_i32_1 : i32, i32, i32
  }
  func.func @transform_5(%arg0: i32) -> (i32, i32, i32) {
    %c0_i32 = arith.constant 0 : i32
    %c0_i32_0 = arith.constant 0 : i32
    %c0_i32_1 = arith.constant 0 : i32
    %c0_i32_2 = arith.constant 0 : i32
    return %c0_i32, %c0_i32_0, %c0_i32_1 : i32, i32, i32
  }
  func.func @transform_6(%arg0: i32) -> (i32, i32, i32) {
    %c0_i32 = arith.constant 0 : i32
    %c0_i32_0 = arith.constant 0 : i32
    %c0_i32_1 = arith.constant 0 : i32
    %c0_i32_2 = arith.constant 0 : i32
    return %c0_i32, %c0_i32_0, %c0_i32_1 : i32, i32, i32
  }
  func.func @transform_7(%arg0: i32) -> (i32, i32) {
    %c0_i32 = arith.constant 0 : i32
    %c0_i32_0 = arith.constant 0 : i32
    %c0_i32_1 = arith.constant 0 : i32
    return %c0_i32, %c0_i32_0 : i32, i32
  }
  func.func @transform_8(%arg0: i32) -> (i32, i32) {
    %c0_i32 = arith.constant 0 : i32
    %c0_i32_0 = arith.constant 0 : i32
    %c0_i32_1 = arith.constant 0 : i32
    return %c0_i32, %c0_i32_0 : i32, i32
  }
  func.func @transform_9(%arg0: i32) -> (i32, i32) {
    %c0_i32 = arith.constant 0 : i32
    %c0_i32_0 = arith.constant 0 : i32
    %c0_i32_1 = arith.constant 0 : i32
    return %c0_i32, %c0_i32_0 : i32, i32
  }
  func.func @transform_10(%arg0: i32) -> (i32, i32) {
    %c0_i32 = arith.constant 0 : i32
    %c0_i32_0 = arith.constant 0 : i32
    %c0_i32_1 = arith.constant 0 : i32
    return %c0_i32, %c0_i32_0 : i32, i32
  }
  func.func @transform_11(%arg0: i32) -> (i32, i32, i32, i32) {
    %c0_i32 = arith.constant 0 : i32
    %c0_i32_0 = arith.constant 0 : i32
    %c0_i32_1 = arith.constant 0 : i32
    %c0_i32_2 = arith.constant 0 : i32
    return %arg0, %c0_i32, %c0_i32_0, %c0_i32_1 : i32, i32, i32, i32
  }
  func.func @transform_12(%arg0: i32) -> (i32, i32, i32) {
    %c0_i32 = arith.constant 0 : i32
    %c0_i32_0 = arith.constant 0 : i32
    %c0_i32_1 = arith.constant 0 : i32
    return %arg0, %c0_i32, %c0_i32_0 : i32, i32, i32
  }
}

module attributes {stable_mosaic.version = 11 : i64} {
  func.func @_edge_mlp_kernel(%arg0: i32, %arg1: i32, %arg2: memref<1x2x256xf32, #tpu.memory_space<vmem>>, %arg3: memref<1x2x256xf32, #tpu.memory_space<vmem>>, %arg4: memref<1x16x16xf32, #tpu.memory_space<vmem>>, %arg5: memref<1x16x16xf32, #tpu.memory_space<vmem>>, %arg6: memref<16x8xf32, #tpu.memory_space<vmem>>, %arg7: memref<1x8xf32, #tpu.memory_space<vmem>>, %arg8: memref<8x2xf32, #tpu.memory_space<vmem>>, %arg9: memref<8x2xf32, #tpu.memory_space<vmem>>, %arg10: memref<8x8xf32, #tpu.memory_space<vmem>>, %arg11: memref<8x1xf32, #tpu.memory_space<vmem>>, %arg12: memref<4x8xf32, #tpu.memory_space<vmem>>, %arg13: memref<4x1xf32, #tpu.memory_space<vmem>>, %arg14: memref<1x4x256xf32, #tpu.memory_space<vmem>>) attributes {dimension_semantics = [#tpu.dimension_semantics<parallel>, #tpu.dimension_semantics<parallel>], iteration_bounds = array<i64: 2, 1>, scalar_prefetch = 0 : i64, scratch_operands = 0 : i64, tpu.core_type = #tpu.core_type<tc>, window_params = [{transform_indices = @transform_0, window_bounds = array<i64: 1, 2, 256>}, {transform_indices = @transform_1, window_bounds = array<i64: 1, 2, 256>}, {transform_indices = @transform_2, window_bounds = array<i64: 1, 16, 16>}, {transform_indices = @transform_3, window_bounds = array<i64: 1, 16, 16>}, {pipeline_mode = #tpu.pipeline_mode<synchronous>, transform_indices = @transform_4, window_bounds = array<i64: 16, 8>}, {pipeline_mode = #tpu.pipeline_mode<synchronous>, transform_indices = @transform_5, window_bounds = array<i64: 1, 8>}, {pipeline_mode = #tpu.pipeline_mode<synchronous>, transform_indices = @transform_6, window_bounds = array<i64: 8, 2>}, {pipeline_mode = #tpu.pipeline_mode<synchronous>, transform_indices = @transform_7, window_bounds = array<i64: 8, 2>}, {pipeline_mode = #tpu.pipeline_mode<synchronous>, transform_indices = @transform_8, window_bounds = array<i64: 8, 8>}, {pipeline_mode = #tpu.pipeline_mode<synchronous>, transform_indices = @transform_9, window_bounds = array<i64: 8, 1>}, {pipeline_mode = #tpu.pipeline_mode<synchronous>, transform_indices = @transform_10, window_bounds = array<i64: 4, 8>}, {pipeline_mode = #tpu.pipeline_mode<synchronous>, transform_indices = @transform_11, window_bounds = array<i64: 4, 1>}, {transform_indices = @transform_12, window_bounds = array<i64: 1, 4, 256>}]} {
    %c0 = arith.constant 0 : index
    %c0_0 = arith.constant 0 : index
    %c0_1 = arith.constant 0 : index
    %0 = vector.load %arg4[%c0, %c0_0, %c0_1] : memref<1x16x16xf32, #tpu.memory_space<vmem>>, vector<1x16x16xf32>
    %1 = vector.shape_cast %0 : vector<1x16x16xf32> to vector<16x16xf32>
    %c0_2 = arith.constant 0 : index
    %c0_3 = arith.constant 0 : index
    %2 = vector.load %arg6[%c0_2, %c0_3] : memref<16x8xf32, #tpu.memory_space<vmem>>, vector<16x8xf32>
    %cst = arith.constant dense<0.000000e+00> : vector<16x8xf32>
    %3 = tpu.matmul %1, %2, %cst {dimension_numbers = #tpu.dot_dimension_numbers<[1], [0], [0], [1], [0, 0, 1, 1], [], []>} : vector<16x16xf32>, vector<16x8xf32>, vector<16x8xf32> -> vector<16x8xf32>
    %c0_4 = arith.constant 0 : index
    %c0_5 = arith.constant 0 : index
    %4 = vector.load %arg7[%c0_4, %c0_5] : memref<1x8xf32, #tpu.memory_space<vmem>>, vector<1x8xf32>
    %5 = vector.broadcast %4 : vector<1x8xf32> to vector<16x8xf32>
    %6 = arith.addf %3, %5 : vector<16x8xf32>
    %c0_6 = arith.constant 0 : index
    %c0_7 = arith.constant 0 : index
    %c0_8 = arith.constant 0 : index
    %7 = vector.load %arg5[%c0_6, %c0_7, %c0_8] : memref<1x16x16xf32, #tpu.memory_space<vmem>>, vector<1x16x16xf32>
    %8 = vector.shape_cast %7 : vector<1x16x16xf32> to vector<16x16xf32>
    %c0_9 = arith.constant 0 : index
    %c0_10 = arith.constant 0 : index
    %9 = vector.load %arg6[%c0_9, %c0_10] : memref<16x8xf32, #tpu.memory_space<vmem>>, vector<16x8xf32>
    %cst_11 = arith.constant dense<0.000000e+00> : vector<16x8xf32>
    %10 = tpu.matmul %8, %9, %cst_11 {dimension_numbers = #tpu.dot_dimension_numbers<[1], [0], [0], [1], [0, 0, 1, 1], [], []>} : vector<16x16xf32>, vector<16x8xf32>, vector<16x8xf32> -> vector<16x8xf32>
    %c0_12 = arith.constant 0 : index
    %c0_13 = arith.constant 0 : index
    %11 = vector.load %arg7[%c0_12, %c0_13] : memref<1x8xf32, #tpu.memory_space<vmem>>, vector<1x8xf32>
    %12 = vector.broadcast %11 : vector<1x8xf32> to vector<16x8xf32>
    %13 = arith.addf %10, %12 : vector<16x8xf32>
    %14 = tpu.transpose %6, [1, 0] : vector<16x8xf32> -> vector<8x16xf32>
    %15 = tpu.transpose %13, [1, 0] : vector<16x8xf32> -> vector<8x16xf32>
    %16 = vector.extract_strided_slice %14 {offsets = [0, 0], sizes = [8, 1], strides = [1, 1]} : vector<8x16xf32> to vector<8x1xf32>
    %17 = vector.broadcast %16 : vector<8x1xf32> to vector<8x16xf32>
    %18 = arith.mulf %17, %15 : vector<8x16xf32>
    %19 = vector.extract_strided_slice %14 {offsets = [0, 1], sizes = [8, 1], strides = [1, 1]} : vector<8x16xf32> to vector<8x1xf32>
    %20 = vector.broadcast %19 : vector<8x1xf32> to vector<8x16xf32>
    %21 = arith.mulf %20, %15 : vector<8x16xf32>
    %22 = vector.extract_strided_slice %14 {offsets = [0, 2], sizes = [8, 1], strides = [1, 1]} : vector<8x16xf32> to vector<8x1xf32>
    %23 = vector.broadcast %22 : vector<8x1xf32> to vector<8x16xf32>
    %24 = arith.mulf %23, %15 : vector<8x16xf32>
    %25 = vector.extract_strided_slice %14 {offsets = [0, 3], sizes = [8, 1], strides = [1, 1]} : vector<8x16xf32> to vector<8x1xf32>
    %26 = vector.broadcast %25 : vector<8x1xf32> to vector<8x16xf32>
    %27 = arith.mulf %26, %15 : vector<8x16xf32>
    %28 = vector.extract_strided_slice %14 {offsets = [0, 4], sizes = [8, 1], strides = [1, 1]} : vector<8x16xf32> to vector<8x1xf32>
    %29 = vector.broadcast %28 : vector<8x1xf32> to vector<8x16xf32>
    %30 = arith.mulf %29, %15 : vector<8x16xf32>
    %31 = vector.extract_strided_slice %14 {offsets = [0, 5], sizes = [8, 1], strides = [1, 1]} : vector<8x16xf32> to vector<8x1xf32>
    %32 = vector.broadcast %31 : vector<8x1xf32> to vector<8x16xf32>
    %33 = arith.mulf %32, %15 : vector<8x16xf32>
    %34 = vector.extract_strided_slice %14 {offsets = [0, 6], sizes = [8, 1], strides = [1, 1]} : vector<8x16xf32> to vector<8x1xf32>
    %35 = vector.broadcast %34 : vector<8x1xf32> to vector<8x16xf32>
    %36 = arith.mulf %35, %15 : vector<8x16xf32>
    %37 = vector.extract_strided_slice %14 {offsets = [0, 7], sizes = [8, 1], strides = [1, 1]} : vector<8x16xf32> to vector<8x1xf32>
    %38 = vector.broadcast %37 : vector<8x1xf32> to vector<8x16xf32>
    %39 = arith.mulf %38, %15 : vector<8x16xf32>
    %40 = vector.extract_strided_slice %14 {offsets = [0, 8], sizes = [8, 1], strides = [1, 1]} : vector<8x16xf32> to vector<8x1xf32>
    %41 = vector.broadcast %40 : vector<8x1xf32> to vector<8x16xf32>
    %42 = arith.mulf %41, %15 : vector<8x16xf32>
    %43 = vector.extract_strided_slice %14 {offsets = [0, 9], sizes = [8, 1], strides = [1, 1]} : vector<8x16xf32> to vector<8x1xf32>
    %44 = vector.broadcast %43 : vector<8x1xf32> to vector<8x16xf32>
    %45 = arith.mulf %44, %15 : vector<8x16xf32>
    %46 = vector.extract_strided_slice %14 {offsets = [0, 10], sizes = [8, 1], strides = [1, 1]} : vector<8x16xf32> to vector<8x1xf32>
    %47 = vector.broadcast %46 : vector<8x1xf32> to vector<8x16xf32>
    %48 = arith.mulf %47, %15 : vector<8x16xf32>
    %49 = vector.extract_strided_slice %14 {offsets = [0, 11], sizes = [8, 1], strides = [1, 1]} : vector<8x16xf32> to vector<8x1xf32>
    %50 = vector.broadcast %49 : vector<8x1xf32> to vector<8x16xf32>
    %51 = arith.mulf %50, %15 : vector<8x16xf32>
    %52 = vector.extract_strided_slice %14 {offsets = [0, 12], sizes = [8, 1], strides = [1, 1]} : vector<8x16xf32> to vector<8x1xf32>
    %53 = vector.broadcast %52 : vector<8x1xf32> to vector<8x16xf32>
    %54 = arith.mulf %53, %15 : vector<8x16xf32>
    %55 = vector.extract_strided_slice %14 {offsets = [0, 13], sizes = [8, 1], strides = [1, 1]} : vector<8x16xf32> to vector<8x1xf32>
    %56 = vector.broadcast %55 : vector<8x1xf32> to vector<8x16xf32>
    %57 = arith.mulf %56, %15 : vector<8x16xf32>
    %58 = vector.extract_strided_slice %14 {offsets = [0, 14], sizes = [8, 1], strides = [1, 1]} : vector<8x16xf32> to vector<8x1xf32>
    %59 = vector.broadcast %58 : vector<8x1xf32> to vector<8x16xf32>
    %60 = arith.mulf %59, %15 : vector<8x16xf32>
    %61 = vector.extract_strided_slice %14 {offsets = [0, 15], sizes = [8, 1], strides = [1, 1]} : vector<8x16xf32> to vector<8x1xf32>
    %62 = vector.broadcast %61 : vector<8x1xf32> to vector<8x16xf32>
    %63 = arith.mulf %62, %15 : vector<8x16xf32>
    %64 = tpu.concatenate %18, %21, %24, %27, %30, %33, %36, %39, %42, %45, %48, %51, %54, %57, %60, %63 in 1 : vector<8x16xf32>, vector<8x16xf32>, vector<8x16xf32>, vector<8x16xf32>, vector<8x16xf32>, vector<8x16xf32>, vector<8x16xf32>, vector<8x16xf32>, vector<8x16xf32>, vector<8x16xf32>, vector<8x16xf32>, vector<8x16xf32>, vector<8x16xf32>, vector<8x16xf32>, vector<8x16xf32>, vector<8x16xf32> -> vector<8x256xf32>
    %c0_14 = arith.constant 0 : index
    %c0_15 = arith.constant 0 : index
    %c0_16 = arith.constant 0 : index
    %65 = vector.load %arg2[%c0_14, %c0_15, %c0_16] : memref<1x2x256xf32, #tpu.memory_space<vmem>>, vector<1x2x256xf32>
    %66 = vector.shape_cast %65 : vector<1x2x256xf32> to vector<2x256xf32>
    %c0_17 = arith.constant 0 : index
    %c0_18 = arith.constant 0 : index
    %c0_19 = arith.constant 0 : index
    %67 = vector.load %arg3[%c0_17, %c0_18, %c0_19] : memref<1x2x256xf32, #tpu.memory_space<vmem>>, vector<1x2x256xf32>
    %68 = vector.shape_cast %67 : vector<1x2x256xf32> to vector<2x256xf32>
    %c0_20 = arith.constant 0 : index
    %c0_21 = arith.constant 0 : index
    %69 = vector.load %arg8[%c0_20, %c0_21] : memref<8x2xf32, #tpu.memory_space<vmem>>, vector<8x2xf32>
    %c0_22 = arith.constant 0 : index
    %c0_23 = arith.constant 0 : index
    %70 = vector.load %arg9[%c0_22, %c0_23] : memref<8x2xf32, #tpu.memory_space<vmem>>, vector<8x2xf32>
    %c0_24 = arith.constant 0 : index
    %c0_25 = arith.constant 0 : index
    %71 = vector.load %arg11[%c0_24, %c0_25] : memref<8x1xf32, #tpu.memory_space<vmem>>, vector<8x1xf32>
    %72 = vector.extract_strided_slice %69 {offsets = [0, 0], sizes = [8, 1], strides = [1, 1]} : vector<8x2xf32> to vector<8x1xf32>
    %73 = vector.extract_strided_slice %66 {offsets = [0, 0], sizes = [1, 256], strides = [1, 1]} : vector<2x256xf32> to vector<1x256xf32>
    %74 = vector.broadcast %72 : vector<8x1xf32> to vector<8x256xf32>
    %75 = vector.broadcast %73 : vector<1x256xf32> to vector<8x256xf32>
    %76 = arith.mulf %74, %75 : vector<8x256xf32>
    %77 = vector.broadcast %71 : vector<8x1xf32> to vector<8x256xf32>
    %78 = arith.addf %77, %76 : vector<8x256xf32>
    %79 = vector.extract_strided_slice %70 {offsets = [0, 0], sizes = [8, 1], strides = [1, 1]} : vector<8x2xf32> to vector<8x1xf32>
    %80 = vector.extract_strided_slice %68 {offsets = [0, 0], sizes = [1, 256], strides = [1, 1]} : vector<2x256xf32> to vector<1x256xf32>
    %81 = vector.broadcast %79 : vector<8x1xf32> to vector<8x256xf32>
    %82 = vector.broadcast %80 : vector<1x256xf32> to vector<8x256xf32>
    %83 = arith.mulf %81, %82 : vector<8x256xf32>
    %84 = arith.addf %78, %83 : vector<8x256xf32>
    %85 = vector.extract_strided_slice %69 {offsets = [0, 1], sizes = [8, 1], strides = [1, 1]} : vector<8x2xf32> to vector<8x1xf32>
    %86 = vector.extract_strided_slice %66 {offsets = [1, 0], sizes = [1, 256], strides = [1, 1]} : vector<2x256xf32> to vector<1x256xf32>
    %87 = vector.broadcast %85 : vector<8x1xf32> to vector<8x256xf32>
    %88 = vector.broadcast %86 : vector<1x256xf32> to vector<8x256xf32>
    %89 = arith.mulf %87, %88 : vector<8x256xf32>
    %90 = arith.addf %84, %89 : vector<8x256xf32>
    %91 = vector.extract_strided_slice %70 {offsets = [0, 1], sizes = [8, 1], strides = [1, 1]} : vector<8x2xf32> to vector<8x1xf32>
    %92 = vector.extract_strided_slice %68 {offsets = [1, 0], sizes = [1, 256], strides = [1, 1]} : vector<2x256xf32> to vector<1x256xf32>
    %93 = vector.broadcast %91 : vector<8x1xf32> to vector<8x256xf32>
    %94 = vector.broadcast %92 : vector<1x256xf32> to vector<8x256xf32>
    %95 = arith.mulf %93, %94 : vector<8x256xf32>
    %96 = arith.addf %90, %95 : vector<8x256xf32>
    %c0_26 = arith.constant 0 : index
    %c0_27 = arith.constant 0 : index
    %97 = vector.load %arg10[%c0_26, %c0_27] : memref<8x8xf32, #tpu.memory_space<vmem>>, vector<8x8xf32>
    %cst_28 = arith.constant dense<0.000000e+00> : vector<8x256xf32>
    %98 = tpu.matmul %97, %64, %cst_28 {dimension_numbers = #tpu.dot_dimension_numbers<[1], [0], [0], [1], [0, 0, 1, 1], [], []>} : vector<8x8xf32>, vector<8x256xf32>, vector<8x256xf32> -> vector<8x256xf32>
    %99 = arith.addf %96, %98 : vector<8x256xf32>
    %cst_29 = arith.constant 0.000000e+00 : f32
    %100 = vector.broadcast %cst_29 : f32 to vector<8x256xf32>
    %101 = arith.cmpf ogt, %99, %100 : vector<8x256xf32>
    %cst_30 = arith.constant 0.000000e+00 : f32
    %102 = vector.broadcast %cst_30 : f32 to vector<8x256xf32>
    %103 = arith.minimumf %99, %102 : vector<8x256xf32>
    %104 = math.exp %103 : vector<8x256xf32>
    %cst_31 = arith.constant 1.000000e+00 : f32
    %105 = vector.broadcast %cst_31 : f32 to vector<8x256xf32>
    %106 = arith.subf %104, %105 : vector<8x256xf32>
    %107 = arith.select %101, %99, %106 : vector<8x256xi1>, vector<8x256xf32>
    %c0_32 = arith.constant 0 : index
    %c0_33 = arith.constant 0 : index
    %108 = vector.load %arg12[%c0_32, %c0_33] : memref<4x8xf32, #tpu.memory_space<vmem>>, vector<4x8xf32>
    %cst_34 = arith.constant dense<0.000000e+00> : vector<4x256xf32>
    %109 = tpu.matmul %108, %107, %cst_34 {dimension_numbers = #tpu.dot_dimension_numbers<[1], [0], [0], [1], [0, 0, 1, 1], [], []>} : vector<4x8xf32>, vector<8x256xf32>, vector<4x256xf32> -> vector<4x256xf32>
    %c0_35 = arith.constant 0 : index
    %c0_36 = arith.constant 0 : index
    %110 = vector.load %arg13[%c0_35, %c0_36] : memref<4x1xf32, #tpu.memory_space<vmem>>, vector<4x1xf32>
    %111 = vector.broadcast %110 : vector<4x1xf32> to vector<4x256xf32>
    %112 = arith.addf %109, %111 : vector<4x256xf32>
    %c0_37 = arith.constant 0 : index
    %c0_38 = arith.constant 0 : index
    %c0_39 = arith.constant 0 : index
    %113 = vector.load %arg14[%c0_37, %c0_38, %c0_39] : memref<1x4x256xf32, #tpu.memory_space<vmem>>, vector<1x4x256xf32>
    %114 = vector.shape_cast %113 : vector<1x4x256xf32> to vector<4x256xf32>
    %115 = vector.shape_cast %112 : vector<4x256xf32> to vector<1x4x256xf32>
    tpu.vector_store %arg14[%c0_37, %c0_38, %c0_39], %115 {strides = array<i32>} : memref<1x4x256xf32, #tpu.memory_space<vmem>>, vector<1x4x256xf32>,
    return
  }
  func.func @transform_0(%arg0: i32, %arg1: i32) -> (i32, i32, i32) {
    %c0_i32 = arith.constant 0 : i32
    %c0_i32_0 = arith.constant 0 : i32
    return %arg0, %c0_i32, %arg1 : i32, i32, i32
  }
  func.func @transform_1(%arg0: i32, %arg1: i32) -> (i32, i32, i32) {
    %c0_i32 = arith.constant 0 : i32
    %c0_i32_0 = arith.constant 0 : i32
    return %arg0, %c0_i32, %arg1 : i32, i32, i32
  }
  func.func @transform_2(%arg0: i32, %arg1: i32) -> (i32, i32, i32) {
    %c0_i32 = arith.constant 0 : i32
    %c0_i32_0 = arith.constant 0 : i32
    return %arg0, %arg1, %c0_i32 : i32, i32, i32
  }
  func.func @transform_3(%arg0: i32, %arg1: i32) -> (i32, i32, i32) {
    %c0_i32 = arith.constant 0 : i32
    %c0_i32_0 = arith.constant 0 : i32
    %c0_i32_1 = arith.constant 0 : i32
    return %arg0, %c0_i32, %c0_i32_0 : i32, i32, i32
  }
  func.func @transform_4(%arg0: i32, %arg1: i32) -> (i32, i32) {
    %c0_i32 = arith.constant 0 : i32
    %c0_i32_0 = arith.constant 0 : i32
    %c0_i32_1 = arith.constant 0 : i32
    return %c0_i32, %c0_i32_0 : i32, i32
  }
  func.func @transform_5(%arg0: i32, %arg1: i32) -> (i32, i32) {
    %c0_i32 = arith.constant 0 : i32
    %c0_i32_0 = arith.constant 0 : i32
    %c0_i32_1 = arith.constant 0 : i32
    return %c0_i32, %c0_i32_0 : i32, i32
  }
  func.func @transform_6(%arg0: i32, %arg1: i32) -> (i32, i32) {
    %c0_i32 = arith.constant 0 : i32
    %c0_i32_0 = arith.constant 0 : i32
    %c0_i32_1 = arith.constant 0 : i32
    return %c0_i32, %c0_i32_0 : i32, i32
  }
  func.func @transform_7(%arg0: i32, %arg1: i32) -> (i32, i32) {
    %c0_i32 = arith.constant 0 : i32
    %c0_i32_0 = arith.constant 0 : i32
    %c0_i32_1 = arith.constant 0 : i32
    return %c0_i32, %c0_i32_0 : i32, i32
  }
  func.func @transform_8(%arg0: i32, %arg1: i32) -> (i32, i32) {
    %c0_i32 = arith.constant 0 : i32
    %c0_i32_0 = arith.constant 0 : i32
    %c0_i32_1 = arith.constant 0 : i32
    return %c0_i32, %c0_i32_0 : i32, i32
  }
  func.func @transform_9(%arg0: i32, %arg1: i32) -> (i32, i32) {
    %c0_i32 = arith.constant 0 : i32
    %c0_i32_0 = arith.constant 0 : i32
    %c0_i32_1 = arith.constant 0 : i32
    return %c0_i32, %c0_i32_0 : i32, i32
  }
  func.func @transform_10(%arg0: i32, %arg1: i32) -> (i32, i32) {
    %c0_i32 = arith.constant 0 : i32
    %c0_i32_0 = arith.constant 0 : i32
    %c0_i32_1 = arith.constant 0 : i32
    return %c0_i32, %c0_i32_0 : i32, i32
  }
  func.func @transform_11(%arg0: i32, %arg1: i32) -> (i32, i32) {
    %c0_i32 = arith.constant 0 : i32
    %c0_i32_0 = arith.constant 0 : i32
    %c0_i32_1 = arith.constant 0 : i32
    return %c0_i32, %c0_i32_0 : i32, i32
  }
  func.func @transform_12(%arg0: i32, %arg1: i32) -> (i32, i32, i32) {
    %c0_i32 = arith.constant 0 : i32
    %c0_i32_0 = arith.constant 0 : i32
    return %arg0, %c0_i32, %arg1 : i32, i32, i32
  }
}

module attributes {stable_mosaic.version = 11 : i64} {
  func.func @_edge_mlp_kernel(%arg0: i32, %arg1: i32, %arg2: memref<1x4x256xf32, #tpu.memory_space<vmem>>, %arg3: memref<1x4x256xf32, #tpu.memory_space<vmem>>, %arg4: memref<1x16x16xf32, #tpu.memory_space<vmem>>, %arg5: memref<1x16x16xf32, #tpu.memory_space<vmem>>, %arg6: memref<16x8xf32, #tpu.memory_space<vmem>>, %arg7: memref<1x8xf32, #tpu.memory_space<vmem>>, %arg8: memref<8x4xf32, #tpu.memory_space<vmem>>, %arg9: memref<8x4xf32, #tpu.memory_space<vmem>>, %arg10: memref<8x8xf32, #tpu.memory_space<vmem>>, %arg11: memref<8x1xf32, #tpu.memory_space<vmem>>, %arg12: memref<4x8xf32, #tpu.memory_space<vmem>>, %arg13: memref<4x1xf32, #tpu.memory_space<vmem>>, %arg14: memref<1x4x256xf32, #tpu.memory_space<vmem>>) attributes {dimension_semantics = [#tpu.dimension_semantics<parallel>, #tpu.dimension_semantics<parallel>], iteration_bounds = array<i64: 2, 1>, scalar_prefetch = 0 : i64, scratch_operands = 0 : i64, tpu.core_type = #tpu.core_type<tc>, window_params = [{transform_indices = @transform_0, window_bounds = array<i64: 1, 4, 256>}, {transform_indices = @transform_1, window_bounds = array<i64: 1, 4, 256>}, {transform_indices = @transform_2, window_bounds = array<i64: 1, 16, 16>}, {transform_indices = @transform_3, window_bounds = array<i64: 1, 16, 16>}, {pipeline_mode = #tpu.pipeline_mode<synchronous>, transform_indices = @transform_4, window_bounds = array<i64: 16, 8>}, {pipeline_mode = #tpu.pipeline_mode<synchronous>, transform_indices = @transform_5, window_bounds = array<i64: 1, 8>}, {pipeline_mode = #tpu.pipeline_mode<synchronous>, transform_indices = @transform_6, window_bounds = array<i64: 8, 4>}, {pipeline_mode = #tpu.pipeline_mode<synchronous>, transform_indices = @transform_7, window_bounds = array<i64: 8, 4>}, {pipeline_mode = #tpu.pipeline_mode<synchronous>, transform_indices = @transform_8, window_bounds = array<i64: 8, 8>}, {pipeline_mode = #tpu.pipeline_mode<synchronous>, transform_indices = @transform_9, window_bounds = array<i64: 8, 1>}, {pipeline_mode = #tpu.pipeline_mode<synchronous>, transform_indices = @transform_10, window_bounds = array<i64: 4, 8>}, {pipeline_mode = #tpu.pipeline_mode<synchronous>, transform_indices = @transform_11, window_bounds = array<i64: 4, 1>}, {transform_indices = @transform_12, window_bounds = array<i64: 1, 4, 256>}]} {
    %c0 = arith.constant 0 : index
    %c0_0 = arith.constant 0 : index
    %c0_1 = arith.constant 0 : index
    %0 = vector.load %arg4[%c0, %c0_0, %c0_1] : memref<1x16x16xf32, #tpu.memory_space<vmem>>, vector<1x16x16xf32>
    %1 = vector.shape_cast %0 : vector<1x16x16xf32> to vector<16x16xf32>
    %c0_2 = arith.constant 0 : index
    %c0_3 = arith.constant 0 : index
    %2 = vector.load %arg6[%c0_2, %c0_3] : memref<16x8xf32, #tpu.memory_space<vmem>>, vector<16x8xf32>
    %cst = arith.constant dense<0.000000e+00> : vector<16x8xf32>
    %3 = tpu.matmul %1, %2, %cst {dimension_numbers = #tpu.dot_dimension_numbers<[1], [0], [0], [1], [0, 0, 1, 1], [], []>} : vector<16x16xf32>, vector<16x8xf32>, vector<16x8xf32> -> vector<16x8xf32>
    %c0_4 = arith.constant 0 : index
    %c0_5 = arith.constant 0 : index
    %4 = vector.load %arg7[%c0_4, %c0_5] : memref<1x8xf32, #tpu.memory_space<vmem>>, vector<1x8xf32>
    %5 = vector.broadcast %4 : vector<1x8xf32> to vector<16x8xf32>
    %6 = arith.addf %3, %5 : vector<16x8xf32>
    %c0_6 = arith.constant 0 : index
    %c0_7 = arith.constant 0 : index
    %c0_8 = arith.constant 0 : index
    %7 = vector.load %arg5[%c0_6, %c0_7, %c0_8] : memref<1x16x16xf32, #tpu.memory_space<vmem>>, vector<1x16x16xf32>
    %8 = vector.shape_cast %7 : vector<1x16x16xf32> to vector<16x16xf32>
    %c0_9 = arith.constant 0 : index
    %c0_10 = arith.constant 0 : index
    %9 = vector.load %arg6[%c0_9, %c0_10] : memref<16x8xf32, #tpu.memory_space<vmem>>, vector<16x8xf32>
    %cst_11 = arith.constant dense<0.000000e+00> : vector<16x8xf32>
    %10 = tpu.matmul %8, %9, %cst_11 {dimension_numbers = #tpu.dot_dimension_numbers<[1], [0], [0], [1], [0, 0, 1, 1], [], []>} : vector<16x16xf32>, vector<16x8xf32>, vector<16x8xf32> -> vector<16x8xf32>
    %c0_12 = arith.constant 0 : index
    %c0_13 = arith.constant 0 : index
    %11 = vector.load %arg7[%c0_12, %c0_13] : memref<1x8xf32, #tpu.memory_space<vmem>>, vector<1x8xf32>
    %12 = vector.broadcast %11 : vector<1x8xf32> to vector<16x8xf32>
    %13 = arith.addf %10, %12 : vector<16x8xf32>
    %14 = tpu.transpose %6, [1, 0] : vector<16x8xf32> -> vector<8x16xf32>
    %15 = tpu.transpose %13, [1, 0] : vector<16x8xf32> -> vector<8x16xf32>
    %16 = vector.extract_strided_slice %14 {offsets = [0, 0], sizes = [8, 1], strides = [1, 1]} : vector<8x16xf32> to vector<8x1xf32>
    %17 = vector.broadcast %16 : vector<8x1xf32> to vector<8x16xf32>
    %18 = arith.mulf %17, %15 : vector<8x16xf32>
    %19 = vector.extract_strided_slice %14 {offsets = [0, 1], sizes = [8, 1], strides = [1, 1]} : vector<8x16xf32> to vector<8x1xf32>
    %20 = vector.broadcast %19 : vector<8x1xf32> to vector<8x16xf32>
    %21 = arith.mulf %20, %15 : vector<8x16xf32>
    %22 = vector.extract_strided_slice %14 {offsets = [0, 2], sizes = [8, 1], strides = [1, 1]} : vector<8x16xf32> to vector<8x1xf32>
    %23 = vector.broadcast %22 : vector<8x1xf32> to vector<8x16xf32>
    %24 = arith.mulf %23, %15 : vector<8x16xf32>
    %25 = vector.extract_strided_slice %14 {offsets = [0, 3], sizes = [8, 1], strides = [1, 1]} : vector<8x16xf32> to vector<8x1xf32>
    %26 = vector.broadcast %25 : vector<8x1xf32> to vector<8x16xf32>
    %27 = arith.mulf %26, %15 : vector<8x16xf32>
    %28 = vector.extract_strided_slice %14 {offsets = [0, 4], sizes = [8, 1], strides = [1, 1]} : vector<8x16xf32> to vector<8x1xf32>
    %29 = vector.broadcast %28 : vector<8x1xf32> to vector<8x16xf32>
    %30 = arith.mulf %29, %15 : vector<8x16xf32>
    %31 = vector.extract_strided_slice %14 {offsets = [0, 5], sizes = [8, 1], strides = [1, 1]} : vector<8x16xf32> to vector<8x1xf32>
    %32 = vector.broadcast %31 : vector<8x1xf32> to vector<8x16xf32>
    %33 = arith.mulf %32, %15 : vector<8x16xf32>
    %34 = vector.extract_strided_slice %14 {offsets = [0, 6], sizes = [8, 1], strides = [1, 1]} : vector<8x16xf32> to vector<8x1xf32>
    %35 = vector.broadcast %34 : vector<8x1xf32> to vector<8x16xf32>
    %36 = arith.mulf %35, %15 : vector<8x16xf32>
    %37 = vector.extract_strided_slice %14 {offsets = [0, 7], sizes = [8, 1], strides = [1, 1]} : vector<8x16xf32> to vector<8x1xf32>
    %38 = vector.broadcast %37 : vector<8x1xf32> to vector<8x16xf32>
    %39 = arith.mulf %38, %15 : vector<8x16xf32>
    %40 = vector.extract_strided_slice %14 {offsets = [0, 8], sizes = [8, 1], strides = [1, 1]} : vector<8x16xf32> to vector<8x1xf32>
    %41 = vector.broadcast %40 : vector<8x1xf32> to vector<8x16xf32>
    %42 = arith.mulf %41, %15 : vector<8x16xf32>
    %43 = vector.extract_strided_slice %14 {offsets = [0, 9], sizes = [8, 1], strides = [1, 1]} : vector<8x16xf32> to vector<8x1xf32>
    %44 = vector.broadcast %43 : vector<8x1xf32> to vector<8x16xf32>
    %45 = arith.mulf %44, %15 : vector<8x16xf32>
    %46 = vector.extract_strided_slice %14 {offsets = [0, 10], sizes = [8, 1], strides = [1, 1]} : vector<8x16xf32> to vector<8x1xf32>
    %47 = vector.broadcast %46 : vector<8x1xf32> to vector<8x16xf32>
    %48 = arith.mulf %47, %15 : vector<8x16xf32>
    %49 = vector.extract_strided_slice %14 {offsets = [0, 11], sizes = [8, 1], strides = [1, 1]} : vector<8x16xf32> to vector<8x1xf32>
    %50 = vector.broadcast %49 : vector<8x1xf32> to vector<8x16xf32>
    %51 = arith.mulf %50, %15 : vector<8x16xf32>
    %52 = vector.extract_strided_slice %14 {offsets = [0, 12], sizes = [8, 1], strides = [1, 1]} : vector<8x16xf32> to vector<8x1xf32>
    %53 = vector.broadcast %52 : vector<8x1xf32> to vector<8x16xf32>
    %54 = arith.mulf %53, %15 : vector<8x16xf32>
    %55 = vector.extract_strided_slice %14 {offsets = [0, 13], sizes = [8, 1], strides = [1, 1]} : vector<8x16xf32> to vector<8x1xf32>
    %56 = vector.broadcast %55 : vector<8x1xf32> to vector<8x16xf32>
    %57 = arith.mulf %56, %15 : vector<8x16xf32>
    %58 = vector.extract_strided_slice %14 {offsets = [0, 14], sizes = [8, 1], strides = [1, 1]} : vector<8x16xf32> to vector<8x1xf32>
    %59 = vector.broadcast %58 : vector<8x1xf32> to vector<8x16xf32>
    %60 = arith.mulf %59, %15 : vector<8x16xf32>
    %61 = vector.extract_strided_slice %14 {offsets = [0, 15], sizes = [8, 1], strides = [1, 1]} : vector<8x16xf32> to vector<8x1xf32>
    %62 = vector.broadcast %61 : vector<8x1xf32> to vector<8x16xf32>
    %63 = arith.mulf %62, %15 : vector<8x16xf32>
    %64 = tpu.concatenate %18, %21, %24, %27, %30, %33, %36, %39, %42, %45, %48, %51, %54, %57, %60, %63 in 1 : vector<8x16xf32>, vector<8x16xf32>, vector<8x16xf32>, vector<8x16xf32>, vector<8x16xf32>, vector<8x16xf32>, vector<8x16xf32>, vector<8x16xf32>, vector<8x16xf32>, vector<8x16xf32>, vector<8x16xf32>, vector<8x16xf32>, vector<8x16xf32>, vector<8x16xf32>, vector<8x16xf32>, vector<8x16xf32> -> vector<8x256xf32>
    %c0_14 = arith.constant 0 : index
    %c0_15 = arith.constant 0 : index
    %c0_16 = arith.constant 0 : index
    %65 = vector.load %arg2[%c0_14, %c0_15, %c0_16] : memref<1x4x256xf32, #tpu.memory_space<vmem>>, vector<1x4x256xf32>
    %66 = vector.shape_cast %65 : vector<1x4x256xf32> to vector<4x256xf32>
    %c0_17 = arith.constant 0 : index
    %c0_18 = arith.constant 0 : index
    %c0_19 = arith.constant 0 : index
    %67 = vector.load %arg3[%c0_17, %c0_18, %c0_19] : memref<1x4x256xf32, #tpu.memory_space<vmem>>, vector<1x4x256xf32>
    %68 = vector.shape_cast %67 : vector<1x4x256xf32> to vector<4x256xf32>
    %c0_20 = arith.constant 0 : index
    %c0_21 = arith.constant 0 : index
    %69 = vector.load %arg8[%c0_20, %c0_21] : memref<8x4xf32, #tpu.memory_space<vmem>>, vector<8x4xf32>
    %c0_22 = arith.constant 0 : index
    %c0_23 = arith.constant 0 : index
    %70 = vector.load %arg9[%c0_22, %c0_23] : memref<8x4xf32, #tpu.memory_space<vmem>>, vector<8x4xf32>
    %c0_24 = arith.constant 0 : index
    %c0_25 = arith.constant 0 : index
    %71 = vector.load %arg11[%c0_24, %c0_25] : memref<8x1xf32, #tpu.memory_space<vmem>>, vector<8x1xf32>
    %72 = vector.extract_strided_slice %69 {offsets = [0, 0], sizes = [8, 1], strides = [1, 1]} : vector<8x4xf32> to vector<8x1xf32>
    %73 = vector.extract_strided_slice %66 {offsets = [0, 0], sizes = [1, 256], strides = [1, 1]} : vector<4x256xf32> to vector<1x256xf32>
    %74 = vector.broadcast %72 : vector<8x1xf32> to vector<8x256xf32>
    %75 = vector.broadcast %73 : vector<1x256xf32> to vector<8x256xf32>
    %76 = arith.mulf %74, %75 : vector<8x256xf32>
    %77 = vector.broadcast %71 : vector<8x1xf32> to vector<8x256xf32>
    %78 = arith.addf %77, %76 : vector<8x256xf32>
    %79 = vector.extract_strided_slice %70 {offsets = [0, 0], sizes = [8, 1], strides = [1, 1]} : vector<8x4xf32> to vector<8x1xf32>
    %80 = vector.extract_strided_slice %68 {offsets = [0, 0], sizes = [1, 256], strides = [1, 1]} : vector<4x256xf32> to vector<1x256xf32>
    %81 = vector.broadcast %79 : vector<8x1xf32> to vector<8x256xf32>
    %82 = vector.broadcast %80 : vector<1x256xf32> to vector<8x256xf32>
    %83 = arith.mulf %81, %82 : vector<8x256xf32>
    %84 = arith.addf %78, %83 : vector<8x256xf32>
    %85 = vector.extract_strided_slice %69 {offsets = [0, 1], sizes = [8, 1], strides = [1, 1]} : vector<8x4xf32> to vector<8x1xf32>
    %86 = vector.extract_strided_slice %66 {offsets = [1, 0], sizes = [1, 256], strides = [1, 1]} : vector<4x256xf32> to vector<1x256xf32>
    %87 = vector.broadcast %85 : vector<8x1xf32> to vector<8x256xf32>
    %88 = vector.broadcast %86 : vector<1x256xf32> to vector<8x256xf32>
    %89 = arith.mulf %87, %88 : vector<8x256xf32>
    %90 = arith.addf %84, %89 : vector<8x256xf32>
    %91 = vector.extract_strided_slice %70 {offsets = [0, 1], sizes = [8, 1], strides = [1, 1]} : vector<8x4xf32> to vector<8x1xf32>
    %92 = vector.extract_strided_slice %68 {offsets = [1, 0], sizes = [1, 256], strides = [1, 1]} : vector<4x256xf32> to vector<1x256xf32>
    %93 = vector.broadcast %91 : vector<8x1xf32> to vector<8x256xf32>
    %94 = vector.broadcast %92 : vector<1x256xf32> to vector<8x256xf32>
    %95 = arith.mulf %93, %94 : vector<8x256xf32>
    %96 = arith.addf %90, %95 : vector<8x256xf32>
    %97 = vector.extract_strided_slice %69 {offsets = [0, 2], sizes = [8, 1], strides = [1, 1]} : vector<8x4xf32> to vector<8x1xf32>
    %98 = vector.extract_strided_slice %66 {offsets = [2, 0], sizes = [1, 256], strides = [1, 1]} : vector<4x256xf32> to vector<1x256xf32>
    %99 = vector.broadcast %97 : vector<8x1xf32> to vector<8x256xf32>
    %100 = vector.broadcast %98 : vector<1x256xf32> to vector<8x256xf32>
    %101 = arith.mulf %99, %100 : vector<8x256xf32>
    %102 = arith.addf %96, %101 : vector<8x256xf32>
    %103 = vector.extract_strided_slice %70 {offsets = [0, 2], sizes = [8, 1], strides = [1, 1]} : vector<8x4xf32> to vector<8x1xf32>
    %104 = vector.extract_strided_slice %68 {offsets = [2, 0], sizes = [1, 256], strides = [1, 1]} : vector<4x256xf32> to vector<1x256xf32>
    %105 = vector.broadcast %103 : vector<8x1xf32> to vector<8x256xf32>
    %106 = vector.broadcast %104 : vector<1x256xf32> to vector<8x256xf32>
    %107 = arith.mulf %105, %106 : vector<8x256xf32>
    %108 = arith.addf %102, %107 : vector<8x256xf32>
    %109 = vector.extract_strided_slice %69 {offsets = [0, 3], sizes = [8, 1], strides = [1, 1]} : vector<8x4xf32> to vector<8x1xf32>
    %110 = vector.extract_strided_slice %66 {offsets = [3, 0], sizes = [1, 256], strides = [1, 1]} : vector<4x256xf32> to vector<1x256xf32>
    %111 = vector.broadcast %109 : vector<8x1xf32> to vector<8x256xf32>
    %112 = vector.broadcast %110 : vector<1x256xf32> to vector<8x256xf32>
    %113 = arith.mulf %111, %112 : vector<8x256xf32>
    %114 = arith.addf %108, %113 : vector<8x256xf32>
    %115 = vector.extract_strided_slice %70 {offsets = [0, 3], sizes = [8, 1], strides = [1, 1]} : vector<8x4xf32> to vector<8x1xf32>
    %116 = vector.extract_strided_slice %68 {offsets = [3, 0], sizes = [1, 256], strides = [1, 1]} : vector<4x256xf32> to vector<1x256xf32>
    %117 = vector.broadcast %115 : vector<8x1xf32> to vector<8x256xf32>
    %118 = vector.broadcast %116 : vector<1x256xf32> to vector<8x256xf32>
    %119 = arith.mulf %117, %118 : vector<8x256xf32>
    %120 = arith.addf %114, %119 : vector<8x256xf32>
    %c0_26 = arith.constant 0 : index
    %c0_27 = arith.constant 0 : index
    %121 = vector.load %arg10[%c0_26, %c0_27] : memref<8x8xf32, #tpu.memory_space<vmem>>, vector<8x8xf32>
    %cst_28 = arith.constant dense<0.000000e+00> : vector<8x256xf32>
    %122 = tpu.matmul %121, %64, %cst_28 {dimension_numbers = #tpu.dot_dimension_numbers<[1], [0], [0], [1], [0, 0, 1, 1], [], []>} : vector<8x8xf32>, vector<8x256xf32>, vector<8x256xf32> -> vector<8x256xf32>
    %123 = arith.addf %120, %122 : vector<8x256xf32>
    %cst_29 = arith.constant 0.000000e+00 : f32
    %124 = vector.broadcast %cst_29 : f32 to vector<8x256xf32>
    %125 = arith.cmpf ogt, %123, %124 : vector<8x256xf32>
    %cst_30 = arith.constant 0.000000e+00 : f32
    %126 = vector.broadcast %cst_30 : f32 to vector<8x256xf32>
    %127 = arith.minimumf %123, %126 : vector<8x256xf32>
    %128 = math.exp %127 : vector<8x256xf32>
    %cst_31 = arith.constant 1.000000e+00 : f32
    %129 = vector.broadcast %cst_31 : f32 to vector<8x256xf32>
    %130 = arith.subf %128, %129 : vector<8x256xf32>
    %131 = arith.select %125, %123, %130 : vector<8x256xi1>, vector<8x256xf32>
    %c0_32 = arith.constant 0 : index
    %c0_33 = arith.constant 0 : index
    %132 = vector.load %arg12[%c0_32, %c0_33] : memref<4x8xf32, #tpu.memory_space<vmem>>, vector<4x8xf32>
    %cst_34 = arith.constant dense<0.000000e+00> : vector<4x256xf32>
    %133 = tpu.matmul %132, %131, %cst_34 {dimension_numbers = #tpu.dot_dimension_numbers<[1], [0], [0], [1], [0, 0, 1, 1], [], []>} : vector<4x8xf32>, vector<8x256xf32>, vector<4x256xf32> -> vector<4x256xf32>
    %c0_35 = arith.constant 0 : index
    %c0_36 = arith.constant 0 : index
    %134 = vector.load %arg13[%c0_35, %c0_36] : memref<4x1xf32, #tpu.memory_space<vmem>>, vector<4x1xf32>
    %135 = vector.broadcast %134 : vector<4x1xf32> to vector<4x256xf32>
    %136 = arith.addf %133, %135 : vector<4x256xf32>
    %c0_37 = arith.constant 0 : index
    %c0_38 = arith.constant 0 : index
    %c0_39 = arith.constant 0 : index
    %137 = vector.load %arg14[%c0_37, %c0_38, %c0_39] : memref<1x4x256xf32, #tpu.memory_space<vmem>>, vector<1x4x256xf32>
    %138 = vector.shape_cast %137 : vector<1x4x256xf32> to vector<4x256xf32>
    %139 = vector.shape_cast %136 : vector<4x256xf32> to vector<1x4x256xf32>
    tpu.vector_store %arg14[%c0_37, %c0_38, %c0_39], %139 {strides = array<i32>} : memref<1x4x256xf32, #tpu.memory_space<vmem>>, vector<1x4x256xf32>,
    return
  }
  func.func @transform_0(%arg0: i32, %arg1: i32) -> (i32, i32, i32) {
    %c0_i32 = arith.constant 0 : i32
    %c0_i32_0 = arith.constant 0 : i32
    return %arg0, %c0_i32, %arg1 : i32, i32, i32
  }
  func.func @transform_1(%arg0: i32, %arg1: i32) -> (i32, i32, i32) {
    %c0_i32 = arith.constant 0 : i32
    %c0_i32_0 = arith.constant 0 : i32
    return %arg0, %c0_i32, %arg1 : i32, i32, i32
  }
  func.func @transform_2(%arg0: i32, %arg1: i32) -> (i32, i32, i32) {
    %c0_i32 = arith.constant 0 : i32
    %c0_i32_0 = arith.constant 0 : i32
    return %arg0, %arg1, %c0_i32 : i32, i32, i32
  }
  func.func @transform_3(%arg0: i32, %arg1: i32) -> (i32, i32, i32) {
    %c0_i32 = arith.constant 0 : i32
    %c0_i32_0 = arith.constant 0 : i32
    %c0_i32_1 = arith.constant 0 : i32
    return %arg0, %c0_i32, %c0_i32_0 : i32, i32, i32
  }
  func.func @transform_4(%arg0: i32, %arg1: i32) -> (i32, i32) {
    %c0_i32 = arith.constant 0 : i32
    %c0_i32_0 = arith.constant 0 : i32
    %c0_i32_1 = arith.constant 0 : i32
    return %c0_i32, %c0_i32_0 : i32, i32
  }
  func.func @transform_5(%arg0: i32, %arg1: i32) -> (i32, i32) {
    %c0_i32 = arith.constant 0 : i32
    %c0_i32_0 = arith.constant 0 : i32
    %c0_i32_1 = arith.constant 0 : i32
    return %c0_i32, %c0_i32_0 : i32, i32
  }
  func.func @transform_6(%arg0: i32, %arg1: i32) -> (i32, i32) {
    %c0_i32 = arith.constant 0 : i32
    %c0_i32_0 = arith.constant 0 : i32
    %c0_i32_1 = arith.constant 0 : i32
    return %c0_i32, %c0_i32_0 : i32, i32
  }
  func.func @transform_7(%arg0: i32, %arg1: i32) -> (i32, i32) {
    %c0_i32 = arith.constant 0 : i32
    %c0_i32_0 = arith.constant 0 : i32
    %c0_i32_1 = arith.constant 0 : i32
    return %c0_i32, %c0_i32_0 : i32, i32
  }
  func.func @transform_8(%arg0: i32, %arg1: i32) -> (i32, i32) {
    %c0_i32 = arith.constant 0 : i32
    %c0_i32_0 = arith.constant 0 : i32
    %c0_i32_1 = arith.constant 0 : i32
    return %c0_i32, %c0_i32_0 : i32, i32
  }
  func.func @transform_9(%arg0: i32, %arg1: i32) -> (i32, i32) {
    %c0_i32 = arith.constant 0 : i32
    %c0_i32_0 = arith.constant 0 : i32
    %c0_i32_1 = arith.constant 0 : i32
    return %c0_i32, %c0_i32_0 : i32, i32
  }
  func.func @transform_10(%arg0: i32, %arg1: i32) -> (i32, i32) {
    %c0_i32 = arith.constant 0 : i32
    %c0_i32_0 = arith.constant 0 : i32
    %c0_i32_1 = arith.constant 0 : i32
    return %c0_i32, %c0_i32_0 : i32, i32
  }
  func.func @transform_11(%arg0: i32, %arg1: i32) -> (i32, i32) {
    %c0_i32 = arith.constant 0 : i32
    %c0_i32_0 = arith.constant 0 : i32
    %c0_i32_1 = arith.constant 0 : i32
    return %c0_i32, %c0_i32_0 : i32, i32
  }
  func.func @transform_12(%arg0: i32, %arg1: i32) -> (i32, i32, i32) {
    %c0_i32 = arith.constant 0 : i32
    %c0_i32_0 = arith.constant 0 : i32
    return %arg0, %c0_i32, %arg1 : i32, i32, i32
  }
}

module attributes {stable_mosaic.version = 11 : i64} {
  func.func @_attn_layer_kernel(%arg0: i32, %arg1: memref<1x16x16xf32, #tpu.memory_space<vmem>>, %arg2: memref<1x4x16x16xf32, #tpu.memory_space<vmem>>, %arg3: memref<1x16x1xf32, #tpu.memory_space<vmem>>, %arg4: memref<4x16x32xf32, #tpu.memory_space<vmem>>, %arg5: memref<4x1x32xf32, #tpu.memory_space<vmem>>, %arg6: memref<4x16x16xf32, #tpu.memory_space<vmem>>, %arg7: memref<4x1x16xf32, #tpu.memory_space<vmem>>, %arg8: memref<64x8xf32, #tpu.memory_space<vmem>>, %arg9: memref<1x8xf32, #tpu.memory_space<vmem>>, %arg10: memref<8x16xf32, #tpu.memory_space<vmem>>, %arg11: memref<1x16xf32, #tpu.memory_space<vmem>>, %arg12: memref<1x4x16x16xf32, #tpu.memory_space<vmem>>, %arg13: memref<1x16x16xf32, #tpu.memory_space<vmem>>) attributes {dimension_semantics = [#tpu.dimension_semantics<parallel>], iteration_bounds = array<i64: 2>, scalar_prefetch = 0 : i64, scratch_operands = 0 : i64, tpu.core_type = #tpu.core_type<tc>, window_params = [{transform_indices = @transform_0, window_bounds = array<i64: 1, 16, 16>}, {transform_indices = @transform_1, window_bounds = array<i64: 1, 4, 16, 16>}, {transform_indices = @transform_2, window_bounds = array<i64: 1, 16, 1>}, {pipeline_mode = #tpu.pipeline_mode<synchronous>, transform_indices = @transform_3, window_bounds = array<i64: 4, 16, 32>}, {pipeline_mode = #tpu.pipeline_mode<synchronous>, transform_indices = @transform_4, window_bounds = array<i64: 4, 1, 32>}, {pipeline_mode = #tpu.pipeline_mode<synchronous>, transform_indices = @transform_5, window_bounds = array<i64: 4, 16, 16>}, {pipeline_mode = #tpu.pipeline_mode<synchronous>, transform_indices = @transform_6, window_bounds = array<i64: 4, 1, 16>}, {pipeline_mode = #tpu.pipeline_mode<synchronous>, transform_indices = @transform_7, window_bounds = array<i64: 64, 8>}, {pipeline_mode = #tpu.pipeline_mode<synchronous>, transform_indices = @transform_8, window_bounds = array<i64: 1, 8>}, {pipeline_mode = #tpu.pipeline_mode<synchronous>, transform_indices = @transform_9, window_bounds = array<i64: 8, 16>}, {pipeline_mode = #tpu.pipeline_mode<synchronous>, transform_indices = @transform_10, window_bounds = array<i64: 1, 16>}, {transform_indices = @transform_11, window_bounds = array<i64: 1, 4, 16, 16>}, {transform_indices = @transform_12, window_bounds = array<i64: 1, 16, 16>}]} {
    %c0 = arith.constant 0 : index
    %c0_0 = arith.constant 0 : index
    %c0_1 = arith.constant 0 : index
    %0 = vector.load %arg1[%c0, %c0_0, %c0_1] : memref<1x16x16xf32, #tpu.memory_space<vmem>>, vector<1x16x16xf32>
    %1 = vector.shape_cast %0 : vector<1x16x16xf32> to vector<16x16xf32>
    %2 = tpu.iota {dimensions = array<i32: 0>} : vector<16x16xi32>
    %3 = tpu.iota {dimensions = array<i32: 1>} : vector<16x16xi32>
    %4 = arith.cmpi eq, %2, %3 : vector<16x16xi32>
    %5 = arith.extui %4 : vector<16x16xi1> to vector<16x16xi32>
    %6 = arith.sitofp %5 : vector<16x16xi32> to vector<16x16xf32>
    %c0_2 = arith.constant 0 : index
    %c0_3 = arith.constant 0 : index
    %c0_4 = arith.constant 0 : index
    %c0_5 = arith.constant 0 : index
    %7 = vector.load %arg2[%c0_2, %c0_3, %c0_4, %c0_5] : memref<1x4x16x16xf32, #tpu.memory_space<vmem>>, vector<1x1x16x16xf32>
    %8 = vector.shape_cast %7 : vector<1x1x16x16xf32> to vector<16x16xf32>
    %cst = arith.constant 1.000000e+00 : f32
    %9 = vector.broadcast %cst : f32 to vector<16x16xf32>
    %10 = arith.subf %9, %6 : vector<16x16xf32>
    %11 = arith.mulf %8, %10 : vector<16x16xf32>
    %12 = arith.addf %11, %6 : vector<16x16xf32>
    %cst_6 = arith.constant dense<0.000000e+00> : vector<16xf32>
    %13 = vector.multi_reduction <add>, %12, %cst_6 [1] : vector<16x16xf32> to vector<16xf32>
    %14 = vector.shape_cast %13 : vector<16xf32> to vector<16x1xf32>
    %cst_7 = arith.constant 1.000000e+00 : f32
    %15 = vector.broadcast %cst_7 : f32 to vector<16x1xf32>
    %16 = arith.maximumf %14, %15 : vector<16x1xf32>
    %17 = math.rsqrt %16 : vector<16x1xf32>
    %c0_8 = arith.constant 0 : index
    %c0_9 = arith.constant 0 : index
    %c0_10 = arith.constant 0 : index
    %18 = vector.load %arg4[%c0_8, %c0_9, %c0_10] : memref<4x16x32xf32, #tpu.memory_space<vmem>>, vector<1x16x32xf32>
    %19 = vector.shape_cast %18 : vector<1x16x32xf32> to vector<16x32xf32>
    %cst_11 = arith.constant dense<0.000000e+00> : vector<16x32xf32>
    %20 = tpu.matmul %1, %19, %cst_11 {dimension_numbers = #tpu.dot_dimension_numbers<[1], [0], [0], [1], [0, 0, 1, 1], [], []>} : vector<16x16xf32>, vector<16x32xf32>, vector<16x32xf32> -> vector<16x32xf32>
    %21 = vector.broadcast %17 : vector<16x1xf32> to vector<16x32xf32>
    %22 = arith.mulf %20, %21 : vector<16x32xf32>
    %cst_12 = arith.constant dense<0.000000e+00> : vector<16x32xf32>
    %23 = tpu.matmul %12, %22, %cst_12 {dimension_numbers = #tpu.dot_dimension_numbers<[1], [0], [0], [1], [0, 0, 1, 1], [], []>} : vector<16x16xf32>, vector<16x32xf32>, vector<16x32xf32> -> vector<16x32xf32>
    %24 = vector.broadcast %17 : vector<16x1xf32> to vector<16x32xf32>
    %25 = arith.mulf %23, %24 : vector<16x32xf32>
    %c0_13 = arith.constant 0 : index
    %c0_14 = arith.constant 0 : index
    %c0_15 = arith.constant 0 : index
    %26 = vector.load %arg5[%c0_13, %c0_14, %c0_15] : memref<4x1x32xf32, #tpu.memory_space<vmem>>, vector<1x1x32xf32>
    %27 = vector.shape_cast %26 : vector<1x1x32xf32> to vector<1x32xf32>
    %28 = vector.broadcast %27 : vector<1x32xf32> to vector<16x32xf32>
    %29 = arith.addf %25, %28 : vector<16x32xf32>
    %c0_16 = arith.constant 0 : index
    %c0_17 = arith.constant 0 : index
    %c0_18 = arith.constant 0 : index
    %30 = vector.load %arg6[%c0_16, %c0_17, %c0_18] : memref<4x16x16xf32, #tpu.memory_space<vmem>>, vector<1x16x16xf32>
    %31 = vector.shape_cast %30 : vector<1x16x16xf32> to vector<16x16xf32>
    %cst_19 = arith.constant dense<0.000000e+00> : vector<16x16xf32>
    %32 = tpu.matmul %1, %31, %cst_19 {dimension_numbers = #tpu.dot_dimension_numbers<[1], [0], [0], [1], [0, 0, 1, 1], [], []>} : vector<16x16xf32>, vector<16x16xf32>, vector<16x16xf32> -> vector<16x16xf32>
    %33 = vector.broadcast %17 : vector<16x1xf32> to vector<16x16xf32>
    %34 = arith.mulf %32, %33 : vector<16x16xf32>
    %cst_20 = arith.constant dense<0.000000e+00> : vector<16x16xf32>
    %35 = tpu.matmul %12, %34, %cst_20 {dimension_numbers = #tpu.dot_dimension_numbers<[1], [0], [0], [1], [0, 0, 1, 1], [], []>} : vector<16x16xf32>, vector<16x16xf32>, vector<16x16xf32> -> vector<16x16xf32>
    %36 = vector.broadcast %17 : vector<16x1xf32> to vector<16x16xf32>
    %37 = arith.mulf %35, %36 : vector<16x16xf32>
    %c0_21 = arith.constant 0 : index
    %c0_22 = arith.constant 0 : index
    %c0_23 = arith.constant 0 : index
    %38 = vector.load %arg7[%c0_21, %c0_22, %c0_23] : memref<4x1x16xf32, #tpu.memory_space<vmem>>, vector<1x1x16xf32>
    %39 = vector.shape_cast %38 : vector<1x1x16xf32> to vector<1x16xf32>
    %40 = vector.broadcast %39 : vector<1x16xf32> to vector<16x16xf32>
    %41 = arith.addf %37, %40 : vector<16x16xf32>
    %42 = vector.extract_strided_slice %29 {offsets = [0, 0], sizes = [16, 16], strides = [1, 1]} : vector<16x32xf32> to vector<16x16xf32>
    %43 = vector.extract_strided_slice %29 {offsets = [0, 16], sizes = [16, 16], strides = [1, 1]} : vector<16x32xf32> to vector<16x16xf32>
    %44 = vector.extract_strided_slice %42 {offsets = [0, 0], sizes = [16, 4], strides = [1, 1]} : vector<16x16xf32> to vector<16x4xf32>
    %45 = vector.extract_strided_slice %43 {offsets = [0, 0], sizes = [16, 4], strides = [1, 1]} : vector<16x16xf32> to vector<16x4xf32>
    %cst_24 = arith.constant dense<0.000000e+00> : vector<16x16xf32>
    %46 = tpu.matmul %44, %45, %cst_24 {dimension_numbers = #tpu.dot_dimension_numbers<[1], [1], [0], [0], [0, 0, 1, 0], [], []>} : vector<16x4xf32>, vector<16x4xf32>, vector<16x16xf32> -> vector<16x16xf32>
    %47 = math.tanh %46 : vector<16x16xf32>
    %48 = vector.extract_strided_slice %42 {offsets = [0, 4], sizes = [16, 4], strides = [1, 1]} : vector<16x16xf32> to vector<16x4xf32>
    %49 = vector.extract_strided_slice %43 {offsets = [0, 4], sizes = [16, 4], strides = [1, 1]} : vector<16x16xf32> to vector<16x4xf32>
    %cst_25 = arith.constant dense<0.000000e+00> : vector<16x16xf32>
    %50 = tpu.matmul %48, %49, %cst_25 {dimension_numbers = #tpu.dot_dimension_numbers<[1], [1], [0], [0], [0, 0, 1, 0], [], []>} : vector<16x4xf32>, vector<16x4xf32>, vector<16x16xf32> -> vector<16x16xf32>
    %51 = math.tanh %50 : vector<16x16xf32>
    %52 = arith.addf %47, %51 : vector<16x16xf32>
    %53 = vector.extract_strided_slice %42 {offsets = [0, 8], sizes = [16, 4], strides = [1, 1]} : vector<16x16xf32> to vector<16x4xf32>
    %54 = vector.extract_strided_slice %43 {offsets = [0, 8], sizes = [16, 4], strides = [1, 1]} : vector<16x16xf32> to vector<16x4xf32>
    %cst_26 = arith.constant dense<0.000000e+00> : vector<16x16xf32>
    %55 = tpu.matmul %53, %54, %cst_26 {dimension_numbers = #tpu.dot_dimension_numbers<[1], [1], [0], [0], [0, 0, 1, 0], [], []>} : vector<16x4xf32>, vector<16x4xf32>, vector<16x16xf32> -> vector<16x16xf32>
    %56 = math.tanh %55 : vector<16x16xf32>
    %57 = arith.addf %52, %56 : vector<16x16xf32>
    %58 = vector.extract_strided_slice %42 {offsets = [0, 12], sizes = [16, 4], strides = [1, 1]} : vector<16x16xf32> to vector<16x4xf32>
    %59 = vector.extract_strided_slice %43 {offsets = [0, 12], sizes = [16, 4], strides = [1, 1]} : vector<16x16xf32> to vector<16x4xf32>
    %cst_27 = arith.constant dense<0.000000e+00> : vector<16x16xf32>
    %60 = tpu.matmul %58, %59, %cst_27 {dimension_numbers = #tpu.dot_dimension_numbers<[1], [1], [0], [0], [0, 0, 1, 0], [], []>} : vector<16x4xf32>, vector<16x4xf32>, vector<16x16xf32> -> vector<16x16xf32>
    %61 = math.tanh %60 : vector<16x16xf32>
    %62 = arith.addf %57, %61 : vector<16x16xf32>
    %cst_28 = arith.constant 2.500000e-01 : f32
    %63 = vector.broadcast %cst_28 : f32 to vector<16x16xf32>
    %64 = arith.mulf %62, %63 : vector<16x16xf32>
    %65 = tpu.transpose %64, [1, 0] : vector<16x16xf32> -> vector<16x16xf32>
    %66 = arith.addf %64, %65 : vector<16x16xf32>
    %cst_29 = arith.constant 5.000000e-01 : f32
    %67 = vector.broadcast %cst_29 : f32 to vector<16x16xf32>
    %68 = arith.mulf %67, %66 : vector<16x16xf32>
    %c0_30 = arith.constant 0 : index
    %c0_31 = arith.constant 0 : index
    %c0_32 = arith.constant 0 : index
    %c0_33 = arith.constant 0 : index
    %69 = vector.load %arg12[%c0_30, %c0_31, %c0_32, %c0_33] : memref<1x4x16x16xf32, #tpu.memory_space<vmem>>, vector<1x1x16x16xf32>
    %70 = vector.shape_cast %69 : vector<1x1x16x16xf32> to vector<16x16xf32>
    %71 = vector.shape_cast %68 : vector<16x16xf32> to vector<1x1x16x16xf32>
    tpu.vector_store %arg12[%c0_30, %c0_31, %c0_32, %c0_33], %71 {strides = array<i32>} : memref<1x4x16x16xf32, #tpu.memory_space<vmem>>, vector<1x1x16x16xf32>,
    %c0_34 = arith.constant 0 : index
    %c1 = arith.constant 1 : index
    %c0_35 = arith.constant 0 : index
    %c0_36 = arith.constant 0 : index
    %72 = vector.load %arg2[%c0_34, %c1, %c0_35, %c0_36] : memref<1x4x16x16xf32, #tpu.memory_space<vmem>>, vector<1x1x16x16xf32>
    %73 = vector.shape_cast %72 : vector<1x1x16x16xf32> to vector<16x16xf32>
    %cst_37 = arith.constant 1.000000e+00 : f32
    %74 = vector.broadcast %cst_37 : f32 to vector<16x16xf32>
    %75 = arith.subf %74, %6 : vector<16x16xf32>
    %76 = arith.mulf %73, %75 : vector<16x16xf32>
    %77 = arith.addf %76, %6 : vector<16x16xf32>
    %cst_38 = arith.constant dense<0.000000e+00> : vector<16xf32>
    %78 = vector.multi_reduction <add>, %77, %cst_38 [1] : vector<16x16xf32> to vector<16xf32>
    %79 = vector.shape_cast %78 : vector<16xf32> to vector<16x1xf32>
    %cst_39 = arith.constant 1.000000e+00 : f32
    %80 = vector.broadcast %cst_39 : f32 to vector<16x1xf32>
    %81 = arith.maximumf %79, %80 : vector<16x1xf32>
    %82 = math.rsqrt %81 : vector<16x1xf32>
    %c1_40 = arith.constant 1 : index
    %c0_41 = arith.constant 0 : index
    %c0_42 = arith.constant 0 : index
    %83 = vector.load %arg4[%c1_40, %c0_41, %c0_42] : memref<4x16x32xf32, #tpu.memory_space<vmem>>, vector<1x16x32xf32>
    %84 = vector.shape_cast %83 : vector<1x16x32xf32> to vector<16x32xf32>
    %cst_43 = arith.constant dense<0.000000e+00> : vector<16x32xf32>
    %85 = tpu.matmul %1, %84, %cst_43 {dimension_numbers = #tpu.dot_dimension_numbers<[1], [0], [0], [1], [0, 0, 1, 1], [], []>} : vector<16x16xf32>, vector<16x32xf32>, vector<16x32xf32> -> vector<16x32xf32>
    %86 = vector.broadcast %82 : vector<16x1xf32> to vector<16x32xf32>
    %87 = arith.mulf %85, %86 : vector<16x32xf32>
    %cst_44 = arith.constant dense<0.000000e+00> : vector<16x32xf32>
    %88 = tpu.matmul %77, %87, %cst_44 {dimension_numbers = #tpu.dot_dimension_numbers<[1], [0], [0], [1], [0, 0, 1, 1], [], []>} : vector<16x16xf32>, vector<16x32xf32>, vector<16x32xf32> -> vector<16x32xf32>
    %89 = vector.broadcast %82 : vector<16x1xf32> to vector<16x32xf32>
    %90 = arith.mulf %88, %89 : vector<16x32xf32>
    %c1_45 = arith.constant 1 : index
    %c0_46 = arith.constant 0 : index
    %c0_47 = arith.constant 0 : index
    %91 = vector.load %arg5[%c1_45, %c0_46, %c0_47] : memref<4x1x32xf32, #tpu.memory_space<vmem>>, vector<1x1x32xf32>
    %92 = vector.shape_cast %91 : vector<1x1x32xf32> to vector<1x32xf32>
    %93 = vector.broadcast %92 : vector<1x32xf32> to vector<16x32xf32>
    %94 = arith.addf %90, %93 : vector<16x32xf32>
    %c1_48 = arith.constant 1 : index
    %c0_49 = arith.constant 0 : index
    %c0_50 = arith.constant 0 : index
    %95 = vector.load %arg6[%c1_48, %c0_49, %c0_50] : memref<4x16x16xf32, #tpu.memory_space<vmem>>, vector<1x16x16xf32>
    %96 = vector.shape_cast %95 : vector<1x16x16xf32> to vector<16x16xf32>
    %cst_51 = arith.constant dense<0.000000e+00> : vector<16x16xf32>
    %97 = tpu.matmul %1, %96, %cst_51 {dimension_numbers = #tpu.dot_dimension_numbers<[1], [0], [0], [1], [0, 0, 1, 1], [], []>} : vector<16x16xf32>, vector<16x16xf32>, vector<16x16xf32> -> vector<16x16xf32>
    %98 = vector.broadcast %82 : vector<16x1xf32> to vector<16x16xf32>
    %99 = arith.mulf %97, %98 : vector<16x16xf32>
    %cst_52 = arith.constant dense<0.000000e+00> : vector<16x16xf32>
    %100 = tpu.matmul %77, %99, %cst_52 {dimension_numbers = #tpu.dot_dimension_numbers<[1], [0], [0], [1], [0, 0, 1, 1], [], []>} : vector<16x16xf32>, vector<16x16xf32>, vector<16x16xf32> -> vector<16x16xf32>
    %101 = vector.broadcast %82 : vector<16x1xf32> to vector<16x16xf32>
    %102 = arith.mulf %100, %101 : vector<16x16xf32>
    %c1_53 = arith.constant 1 : index
    %c0_54 = arith.constant 0 : index
    %c0_55 = arith.constant 0 : index
    %103 = vector.load %arg7[%c1_53, %c0_54, %c0_55] : memref<4x1x16xf32, #tpu.memory_space<vmem>>, vector<1x1x16xf32>
    %104 = vector.shape_cast %103 : vector<1x1x16xf32> to vector<1x16xf32>
    %105 = vector.broadcast %104 : vector<1x16xf32> to vector<16x16xf32>
    %106 = arith.addf %102, %105 : vector<16x16xf32>
    %107 = vector.extract_strided_slice %94 {offsets = [0, 0], sizes = [16, 16], strides = [1, 1]} : vector<16x32xf32> to vector<16x16xf32>
    %108 = vector.extract_strided_slice %94 {offsets = [0, 16], sizes = [16, 16], strides = [1, 1]} : vector<16x32xf32> to vector<16x16xf32>
    %109 = vector.extract_strided_slice %107 {offsets = [0, 0], sizes = [16, 4], strides = [1, 1]} : vector<16x16xf32> to vector<16x4xf32>
    %110 = vector.extract_strided_slice %108 {offsets = [0, 0], sizes = [16, 4], strides = [1, 1]} : vector<16x16xf32> to vector<16x4xf32>
    %cst_56 = arith.constant dense<0.000000e+00> : vector<16x16xf32>
    %111 = tpu.matmul %109, %110, %cst_56 {dimension_numbers = #tpu.dot_dimension_numbers<[1], [1], [0], [0], [0, 0, 1, 0], [], []>} : vector<16x4xf32>, vector<16x4xf32>, vector<16x16xf32> -> vector<16x16xf32>
    %112 = math.tanh %111 : vector<16x16xf32>
    %113 = vector.extract_strided_slice %107 {offsets = [0, 4], sizes = [16, 4], strides = [1, 1]} : vector<16x16xf32> to vector<16x4xf32>
    %114 = vector.extract_strided_slice %108 {offsets = [0, 4], sizes = [16, 4], strides = [1, 1]} : vector<16x16xf32> to vector<16x4xf32>
    %cst_57 = arith.constant dense<0.000000e+00> : vector<16x16xf32>
    %115 = tpu.matmul %113, %114, %cst_57 {dimension_numbers = #tpu.dot_dimension_numbers<[1], [1], [0], [0], [0, 0, 1, 0], [], []>} : vector<16x4xf32>, vector<16x4xf32>, vector<16x16xf32> -> vector<16x16xf32>
    %116 = math.tanh %115 : vector<16x16xf32>
    %117 = arith.addf %112, %116 : vector<16x16xf32>
    %118 = vector.extract_strided_slice %107 {offsets = [0, 8], sizes = [16, 4], strides = [1, 1]} : vector<16x16xf32> to vector<16x4xf32>
    %119 = vector.extract_strided_slice %108 {offsets = [0, 8], sizes = [16, 4], strides = [1, 1]} : vector<16x16xf32> to vector<16x4xf32>
    %cst_58 = arith.constant dense<0.000000e+00> : vector<16x16xf32>
    %120 = tpu.matmul %118, %119, %cst_58 {dimension_numbers = #tpu.dot_dimension_numbers<[1], [1], [0], [0], [0, 0, 1, 0], [], []>} : vector<16x4xf32>, vector<16x4xf32>, vector<16x16xf32> -> vector<16x16xf32>
    %121 = math.tanh %120 : vector<16x16xf32>
    %122 = arith.addf %117, %121 : vector<16x16xf32>
    %123 = vector.extract_strided_slice %107 {offsets = [0, 12], sizes = [16, 4], strides = [1, 1]} : vector<16x16xf32> to vector<16x4xf32>
    %124 = vector.extract_strided_slice %108 {offsets = [0, 12], sizes = [16, 4], strides = [1, 1]} : vector<16x16xf32> to vector<16x4xf32>
    %cst_59 = arith.constant dense<0.000000e+00> : vector<16x16xf32>
    %125 = tpu.matmul %123, %124, %cst_59 {dimension_numbers = #tpu.dot_dimension_numbers<[1], [1], [0], [0], [0, 0, 1, 0], [], []>} : vector<16x4xf32>, vector<16x4xf32>, vector<16x16xf32> -> vector<16x16xf32>
    %126 = math.tanh %125 : vector<16x16xf32>
    %127 = arith.addf %122, %126 : vector<16x16xf32>
    %cst_60 = arith.constant 2.500000e-01 : f32
    %128 = vector.broadcast %cst_60 : f32 to vector<16x16xf32>
    %129 = arith.mulf %127, %128 : vector<16x16xf32>
    %130 = tpu.transpose %129, [1, 0] : vector<16x16xf32> -> vector<16x16xf32>
    %131 = arith.addf %129, %130 : vector<16x16xf32>
    %cst_61 = arith.constant 5.000000e-01 : f32
    %132 = vector.broadcast %cst_61 : f32 to vector<16x16xf32>
    %133 = arith.mulf %132, %131 : vector<16x16xf32>
    %c0_62 = arith.constant 0 : index
    %c1_63 = arith.constant 1 : index
    %c0_64 = arith.constant 0 : index
    %c0_65 = arith.constant 0 : index
    %134 = vector.load %arg12[%c0_62, %c1_63, %c0_64, %c0_65] : memref<1x4x16x16xf32, #tpu.memory_space<vmem>>, vector<1x1x16x16xf32>
    %135 = vector.shape_cast %134 : vector<1x1x16x16xf32> to vector<16x16xf32>
    %136 = vector.shape_cast %133 : vector<16x16xf32> to vector<1x1x16x16xf32>
    tpu.vector_store %arg12[%c0_62, %c1_63, %c0_64, %c0_65], %136 {strides = array<i32>} : memref<1x4x16x16xf32, #tpu.memory_space<vmem>>, vector<1x1x16x16xf32>,
    %c0_66 = arith.constant 0 : index
    %c2 = arith.constant 2 : index
    %c0_67 = arith.constant 0 : index
    %c0_68 = arith.constant 0 : index
    %137 = vector.load %arg2[%c0_66, %c2, %c0_67, %c0_68] : memref<1x4x16x16xf32, #tpu.memory_space<vmem>>, vector<1x1x16x16xf32>
    %138 = vector.shape_cast %137 : vector<1x1x16x16xf32> to vector<16x16xf32>
    %cst_69 = arith.constant 1.000000e+00 : f32
    %139 = vector.broadcast %cst_69 : f32 to vector<16x16xf32>
    %140 = arith.subf %139, %6 : vector<16x16xf32>
    %141 = arith.mulf %138, %140 : vector<16x16xf32>
    %142 = arith.addf %141, %6 : vector<16x16xf32>
    %cst_70 = arith.constant dense<0.000000e+00> : vector<16xf32>
    %143 = vector.multi_reduction <add>, %142, %cst_70 [1] : vector<16x16xf32> to vector<16xf32>
    %144 = vector.shape_cast %143 : vector<16xf32> to vector<16x1xf32>
    %cst_71 = arith.constant 1.000000e+00 : f32
    %145 = vector.broadcast %cst_71 : f32 to vector<16x1xf32>
    %146 = arith.maximumf %144, %145 : vector<16x1xf32>
    %147 = math.rsqrt %146 : vector<16x1xf32>
    %c2_72 = arith.constant 2 : index
    %c0_73 = arith.constant 0 : index
    %c0_74 = arith.constant 0 : index
    %148 = vector.load %arg4[%c2_72, %c0_73, %c0_74] : memref<4x16x32xf32, #tpu.memory_space<vmem>>, vector<1x16x32xf32>
    %149 = vector.shape_cast %148 : vector<1x16x32xf32> to vector<16x32xf32>
    %cst_75 = arith.constant dense<0.000000e+00> : vector<16x32xf32>
    %150 = tpu.matmul %1, %149, %cst_75 {dimension_numbers = #tpu.dot_dimension_numbers<[1], [0], [0], [1], [0, 0, 1, 1], [], []>} : vector<16x16xf32>, vector<16x32xf32>, vector<16x32xf32> -> vector<16x32xf32>
    %151 = vector.broadcast %147 : vector<16x1xf32> to vector<16x32xf32>
    %152 = arith.mulf %150, %151 : vector<16x32xf32>
    %cst_76 = arith.constant dense<0.000000e+00> : vector<16x32xf32>
    %153 = tpu.matmul %142, %152, %cst_76 {dimension_numbers = #tpu.dot_dimension_numbers<[1], [0], [0], [1], [0, 0, 1, 1], [], []>} : vector<16x16xf32>, vector<16x32xf32>, vector<16x32xf32> -> vector<16x32xf32>
    %154 = vector.broadcast %147 : vector<16x1xf32> to vector<16x32xf32>
    %155 = arith.mulf %153, %154 : vector<16x32xf32>
    %c2_77 = arith.constant 2 : index
    %c0_78 = arith.constant 0 : index
    %c0_79 = arith.constant 0 : index
    %156 = vector.load %arg5[%c2_77, %c0_78, %c0_79] : memref<4x1x32xf32, #tpu.memory_space<vmem>>, vector<1x1x32xf32>
    %157 = vector.shape_cast %156 : vector<1x1x32xf32> to vector<1x32xf32>
    %158 = vector.broadcast %157 : vector<1x32xf32> to vector<16x32xf32>
    %159 = arith.addf %155, %158 : vector<16x32xf32>
    %c2_80 = arith.constant 2 : index
    %c0_81 = arith.constant 0 : index
    %c0_82 = arith.constant 0 : index
    %160 = vector.load %arg6[%c2_80, %c0_81, %c0_82] : memref<4x16x16xf32, #tpu.memory_space<vmem>>, vector<1x16x16xf32>
    %161 = vector.shape_cast %160 : vector<1x16x16xf32> to vector<16x16xf32>
    %cst_83 = arith.constant dense<0.000000e+00> : vector<16x16xf32>
    %162 = tpu.matmul %1, %161, %cst_83 {dimension_numbers = #tpu.dot_dimension_numbers<[1], [0], [0], [1], [0, 0, 1, 1], [], []>} : vector<16x16xf32>, vector<16x16xf32>, vector<16x16xf32> -> vector<16x16xf32>
    %163 = vector.broadcast %147 : vector<16x1xf32> to vector<16x16xf32>
    %164 = arith.mulf %162, %163 : vector<16x16xf32>
    %cst_84 = arith.constant dense<0.000000e+00> : vector<16x16xf32>
    %165 = tpu.matmul %142, %164, %cst_84 {dimension_numbers = #tpu.dot_dimension_numbers<[1], [0], [0], [1], [0, 0, 1, 1], [], []>} : vector<16x16xf32>, vector<16x16xf32>, vector<16x16xf32> -> vector<16x16xf32>
    %166 = vector.broadcast %147 : vector<16x1xf32> to vector<16x16xf32>
    %167 = arith.mulf %165, %166 : vector<16x16xf32>
    %c2_85 = arith.constant 2 : index
    %c0_86 = arith.constant 0 : index
    %c0_87 = arith.constant 0 : index
    %168 = vector.load %arg7[%c2_85, %c0_86, %c0_87] : memref<4x1x16xf32, #tpu.memory_space<vmem>>, vector<1x1x16xf32>
    %169 = vector.shape_cast %168 : vector<1x1x16xf32> to vector<1x16xf32>
    %170 = vector.broadcast %169 : vector<1x16xf32> to vector<16x16xf32>
    %171 = arith.addf %167, %170 : vector<16x16xf32>
    %172 = vector.extract_strided_slice %159 {offsets = [0, 0], sizes = [16, 16], strides = [1, 1]} : vector<16x32xf32> to vector<16x16xf32>
    %173 = vector.extract_strided_slice %159 {offsets = [0, 16], sizes = [16, 16], strides = [1, 1]} : vector<16x32xf32> to vector<16x16xf32>
    %174 = vector.extract_strided_slice %172 {offsets = [0, 0], sizes = [16, 4], strides = [1, 1]} : vector<16x16xf32> to vector<16x4xf32>
    %175 = vector.extract_strided_slice %173 {offsets = [0, 0], sizes = [16, 4], strides = [1, 1]} : vector<16x16xf32> to vector<16x4xf32>
    %cst_88 = arith.constant dense<0.000000e+00> : vector<16x16xf32>
    %176 = tpu.matmul %174, %175, %cst_88 {dimension_numbers = #tpu.dot_dimension_numbers<[1], [1], [0], [0], [0, 0, 1, 0], [], []>} : vector<16x4xf32>, vector<16x4xf32>, vector<16x16xf32> -> vector<16x16xf32>
    %177 = math.tanh %176 : vector<16x16xf32>
    %178 = vector.extract_strided_slice %172 {offsets = [0, 4], sizes = [16, 4], strides = [1, 1]} : vector<16x16xf32> to vector<16x4xf32>
    %179 = vector.extract_strided_slice %173 {offsets = [0, 4], sizes = [16, 4], strides = [1, 1]} : vector<16x16xf32> to vector<16x4xf32>
    %cst_89 = arith.constant dense<0.000000e+00> : vector<16x16xf32>
    %180 = tpu.matmul %178, %179, %cst_89 {dimension_numbers = #tpu.dot_dimension_numbers<[1], [1], [0], [0], [0, 0, 1, 0], [], []>} : vector<16x4xf32>, vector<16x4xf32>, vector<16x16xf32> -> vector<16x16xf32>
    %181 = math.tanh %180 : vector<16x16xf32>
    %182 = arith.addf %177, %181 : vector<16x16xf32>
    %183 = vector.extract_strided_slice %172 {offsets = [0, 8], sizes = [16, 4], strides = [1, 1]} : vector<16x16xf32> to vector<16x4xf32>
    %184 = vector.extract_strided_slice %173 {offsets = [0, 8], sizes = [16, 4], strides = [1, 1]} : vector<16x16xf32> to vector<16x4xf32>
    %cst_90 = arith.constant dense<0.000000e+00> : vector<16x16xf32>
    %185 = tpu.matmul %183, %184, %cst_90 {dimension_numbers = #tpu.dot_dimension_numbers<[1], [1], [0], [0], [0, 0, 1, 0], [], []>} : vector<16x4xf32>, vector<16x4xf32>, vector<16x16xf32> -> vector<16x16xf32>
    %186 = math.tanh %185 : vector<16x16xf32>
    %187 = arith.addf %182, %186 : vector<16x16xf32>
    %188 = vector.extract_strided_slice %172 {offsets = [0, 12], sizes = [16, 4], strides = [1, 1]} : vector<16x16xf32> to vector<16x4xf32>
    %189 = vector.extract_strided_slice %173 {offsets = [0, 12], sizes = [16, 4], strides = [1, 1]} : vector<16x16xf32> to vector<16x4xf32>
    %cst_91 = arith.constant dense<0.000000e+00> : vector<16x16xf32>
    %190 = tpu.matmul %188, %189, %cst_91 {dimension_numbers = #tpu.dot_dimension_numbers<[1], [1], [0], [0], [0, 0, 1, 0], [], []>} : vector<16x4xf32>, vector<16x4xf32>, vector<16x16xf32> -> vector<16x16xf32>
    %191 = math.tanh %190 : vector<16x16xf32>
    %192 = arith.addf %187, %191 : vector<16x16xf32>
    %cst_92 = arith.constant 2.500000e-01 : f32
    %193 = vector.broadcast %cst_92 : f32 to vector<16x16xf32>
    %194 = arith.mulf %192, %193 : vector<16x16xf32>
    %195 = tpu.transpose %194, [1, 0] : vector<16x16xf32> -> vector<16x16xf32>
    %196 = arith.addf %194, %195 : vector<16x16xf32>
    %cst_93 = arith.constant 5.000000e-01 : f32
    %197 = vector.broadcast %cst_93 : f32 to vector<16x16xf32>
    %198 = arith.mulf %197, %196 : vector<16x16xf32>
    %c0_94 = arith.constant 0 : index
    %c2_95 = arith.constant 2 : index
    %c0_96 = arith.constant 0 : index
    %c0_97 = arith.constant 0 : index
    %199 = vector.load %arg12[%c0_94, %c2_95, %c0_96, %c0_97] : memref<1x4x16x16xf32, #tpu.memory_space<vmem>>, vector<1x1x16x16xf32>
    %200 = vector.shape_cast %199 : vector<1x1x16x16xf32> to vector<16x16xf32>
    %201 = vector.shape_cast %198 : vector<16x16xf32> to vector<1x1x16x16xf32>
    tpu.vector_store %arg12[%c0_94, %c2_95, %c0_96, %c0_97], %201 {strides = array<i32>} : memref<1x4x16x16xf32, #tpu.memory_space<vmem>>, vector<1x1x16x16xf32>,
    %c0_98 = arith.constant 0 : index
    %c3 = arith.constant 3 : index
    %c0_99 = arith.constant 0 : index
    %c0_100 = arith.constant 0 : index
    %202 = vector.load %arg2[%c0_98, %c3, %c0_99, %c0_100] : memref<1x4x16x16xf32, #tpu.memory_space<vmem>>, vector<1x1x16x16xf32>
    %203 = vector.shape_cast %202 : vector<1x1x16x16xf32> to vector<16x16xf32>
    %cst_101 = arith.constant 1.000000e+00 : f32
    %204 = vector.broadcast %cst_101 : f32 to vector<16x16xf32>
    %205 = arith.subf %204, %6 : vector<16x16xf32>
    %206 = arith.mulf %203, %205 : vector<16x16xf32>
    %207 = arith.addf %206, %6 : vector<16x16xf32>
    %cst_102 = arith.constant dense<0.000000e+00> : vector<16xf32>
    %208 = vector.multi_reduction <add>, %207, %cst_102 [1] : vector<16x16xf32> to vector<16xf32>
    %209 = vector.shape_cast %208 : vector<16xf32> to vector<16x1xf32>
    %cst_103 = arith.constant 1.000000e+00 : f32
    %210 = vector.broadcast %cst_103 : f32 to vector<16x1xf32>
    %211 = arith.maximumf %209, %210 : vector<16x1xf32>
    %212 = math.rsqrt %211 : vector<16x1xf32>
    %c3_104 = arith.constant 3 : index
    %c0_105 = arith.constant 0 : index
    %c0_106 = arith.constant 0 : index
    %213 = vector.load %arg4[%c3_104, %c0_105, %c0_106] : memref<4x16x32xf32, #tpu.memory_space<vmem>>, vector<1x16x32xf32>
    %214 = vector.shape_cast %213 : vector<1x16x32xf32> to vector<16x32xf32>
    %cst_107 = arith.constant dense<0.000000e+00> : vector<16x32xf32>
    %215 = tpu.matmul %1, %214, %cst_107 {dimension_numbers = #tpu.dot_dimension_numbers<[1], [0], [0], [1], [0, 0, 1, 1], [], []>} : vector<16x16xf32>, vector<16x32xf32>, vector<16x32xf32> -> vector<16x32xf32>
    %216 = vector.broadcast %212 : vector<16x1xf32> to vector<16x32xf32>
    %217 = arith.mulf %215, %216 : vector<16x32xf32>
    %cst_108 = arith.constant dense<0.000000e+00> : vector<16x32xf32>
    %218 = tpu.matmul %207, %217, %cst_108 {dimension_numbers = #tpu.dot_dimension_numbers<[1], [0], [0], [1], [0, 0, 1, 1], [], []>} : vector<16x16xf32>, vector<16x32xf32>, vector<16x32xf32> -> vector<16x32xf32>
    %219 = vector.broadcast %212 : vector<16x1xf32> to vector<16x32xf32>
    %220 = arith.mulf %218, %219 : vector<16x32xf32>
    %c3_109 = arith.constant 3 : index
    %c0_110 = arith.constant 0 : index
    %c0_111 = arith.constant 0 : index
    %221 = vector.load %arg5[%c3_109, %c0_110, %c0_111] : memref<4x1x32xf32, #tpu.memory_space<vmem>>, vector<1x1x32xf32>
    %222 = vector.shape_cast %221 : vector<1x1x32xf32> to vector<1x32xf32>
    %223 = vector.broadcast %222 : vector<1x32xf32> to vector<16x32xf32>
    %224 = arith.addf %220, %223 : vector<16x32xf32>
    %c3_112 = arith.constant 3 : index
    %c0_113 = arith.constant 0 : index
    %c0_114 = arith.constant 0 : index
    %225 = vector.load %arg6[%c3_112, %c0_113, %c0_114] : memref<4x16x16xf32, #tpu.memory_space<vmem>>, vector<1x16x16xf32>
    %226 = vector.shape_cast %225 : vector<1x16x16xf32> to vector<16x16xf32>
    %cst_115 = arith.constant dense<0.000000e+00> : vector<16x16xf32>
    %227 = tpu.matmul %1, %226, %cst_115 {dimension_numbers = #tpu.dot_dimension_numbers<[1], [0], [0], [1], [0, 0, 1, 1], [], []>} : vector<16x16xf32>, vector<16x16xf32>, vector<16x16xf32> -> vector<16x16xf32>
    %228 = vector.broadcast %212 : vector<16x1xf32> to vector<16x16xf32>
    %229 = arith.mulf %227, %228 : vector<16x16xf32>
    %cst_116 = arith.constant dense<0.000000e+00> : vector<16x16xf32>
    %230 = tpu.matmul %207, %229, %cst_116 {dimension_numbers = #tpu.dot_dimension_numbers<[1], [0], [0], [1], [0, 0, 1, 1], [], []>} : vector<16x16xf32>, vector<16x16xf32>, vector<16x16xf32> -> vector<16x16xf32>
    %231 = vector.broadcast %212 : vector<16x1xf32> to vector<16x16xf32>
    %232 = arith.mulf %230, %231 : vector<16x16xf32>
    %c3_117 = arith.constant 3 : index
    %c0_118 = arith.constant 0 : index
    %c0_119 = arith.constant 0 : index
    %233 = vector.load %arg7[%c3_117, %c0_118, %c0_119] : memref<4x1x16xf32, #tpu.memory_space<vmem>>, vector<1x1x16xf32>
    %234 = vector.shape_cast %233 : vector<1x1x16xf32> to vector<1x16xf32>
    %235 = vector.broadcast %234 : vector<1x16xf32> to vector<16x16xf32>
    %236 = arith.addf %232, %235 : vector<16x16xf32>
    %237 = vector.extract_strided_slice %224 {offsets = [0, 0], sizes = [16, 16], strides = [1, 1]} : vector<16x32xf32> to vector<16x16xf32>
    %238 = vector.extract_strided_slice %224 {offsets = [0, 16], sizes = [16, 16], strides = [1, 1]} : vector<16x32xf32> to vector<16x16xf32>
    %239 = vector.extract_strided_slice %237 {offsets = [0, 0], sizes = [16, 4], strides = [1, 1]} : vector<16x16xf32> to vector<16x4xf32>
    %240 = vector.extract_strided_slice %238 {offsets = [0, 0], sizes = [16, 4], strides = [1, 1]} : vector<16x16xf32> to vector<16x4xf32>
    %cst_120 = arith.constant dense<0.000000e+00> : vector<16x16xf32>
    %241 = tpu.matmul %239, %240, %cst_120 {dimension_numbers = #tpu.dot_dimension_numbers<[1], [1], [0], [0], [0, 0, 1, 0], [], []>} : vector<16x4xf32>, vector<16x4xf32>, vector<16x16xf32> -> vector<16x16xf32>
    %242 = math.tanh %241 : vector<16x16xf32>
    %243 = vector.extract_strided_slice %237 {offsets = [0, 4], sizes = [16, 4], strides = [1, 1]} : vector<16x16xf32> to vector<16x4xf32>
    %244 = vector.extract_strided_slice %238 {offsets = [0, 4], sizes = [16, 4], strides = [1, 1]} : vector<16x16xf32> to vector<16x4xf32>
    %cst_121 = arith.constant dense<0.000000e+00> : vector<16x16xf32>
    %245 = tpu.matmul %243, %244, %cst_121 {dimension_numbers = #tpu.dot_dimension_numbers<[1], [1], [0], [0], [0, 0, 1, 0], [], []>} : vector<16x4xf32>, vector<16x4xf32>, vector<16x16xf32> -> vector<16x16xf32>
    %246 = math.tanh %245 : vector<16x16xf32>
    %247 = arith.addf %242, %246 : vector<16x16xf32>
    %248 = vector.extract_strided_slice %237 {offsets = [0, 8], sizes = [16, 4], strides = [1, 1]} : vector<16x16xf32> to vector<16x4xf32>
    %249 = vector.extract_strided_slice %238 {offsets = [0, 8], sizes = [16, 4], strides = [1, 1]} : vector<16x16xf32> to vector<16x4xf32>
    %cst_122 = arith.constant dense<0.000000e+00> : vector<16x16xf32>
    %250 = tpu.matmul %248, %249, %cst_122 {dimension_numbers = #tpu.dot_dimension_numbers<[1], [1], [0], [0], [0, 0, 1, 0], [], []>} : vector<16x4xf32>, vector<16x4xf32>, vector<16x16xf32> -> vector<16x16xf32>
    %251 = math.tanh %250 : vector<16x16xf32>
    %252 = arith.addf %247, %251 : vector<16x16xf32>
    %253 = vector.extract_strided_slice %237 {offsets = [0, 12], sizes = [16, 4], strides = [1, 1]} : vector<16x16xf32> to vector<16x4xf32>
    %254 = vector.extract_strided_slice %238 {offsets = [0, 12], sizes = [16, 4], strides = [1, 1]} : vector<16x16xf32> to vector<16x4xf32>
    %cst_123 = arith.constant dense<0.000000e+00> : vector<16x16xf32>
    %255 = tpu.matmul %253, %254, %cst_123 {dimension_numbers = #tpu.dot_dimension_numbers<[1], [1], [0], [0], [0, 0, 1, 0], [], []>} : vector<16x4xf32>, vector<16x4xf32>, vector<16x16xf32> -> vector<16x16xf32>
    %256 = math.tanh %255 : vector<16x16xf32>
    %257 = arith.addf %252, %256 : vector<16x16xf32>
    %cst_124 = arith.constant 2.500000e-01 : f32
    %258 = vector.broadcast %cst_124 : f32 to vector<16x16xf32>
    %259 = arith.mulf %257, %258 : vector<16x16xf32>
    %260 = tpu.transpose %259, [1, 0] : vector<16x16xf32> -> vector<16x16xf32>
    %261 = arith.addf %259, %260 : vector<16x16xf32>
    %cst_125 = arith.constant 5.000000e-01 : f32
    %262 = vector.broadcast %cst_125 : f32 to vector<16x16xf32>
    %263 = arith.mulf %262, %261 : vector<16x16xf32>
    %c0_126 = arith.constant 0 : index
    %c3_127 = arith.constant 3 : index
    %c0_128 = arith.constant 0 : index
    %c0_129 = arith.constant 0 : index
    %264 = vector.load %arg12[%c0_126, %c3_127, %c0_128, %c0_129] : memref<1x4x16x16xf32, #tpu.memory_space<vmem>>, vector<1x1x16x16xf32>
    %265 = vector.shape_cast %264 : vector<1x1x16x16xf32> to vector<16x16xf32>
    %266 = vector.shape_cast %263 : vector<16x16xf32> to vector<1x1x16x16xf32>
    tpu.vector_store %arg12[%c0_126, %c3_127, %c0_128, %c0_129], %266 {strides = array<i32>} : memref<1x4x16x16xf32, #tpu.memory_space<vmem>>, vector<1x1x16x16xf32>,
    %267 = tpu.concatenate %41, %106, %171, %236 in 1 : vector<16x16xf32>, vector<16x16xf32>, vector<16x16xf32>, vector<16x16xf32> -> vector<16x64xf32>
    %c0_130 = arith.constant 0 : index
    %c0_131 = arith.constant 0 : index
    %268 = vector.load %arg8[%c0_130, %c0_131] : memref<64x8xf32, #tpu.memory_space<vmem>>, vector<64x8xf32>
    %cst_132 = arith.constant dense<0.000000e+00> : vector<16x8xf32>
    %269 = tpu.matmul %267, %268, %cst_132 {dimension_numbers = #tpu.dot_dimension_numbers<[1], [0], [0], [1], [0, 0, 1, 1], [], []>} : vector<16x64xf32>, vector<64x8xf32>, vector<16x8xf32> -> vector<16x8xf32>
    %c0_133 = arith.constant 0 : index
    %c0_134 = arith.constant 0 : index
    %270 = vector.load %arg9[%c0_133, %c0_134] : memref<1x8xf32, #tpu.memory_space<vmem>>, vector<1x8xf32>
    %271 = vector.broadcast %270 : vector<1x8xf32> to vector<16x8xf32>
    %272 = arith.addf %269, %271 : vector<16x8xf32>
    %cst_135 = arith.constant 0.000000e+00 : f32
    %273 = vector.broadcast %cst_135 : f32 to vector<16x8xf32>
    %274 = arith.cmpf ogt, %272, %273 : vector<16x8xf32>
    %cst_136 = arith.constant 0.000000e+00 : f32
    %275 = vector.broadcast %cst_136 : f32 to vector<16x8xf32>
    %276 = arith.minimumf %272, %275 : vector<16x8xf32>
    %277 = math.exp %276 : vector<16x8xf32>
    %cst_137 = arith.constant 1.000000e+00 : f32
    %278 = vector.broadcast %cst_137 : f32 to vector<16x8xf32>
    %279 = arith.subf %277, %278 : vector<16x8xf32>
    %280 = arith.select %274, %272, %279 : vector<16x8xi1>, vector<16x8xf32>
    %c0_138 = arith.constant 0 : index
    %c0_139 = arith.constant 0 : index
    %281 = vector.load %arg10[%c0_138, %c0_139] : memref<8x16xf32, #tpu.memory_space<vmem>>, vector<8x16xf32>
    %cst_140 = arith.constant dense<0.000000e+00> : vector<16x16xf32>
    %282 = tpu.matmul %280, %281, %cst_140 {dimension_numbers = #tpu.dot_dimension_numbers<[1], [0], [0], [1], [0, 0, 1, 1], [], []>} : vector<16x8xf32>, vector<8x16xf32>, vector<16x16xf32> -> vector<16x16xf32>
    %c0_141 = arith.constant 0 : index
    %c0_142 = arith.constant 0 : index
    %283 = vector.load %arg11[%c0_141, %c0_142] : memref<1x16xf32, #tpu.memory_space<vmem>>, vector<1x16xf32>
    %284 = vector.broadcast %283 : vector<1x16xf32> to vector<16x16xf32>
    %285 = arith.addf %282, %284 : vector<16x16xf32>
    %c0_143 = arith.constant 0 : index
    %c0_144 = arith.constant 0 : index
    %c0_145 = arith.constant 0 : index
    %286 = vector.load %arg3[%c0_143, %c0_144, %c0_145] : memref<1x16x1xf32, #tpu.memory_space<vmem>>, vector<1x16x1xf32>
    %287 = vector.shape_cast %286 : vector<1x16x1xf32> to vector<16x1xf32>
    %288 = vector.broadcast %287 : vector<16x1xf32> to vector<16x16xf32>
    %289 = arith.mulf %285, %288 : vector<16x16xf32>
    %290 = math.tanh %289 : vector<16x16xf32>
    %c0_146 = arith.constant 0 : index
    %c0_147 = arith.constant 0 : index
    %c0_148 = arith.constant 0 : index
    %291 = vector.load %arg13[%c0_146, %c0_147, %c0_148] : memref<1x16x16xf32, #tpu.memory_space<vmem>>, vector<1x16x16xf32>
    %292 = vector.shape_cast %291 : vector<1x16x16xf32> to vector<16x16xf32>
    %293 = vector.shape_cast %290 : vector<16x16xf32> to vector<1x16x16xf32>
    tpu.vector_store %arg13[%c0_146, %c0_147, %c0_148], %293 {strides = array<i32>} : memref<1x16x16xf32, #tpu.memory_space<vmem>>, vector<1x16x16xf32>,
    return
  }
  func.func @transform_0(%arg0: i32) -> (i32, i32, i32) {
    %c0_i32 = arith.constant 0 : i32
    %c0_i32_0 = arith.constant 0 : i32
    %c0_i32_1 = arith.constant 0 : i32
    return %arg0, %c0_i32, %c0_i32_0 : i32, i32, i32
  }
  func.func @transform_1(%arg0: i32) -> (i32, i32, i32, i32) {
    %c0_i32 = arith.constant 0 : i32
    %c0_i32_0 = arith.constant 0 : i32
    %c0_i32_1 = arith.constant 0 : i32
    %c0_i32_2 = arith.constant 0 : i32
    return %arg0, %c0_i32, %c0_i32_0, %c0_i32_1 : i32, i32, i32, i32
  }
  func.func @transform_2(%arg0: i32) -> (i32, i32, i32) {
    %c0_i32 = arith.constant 0 : i32
    %c0_i32_0 = arith.constant 0 : i32
    %c0_i32_1 = arith.constant 0 : i32
    return %arg0, %c0_i32, %c0_i32_0 : i32, i32, i32
  }
  func.func @transform_3(%arg0: i32) -> (i32, i32, i32) {
    %c0_i32 = arith.constant 0 : i32
    %c0_i32_0 = arith.constant 0 : i32
    %c0_i32_1 = arith.constant 0 : i32
    %c0_i32_2 = arith.constant 0 : i32
    return %c0_i32, %c0_i32_0, %c0_i32_1 : i32, i32, i32
  }
  func.func @transform_4(%arg0: i32) -> (i32, i32, i32) {
    %c0_i32 = arith.constant 0 : i32
    %c0_i32_0 = arith.constant 0 : i32
    %c0_i32_1 = arith.constant 0 : i32
    %c0_i32_2 = arith.constant 0 : i32
    return %c0_i32, %c0_i32_0, %c0_i32_1 : i32, i32, i32
  }
  func.func @transform_5(%arg0: i32) -> (i32, i32, i32) {
    %c0_i32 = arith.constant 0 : i32
    %c0_i32_0 = arith.constant 0 : i32
    %c0_i32_1 = arith.constant 0 : i32
    %c0_i32_2 = arith.constant 0 : i32
    return %c0_i32, %c0_i32_0, %c0_i32_1 : i32, i32, i32
  }
  func.func @transform_6(%arg0: i32) -> (i32, i32, i32) {
    %c0_i32 = arith.constant 0 : i32
    %c0_i32_0 = arith.constant 0 : i32
    %c0_i32_1 = arith.constant 0 : i32
    %c0_i32_2 = arith.constant 0 : i32
    return %c0_i32, %c0_i32_0, %c0_i32_1 : i32, i32, i32
  }
  func.func @transform_7(%arg0: i32) -> (i32, i32) {
    %c0_i32 = arith.constant 0 : i32
    %c0_i32_0 = arith.constant 0 : i32
    %c0_i32_1 = arith.constant 0 : i32
    return %c0_i32, %c0_i32_0 : i32, i32
  }
  func.func @transform_8(%arg0: i32) -> (i32, i32) {
    %c0_i32 = arith.constant 0 : i32
    %c0_i32_0 = arith.constant 0 : i32
    %c0_i32_1 = arith.constant 0 : i32
    return %c0_i32, %c0_i32_0 : i32, i32
  }
  func.func @transform_9(%arg0: i32) -> (i32, i32) {
    %c0_i32 = arith.constant 0 : i32
    %c0_i32_0 = arith.constant 0 : i32
    %c0_i32_1 = arith.constant 0 : i32
    return %c0_i32, %c0_i32_0 : i32, i32
  }
  func.func @transform_10(%arg0: i32) -> (i32, i32) {
    %c0_i32 = arith.constant 0 : i32
    %c0_i32_0 = arith.constant 0 : i32
    %c0_i32_1 = arith.constant 0 : i32
    return %c0_i32, %c0_i32_0 : i32, i32
  }
  func.func @transform_11(%arg0: i32) -> (i32, i32, i32, i32) {
    %c0_i32 = arith.constant 0 : i32
    %c0_i32_0 = arith.constant 0 : i32
    %c0_i32_1 = arith.constant 0 : i32
    %c0_i32_2 = arith.constant 0 : i32
    return %arg0, %c0_i32, %c0_i32_0, %c0_i32_1 : i32, i32, i32, i32
  }
  func.func @transform_12(%arg0: i32) -> (i32, i32, i32) {
    %c0_i32 = arith.constant 0 : i32
    %c0_i32_0 = arith.constant 0 : i32
    %c0_i32_1 = arith.constant 0 : i32
    return %arg0, %c0_i32, %c0_i32_0 : i32, i32, i32
  }
}

module attributes {stable_mosaic.version = 11 : i64} {
  func.func @_attn_layer_kernel(%arg0: i32, %arg1: memref<1x16x16xf32, #tpu.memory_space<vmem>>, %arg2: memref<1x4x16x16xf32, #tpu.memory_space<vmem>>, %arg3: memref<1x16x1xf32, #tpu.memory_space<vmem>>, %arg4: memref<4x16x32xf32, #tpu.memory_space<vmem>>, %arg5: memref<4x1x32xf32, #tpu.memory_space<vmem>>, %arg6: memref<4x16x16xf32, #tpu.memory_space<vmem>>, %arg7: memref<4x1x16xf32, #tpu.memory_space<vmem>>, %arg8: memref<64x8xf32, #tpu.memory_space<vmem>>, %arg9: memref<1x8xf32, #tpu.memory_space<vmem>>, %arg10: memref<8x16xf32, #tpu.memory_space<vmem>>, %arg11: memref<1x16xf32, #tpu.memory_space<vmem>>, %arg12: memref<1x4x16x16xf32, #tpu.memory_space<vmem>>, %arg13: memref<1x16x16xf32, #tpu.memory_space<vmem>>) attributes {dimension_semantics = [#tpu.dimension_semantics<parallel>], iteration_bounds = array<i64: 2>, scalar_prefetch = 0 : i64, scratch_operands = 0 : i64, tpu.core_type = #tpu.core_type<tc>, window_params = [{transform_indices = @transform_0, window_bounds = array<i64: 1, 16, 16>}, {transform_indices = @transform_1, window_bounds = array<i64: 1, 4, 16, 16>}, {transform_indices = @transform_2, window_bounds = array<i64: 1, 16, 1>}, {pipeline_mode = #tpu.pipeline_mode<synchronous>, transform_indices = @transform_3, window_bounds = array<i64: 4, 16, 32>}, {pipeline_mode = #tpu.pipeline_mode<synchronous>, transform_indices = @transform_4, window_bounds = array<i64: 4, 1, 32>}, {pipeline_mode = #tpu.pipeline_mode<synchronous>, transform_indices = @transform_5, window_bounds = array<i64: 4, 16, 16>}, {pipeline_mode = #tpu.pipeline_mode<synchronous>, transform_indices = @transform_6, window_bounds = array<i64: 4, 1, 16>}, {pipeline_mode = #tpu.pipeline_mode<synchronous>, transform_indices = @transform_7, window_bounds = array<i64: 64, 8>}, {pipeline_mode = #tpu.pipeline_mode<synchronous>, transform_indices = @transform_8, window_bounds = array<i64: 1, 8>}, {pipeline_mode = #tpu.pipeline_mode<synchronous>, transform_indices = @transform_9, window_bounds = array<i64: 8, 16>}, {pipeline_mode = #tpu.pipeline_mode<synchronous>, transform_indices = @transform_10, window_bounds = array<i64: 1, 16>}, {transform_indices = @transform_11, window_bounds = array<i64: 1, 4, 16, 16>}, {transform_indices = @transform_12, window_bounds = array<i64: 1, 16, 16>}]} {
    %c0 = arith.constant 0 : index
    %c0_0 = arith.constant 0 : index
    %c0_1 = arith.constant 0 : index
    %0 = vector.load %arg1[%c0, %c0_0, %c0_1] : memref<1x16x16xf32, #tpu.memory_space<vmem>>, vector<1x16x16xf32>
    %1 = vector.shape_cast %0 : vector<1x16x16xf32> to vector<16x16xf32>
    %2 = tpu.iota {dimensions = array<i32: 0>} : vector<16x16xi32>
    %3 = tpu.iota {dimensions = array<i32: 1>} : vector<16x16xi32>
    %4 = arith.cmpi eq, %2, %3 : vector<16x16xi32>
    %5 = arith.extui %4 : vector<16x16xi1> to vector<16x16xi32>
    %6 = arith.sitofp %5 : vector<16x16xi32> to vector<16x16xf32>
    %c0_2 = arith.constant 0 : index
    %c0_3 = arith.constant 0 : index
    %c0_4 = arith.constant 0 : index
    %c0_5 = arith.constant 0 : index
    %7 = vector.load %arg2[%c0_2, %c0_3, %c0_4, %c0_5] : memref<1x4x16x16xf32, #tpu.memory_space<vmem>>, vector<1x1x16x16xf32>
    %8 = vector.shape_cast %7 : vector<1x1x16x16xf32> to vector<16x16xf32>
    %cst = arith.constant 1.000000e+00 : f32
    %9 = vector.broadcast %cst : f32 to vector<16x16xf32>
    %10 = arith.subf %9, %6 : vector<16x16xf32>
    %11 = arith.mulf %8, %10 : vector<16x16xf32>
    %12 = arith.addf %11, %6 : vector<16x16xf32>
    %cst_6 = arith.constant dense<0.000000e+00> : vector<16xf32>
    %13 = vector.multi_reduction <add>, %12, %cst_6 [1] : vector<16x16xf32> to vector<16xf32>
    %14 = vector.shape_cast %13 : vector<16xf32> to vector<16x1xf32>
    %cst_7 = arith.constant 1.000000e+00 : f32
    %15 = vector.broadcast %cst_7 : f32 to vector<16x1xf32>
    %16 = arith.maximumf %14, %15 : vector<16x1xf32>
    %17 = math.rsqrt %16 : vector<16x1xf32>
    %c0_8 = arith.constant 0 : index
    %c0_9 = arith.constant 0 : index
    %c0_10 = arith.constant 0 : index
    %18 = vector.load %arg4[%c0_8, %c0_9, %c0_10] : memref<4x16x32xf32, #tpu.memory_space<vmem>>, vector<1x16x32xf32>
    %19 = vector.shape_cast %18 : vector<1x16x32xf32> to vector<16x32xf32>
    %cst_11 = arith.constant dense<0.000000e+00> : vector<16x32xf32>
    %20 = tpu.matmul %1, %19, %cst_11 {dimension_numbers = #tpu.dot_dimension_numbers<[1], [0], [0], [1], [0, 0, 1, 1], [], []>} : vector<16x16xf32>, vector<16x32xf32>, vector<16x32xf32> -> vector<16x32xf32>
    %21 = vector.broadcast %17 : vector<16x1xf32> to vector<16x32xf32>
    %22 = arith.mulf %20, %21 : vector<16x32xf32>
    %cst_12 = arith.constant dense<0.000000e+00> : vector<16x32xf32>
    %23 = tpu.matmul %12, %22, %cst_12 {dimension_numbers = #tpu.dot_dimension_numbers<[1], [0], [0], [1], [0, 0, 1, 1], [], []>} : vector<16x16xf32>, vector<16x32xf32>, vector<16x32xf32> -> vector<16x32xf32>
    %24 = vector.broadcast %17 : vector<16x1xf32> to vector<16x32xf32>
    %25 = arith.mulf %23, %24 : vector<16x32xf32>
    %c0_13 = arith.constant 0 : index
    %c0_14 = arith.constant 0 : index
    %c0_15 = arith.constant 0 : index
    %26 = vector.load %arg5[%c0_13, %c0_14, %c0_15] : memref<4x1x32xf32, #tpu.memory_space<vmem>>, vector<1x1x32xf32>
    %27 = vector.shape_cast %26 : vector<1x1x32xf32> to vector<1x32xf32>
    %28 = vector.broadcast %27 : vector<1x32xf32> to vector<16x32xf32>
    %29 = arith.addf %25, %28 : vector<16x32xf32>
    %c0_16 = arith.constant 0 : index
    %c0_17 = arith.constant 0 : index
    %c0_18 = arith.constant 0 : index
    %30 = vector.load %arg6[%c0_16, %c0_17, %c0_18] : memref<4x16x16xf32, #tpu.memory_space<vmem>>, vector<1x16x16xf32>
    %31 = vector.shape_cast %30 : vector<1x16x16xf32> to vector<16x16xf32>
    %cst_19 = arith.constant dense<0.000000e+00> : vector<16x16xf32>
    %32 = tpu.matmul %1, %31, %cst_19 {dimension_numbers = #tpu.dot_dimension_numbers<[1], [0], [0], [1], [0, 0, 1, 1], [], []>} : vector<16x16xf32>, vector<16x16xf32>, vector<16x16xf32> -> vector<16x16xf32>
    %33 = vector.broadcast %17 : vector<16x1xf32> to vector<16x16xf32>
    %34 = arith.mulf %32, %33 : vector<16x16xf32>
    %cst_20 = arith.constant dense<0.000000e+00> : vector<16x16xf32>
    %35 = tpu.matmul %12, %34, %cst_20 {dimension_numbers = #tpu.dot_dimension_numbers<[1], [0], [0], [1], [0, 0, 1, 1], [], []>} : vector<16x16xf32>, vector<16x16xf32>, vector<16x16xf32> -> vector<16x16xf32>
    %36 = vector.broadcast %17 : vector<16x1xf32> to vector<16x16xf32>
    %37 = arith.mulf %35, %36 : vector<16x16xf32>
    %c0_21 = arith.constant 0 : index
    %c0_22 = arith.constant 0 : index
    %c0_23 = arith.constant 0 : index
    %38 = vector.load %arg7[%c0_21, %c0_22, %c0_23] : memref<4x1x16xf32, #tpu.memory_space<vmem>>, vector<1x1x16xf32>
    %39 = vector.shape_cast %38 : vector<1x1x16xf32> to vector<1x16xf32>
    %40 = vector.broadcast %39 : vector<1x16xf32> to vector<16x16xf32>
    %41 = arith.addf %37, %40 : vector<16x16xf32>
    %42 = vector.extract_strided_slice %29 {offsets = [0, 0], sizes = [16, 16], strides = [1, 1]} : vector<16x32xf32> to vector<16x16xf32>
    %43 = vector.extract_strided_slice %29 {offsets = [0, 16], sizes = [16, 16], strides = [1, 1]} : vector<16x32xf32> to vector<16x16xf32>
    %44 = vector.extract_strided_slice %42 {offsets = [0, 0], sizes = [16, 4], strides = [1, 1]} : vector<16x16xf32> to vector<16x4xf32>
    %45 = vector.extract_strided_slice %43 {offsets = [0, 0], sizes = [16, 4], strides = [1, 1]} : vector<16x16xf32> to vector<16x4xf32>
    %cst_24 = arith.constant dense<0.000000e+00> : vector<16x16xf32>
    %46 = tpu.matmul %44, %45, %cst_24 {dimension_numbers = #tpu.dot_dimension_numbers<[1], [1], [0], [0], [0, 0, 1, 0], [], []>} : vector<16x4xf32>, vector<16x4xf32>, vector<16x16xf32> -> vector<16x16xf32>
    %47 = math.tanh %46 : vector<16x16xf32>
    %48 = vector.extract_strided_slice %42 {offsets = [0, 4], sizes = [16, 4], strides = [1, 1]} : vector<16x16xf32> to vector<16x4xf32>
    %49 = vector.extract_strided_slice %43 {offsets = [0, 4], sizes = [16, 4], strides = [1, 1]} : vector<16x16xf32> to vector<16x4xf32>
    %cst_25 = arith.constant dense<0.000000e+00> : vector<16x16xf32>
    %50 = tpu.matmul %48, %49, %cst_25 {dimension_numbers = #tpu.dot_dimension_numbers<[1], [1], [0], [0], [0, 0, 1, 0], [], []>} : vector<16x4xf32>, vector<16x4xf32>, vector<16x16xf32> -> vector<16x16xf32>
    %51 = math.tanh %50 : vector<16x16xf32>
    %52 = arith.addf %47, %51 : vector<16x16xf32>
    %53 = vector.extract_strided_slice %42 {offsets = [0, 8], sizes = [16, 4], strides = [1, 1]} : vector<16x16xf32> to vector<16x4xf32>
    %54 = vector.extract_strided_slice %43 {offsets = [0, 8], sizes = [16, 4], strides = [1, 1]} : vector<16x16xf32> to vector<16x4xf32>
    %cst_26 = arith.constant dense<0.000000e+00> : vector<16x16xf32>
    %55 = tpu.matmul %53, %54, %cst_26 {dimension_numbers = #tpu.dot_dimension_numbers<[1], [1], [0], [0], [0, 0, 1, 0], [], []>} : vector<16x4xf32>, vector<16x4xf32>, vector<16x16xf32> -> vector<16x16xf32>
    %56 = math.tanh %55 : vector<16x16xf32>
    %57 = arith.addf %52, %56 : vector<16x16xf32>
    %58 = vector.extract_strided_slice %42 {offsets = [0, 12], sizes = [16, 4], strides = [1, 1]} : vector<16x16xf32> to vector<16x4xf32>
    %59 = vector.extract_strided_slice %43 {offsets = [0, 12], sizes = [16, 4], strides = [1, 1]} : vector<16x16xf32> to vector<16x4xf32>
    %cst_27 = arith.constant dense<0.000000e+00> : vector<16x16xf32>
    %60 = tpu.matmul %58, %59, %cst_27 {dimension_numbers = #tpu.dot_dimension_numbers<[1], [1], [0], [0], [0, 0, 1, 0], [], []>} : vector<16x4xf32>, vector<16x4xf32>, vector<16x16xf32> -> vector<16x16xf32>
    %61 = math.tanh %60 : vector<16x16xf32>
    %62 = arith.addf %57, %61 : vector<16x16xf32>
    %cst_28 = arith.constant 2.500000e-01 : f32
    %63 = vector.broadcast %cst_28 : f32 to vector<16x16xf32>
    %64 = arith.mulf %62, %63 : vector<16x16xf32>
    %65 = tpu.transpose %64, [1, 0] : vector<16x16xf32> -> vector<16x16xf32>
    %66 = arith.addf %64, %65 : vector<16x16xf32>
    %cst_29 = arith.constant 5.000000e-01 : f32
    %67 = vector.broadcast %cst_29 : f32 to vector<16x16xf32>
    %68 = arith.mulf %67, %66 : vector<16x16xf32>
    %c0_30 = arith.constant 0 : index
    %c0_31 = arith.constant 0 : index
    %c0_32 = arith.constant 0 : index
    %c0_33 = arith.constant 0 : index
    %69 = vector.load %arg12[%c0_30, %c0_31, %c0_32, %c0_33] : memref<1x4x16x16xf32, #tpu.memory_space<vmem>>, vector<1x1x16x16xf32>
    %70 = vector.shape_cast %69 : vector<1x1x16x16xf32> to vector<16x16xf32>
    %71 = vector.shape_cast %68 : vector<16x16xf32> to vector<1x1x16x16xf32>
    tpu.vector_store %arg12[%c0_30, %c0_31, %c0_32, %c0_33], %71 {strides = array<i32>} : memref<1x4x16x16xf32, #tpu.memory_space<vmem>>, vector<1x1x16x16xf32>,
    %c0_34 = arith.constant 0 : index
    %c1 = arith.constant 1 : index
    %c0_35 = arith.constant 0 : index
    %c0_36 = arith.constant 0 : index
    %72 = vector.load %arg2[%c0_34, %c1, %c0_35, %c0_36] : memref<1x4x16x16xf32, #tpu.memory_space<vmem>>, vector<1x1x16x16xf32>
    %73 = vector.shape_cast %72 : vector<1x1x16x16xf32> to vector<16x16xf32>
    %cst_37 = arith.constant 1.000000e+00 : f32
    %74 = vector.broadcast %cst_37 : f32 to vector<16x16xf32>
    %75 = arith.subf %74, %6 : vector<16x16xf32>
    %76 = arith.mulf %73, %75 : vector<16x16xf32>
    %77 = arith.addf %76, %6 : vector<16x16xf32>
    %cst_38 = arith.constant dense<0.000000e+00> : vector<16xf32>
    %78 = vector.multi_reduction <add>, %77, %cst_38 [1] : vector<16x16xf32> to vector<16xf32>
    %79 = vector.shape_cast %78 : vector<16xf32> to vector<16x1xf32>
    %cst_39 = arith.constant 1.000000e+00 : f32
    %80 = vector.broadcast %cst_39 : f32 to vector<16x1xf32>
    %81 = arith.maximumf %79, %80 : vector<16x1xf32>
    %82 = math.rsqrt %81 : vector<16x1xf32>
    %c1_40 = arith.constant 1 : index
    %c0_41 = arith.constant 0 : index
    %c0_42 = arith.constant 0 : index
    %83 = vector.load %arg4[%c1_40, %c0_41, %c0_42] : memref<4x16x32xf32, #tpu.memory_space<vmem>>, vector<1x16x32xf32>
    %84 = vector.shape_cast %83 : vector<1x16x32xf32> to vector<16x32xf32>
    %cst_43 = arith.constant dense<0.000000e+00> : vector<16x32xf32>
    %85 = tpu.matmul %1, %84, %cst_43 {dimension_numbers = #tpu.dot_dimension_numbers<[1], [0], [0], [1], [0, 0, 1, 1], [], []>} : vector<16x16xf32>, vector<16x32xf32>, vector<16x32xf32> -> vector<16x32xf32>
    %86 = vector.broadcast %82 : vector<16x1xf32> to vector<16x32xf32>
    %87 = arith.mulf %85, %86 : vector<16x32xf32>
    %cst_44 = arith.constant dense<0.000000e+00> : vector<16x32xf32>
    %88 = tpu.matmul %77, %87, %cst_44 {dimension_numbers = #tpu.dot_dimension_numbers<[1], [0], [0], [1], [0, 0, 1, 1], [], []>} : vector<16x16xf32>, vector<16x32xf32>, vector<16x32xf32> -> vector<16x32xf32>
    %89 = vector.broadcast %82 : vector<16x1xf32> to vector<16x32xf32>
    %90 = arith.mulf %88, %89 : vector<16x32xf32>
    %c1_45 = arith.constant 1 : index
    %c0_46 = arith.constant 0 : index
    %c0_47 = arith.constant 0 : index
    %91 = vector.load %arg5[%c1_45, %c0_46, %c0_47] : memref<4x1x32xf32, #tpu.memory_space<vmem>>, vector<1x1x32xf32>
    %92 = vector.shape_cast %91 : vector<1x1x32xf32> to vector<1x32xf32>
    %93 = vector.broadcast %92 : vector<1x32xf32> to vector<16x32xf32>
    %94 = arith.addf %90, %93 : vector<16x32xf32>
    %c1_48 = arith.constant 1 : index
    %c0_49 = arith.constant 0 : index
    %c0_50 = arith.constant 0 : index
    %95 = vector.load %arg6[%c1_48, %c0_49, %c0_50] : memref<4x16x16xf32, #tpu.memory_space<vmem>>, vector<1x16x16xf32>
    %96 = vector.shape_cast %95 : vector<1x16x16xf32> to vector<16x16xf32>
    %cst_51 = arith.constant dense<0.000000e+00> : vector<16x16xf32>
    %97 = tpu.matmul %1, %96, %cst_51 {dimension_numbers = #tpu.dot_dimension_numbers<[1], [0], [0], [1], [0, 0, 1, 1], [], []>} : vector<16x16xf32>, vector<16x16xf32>, vector<16x16xf32> -> vector<16x16xf32>
    %98 = vector.broadcast %82 : vector<16x1xf32> to vector<16x16xf32>
    %99 = arith.mulf %97, %98 : vector<16x16xf32>
    %cst_52 = arith.constant dense<0.000000e+00> : vector<16x16xf32>
    %100 = tpu.matmul %77, %99, %cst_52 {dimension_numbers = #tpu.dot_dimension_numbers<[1], [0], [0], [1], [0, 0, 1, 1], [], []>} : vector<16x16xf32>, vector<16x16xf32>, vector<16x16xf32> -> vector<16x16xf32>
    %101 = vector.broadcast %82 : vector<16x1xf32> to vector<16x16xf32>
    %102 = arith.mulf %100, %101 : vector<16x16xf32>
    %c1_53 = arith.constant 1 : index
    %c0_54 = arith.constant 0 : index
    %c0_55 = arith.constant 0 : index
    %103 = vector.load %arg7[%c1_53, %c0_54, %c0_55] : memref<4x1x16xf32, #tpu.memory_space<vmem>>, vector<1x1x16xf32>
    %104 = vector.shape_cast %103 : vector<1x1x16xf32> to vector<1x16xf32>
    %105 = vector.broadcast %104 : vector<1x16xf32> to vector<16x16xf32>
    %106 = arith.addf %102, %105 : vector<16x16xf32>
    %107 = vector.extract_strided_slice %94 {offsets = [0, 0], sizes = [16, 16], strides = [1, 1]} : vector<16x32xf32> to vector<16x16xf32>
    %108 = vector.extract_strided_slice %94 {offsets = [0, 16], sizes = [16, 16], strides = [1, 1]} : vector<16x32xf32> to vector<16x16xf32>
    %109 = vector.extract_strided_slice %107 {offsets = [0, 0], sizes = [16, 4], strides = [1, 1]} : vector<16x16xf32> to vector<16x4xf32>
    %110 = vector.extract_strided_slice %108 {offsets = [0, 0], sizes = [16, 4], strides = [1, 1]} : vector<16x16xf32> to vector<16x4xf32>
    %cst_56 = arith.constant dense<0.000000e+00> : vector<16x16xf32>
    %111 = tpu.matmul %109, %110, %cst_56 {dimension_numbers = #tpu.dot_dimension_numbers<[1], [1], [0], [0], [0, 0, 1, 0], [], []>} : vector<16x4xf32>, vector<16x4xf32>, vector<16x16xf32> -> vector<16x16xf32>
    %112 = math.tanh %111 : vector<16x16xf32>
    %113 = vector.extract_strided_slice %107 {offsets = [0, 4], sizes = [16, 4], strides = [1, 1]} : vector<16x16xf32> to vector<16x4xf32>
    %114 = vector.extract_strided_slice %108 {offsets = [0, 4], sizes = [16, 4], strides = [1, 1]} : vector<16x16xf32> to vector<16x4xf32>
    %cst_57 = arith.constant dense<0.000000e+00> : vector<16x16xf32>
    %115 = tpu.matmul %113, %114, %cst_57 {dimension_numbers = #tpu.dot_dimension_numbers<[1], [1], [0], [0], [0, 0, 1, 0], [], []>} : vector<16x4xf32>, vector<16x4xf32>, vector<16x16xf32> -> vector<16x16xf32>
    %116 = math.tanh %115 : vector<16x16xf32>
    %117 = arith.addf %112, %116 : vector<16x16xf32>
    %118 = vector.extract_strided_slice %107 {offsets = [0, 8], sizes = [16, 4], strides = [1, 1]} : vector<16x16xf32> to vector<16x4xf32>
    %119 = vector.extract_strided_slice %108 {offsets = [0, 8], sizes = [16, 4], strides = [1, 1]} : vector<16x16xf32> to vector<16x4xf32>
    %cst_58 = arith.constant dense<0.000000e+00> : vector<16x16xf32>
    %120 = tpu.matmul %118, %119, %cst_58 {dimension_numbers = #tpu.dot_dimension_numbers<[1], [1], [0], [0], [0, 0, 1, 0], [], []>} : vector<16x4xf32>, vector<16x4xf32>, vector<16x16xf32> -> vector<16x16xf32>
    %121 = math.tanh %120 : vector<16x16xf32>
    %122 = arith.addf %117, %121 : vector<16x16xf32>
    %123 = vector.extract_strided_slice %107 {offsets = [0, 12], sizes = [16, 4], strides = [1, 1]} : vector<16x16xf32> to vector<16x4xf32>
    %124 = vector.extract_strided_slice %108 {offsets = [0, 12], sizes = [16, 4], strides = [1, 1]} : vector<16x16xf32> to vector<16x4xf32>
    %cst_59 = arith.constant dense<0.000000e+00> : vector<16x16xf32>
    %125 = tpu.matmul %123, %124, %cst_59 {dimension_numbers = #tpu.dot_dimension_numbers<[1], [1], [0], [0], [0, 0, 1, 0], [], []>} : vector<16x4xf32>, vector<16x4xf32>, vector<16x16xf32> -> vector<16x16xf32>
    %126 = math.tanh %125 : vector<16x16xf32>
    %127 = arith.addf %122, %126 : vector<16x16xf32>
    %cst_60 = arith.constant 2.500000e-01 : f32
    %128 = vector.broadcast %cst_60 : f32 to vector<16x16xf32>
    %129 = arith.mulf %127, %128 : vector<16x16xf32>
    %130 = tpu.transpose %129, [1, 0] : vector<16x16xf32> -> vector<16x16xf32>
    %131 = arith.addf %129, %130 : vector<16x16xf32>
    %cst_61 = arith.constant 5.000000e-01 : f32
    %132 = vector.broadcast %cst_61 : f32 to vector<16x16xf32>
    %133 = arith.mulf %132, %131 : vector<16x16xf32>
    %c0_62 = arith.constant 0 : index
    %c1_63 = arith.constant 1 : index
    %c0_64 = arith.constant 0 : index
    %c0_65 = arith.constant 0 : index
    %134 = vector.load %arg12[%c0_62, %c1_63, %c0_64, %c0_65] : memref<1x4x16x16xf32, #tpu.memory_space<vmem>>, vector<1x1x16x16xf32>
    %135 = vector.shape_cast %134 : vector<1x1x16x16xf32> to vector<16x16xf32>
    %136 = vector.shape_cast %133 : vector<16x16xf32> to vector<1x1x16x16xf32>
    tpu.vector_store %arg12[%c0_62, %c1_63, %c0_64, %c0_65], %136 {strides = array<i32>} : memref<1x4x16x16xf32, #tpu.memory_space<vmem>>, vector<1x1x16x16xf32>,
    %c0_66 = arith.constant 0 : index
    %c2 = arith.constant 2 : index
    %c0_67 = arith.constant 0 : index
    %c0_68 = arith.constant 0 : index
    %137 = vector.load %arg2[%c0_66, %c2, %c0_67, %c0_68] : memref<1x4x16x16xf32, #tpu.memory_space<vmem>>, vector<1x1x16x16xf32>
    %138 = vector.shape_cast %137 : vector<1x1x16x16xf32> to vector<16x16xf32>
    %cst_69 = arith.constant 1.000000e+00 : f32
    %139 = vector.broadcast %cst_69 : f32 to vector<16x16xf32>
    %140 = arith.subf %139, %6 : vector<16x16xf32>
    %141 = arith.mulf %138, %140 : vector<16x16xf32>
    %142 = arith.addf %141, %6 : vector<16x16xf32>
    %cst_70 = arith.constant dense<0.000000e+00> : vector<16xf32>
    %143 = vector.multi_reduction <add>, %142, %cst_70 [1] : vector<16x16xf32> to vector<16xf32>
    %144 = vector.shape_cast %143 : vector<16xf32> to vector<16x1xf32>
    %cst_71 = arith.constant 1.000000e+00 : f32
    %145 = vector.broadcast %cst_71 : f32 to vector<16x1xf32>
    %146 = arith.maximumf %144, %145 : vector<16x1xf32>
    %147 = math.rsqrt %146 : vector<16x1xf32>
    %c2_72 = arith.constant 2 : index
    %c0_73 = arith.constant 0 : index
    %c0_74 = arith.constant 0 : index
    %148 = vector.load %arg4[%c2_72, %c0_73, %c0_74] : memref<4x16x32xf32, #tpu.memory_space<vmem>>, vector<1x16x32xf32>
    %149 = vector.shape_cast %148 : vector<1x16x32xf32> to vector<16x32xf32>
    %cst_75 = arith.constant dense<0.000000e+00> : vector<16x32xf32>
    %150 = tpu.matmul %1, %149, %cst_75 {dimension_numbers = #tpu.dot_dimension_numbers<[1], [0], [0], [1], [0, 0, 1, 1], [], []>} : vector<16x16xf32>, vector<16x32xf32>, vector<16x32xf32> -> vector<16x32xf32>
    %151 = vector.broadcast %147 : vector<16x1xf32> to vector<16x32xf32>
    %152 = arith.mulf %150, %151 : vector<16x32xf32>
    %cst_76 = arith.constant dense<0.000000e+00> : vector<16x32xf32>
    %153 = tpu.matmul %142, %152, %cst_76 {dimension_numbers = #tpu.dot_dimension_numbers<[1], [0], [0], [1], [0, 0, 1, 1], [], []>} : vector<16x16xf32>, vector<16x32xf32>, vector<16x32xf32> -> vector<16x32xf32>
    %154 = vector.broadcast %147 : vector<16x1xf32> to vector<16x32xf32>
    %155 = arith.mulf %153, %154 : vector<16x32xf32>
    %c2_77 = arith.constant 2 : index
    %c0_78 = arith.constant 0 : index
    %c0_79 = arith.constant 0 : index
    %156 = vector.load %arg5[%c2_77, %c0_78, %c0_79] : memref<4x1x32xf32, #tpu.memory_space<vmem>>, vector<1x1x32xf32>
    %157 = vector.shape_cast %156 : vector<1x1x32xf32> to vector<1x32xf32>
    %158 = vector.broadcast %157 : vector<1x32xf32> to vector<16x32xf32>
    %159 = arith.addf %155, %158 : vector<16x32xf32>
    %c2_80 = arith.constant 2 : index
    %c0_81 = arith.constant 0 : index
    %c0_82 = arith.constant 0 : index
    %160 = vector.load %arg6[%c2_80, %c0_81, %c0_82] : memref<4x16x16xf32, #tpu.memory_space<vmem>>, vector<1x16x16xf32>
    %161 = vector.shape_cast %160 : vector<1x16x16xf32> to vector<16x16xf32>
    %cst_83 = arith.constant dense<0.000000e+00> : vector<16x16xf32>
    %162 = tpu.matmul %1, %161, %cst_83 {dimension_numbers = #tpu.dot_dimension_numbers<[1], [0], [0], [1], [0, 0, 1, 1], [], []>} : vector<16x16xf32>, vector<16x16xf32>, vector<16x16xf32> -> vector<16x16xf32>
    %163 = vector.broadcast %147 : vector<16x1xf32> to vector<16x16xf32>
    %164 = arith.mulf %162, %163 : vector<16x16xf32>
    %cst_84 = arith.constant dense<0.000000e+00> : vector<16x16xf32>
    %165 = tpu.matmul %142, %164, %cst_84 {dimension_numbers = #tpu.dot_dimension_numbers<[1], [0], [0], [1], [0, 0, 1, 1], [], []>} : vector<16x16xf32>, vector<16x16xf32>, vector<16x16xf32> -> vector<16x16xf32>
    %166 = vector.broadcast %147 : vector<16x1xf32> to vector<16x16xf32>
    %167 = arith.mulf %165, %166 : vector<16x16xf32>
    %c2_85 = arith.constant 2 : index
    %c0_86 = arith.constant 0 : index
    %c0_87 = arith.constant 0 : index
    %168 = vector.load %arg7[%c2_85, %c0_86, %c0_87] : memref<4x1x16xf32, #tpu.memory_space<vmem>>, vector<1x1x16xf32>
    %169 = vector.shape_cast %168 : vector<1x1x16xf32> to vector<1x16xf32>
    %170 = vector.broadcast %169 : vector<1x16xf32> to vector<16x16xf32>
    %171 = arith.addf %167, %170 : vector<16x16xf32>
    %172 = vector.extract_strided_slice %159 {offsets = [0, 0], sizes = [16, 16], strides = [1, 1]} : vector<16x32xf32> to vector<16x16xf32>
    %173 = vector.extract_strided_slice %159 {offsets = [0, 16], sizes = [16, 16], strides = [1, 1]} : vector<16x32xf32> to vector<16x16xf32>
    %174 = vector.extract_strided_slice %172 {offsets = [0, 0], sizes = [16, 4], strides = [1, 1]} : vector<16x16xf32> to vector<16x4xf32>
    %175 = vector.extract_strided_slice %173 {offsets = [0, 0], sizes = [16, 4], strides = [1, 1]} : vector<16x16xf32> to vector<16x4xf32>
    %cst_88 = arith.constant dense<0.000000e+00> : vector<16x16xf32>
    %176 = tpu.matmul %174, %175, %cst_88 {dimension_numbers = #tpu.dot_dimension_numbers<[1], [1], [0], [0], [0, 0, 1, 0], [], []>} : vector<16x4xf32>, vector<16x4xf32>, vector<16x16xf32> -> vector<16x16xf32>
    %177 = math.tanh %176 : vector<16x16xf32>
    %178 = vector.extract_strided_slice %172 {offsets = [0, 4], sizes = [16, 4], strides = [1, 1]} : vector<16x16xf32> to vector<16x4xf32>
    %179 = vector.extract_strided_slice %173 {offsets = [0, 4], sizes = [16, 4], strides = [1, 1]} : vector<16x16xf32> to vector<16x4xf32>
    %cst_89 = arith.constant dense<0.000000e+00> : vector<16x16xf32>
    %180 = tpu.matmul %178, %179, %cst_89 {dimension_numbers = #tpu.dot_dimension_numbers<[1], [1], [0], [0], [0, 0, 1, 0], [], []>} : vector<16x4xf32>, vector<16x4xf32>, vector<16x16xf32> -> vector<16x16xf32>
    %181 = math.tanh %180 : vector<16x16xf32>
    %182 = arith.addf %177, %181 : vector<16x16xf32>
    %183 = vector.extract_strided_slice %172 {offsets = [0, 8], sizes = [16, 4], strides = [1, 1]} : vector<16x16xf32> to vector<16x4xf32>
    %184 = vector.extract_strided_slice %173 {offsets = [0, 8], sizes = [16, 4], strides = [1, 1]} : vector<16x16xf32> to vector<16x4xf32>
    %cst_90 = arith.constant dense<0.000000e+00> : vector<16x16xf32>
    %185 = tpu.matmul %183, %184, %cst_90 {dimension_numbers = #tpu.dot_dimension_numbers<[1], [1], [0], [0], [0, 0, 1, 0], [], []>} : vector<16x4xf32>, vector<16x4xf32>, vector<16x16xf32> -> vector<16x16xf32>
    %186 = math.tanh %185 : vector<16x16xf32>
    %187 = arith.addf %182, %186 : vector<16x16xf32>
    %188 = vector.extract_strided_slice %172 {offsets = [0, 12], sizes = [16, 4], strides = [1, 1]} : vector<16x16xf32> to vector<16x4xf32>
    %189 = vector.extract_strided_slice %173 {offsets = [0, 12], sizes = [16, 4], strides = [1, 1]} : vector<16x16xf32> to vector<16x4xf32>
    %cst_91 = arith.constant dense<0.000000e+00> : vector<16x16xf32>
    %190 = tpu.matmul %188, %189, %cst_91 {dimension_numbers = #tpu.dot_dimension_numbers<[1], [1], [0], [0], [0, 0, 1, 0], [], []>} : vector<16x4xf32>, vector<16x4xf32>, vector<16x16xf32> -> vector<16x16xf32>
    %191 = math.tanh %190 : vector<16x16xf32>
    %192 = arith.addf %187, %191 : vector<16x16xf32>
    %cst_92 = arith.constant 2.500000e-01 : f32
    %193 = vector.broadcast %cst_92 : f32 to vector<16x16xf32>
    %194 = arith.mulf %192, %193 : vector<16x16xf32>
    %195 = tpu.transpose %194, [1, 0] : vector<16x16xf32> -> vector<16x16xf32>
    %196 = arith.addf %194, %195 : vector<16x16xf32>
    %cst_93 = arith.constant 5.000000e-01 : f32
    %197 = vector.broadcast %cst_93 : f32 to vector<16x16xf32>
    %198 = arith.mulf %197, %196 : vector<16x16xf32>
    %c0_94 = arith.constant 0 : index
    %c2_95 = arith.constant 2 : index
    %c0_96 = arith.constant 0 : index
    %c0_97 = arith.constant 0 : index
    %199 = vector.load %arg12[%c0_94, %c2_95, %c0_96, %c0_97] : memref<1x4x16x16xf32, #tpu.memory_space<vmem>>, vector<1x1x16x16xf32>
    %200 = vector.shape_cast %199 : vector<1x1x16x16xf32> to vector<16x16xf32>
    %201 = vector.shape_cast %198 : vector<16x16xf32> to vector<1x1x16x16xf32>
    tpu.vector_store %arg12[%c0_94, %c2_95, %c0_96, %c0_97], %201 {strides = array<i32>} : memref<1x4x16x16xf32, #tpu.memory_space<vmem>>, vector<1x1x16x16xf32>,
    %c0_98 = arith.constant 0 : index
    %c3 = arith.constant 3 : index
    %c0_99 = arith.constant 0 : index
    %c0_100 = arith.constant 0 : index
    %202 = vector.load %arg2[%c0_98, %c3, %c0_99, %c0_100] : memref<1x4x16x16xf32, #tpu.memory_space<vmem>>, vector<1x1x16x16xf32>
    %203 = vector.shape_cast %202 : vector<1x1x16x16xf32> to vector<16x16xf32>
    %cst_101 = arith.constant 1.000000e+00 : f32
    %204 = vector.broadcast %cst_101 : f32 to vector<16x16xf32>
    %205 = arith.subf %204, %6 : vector<16x16xf32>
    %206 = arith.mulf %203, %205 : vector<16x16xf32>
    %207 = arith.addf %206, %6 : vector<16x16xf32>
    %cst_102 = arith.constant dense<0.000000e+00> : vector<16xf32>
    %208 = vector.multi_reduction <add>, %207, %cst_102 [1] : vector<16x16xf32> to vector<16xf32>
    %209 = vector.shape_cast %208 : vector<16xf32> to vector<16x1xf32>
    %cst_103 = arith.constant 1.000000e+00 : f32
    %210 = vector.broadcast %cst_103 : f32 to vector<16x1xf32>
    %211 = arith.maximumf %209, %210 : vector<16x1xf32>
    %212 = math.rsqrt %211 : vector<16x1xf32>
    %c3_104 = arith.constant 3 : index
    %c0_105 = arith.constant 0 : index
    %c0_106 = arith.constant 0 : index
    %213 = vector.load %arg4[%c3_104, %c0_105, %c0_106] : memref<4x16x32xf32, #tpu.memory_space<vmem>>, vector<1x16x32xf32>
    %214 = vector.shape_cast %213 : vector<1x16x32xf32> to vector<16x32xf32>
    %cst_107 = arith.constant dense<0.000000e+00> : vector<16x32xf32>
    %215 = tpu.matmul %1, %214, %cst_107 {dimension_numbers = #tpu.dot_dimension_numbers<[1], [0], [0], [1], [0, 0, 1, 1], [], []>} : vector<16x16xf32>, vector<16x32xf32>, vector<16x32xf32> -> vector<16x32xf32>
    %216 = vector.broadcast %212 : vector<16x1xf32> to vector<16x32xf32>
    %217 = arith.mulf %215, %216 : vector<16x32xf32>
    %cst_108 = arith.constant dense<0.000000e+00> : vector<16x32xf32>
    %218 = tpu.matmul %207, %217, %cst_108 {dimension_numbers = #tpu.dot_dimension_numbers<[1], [0], [0], [1], [0, 0, 1, 1], [], []>} : vector<16x16xf32>, vector<16x32xf32>, vector<16x32xf32> -> vector<16x32xf32>
    %219 = vector.broadcast %212 : vector<16x1xf32> to vector<16x32xf32>
    %220 = arith.mulf %218, %219 : vector<16x32xf32>
    %c3_109 = arith.constant 3 : index
    %c0_110 = arith.constant 0 : index
    %c0_111 = arith.constant 0 : index
    %221 = vector.load %arg5[%c3_109, %c0_110, %c0_111] : memref<4x1x32xf32, #tpu.memory_space<vmem>>, vector<1x1x32xf32>
    %222 = vector.shape_cast %221 : vector<1x1x32xf32> to vector<1x32xf32>
    %223 = vector.broadcast %222 : vector<1x32xf32> to vector<16x32xf32>
    %224 = arith.addf %220, %223 : vector<16x32xf32>
    %c3_112 = arith.constant 3 : index
    %c0_113 = arith.constant 0 : index
    %c0_114 = arith.constant 0 : index
    %225 = vector.load %arg6[%c3_112, %c0_113, %c0_114] : memref<4x16x16xf32, #tpu.memory_space<vmem>>, vector<1x16x16xf32>
    %226 = vector.shape_cast %225 : vector<1x16x16xf32> to vector<16x16xf32>
    %cst_115 = arith.constant dense<0.000000e+00> : vector<16x16xf32>
    %227 = tpu.matmul %1, %226, %cst_115 {dimension_numbers = #tpu.dot_dimension_numbers<[1], [0], [0], [1], [0, 0, 1, 1], [], []>} : vector<16x16xf32>, vector<16x16xf32>, vector<16x16xf32> -> vector<16x16xf32>
    %228 = vector.broadcast %212 : vector<16x1xf32> to vector<16x16xf32>
    %229 = arith.mulf %227, %228 : vector<16x16xf32>
    %cst_116 = arith.constant dense<0.000000e+00> : vector<16x16xf32>
    %230 = tpu.matmul %207, %229, %cst_116 {dimension_numbers = #tpu.dot_dimension_numbers<[1], [0], [0], [1], [0, 0, 1, 1], [], []>} : vector<16x16xf32>, vector<16x16xf32>, vector<16x16xf32> -> vector<16x16xf32>
    %231 = vector.broadcast %212 : vector<16x1xf32> to vector<16x16xf32>
    %232 = arith.mulf %230, %231 : vector<16x16xf32>
    %c3_117 = arith.constant 3 : index
    %c0_118 = arith.constant 0 : index
    %c0_119 = arith.constant 0 : index
    %233 = vector.load %arg7[%c3_117, %c0_118, %c0_119] : memref<4x1x16xf32, #tpu.memory_space<vmem>>, vector<1x1x16xf32>
    %234 = vector.shape_cast %233 : vector<1x1x16xf32> to vector<1x16xf32>
    %235 = vector.broadcast %234 : vector<1x16xf32> to vector<16x16xf32>
    %236 = arith.addf %232, %235 : vector<16x16xf32>
    %237 = vector.extract_strided_slice %224 {offsets = [0, 0], sizes = [16, 16], strides = [1, 1]} : vector<16x32xf32> to vector<16x16xf32>
    %238 = vector.extract_strided_slice %224 {offsets = [0, 16], sizes = [16, 16], strides = [1, 1]} : vector<16x32xf32> to vector<16x16xf32>
    %239 = vector.extract_strided_slice %237 {offsets = [0, 0], sizes = [16, 4], strides = [1, 1]} : vector<16x16xf32> to vector<16x4xf32>
    %240 = vector.extract_strided_slice %238 {offsets = [0, 0], sizes = [16, 4], strides = [1, 1]} : vector<16x16xf32> to vector<16x4xf32>
    %cst_120 = arith.constant dense<0.000000e+00> : vector<16x16xf32>
    %241 = tpu.matmul %239, %240, %cst_120 {dimension_numbers = #tpu.dot_dimension_numbers<[1], [1], [0], [0], [0, 0, 1, 0], [], []>} : vector<16x4xf32>, vector<16x4xf32>, vector<16x16xf32> -> vector<16x16xf32>
    %242 = math.tanh %241 : vector<16x16xf32>
    %243 = vector.extract_strided_slice %237 {offsets = [0, 4], sizes = [16, 4], strides = [1, 1]} : vector<16x16xf32> to vector<16x4xf32>
    %244 = vector.extract_strided_slice %238 {offsets = [0, 4], sizes = [16, 4], strides = [1, 1]} : vector<16x16xf32> to vector<16x4xf32>
    %cst_121 = arith.constant dense<0.000000e+00> : vector<16x16xf32>
    %245 = tpu.matmul %243, %244, %cst_121 {dimension_numbers = #tpu.dot_dimension_numbers<[1], [1], [0], [0], [0, 0, 1, 0], [], []>} : vector<16x4xf32>, vector<16x4xf32>, vector<16x16xf32> -> vector<16x16xf32>
    %246 = math.tanh %245 : vector<16x16xf32>
    %247 = arith.addf %242, %246 : vector<16x16xf32>
    %248 = vector.extract_strided_slice %237 {offsets = [0, 8], sizes = [16, 4], strides = [1, 1]} : vector<16x16xf32> to vector<16x4xf32>
    %249 = vector.extract_strided_slice %238 {offsets = [0, 8], sizes = [16, 4], strides = [1, 1]} : vector<16x16xf32> to vector<16x4xf32>
    %cst_122 = arith.constant dense<0.000000e+00> : vector<16x16xf32>
    %250 = tpu.matmul %248, %249, %cst_122 {dimension_numbers = #tpu.dot_dimension_numbers<[1], [1], [0], [0], [0, 0, 1, 0], [], []>} : vector<16x4xf32>, vector<16x4xf32>, vector<16x16xf32> -> vector<16x16xf32>
    %251 = math.tanh %250 : vector<16x16xf32>
    %252 = arith.addf %247, %251 : vector<16x16xf32>
    %253 = vector.extract_strided_slice %237 {offsets = [0, 12], sizes = [16, 4], strides = [1, 1]} : vector<16x16xf32> to vector<16x4xf32>
    %254 = vector.extract_strided_slice %238 {offsets = [0, 12], sizes = [16, 4], strides = [1, 1]} : vector<16x16xf32> to vector<16x4xf32>
    %cst_123 = arith.constant dense<0.000000e+00> : vector<16x16xf32>
    %255 = tpu.matmul %253, %254, %cst_123 {dimension_numbers = #tpu.dot_dimension_numbers<[1], [1], [0], [0], [0, 0, 1, 0], [], []>} : vector<16x4xf32>, vector<16x4xf32>, vector<16x16xf32> -> vector<16x16xf32>
    %256 = math.tanh %255 : vector<16x16xf32>
    %257 = arith.addf %252, %256 : vector<16x16xf32>
    %cst_124 = arith.constant 2.500000e-01 : f32
    %258 = vector.broadcast %cst_124 : f32 to vector<16x16xf32>
    %259 = arith.mulf %257, %258 : vector<16x16xf32>
    %260 = tpu.transpose %259, [1, 0] : vector<16x16xf32> -> vector<16x16xf32>
    %261 = arith.addf %259, %260 : vector<16x16xf32>
    %cst_125 = arith.constant 5.000000e-01 : f32
    %262 = vector.broadcast %cst_125 : f32 to vector<16x16xf32>
    %263 = arith.mulf %262, %261 : vector<16x16xf32>
    %c0_126 = arith.constant 0 : index
    %c3_127 = arith.constant 3 : index
    %c0_128 = arith.constant 0 : index
    %c0_129 = arith.constant 0 : index
    %264 = vector.load %arg12[%c0_126, %c3_127, %c0_128, %c0_129] : memref<1x4x16x16xf32, #tpu.memory_space<vmem>>, vector<1x1x16x16xf32>
    %265 = vector.shape_cast %264 : vector<1x1x16x16xf32> to vector<16x16xf32>
    %266 = vector.shape_cast %263 : vector<16x16xf32> to vector<1x1x16x16xf32>
    tpu.vector_store %arg12[%c0_126, %c3_127, %c0_128, %c0_129], %266 {strides = array<i32>} : memref<1x4x16x16xf32, #tpu.memory_space<vmem>>, vector<1x1x16x16xf32>,
    %267 = tpu.concatenate %41, %106, %171, %236 in 1 : vector<16x16xf32>, vector<16x16xf32>, vector<16x16xf32>, vector<16x16xf32> -> vector<16x64xf32>
    %c0_130 = arith.constant 0 : index
    %c0_131 = arith.constant 0 : index
    %268 = vector.load %arg8[%c0_130, %c0_131] : memref<64x8xf32, #tpu.memory_space<vmem>>, vector<64x8xf32>
    %cst_132 = arith.constant dense<0.000000e+00> : vector<16x8xf32>
    %269 = tpu.matmul %267, %268, %cst_132 {dimension_numbers = #tpu.dot_dimension_numbers<[1], [0], [0], [1], [0, 0, 1, 1], [], []>} : vector<16x64xf32>, vector<64x8xf32>, vector<16x8xf32> -> vector<16x8xf32>
    %c0_133 = arith.constant 0 : index
    %c0_134 = arith.constant 0 : index
    %270 = vector.load %arg9[%c0_133, %c0_134] : memref<1x8xf32, #tpu.memory_space<vmem>>, vector<1x8xf32>
    %271 = vector.broadcast %270 : vector<1x8xf32> to vector<16x8xf32>
    %272 = arith.addf %269, %271 : vector<16x8xf32>
    %cst_135 = arith.constant 0.000000e+00 : f32
    %273 = vector.broadcast %cst_135 : f32 to vector<16x8xf32>
    %274 = arith.cmpf ogt, %272, %273 : vector<16x8xf32>
    %cst_136 = arith.constant 0.000000e+00 : f32
    %275 = vector.broadcast %cst_136 : f32 to vector<16x8xf32>
    %276 = arith.minimumf %272, %275 : vector<16x8xf32>
    %277 = math.exp %276 : vector<16x8xf32>
    %cst_137 = arith.constant 1.000000e+00 : f32
    %278 = vector.broadcast %cst_137 : f32 to vector<16x8xf32>
    %279 = arith.subf %277, %278 : vector<16x8xf32>
    %280 = arith.select %274, %272, %279 : vector<16x8xi1>, vector<16x8xf32>
    %c0_138 = arith.constant 0 : index
    %c0_139 = arith.constant 0 : index
    %281 = vector.load %arg10[%c0_138, %c0_139] : memref<8x16xf32, #tpu.memory_space<vmem>>, vector<8x16xf32>
    %cst_140 = arith.constant dense<0.000000e+00> : vector<16x16xf32>
    %282 = tpu.matmul %280, %281, %cst_140 {dimension_numbers = #tpu.dot_dimension_numbers<[1], [0], [0], [1], [0, 0, 1, 1], [], []>} : vector<16x8xf32>, vector<8x16xf32>, vector<16x16xf32> -> vector<16x16xf32>
    %c0_141 = arith.constant 0 : index
    %c0_142 = arith.constant 0 : index
    %283 = vector.load %arg11[%c0_141, %c0_142] : memref<1x16xf32, #tpu.memory_space<vmem>>, vector<1x16xf32>
    %284 = vector.broadcast %283 : vector<1x16xf32> to vector<16x16xf32>
    %285 = arith.addf %282, %284 : vector<16x16xf32>
    %c0_143 = arith.constant 0 : index
    %c0_144 = arith.constant 0 : index
    %c0_145 = arith.constant 0 : index
    %286 = vector.load %arg3[%c0_143, %c0_144, %c0_145] : memref<1x16x1xf32, #tpu.memory_space<vmem>>, vector<1x16x1xf32>
    %287 = vector.shape_cast %286 : vector<1x16x1xf32> to vector<16x1xf32>
    %288 = vector.broadcast %287 : vector<16x1xf32> to vector<16x16xf32>
    %289 = arith.mulf %285, %288 : vector<16x16xf32>
    %290 = math.tanh %289 : vector<16x16xf32>
    %c0_146 = arith.constant 0 : index
    %c0_147 = arith.constant 0 : index
    %c0_148 = arith.constant 0 : index
    %291 = vector.load %arg13[%c0_146, %c0_147, %c0_148] : memref<1x16x16xf32, #tpu.memory_space<vmem>>, vector<1x16x16xf32>
    %292 = vector.shape_cast %291 : vector<1x16x16xf32> to vector<16x16xf32>
    %293 = vector.shape_cast %290 : vector<16x16xf32> to vector<1x16x16xf32>
    tpu.vector_store %arg13[%c0_146, %c0_147, %c0_148], %293 {strides = array<i32>} : memref<1x16x16xf32, #tpu.memory_space<vmem>>, vector<1x16x16xf32>,
    return
  }
  func.func @transform_0(%arg0: i32) -> (i32, i32, i32) {
    %c0_i32 = arith.constant 0 : i32
    %c0_i32_0 = arith.constant 0 : i32
    %c0_i32_1 = arith.constant 0 : i32
    return %arg0, %c0_i32, %c0_i32_0 : i32, i32, i32
  }
  func.func @transform_1(%arg0: i32) -> (i32, i32, i32, i32) {
    %c0_i32 = arith.constant 0 : i32
    %c0_i32_0 = arith.constant 0 : i32
    %c0_i32_1 = arith.constant 0 : i32
    %c0_i32_2 = arith.constant 0 : i32
    return %arg0, %c0_i32, %c0_i32_0, %c0_i32_1 : i32, i32, i32, i32
  }
  func.func @transform_2(%arg0: i32) -> (i32, i32, i32) {
    %c0_i32 = arith.constant 0 : i32
    %c0_i32_0 = arith.constant 0 : i32
    %c0_i32_1 = arith.constant 0 : i32
    return %arg0, %c0_i32, %c0_i32_0 : i32, i32, i32
  }
  func.func @transform_3(%arg0: i32) -> (i32, i32, i32) {
    %c0_i32 = arith.constant 0 : i32
    %c0_i32_0 = arith.constant 0 : i32
    %c0_i32_1 = arith.constant 0 : i32
    %c0_i32_2 = arith.constant 0 : i32
    return %c0_i32, %c0_i32_0, %c0_i32_1 : i32, i32, i32
  }
  func.func @transform_4(%arg0: i32) -> (i32, i32, i32) {
    %c0_i32 = arith.constant 0 : i32
    %c0_i32_0 = arith.constant 0 : i32
    %c0_i32_1 = arith.constant 0 : i32
    %c0_i32_2 = arith.constant 0 : i32
    return %c0_i32, %c0_i32_0, %c0_i32_1 : i32, i32, i32
  }
  func.func @transform_5(%arg0: i32) -> (i32, i32, i32) {
    %c0_i32 = arith.constant 0 : i32
    %c0_i32_0 = arith.constant 0 : i32
    %c0_i32_1 = arith.constant 0 : i32
    %c0_i32_2 = arith.constant 0 : i32
    return %c0_i32, %c0_i32_0, %c0_i32_1 : i32, i32, i32
  }
  func.func @transform_6(%arg0: i32) -> (i32, i32, i32) {
    %c0_i32 = arith.constant 0 : i32
    %c0_i32_0 = arith.constant 0 : i32
    %c0_i32_1 = arith.constant 0 : i32
    %c0_i32_2 = arith.constant 0 : i32
    return %c0_i32, %c0_i32_0, %c0_i32_1 : i32, i32, i32
  }
  func.func @transform_7(%arg0: i32) -> (i32, i32) {
    %c0_i32 = arith.constant 0 : i32
    %c0_i32_0 = arith.constant 0 : i32
    %c0_i32_1 = arith.constant 0 : i32
    return %c0_i32, %c0_i32_0 : i32, i32
  }
  func.func @transform_8(%arg0: i32) -> (i32, i32) {
    %c0_i32 = arith.constant 0 : i32
    %c0_i32_0 = arith.constant 0 : i32
    %c0_i32_1 = arith.constant 0 : i32
    return %c0_i32, %c0_i32_0 : i32, i32
  }
  func.func @transform_9(%arg0: i32) -> (i32, i32) {
    %c0_i32 = arith.constant 0 : i32
    %c0_i32_0 = arith.constant 0 : i32
    %c0_i32_1 = arith.constant 0 : i32
    return %c0_i32, %c0_i32_0 : i32, i32
  }
  func.func @transform_10(%arg0: i32) -> (i32, i32) {
    %c0_i32 = arith.constant 0 : i32
    %c0_i32_0 = arith.constant 0 : i32
    %c0_i32_1 = arith.constant 0 : i32
    return %c0_i32, %c0_i32_0 : i32, i32
  }
  func.func @transform_11(%arg0: i32) -> (i32, i32, i32, i32) {
    %c0_i32 = arith.constant 0 : i32
    %c0_i32_0 = arith.constant 0 : i32
    %c0_i32_1 = arith.constant 0 : i32
    %c0_i32_2 = arith.constant 0 : i32
    return %arg0, %c0_i32, %c0_i32_0, %c0_i32_1 : i32, i32, i32, i32
  }
  func.func @transform_12(%arg0: i32) -> (i32, i32, i32) {
    %c0_i32 = arith.constant 0 : i32
    %c0_i32_0 = arith.constant 0 : i32
    %c0_i32_1 = arith.constant 0 : i32
    return %arg0, %c0_i32, %c0_i32_0 : i32, i32, i32
  }
}

module attributes {stable_mosaic.version = 11 : i64} {
  func.func @_final_mlp_kernel(%arg0: i32, %arg1: i32, %arg2: memref<1x2x256xf32, #tpu.memory_space<vmem>>, %arg3: memref<1x4x256xf32, #tpu.memory_space<vmem>>, %arg4: memref<1x4x256xf32, #tpu.memory_space<vmem>>, %arg5: memref<1x4x256xf32, #tpu.memory_space<vmem>>, %arg6: memref<1x1x256xf32, #tpu.memory_space<vmem>>, %arg7: memref<28x2xf32, #tpu.memory_space<vmem>>, %arg8: memref<28x4xf32, #tpu.memory_space<vmem>>, %arg9: memref<28x4xf32, #tpu.memory_space<vmem>>, %arg10: memref<28x4xf32, #tpu.memory_space<vmem>>, %arg11: memref<28x1xf32, #tpu.memory_space<vmem>>, %arg12: memref<28x28xf32, #tpu.memory_space<vmem>>, %arg13: memref<28x1xf32, #tpu.memory_space<vmem>>, %arg14: memref<28x1xf32, #tpu.memory_space<vmem>>, %arg15: memref<1x1xf32, #tpu.memory_space<vmem>>, %arg16: memref<1x1x256xf32, #tpu.memory_space<vmem>>) attributes {dimension_semantics = [#tpu.dimension_semantics<parallel>, #tpu.dimension_semantics<parallel>], iteration_bounds = array<i64: 2, 1>, scalar_prefetch = 0 : i64, scratch_operands = 0 : i64, tpu.core_type = #tpu.core_type<tc>, window_params = [{transform_indices = @transform_0, window_bounds = array<i64: 1, 2, 256>}, {transform_indices = @transform_1, window_bounds = array<i64: 1, 4, 256>}, {transform_indices = @transform_2, window_bounds = array<i64: 1, 4, 256>}, {transform_indices = @transform_3, window_bounds = array<i64: 1, 4, 256>}, {transform_indices = @transform_4, window_bounds = array<i64: 1, 1, 256>}, {pipeline_mode = #tpu.pipeline_mode<synchronous>, transform_indices = @transform_5, window_bounds = array<i64: 28, 2>}, {pipeline_mode = #tpu.pipeline_mode<synchronous>, transform_indices = @transform_6, window_bounds = array<i64: 28, 4>}, {pipeline_mode = #tpu.pipeline_mode<synchronous>, transform_indices = @transform_7, window_bounds = array<i64: 28, 4>}, {pipeline_mode = #tpu.pipeline_mode<synchronous>, transform_indices = @transform_8, window_bounds = array<i64: 28, 4>}, {pipeline_mode = #tpu.pipeline_mode<synchronous>, transform_indices = @transform_9, window_bounds = array<i64: 28, 1>}, {pipeline_mode = #tpu.pipeline_mode<synchronous>, transform_indices = @transform_10, window_bounds = array<i64: 28, 28>}, {pipeline_mode = #tpu.pipeline_mode<synchronous>, transform_indices = @transform_11, window_bounds = array<i64: 28, 1>}, {pipeline_mode = #tpu.pipeline_mode<synchronous>, transform_indices = @transform_12, window_bounds = array<i64: 28, 1>}, {pipeline_mode = #tpu.pipeline_mode<synchronous>, transform_indices = @transform_13, window_bounds = array<i64: 1, 1>}, {transform_indices = @transform_14, window_bounds = array<i64: 1, 1, 256>}]} {
    %c0 = arith.constant 0 : index
    %c0_0 = arith.constant 0 : index
    %0 = vector.load %arg11[%c0, %c0_0] : memref<28x1xf32, #tpu.memory_space<vmem>>, vector<28x1xf32>
    %c0_1 = arith.constant 0 : index
    %c0_2 = arith.constant 0 : index
    %1 = vector.load %arg7[%c0_1, %c0_2] : memref<28x2xf32, #tpu.memory_space<vmem>>, vector<28x2xf32>
    %c0_3 = arith.constant 0 : index
    %c0_4 = arith.constant 0 : index
    %c0_5 = arith.constant 0 : index
    %2 = vector.load %arg2[%c0_3, %c0_4, %c0_5] : memref<1x2x256xf32, #tpu.memory_space<vmem>>, vector<1x2x256xf32>
    %3 = vector.shape_cast %2 : vector<1x2x256xf32> to vector<2x256xf32>
    %4 = vector.extract_strided_slice %1 {offsets = [0, 0], sizes = [28, 1], strides = [1, 1]} : vector<28x2xf32> to vector<28x1xf32>
    %5 = vector.extract_strided_slice %3 {offsets = [0, 0], sizes = [1, 256], strides = [1, 1]} : vector<2x256xf32> to vector<1x256xf32>
    %6 = vector.broadcast %4 : vector<28x1xf32> to vector<28x256xf32>
    %7 = vector.broadcast %5 : vector<1x256xf32> to vector<28x256xf32>
    %8 = arith.mulf %6, %7 : vector<28x256xf32>
    %9 = vector.broadcast %0 : vector<28x1xf32> to vector<28x256xf32>
    %10 = arith.addf %9, %8 : vector<28x256xf32>
    %11 = vector.extract_strided_slice %1 {offsets = [0, 1], sizes = [28, 1], strides = [1, 1]} : vector<28x2xf32> to vector<28x1xf32>
    %12 = vector.extract_strided_slice %3 {offsets = [1, 0], sizes = [1, 256], strides = [1, 1]} : vector<2x256xf32> to vector<1x256xf32>
    %13 = vector.broadcast %11 : vector<28x1xf32> to vector<28x256xf32>
    %14 = vector.broadcast %12 : vector<1x256xf32> to vector<28x256xf32>
    %15 = arith.mulf %13, %14 : vector<28x256xf32>
    %16 = arith.addf %10, %15 : vector<28x256xf32>
    %c0_6 = arith.constant 0 : index
    %c0_7 = arith.constant 0 : index
    %17 = vector.load %arg8[%c0_6, %c0_7] : memref<28x4xf32, #tpu.memory_space<vmem>>, vector<28x4xf32>
    %c0_8 = arith.constant 0 : index
    %c0_9 = arith.constant 0 : index
    %c0_10 = arith.constant 0 : index
    %18 = vector.load %arg3[%c0_8, %c0_9, %c0_10] : memref<1x4x256xf32, #tpu.memory_space<vmem>>, vector<1x4x256xf32>
    %19 = vector.shape_cast %18 : vector<1x4x256xf32> to vector<4x256xf32>
    %20 = vector.extract_strided_slice %17 {offsets = [0, 0], sizes = [28, 1], strides = [1, 1]} : vector<28x4xf32> to vector<28x1xf32>
    %21 = vector.extract_strided_slice %19 {offsets = [0, 0], sizes = [1, 256], strides = [1, 1]} : vector<4x256xf32> to vector<1x256xf32>
    %22 = vector.broadcast %20 : vector<28x1xf32> to vector<28x256xf32>
    %23 = vector.broadcast %21 : vector<1x256xf32> to vector<28x256xf32>
    %24 = arith.mulf %22, %23 : vector<28x256xf32>
    %25 = arith.addf %16, %24 : vector<28x256xf32>
    %26 = vector.extract_strided_slice %17 {offsets = [0, 1], sizes = [28, 1], strides = [1, 1]} : vector<28x4xf32> to vector<28x1xf32>
    %27 = vector.extract_strided_slice %19 {offsets = [1, 0], sizes = [1, 256], strides = [1, 1]} : vector<4x256xf32> to vector<1x256xf32>
    %28 = vector.broadcast %26 : vector<28x1xf32> to vector<28x256xf32>
    %29 = vector.broadcast %27 : vector<1x256xf32> to vector<28x256xf32>
    %30 = arith.mulf %28, %29 : vector<28x256xf32>
    %31 = arith.addf %25, %30 : vector<28x256xf32>
    %32 = vector.extract_strided_slice %17 {offsets = [0, 2], sizes = [28, 1], strides = [1, 1]} : vector<28x4xf32> to vector<28x1xf32>
    %33 = vector.extract_strided_slice %19 {offsets = [2, 0], sizes = [1, 256], strides = [1, 1]} : vector<4x256xf32> to vector<1x256xf32>
    %34 = vector.broadcast %32 : vector<28x1xf32> to vector<28x256xf32>
    %35 = vector.broadcast %33 : vector<1x256xf32> to vector<28x256xf32>
    %36 = arith.mulf %34, %35 : vector<28x256xf32>
    %37 = arith.addf %31, %36 : vector<28x256xf32>
    %38 = vector.extract_strided_slice %17 {offsets = [0, 3], sizes = [28, 1], strides = [1, 1]} : vector<28x4xf32> to vector<28x1xf32>
    %39 = vector.extract_strided_slice %19 {offsets = [3, 0], sizes = [1, 256], strides = [1, 1]} : vector<4x256xf32> to vector<1x256xf32>
    %40 = vector.broadcast %38 : vector<28x1xf32> to vector<28x256xf32>
    %41 = vector.broadcast %39 : vector<1x256xf32> to vector<28x256xf32>
    %42 = arith.mulf %40, %41 : vector<28x256xf32>
    %43 = arith.addf %37, %42 : vector<28x256xf32>
    %c0_11 = arith.constant 0 : index
    %c0_12 = arith.constant 0 : index
    %44 = vector.load %arg9[%c0_11, %c0_12] : memref<28x4xf32, #tpu.memory_space<vmem>>, vector<28x4xf32>
    %c0_13 = arith.constant 0 : index
    %c0_14 = arith.constant 0 : index
    %c0_15 = arith.constant 0 : index
    %45 = vector.load %arg4[%c0_13, %c0_14, %c0_15] : memref<1x4x256xf32, #tpu.memory_space<vmem>>, vector<1x4x256xf32>
    %46 = vector.shape_cast %45 : vector<1x4x256xf32> to vector<4x256xf32>
    %47 = vector.extract_strided_slice %44 {offsets = [0, 0], sizes = [28, 1], strides = [1, 1]} : vector<28x4xf32> to vector<28x1xf32>
    %48 = vector.extract_strided_slice %46 {offsets = [0, 0], sizes = [1, 256], strides = [1, 1]} : vector<4x256xf32> to vector<1x256xf32>
    %49 = vector.broadcast %47 : vector<28x1xf32> to vector<28x256xf32>
    %50 = vector.broadcast %48 : vector<1x256xf32> to vector<28x256xf32>
    %51 = arith.mulf %49, %50 : vector<28x256xf32>
    %52 = arith.addf %43, %51 : vector<28x256xf32>
    %53 = vector.extract_strided_slice %44 {offsets = [0, 1], sizes = [28, 1], strides = [1, 1]} : vector<28x4xf32> to vector<28x1xf32>
    %54 = vector.extract_strided_slice %46 {offsets = [1, 0], sizes = [1, 256], strides = [1, 1]} : vector<4x256xf32> to vector<1x256xf32>
    %55 = vector.broadcast %53 : vector<28x1xf32> to vector<28x256xf32>
    %56 = vector.broadcast %54 : vector<1x256xf32> to vector<28x256xf32>
    %57 = arith.mulf %55, %56 : vector<28x256xf32>
    %58 = arith.addf %52, %57 : vector<28x256xf32>
    %59 = vector.extract_strided_slice %44 {offsets = [0, 2], sizes = [28, 1], strides = [1, 1]} : vector<28x4xf32> to vector<28x1xf32>
    %60 = vector.extract_strided_slice %46 {offsets = [2, 0], sizes = [1, 256], strides = [1, 1]} : vector<4x256xf32> to vector<1x256xf32>
    %61 = vector.broadcast %59 : vector<28x1xf32> to vector<28x256xf32>
    %62 = vector.broadcast %60 : vector<1x256xf32> to vector<28x256xf32>
    %63 = arith.mulf %61, %62 : vector<28x256xf32>
    %64 = arith.addf %58, %63 : vector<28x256xf32>
    %65 = vector.extract_strided_slice %44 {offsets = [0, 3], sizes = [28, 1], strides = [1, 1]} : vector<28x4xf32> to vector<28x1xf32>
    %66 = vector.extract_strided_slice %46 {offsets = [3, 0], sizes = [1, 256], strides = [1, 1]} : vector<4x256xf32> to vector<1x256xf32>
    %67 = vector.broadcast %65 : vector<28x1xf32> to vector<28x256xf32>
    %68 = vector.broadcast %66 : vector<1x256xf32> to vector<28x256xf32>
    %69 = arith.mulf %67, %68 : vector<28x256xf32>
    %70 = arith.addf %64, %69 : vector<28x256xf32>
    %c0_16 = arith.constant 0 : index
    %c0_17 = arith.constant 0 : index
    %71 = vector.load %arg10[%c0_16, %c0_17] : memref<28x4xf32, #tpu.memory_space<vmem>>, vector<28x4xf32>
    %c0_18 = arith.constant 0 : index
    %c0_19 = arith.constant 0 : index
    %c0_20 = arith.constant 0 : index
    %72 = vector.load %arg5[%c0_18, %c0_19, %c0_20] : memref<1x4x256xf32, #tpu.memory_space<vmem>>, vector<1x4x256xf32>
    %73 = vector.shape_cast %72 : vector<1x4x256xf32> to vector<4x256xf32>
    %74 = vector.extract_strided_slice %71 {offsets = [0, 0], sizes = [28, 1], strides = [1, 1]} : vector<28x4xf32> to vector<28x1xf32>
    %75 = vector.extract_strided_slice %73 {offsets = [0, 0], sizes = [1, 256], strides = [1, 1]} : vector<4x256xf32> to vector<1x256xf32>
    %76 = vector.broadcast %74 : vector<28x1xf32> to vector<28x256xf32>
    %77 = vector.broadcast %75 : vector<1x256xf32> to vector<28x256xf32>
    %78 = arith.mulf %76, %77 : vector<28x256xf32>
    %79 = arith.addf %70, %78 : vector<28x256xf32>
    %80 = vector.extract_strided_slice %71 {offsets = [0, 1], sizes = [28, 1], strides = [1, 1]} : vector<28x4xf32> to vector<28x1xf32>
    %81 = vector.extract_strided_slice %73 {offsets = [1, 0], sizes = [1, 256], strides = [1, 1]} : vector<4x256xf32> to vector<1x256xf32>
    %82 = vector.broadcast %80 : vector<28x1xf32> to vector<28x256xf32>
    %83 = vector.broadcast %81 : vector<1x256xf32> to vector<28x256xf32>
    %84 = arith.mulf %82, %83 : vector<28x256xf32>
    %85 = arith.addf %79, %84 : vector<28x256xf32>
    %86 = vector.extract_strided_slice %71 {offsets = [0, 2], sizes = [28, 1], strides = [1, 1]} : vector<28x4xf32> to vector<28x1xf32>
    %87 = vector.extract_strided_slice %73 {offsets = [2, 0], sizes = [1, 256], strides = [1, 1]} : vector<4x256xf32> to vector<1x256xf32>
    %88 = vector.broadcast %86 : vector<28x1xf32> to vector<28x256xf32>
    %89 = vector.broadcast %87 : vector<1x256xf32> to vector<28x256xf32>
    %90 = arith.mulf %88, %89 : vector<28x256xf32>
    %91 = arith.addf %85, %90 : vector<28x256xf32>
    %92 = vector.extract_strided_slice %71 {offsets = [0, 3], sizes = [28, 1], strides = [1, 1]} : vector<28x4xf32> to vector<28x1xf32>
    %93 = vector.extract_strided_slice %73 {offsets = [3, 0], sizes = [1, 256], strides = [1, 1]} : vector<4x256xf32> to vector<1x256xf32>
    %94 = vector.broadcast %92 : vector<28x1xf32> to vector<28x256xf32>
    %95 = vector.broadcast %93 : vector<1x256xf32> to vector<28x256xf32>
    %96 = arith.mulf %94, %95 : vector<28x256xf32>
    %97 = arith.addf %91, %96 : vector<28x256xf32>
    %cst = arith.constant 0.000000e+00 : f32
    %98 = vector.broadcast %cst : f32 to vector<28x256xf32>
    %99 = arith.subf %98, %97 : vector<28x256xf32>
    %100 = math.exp %99 : vector<28x256xf32>
    %cst_21 = arith.constant 1.000000e+00 : f32
    %101 = vector.broadcast %cst_21 : f32 to vector<28x256xf32>
    %102 = arith.addf %101, %100 : vector<28x256xf32>
    %cst_22 = arith.constant 1.000000e+00 : f32
    %103 = vector.broadcast %cst_22 : f32 to vector<28x256xf32>
    %104 = arith.divf %103, %102 : vector<28x256xf32>
    %105 = arith.mulf %97, %104 : vector<28x256xf32>
    %c0_23 = arith.constant 0 : index
    %c0_24 = arith.constant 0 : index
    %106 = vector.load %arg12[%c0_23, %c0_24] : memref<28x28xf32, #tpu.memory_space<vmem>>, vector<28x28xf32>
    %cst_25 = arith.constant dense<0.000000e+00> : vector<28x256xf32>
    %107 = tpu.matmul %106, %105, %cst_25 {dimension_numbers = #tpu.dot_dimension_numbers<[1], [0], [0], [1], [0, 0, 1, 1], [], []>} : vector<28x28xf32>, vector<28x256xf32>, vector<28x256xf32> -> vector<28x256xf32>
    %c0_26 = arith.constant 0 : index
    %c0_27 = arith.constant 0 : index
    %108 = vector.load %arg13[%c0_26, %c0_27] : memref<28x1xf32, #tpu.memory_space<vmem>>, vector<28x1xf32>
    %109 = vector.broadcast %108 : vector<28x1xf32> to vector<28x256xf32>
    %110 = arith.addf %107, %109 : vector<28x256xf32>
    %cst_28 = arith.constant 0.000000e+00 : f32
    %111 = vector.broadcast %cst_28 : f32 to vector<28x256xf32>
    %112 = arith.subf %111, %110 : vector<28x256xf32>
    %113 = math.exp %112 : vector<28x256xf32>
    %cst_29 = arith.constant 1.000000e+00 : f32
    %114 = vector.broadcast %cst_29 : f32 to vector<28x256xf32>
    %115 = arith.addf %114, %113 : vector<28x256xf32>
    %cst_30 = arith.constant 1.000000e+00 : f32
    %116 = vector.broadcast %cst_30 : f32 to vector<28x256xf32>
    %117 = arith.divf %116, %115 : vector<28x256xf32>
    %118 = arith.mulf %110, %117 : vector<28x256xf32>
    %c0_31 = arith.constant 0 : index
    %c0_32 = arith.constant 0 : index
    %119 = vector.load %arg14[%c0_31, %c0_32] : memref<28x1xf32, #tpu.memory_space<vmem>>, vector<28x1xf32>
    %120 = vector.broadcast %119 : vector<28x1xf32> to vector<28x256xf32>
    %121 = arith.mulf %118, %120 : vector<28x256xf32>
    %cst_33 = arith.constant dense<0.000000e+00> : vector<256xf32>
    %122 = vector.multi_reduction <add>, %121, %cst_33 [0] : vector<28x256xf32> to vector<256xf32>
    %123 = vector.shape_cast %122 : vector<256xf32> to vector<1x256xf32>
    %c0_34 = arith.constant 0 : index
    %c0_35 = arith.constant 0 : index
    %124 = vector.load %arg15[%c0_34, %c0_35] : memref<1x1xf32, #tpu.memory_space<vmem>>, vector<1x1xf32>
    %125 = vector.broadcast %124 : vector<1x1xf32> to vector<1x256xf32>
    %126 = arith.addf %123, %125 : vector<1x256xf32>
    %c0_36 = arith.constant 0 : index
    %c0_37 = arith.constant 0 : index
    %c0_38 = arith.constant 0 : index
    %127 = vector.load %arg6[%c0_36, %c0_37, %c0_38] : memref<1x1x256xf32, #tpu.memory_space<vmem>>, vector<1x1x256xf32>
    %128 = vector.shape_cast %127 : vector<1x1x256xf32> to vector<1x256xf32>
    %129 = arith.mulf %126, %128 : vector<1x256xf32>
    %c0_39 = arith.constant 0 : index
    %c0_40 = arith.constant 0 : index
    %c0_41 = arith.constant 0 : index
    %130 = vector.load %arg16[%c0_39, %c0_40, %c0_41] : memref<1x1x256xf32, #tpu.memory_space<vmem>>, vector<1x1x256xf32>
    %131 = vector.shape_cast %130 : vector<1x1x256xf32> to vector<1x256xf32>
    %132 = vector.shape_cast %129 : vector<1x256xf32> to vector<1x1x256xf32>
    tpu.vector_store %arg16[%c0_39, %c0_40, %c0_41], %132 {strides = array<i32>} : memref<1x1x256xf32, #tpu.memory_space<vmem>>, vector<1x1x256xf32>,
    return
  }
  func.func @transform_0(%arg0: i32, %arg1: i32) -> (i32, i32, i32) {
    %c0_i32 = arith.constant 0 : i32
    %c0_i32_0 = arith.constant 0 : i32
    return %arg0, %c0_i32, %arg1 : i32, i32, i32
  }
  func.func @transform_1(%arg0: i32, %arg1: i32) -> (i32, i32, i32) {
    %c0_i32 = arith.constant 0 : i32
    %c0_i32_0 = arith.constant 0 : i32
    return %arg0, %c0_i32, %arg1 : i32, i32, i32
  }
  func.func @transform_2(%arg0: i32, %arg1: i32) -> (i32, i32, i32) {
    %c0_i32 = arith.constant 0 : i32
    %c0_i32_0 = arith.constant 0 : i32
    return %arg0, %c0_i32, %arg1 : i32, i32, i32
  }
  func.func @transform_3(%arg0: i32, %arg1: i32) -> (i32, i32, i32) {
    %c0_i32 = arith.constant 0 : i32
    %c0_i32_0 = arith.constant 0 : i32
    return %arg0, %c0_i32, %arg1 : i32, i32, i32
  }
  func.func @transform_4(%arg0: i32, %arg1: i32) -> (i32, i32, i32) {
    %c0_i32 = arith.constant 0 : i32
    %c0_i32_0 = arith.constant 0 : i32
    return %arg0, %c0_i32, %arg1 : i32, i32, i32
  }
  func.func @transform_5(%arg0: i32, %arg1: i32) -> (i32, i32) {
    %c0_i32 = arith.constant 0 : i32
    %c0_i32_0 = arith.constant 0 : i32
    %c0_i32_1 = arith.constant 0 : i32
    return %c0_i32, %c0_i32_0 : i32, i32
  }
  func.func @transform_6(%arg0: i32, %arg1: i32) -> (i32, i32) {
    %c0_i32 = arith.constant 0 : i32
    %c0_i32_0 = arith.constant 0 : i32
    %c0_i32_1 = arith.constant 0 : i32
    return %c0_i32, %c0_i32_0 : i32, i32
  }
  func.func @transform_7(%arg0: i32, %arg1: i32) -> (i32, i32) {
    %c0_i32 = arith.constant 0 : i32
    %c0_i32_0 = arith.constant 0 : i32
    %c0_i32_1 = arith.constant 0 : i32
    return %c0_i32, %c0_i32_0 : i32, i32
  }
  func.func @transform_8(%arg0: i32, %arg1: i32) -> (i32, i32) {
    %c0_i32 = arith.constant 0 : i32
    %c0_i32_0 = arith.constant 0 : i32
    %c0_i32_1 = arith.constant 0 : i32
    return %c0_i32, %c0_i32_0 : i32, i32
  }
  func.func @transform_9(%arg0: i32, %arg1: i32) -> (i32, i32) {
    %c0_i32 = arith.constant 0 : i32
    %c0_i32_0 = arith.constant 0 : i32
    %c0_i32_1 = arith.constant 0 : i32
    return %c0_i32, %c0_i32_0 : i32, i32
  }
  func.func @transform_10(%arg0: i32, %arg1: i32) -> (i32, i32) {
    %c0_i32 = arith.constant 0 : i32
    %c0_i32_0 = arith.constant 0 : i32
    %c0_i32_1 = arith.constant 0 : i32
    return %c0_i32, %c0_i32_0 : i32, i32
  }
  func.func @transform_11(%arg0: i32, %arg1: i32) -> (i32, i32) {
    %c0_i32 = arith.constant 0 : i32
    %c0_i32_0 = arith.constant 0 : i32
    %c0_i32_1 = arith.constant 0 : i32
    return %c0_i32, %c0_i32_0 : i32, i32
  }
  func.func @transform_12(%arg0: i32, %arg1: i32) -> (i32, i32) {
    %c0_i32 = arith.constant 0 : i32
    %c0_i32_0 = arith.constant 0 : i32
    %c0_i32_1 = arith.constant 0 : i32
    return %c0_i32, %c0_i32_0 : i32, i32
  }
  func.func @transform_13(%arg0: i32, %arg1: i32) -> (i32, i32) {
    %c0_i32 = arith.constant 0 : i32
    %c0_i32_0 = arith.constant 0 : i32
    %c0_i32_1 = arith.constant 0 : i32
    return %c0_i32, %c0_i32_0 : i32, i32
  }
  func.func @transform_14(%arg0: i32, %arg1: i32) -> (i32, i32, i32) {
    %c0_i32 = arith.constant 0 : i32
    %c0_i32_0 = arith.constant 0 : i32
    return %arg0, %c0_i32, %arg1 : i32, i32, i32
  }
}

</mosaic_0001>

<bundles_post_ra>
// kernel: edge_score_network_forward.8
= control target key start
LH: loop header
LB: loop body
LE: loop exit
PB: predicated region body
PF: predicated region fallthrough
CT: control target
= control target key end

     0   :  { %s319_s6 = smov 0   ;;  %s342_s0 = inlined_call_operand.vmem [shape: f32[2,16,16], index: 0, kind: input, shape index: {}]   ;;  %s343_s1 = inlined_call_operand.vmem [shape: f32[2,2,16,16], index: 1, kind: output, shape index: {}]  }
   0x1 LB: > { %s261_s7 = sadd.s32 4294967295, %s307_s6   ;;  %p265_p0 = scmp.ge.s32.totalorder %s307_s6, 1  ;;  %s307_s6 = sphi %s319_s6, %s11_s6  }
   0x2   : > { %p87_p1 = scmp.lt.s32.totalorder %s307_s6, 3 }
   0x4   : > { %p88_p2 = pnand %p265_p0, %p87_p1 }
   0x5   : > { %p107_p3 = scmp.lt.s32.totalorder (!%p88_p2), %s261_s7, 1  ;;  %vm119_vm0 = vcmask (!%p88_p2), 130048  }
   0x6   : > { %91 = sbr.rel (%p88_p2) target bundleno = 237 (0xed), region = 24 }
   0xd   : > { %s345_s7 = smov (!%p107_p3, %s261_s7), 1 }
   0xe   : > { %s276_s8 = sshll.u32 %s345_s7, 4  ;;  %s277_s9 = sshll.u32 %s345_s7, 5 }
   0xf   : > { %s111_s12 = scalar_lea.vmem %s342_s0, %s276_s8  ;;  %s116_s15 = scalar_lea.vmem %s343_s1, %s277_s9 }
  0x10   : > { %v117_v0 = vld [vmem:[%s111_s12] sm:$0xff]  ;;  %v118_v1 = vld [vmem:[%s111_s12 + $0x8] sm:$0xff] }
  0x11   : > { %v289_v2 = vpack.c.bf16 %v118_v1, %v117_v0  ;;  %286 = vmatprep.mubr.msk.f32.mxu0 %vm119_vm0, %v117_v0  ;;  %120 = vst.msk [vmem:[%s116_s15] sm:$0xff] %vm119_vm0, %v117_v0  ;;  %121 = vst.msk [vmem:[%s116_s15 + $0x8] sm:$0xff] %vm119_vm0, %v118_v1 }
  0x13   : > { %290 = vmatprep.subr.bf16.mxu0 %v289_v2 }
  0x14   : > { %292 = vmatpush3.bf16.msra.mxu0 %v289_v2 }
  0x17   : > { %287 = vmatmul.mubr.msk.f32.vlgmr.msra.gmra.mrb[0].mxu0 %vm119_vm0, %v118_v1 }
  0xea   : > { %v288_v3 = vpop.f32.mrb[0].mxu0 }
  0xeb   : > { %273 = vst.msk [vmem:[%s116_s15 + $0x18] sm:$0xff] %vm119_vm0, %v288_v3  ;;  %v194_v4 = vpop.f32.mrb[1].mxu0 }
  0xec   : > { %272 = vst.msk [vmem:[%s116_s15 + $0x10] sm:$0xff] %vm119_vm0, %v194_v4 }
  0xed PF: > { %s11_s6 = sadd.s32 1, %s307_s6  }
  0xee   : > { %p8_p4 = scmp.ge.s32.totalorder %s11_s6, 4  }
  0xf0   :  { %10 = sbr.rel (!%p8_p4) target bundleno = 1 (0x1), region = 55 }

// kernel: edge_score_network_forward.10
= control target key start
LH: loop header
LB: loop body
LE: loop exit
PB: predicated region body
PF: predicated region fallthrough
CT: control target
= control target key end

     0   :  { %s1617_s21 = smov 0   ;;  %s1619_s22 = smov 0   ;;  %s1729_s0 = inlined_call_operand.vmem [shape: f32[2,2,256], index: 0, kind: input, shape index: {}]   ;;  %s1730_s1 = inlined_call_operand.vmem [shape: f32[2,2,256], index: 1, kind: input, shape index: {}]   ;;  %s1731_s2 = inlined_call_operand.vmem [shape: f32[2,16,16], index: 2, kind: input, shape index: {}, may-alias: {2,3}]   ;;  %s1732_s3 = inlined_call_operand.vmem [shape: f32[2,16,16], index: 3, kind: input, shape index: {}, may-alias: {2,3}]   ;;  %s1733_s4 = inlined_call_operand.vmem [shape: f32[16,8], index: 4, kind: input, shape index: {}]   ;;  %s1734_s5 = inlined_call_operand.vmem [shape: f32[1,8], index: 5, kind: input, shape index: {}]   ;;  %s1735_s6 = inlined_call_operand.vmem [shape: f32[8,2], index: 6, kind: input, shape index: {}]   ;;  %s1736_s7 = inlined_call_operand.vmem [shape: f32[8,2], index: 7, kind: input, shape index: {}]   ;;  %s1737_s8 = inlined_call_operand.vmem [shape: f32[8,8], index: 8, kind: input, shape index: {}]   ;;  %s1738_s9 = inlined_call_operand.vmem [shape: f32[8,1], index: 9, kind: input, shape index: {}]   ;;  %s1739_s10 = inlined_call_operand.vmem [shape: f32[4,8], index: 10, kind: input, shape index: {}]   ;;  %s1740_s11 = inlined_call_operand.vmem [shape: f32[4,1], index: 11, kind: input, shape index: {}]   ;;  %s1741_s12 = inlined_call_operand.vmem [shape: f32[2,4,256], index: 12, kind: output, shape index: {}]  }
   0x1   :  { %s1621_s23 = smov 0  }
   0x2 LB: > { %s34_s24 = sadd.s32 1, %s1522_s22  ;;  %p1375_p0 = scmp.ge.s32.totalorder %s1526_s23, 1  ;;  %s1526_s23 = sphi %s1621_s23, %s22_s23   ;;  %s1522_s22 = sphi %s1619_s22, %s1743_s22   ;;  %s1518_s21 = sphi %s1617_s21, %s1742_s21  }
   0x3   : > { %p36_p1 = scmp.ge.s32.totalorder %s34_s24, 2  ;;  %p427_p2 = scmp.lt.s32.totalorder %s1526_s23, 3 }
   0x5   : > { %s1745_s24 = smov (%p36_p1, %s34_s24), 0  ;;  %p428_p3 = pnand %p1375_p0, %p427_p2 }
   0x6   : > { %v547_v0 = vld [vmem:[%s1733_s4] sm:$0xff] (!%p428_p3)  ;;  %v548_v1 = vld [vmem:[%s1733_s4 + $0x8] sm:$0xff] (!%p428_p3)  ;;  %p501_p4 = scmp.lt.s32.totalorder (!%p428_p3), %s1518_s21, 1  ;;  %vm556_vm0 = vcmask (!%p428_p3), 130048   ;;  %v1528_v7 = vmov (!%p428_p3), 9   ;;  %v1529_v17 = vmov (!%p428_p3), 10  }
   0x7   : > { %431 = sbr.rel (%p428_p3) target bundleno = 1142 (0x476), region = 68  ;;  %v1424_v2 = vpack.c.bf16 (!%p428_p3), %v548_v1, %v547_v0  ;;  %1480 = vset.pattern.permute.xlu1 (!%p428_p3), %v1528_v7  ;;  %v1386_v8 = vld [vmem:[%s1734_s5] ss:$0 sm:$0xff] (!%p428_p3)  ;;  %v1530_v19 = vmov (!%p428_p3), 1   ;;  %v1531_v20 = vmov (!%p428_p3), 2   ;;  %v1532_v21 = vmov (!%p428_p3), 11  }
   0x8   : > { %v1533_v22 = vmov (!%p428_p3), 3   ;;  %v1534_v23 = vmov (!%p428_p3), 12   ;;  %v1535_v24 = vmov (!%p428_p3), 4   ;;  %v1536_v25 = vmov (!%p428_p3), 13   ;;  %s1544_s20 = smov (!%p428_p3), 16   ;;  %s1545_s25 = smov (!%p428_p3), 64  }
   0x9   : > { %1425 = vmatprep.subr.bf16.mxu0 (!%p428_p3), %v1424_v2  ;;  %1429 = vmatprep.subr.bf16.mxu1 (!%p428_p3), %v1424_v2  ;;  %v1537_v26 = vmov (!%p428_p3), 5   ;;  %v1538_v27 = vmov (!%p428_p3), 14   ;;  %v1539_v28 = vmov (!%p428_p3), 6   ;;  %v1540_v29 = vmov (!%p428_p3), 15   ;;  %v944_v44 = vld [vmem:[%s1735_s6] sm:$0xff] (!%p428_p3)  ;;  %s1546_s28 = smov (!%p428_p3), 32  }
   0xa   : > { %1427 = vmatpush3.bf16.msra.mxu0 (!%p428_p3), %v1424_v2  ;;  %1431 = vmatpush3.bf16.msra.mxu1 (!%p428_p3), %v1424_v2  ;;  %v1541_v30 = vmov (!%p428_p3), 7   ;;  %v1542_v31 = vmov (!%p428_p3), 8   ;;  %v1543_v32 = vmov (!%p428_p3), 0   ;;  %s1548_s30 = smov (!%p428_p3), 80   ;;  %s1549_s13 = smov (!%p428_p3), 96   ;;  %v1550_v59 = vmov (!%p428_p3), 0.0  }
   0xb   : > { %v946_v0 = vld [vmem:[%s1738_s9] sm:$0xff] (!%p428_p3)  ;;  %vm923_vm1 = vcmask (!%p428_p3), 261120   ;;  %vm925_vm2 = vcmask (!%p428_p3), 392192   ;;  %vm927_vm3 = vcmask (!%p428_p3), 523264   ;;  %vm929_vm4 = vcmask (!%p428_p3), 654336  }
   0xc   : > { %v945_v1 = vld [vmem:[%s1736_s7] sm:$0xff] (!%p428_p3)  ;;  %vm931_vm5 = vcmask (!%p428_p3), 785408   ;;  %vm933_vm6 = vcmask (!%p428_p3), 916480   ;;  %vm1061_vm7 = vcmask (!%p428_p3), 64512  }
   0xe   : > { %s1747_s21 = smov (!%p501_p4, %s1518_s21), 1 }
   0xf   : > { %s1399_s29 = sshll.u32 %s1747_s21, 4  ;;  %s1397_s27 = sshll.u32 %s1747_s21, 2 }
  0x10   : > { %s528_s14 = scalar_lea.vmem %s1731_s2, %s1399_s29  ;;  %s534_s17 = scalar_lea.vmem %s1732_s3, %s1399_s29 }
  0x11   : > { %v545_v3 = vld [vmem:[%s528_s14] sm:$0xff]  ;;  %v546_v4 = vld [vmem:[%s528_s14 + $0x8] sm:$0xff]  ;;  %s1547_s29 = smov 48   ;;  %s1551_s14 = smov 112  }
  0x12   : > { %v638_v5 = vld [vmem:[%s534_s17] sm:$0xff]  ;;  %1414 = vmatprep.mubr.msk.f32.mxu0 %vm556_vm0, %v545_v3  ;;  %v639_v6 = vld [vmem:[%s534_s17 + $0x8] sm:$0xff]  ;;  %s518_s15 = scalar_lea.vmem %s1730_s1, %s1397_s27  ;;  %s1401_s18 = sshll.u32 %s1747_s21, 3 }
  0x13   : > { %1421 = vmatprep.mubr.msk.f32.mxu1 %vm556_vm0, %v638_v5  ;;  %1415 = vmatmul.mubr.msk.f32.vlgmr.msra.gmra.mrb[0].mxu0 %vm556_vm0, %v546_v4 }
  0x14   : > { %1422 = vmatmul.mubr.msk.f32.vlgmr.msra.gmra.mrb[0].mxu1 %vm556_vm0, %v639_v6  ;;  %1129 = vmatprep.mubr.f32.mxu0 %v1550_v59 }
  0x15   : > { %1224 = vmatprep.mubr.f32.mxu1 %v1550_v59 }
  0xe6   : > { %v1416_v9 = vpop.f32.mrb[0].mxu0 }
  0xe7   : > { %v629_v10 = vpop.f32.mrb[1].mxu0  ;;  %v635_v12 = vadd.f32 %v1416_v9, %v1386_v8  ;;  %v1423_v13 = vpop.f32.mrb[0].mxu1 }
  0xe8   : > { %v630_v11 = vadd.f32 %v1386_v8, %v629_v10  ;;  %v718_v14 = vadd.f32 %v1423_v13, %v1386_v8  ;;  %v712_v15 = vpop.f32.mrb[1].mxu1 }
  0xe9   : > { %v713_v16 = vadd.f32 %v1386_v8, %v712_v15 }
  0xea   : > { %721 = vxpose.xlu0.b32.start [1/2] (short) (narrow) %v630_v11, 8 }
  0xee   : > { %722 = vxpose.xlu0.b32.end [2/2] (short) (narrow) %v635_v12, 8 }
 0x117   : > { %1482 = vset.pattern.permute.xlu0 %v1529_v17 }
 0x16a   : > { %v737_v18 = vpop.trf.xlu0 }
 0x16b   : > { %837 = vperm.xlu0 %1482, %v737_v18   ;;  %832 = vperm.xlu1 %1480, %v737_v18  }
 0x16f   : > { %1481 = vset.pattern.permute.xlu1 %v1530_v19 }
 0x170   : > { %792 = vperm.xlu1 %1481, %v737_v18  }
 0x174   : > { %1483 = vset.pattern.permute.xlu1 %v1531_v20 }
 0x175   : > { %797 = vperm.xlu1 %1483, %v737_v18  }
 0x179   : > { %1484 = vset.pattern.permute.xlu1 %v1532_v21 }
 0x17a   : > { %842 = vperm.xlu1 %1484, %v737_v18  }
 0x17e   : > { %1485 = vset.pattern.permute.xlu1 %v1533_v22 }
 0x17f   : > { %802 = vperm.xlu1 %1485, %v737_v18  }
 0x183   : > { %1486 = vset.pattern.permute.xlu1 %v1534_v23 }
 0x184   : > { %847 = vperm.xlu1 %1486, %v737_v18  }
 0x188   : > { %1487 = vset.pattern.permute.xlu1 %v1535_v24 }
 0x189   : > { %753 = vxpose.xlu0.b32.start [1/2] (short) (narrow) %v713_v16, 8  ;;  %807 = vperm.xlu1 %1487, %v737_v18  }
 0x18d   : > { %754 = vxpose.xlu0.b32.end [2/2] (short) (narrow) %v718_v14, 8  ;;  %1488 = vset.pattern.permute.xlu1 %v1536_v25 }
 0x18e   : > { %852 = vperm.xlu1 %1488, %v737_v18  }
 0x192   : > { %1489 = vset.pattern.permute.xlu1 %v1537_v26 }
 0x193   : > { %812 = vperm.xlu1 %1489, %v737_v18  }
 0x197   : > { %1490 = vset.pattern.permute.xlu1 %v1538_v27 }
 0x198   : > { %857 = vperm.xlu1 %1490, %v737_v18  }
 0x19c   : > { %1491 = vset.pattern.permute.xlu1 %v1539_v28 }
 0x19d   : > { %817 = vperm.xlu1 %1491, %v737_v18  }
 0x1a1   : > { %1492 = vset.pattern.permute.xlu1 %v1540_v29 }
 0x1a2   : > { %862 = vperm.xlu1 %1492, %v737_v18  }
 0x1a6   : > { %1493 = vset.pattern.permute.xlu1 %v1541_v30 }
 0x1a7   : > { %822 = vperm.xlu1 %1493, %v737_v18  }
 0x1ab   : > { %1494 = vset.pattern.permute.xlu1 %v1542_v31 }
 0x1ac   : > { %827 = vperm.xlu1 %1494, %v737_v18  }
 0x1b0   : > { %1495 = vset.pattern.permute.xlu1 %v1543_v32 }
 0x1b1   : > { %787 = vperm.xlu1 %1495, %v737_v18  }
 0x1b6   : > { %1496 = vset.pattern.permute.xlu0 %v1530_v19 }
 0x1ea   : > { %v833_v33 = vpop.permute.xlu1 %832  ;;  %v838_v38 = vpop.permute.xlu0 %837 }
 0x1ef   : > { %v793_v34 = vpop.permute.xlu1 %792 }
 0x1f4   : > { %v798_v35 = vpop.permute.xlu1 %797 }
 0x1f9   : > { %v843_v36 = vpop.permute.xlu1 %842 }
 0x1fe   : > { %v803_v37 = vpop.permute.xlu1 %802 }
 0x203   : > { %v848_v39 = vpop.permute.xlu1 %847 }
 0x208   : > { %v808_v46 = vpop.permute.xlu1 %807 }
 0x209   : > { %v1660_v40 = vpop.trf.xlu0 }
 0x20a   : > { %v835_v41 = vmul.f32 %v833_v33, %v1660_v40  ;;  %v850_v42 = vmul.f32 %v848_v39, %v1660_v40  ;;  %v795_v43 = vmul.f32 %v793_v34, %v1660_v40  ;;  %v840_v45 = vmul.f32 %v838_v38, %v1660_v40  ;;  %v1060_v33 = vld [vmem:[%s1737_s8] sm:$0xff] }
 0x20b   : > { %v800_v47 = vmul.f32 %v798_v35, %v1660_v40  ;;  %v845_v49 = vmul.f32 %v843_v36, %v1660_v40  ;;  %v805_v50 = vmul.f32 %v803_v37, %v1660_v40  ;;  %v810_v52 = vmul.f32 %v808_v46, %v1660_v40  ;;  %v1151_v35 = vld [vmem:[%s1740_s11] sm:$0xf] }
 0x20c   : > { %895 = vrot.lane.b32.xlu1 %v835_v41, %s1544_s20  ;;  %907 = vrot.lane.b32.xlu0 %v850_v42, %s1545_s25  ;;  %v953_v36 = vlaneseq  ;;  %v943_v42 = vld [vmem:[%s518_s15] sm:$0xf] }
 0x20d   : > { %v853_v48 = vpop.permute.xlu1 %852 }
 0x20e   : > { %v855_v54 = vmul.f32 %v853_v48, %v1660_v40  ;;  %v954_v37 = vshrl.u32 %v953_v36, 7 }
 0x210   : > { %867 = vrot.lane.b32.xlu1 %v795_v43, %s1544_s20  ;;  %1009 = vperm.xlu0 %1496, %v944_v44   ;;  %v955_v39 = vsub.s32 0, %v954_v37  ;;  %v1014_v46 = vsub.s32 1, %v954_v37 }
 0x212   : > { %v813_v51 = vpop.permute.xlu1 %812 }
 0x213   : > { %v815_v55 = vmul.f32 %v813_v51, %v1660_v40 }
 0x214   : > { %899 = vrot.lane.b32.xlu1 %v840_v45, %s1546_s28  ;;  %1499 = vset.pattern.permute.xlu0 %v1543_v32  ;;  %v989_v45 = vrot.slane %v943_v42, %v955_v39 }
 0x216   : > { %v999_v51 = vrot.slane %v989_v45, %v955_v39 }
 0x217   : > { %v858_v53 = vpop.permute.xlu1 %857 }
 0x218   : > { %871 = vrot.lane.b32.xlu1 %v800_v47, %s1546_s28  ;;  %v860_v57 = vmul.f32 %v858_v53, %v1660_v40 }
 0x21c   : > { %903 = vrot.lane.b32.xlu1 %v845_v49, %s1547_s29  ;;  %v818_v56 = vpop.permute.xlu1 %817  ;;  %v1018_v49 = vsub.s32 3, %v954_v37 }
 0x21d   : > { %v820_v60 = vmul.f32 %v818_v56, %v1660_v40 }
 0x220   : > { %875 = vrot.lane.b32.xlu1 %v805_v50, %s1547_s29 }
 0x221   : > { %v863_v58 = vpop.permute.xlu1 %862 }
 0x222   : > { %v865_v61 = vmul.f32 %v863_v58, %v1660_v40 }
 0x224   : > { %879 = vrot.lane.b32.xlu1 %v810_v52, %s1545_s25  ;;  %s543_s25 = scalar_lea.vmem %s1741_s12, %s1401_s18 }
 0x226   : > { %v823_v62 = vpop.permute.xlu1 %822 }
 0x227   : > { %v825_v63 = vmul.f32 %v823_v62, %v1660_v40 }
 0x228   : > { %911 = vrot.lane.b32.xlu1 %v855_v54, %s1548_s30 }
 0x22b   : > { %v828_v2 = vpop.permute.xlu1 %827 }
 0x22c   : > { %883 = vrot.lane.b32.xlu1 %v815_v55, %s1548_s30  ;;  %v830_v13 = vmul.f32 %v828_v2, %v1660_v40  ;;  %s508_s30 = scalar_lea.vmem %s1729_s0, %s1397_s27 }
 0x22d   : > { %v942_v41 = vld [vmem:[%s508_s30] sm:$0xf] }
 0x22e   : > { %v1015_v52 = vrot.slane %v942_v41, %v1014_v46  ;;  %v1019_v56 = vrot.slane %v942_v41, %v1018_v49 }
 0x230   : > { %915 = vrot.lane.b32.xlu1 %v860_v57, %s1549_s13  ;;  %v788_v3 = vpop.permute.xlu1 %787  ;;  %v1025_v59 = vrot.slane %v1015_v52, %v1014_v46 }
 0x234   : > { %887 = vrot.lane.b32.xlu1 %v820_v60, %s1549_s13  ;;  %v1041_v60 = vrot.slane %v943_v42, %v1014_v46 }
 0x238   : > { %919 = vrot.lane.b32.xlu1 %v865_v61, %s1551_s14 }
 0x23c   : > { %891 = vrot.lane.b32.xlu1 %v825_v63, %s1551_s14 }
 0x240   : > { %949 = vperm.xlu1 %1495, %v944_v44   ;;  %v956_v44 = vrot.slane %v942_v41, %v955_v39 }
 0x242   : > { %v966_v50 = vrot.slane %v956_v44, %v955_v39 }
 0x244   : > { %975 = vperm.xlu1 %1495, %v946_v0   ;;  %v1029_v0 = vrot.slane %v1019_v56, %v1014_v46 }
 0x248   : > { %982 = vperm.xlu1 %1495, %v945_v1  }
 0x24c   : > { %1497 = vset.pattern.permute.xlu1 %v1530_v19  ;;  %v790_v19 = vmul.f32 %v788_v3, %v1660_v40  ;;  %v959_v40 = vsub.s32 2, %v954_v37 }
 0x24d   : > { %1035 = vperm.xlu1 %1497, %v945_v1   ;;  %v1045_v1 = vrot.slane %v943_v42, %v1018_v49 }
 0x24e   : > { %v960_v47 = vrot.slane %v942_v41, %v959_v40  ;;  %v993_v48 = vrot.slane %v943_v42, %v959_v40 }
 0x250   : > { %v970_v53 = vrot.slane %v960_v47, %v955_v39  ;;  %v1003_v55 = vrot.slane %v993_v48, %v955_v39 }
 0x251   : > { %1498 = vset.pattern.permute.xlu1 %v1543_v32 }
 0x252   : > { %1154 = vperm.xlu1 %1498, %v1151_v35  }
 0x27e   : > { %v896_v4 = vpop.permute.xlu1 %895  ;;  %v908_v20 = vpop.permute.xlu0 %907 }
 0x27f   : > { %v935_v15 = vsel %vm556_vm0, %v830_v13, %v896_v4 }
 0x282   : > { %v868_v5 = vpop.permute.xlu1 %867 }
 0x283   : > { %v922_v22 = vsel %vm556_vm0, %v790_v19, %v868_v5 }
 0x286   : > { %v900_v6 = vpop.permute.xlu1 %899 }
 0x287   : > { %v936_v16 = vsel %vm923_vm1, %v935_v15, %v900_v6  ;;  %v1051_v6 = vrot.slane %v1041_v60, %v1014_v46 }
 0x28a   : > { %v872_v7 = vpop.permute.xlu1 %871 }
 0x28b   : > { %v924_v24 = vsel %vm923_vm1, %v922_v22, %v872_v7 }
 0x28e   : > { %v904_v8 = vpop.permute.xlu1 %903 }
 0x28f   : > { %v937_v17 = vsel %vm925_vm2, %v936_v16, %v904_v8  ;;  %v1010_v63 = vpop.permute.xlu0 %1009 }
 0x290   : > { %v938_v21 = vsel %vm927_vm3, %v937_v17, %v908_v20  ;;  %v1030_v5 = vmul.f32 %v1025_v59, %v1010_v63  ;;  %v1031_v8 = vmul.f32 %v1029_v0, %v1010_v63 }
 0x292   : > { %v876_v9 = vpop.permute.xlu1 %875 }
 0x293   : > { %v926_v27 = vsel %vm925_vm2, %v924_v24, %v876_v9 }
 0x296   : > { %v880_v10 = vpop.permute.xlu1 %879 }
 0x297   : > { %v928_v29 = vsel %vm927_vm3, %v926_v27, %v880_v10  ;;  %v1055_v10 = vrot.slane %v1045_v1, %v1014_v46 }
 0x29a   : > { %v912_v11 = vpop.permute.xlu1 %911 }
 0x29b   : > { %v939_v23 = vsel %vm929_vm4, %v938_v21, %v912_v11 }
 0x29e   : > { %v884_v12 = vpop.permute.xlu1 %883 }
 0x29f   : > { %v930_v30 = vsel %vm929_vm4, %v928_v29, %v884_v12 }
 0x2a2   : > { %v916_v14 = vpop.permute.xlu1 %915 }
 0x2a3   : > { %v940_v25 = vsel %vm931_vm5, %v939_v23, %v916_v14 }
 0x2a6   : > { %v888_v18 = vpop.permute.xlu1 %887 }
 0x2a7   : > { %v932_v31 = vsel %vm931_vm5, %v930_v30, %v888_v18  ;;  %v1150_v30 = vld [vmem:[%s1739_s10] sm:$0xf] }
 0x2aa   : > { %v920_v26 = vpop.permute.xlu1 %919 }
 0x2ab   : > { %v941_v28 = vsel %vm933_vm6, %v940_v25, %v920_v26 }
 0x2ac   : > { %1065 = vmatprep.subr.mxu0 %v941_v28 }
 0x2ae   : > { %v892_v32 = vpop.permute.xlu1 %891 }
 0x2af   : > { %v934_v34 = vsel %vm933_vm6, %v932_v31, %v892_v32 }
 0x2b0   : > { %1066 = vmatpush1.msra.mxu0 %v934_v34 }
 0x2b1   : > { %1391 = vmatmul.mubr.msk.f32.vlgmr.msra.gmra.mrb[2].mxu0 %vm1061_vm7, %v1060_v33 }
 0x2bf   : > { %v950_v38 = vpop.permute.xlu1 %949 }
 0x2c0   : > { %v971_v57 = vmul.f32 %v966_v50, %v950_v38  ;;  %v972_v61 = vmul.f32 %v970_v53, %v950_v38 }
 0x2c3   : > { %v976_v43 = vpop.permute.xlu1 %975 }
 0x2c4   : > { %v978_v2 = vadd.f32 %v976_v43, %v971_v57  ;;  %v979_v3 = vadd.f32 %v976_v43, %v972_v61 }
 0x2c7   : > { %v983_v54 = vpop.permute.xlu1 %982 }
 0x2c8   : > { %v1004_v58 = vmul.f32 %v999_v51, %v983_v54  ;;  %v1005_v62 = vmul.f32 %v1003_v55, %v983_v54 }
 0x2ca   : > { %v1006_v4 = vadd.f32 %v1004_v58, %v978_v2  ;;  %v1007_v7 = vadd.f32 %v1005_v62, %v979_v3 }
 0x2cc   : > { %v1036_v9 = vpop.permute.xlu1 %1035  ;;  %v1032_v11 = vadd.f32 %v1030_v5, %v1006_v4  ;;  %v1033_v13 = vadd.f32 %v1031_v8, %v1007_v7 }
 0x2cd   : > { %v1056_v12 = vmul.f32 %v1051_v6, %v1036_v9  ;;  %v1057_v14 = vmul.f32 %v1055_v10, %v1036_v9 }
 0x2cf   : > { %v1058_v15 = vadd.f32 %v1056_v12, %v1032_v11  ;;  %v1059_v17 = vadd.f32 %v1057_v14, %v1033_v13 }
 0x2d1   : > { %v1155_v32 = vpop.permute.xlu1 %1154 }
 0x384   : > { %v1131_v16 = vpop.f32.mrb[2].mxu0 }
 0x385   : > { %v1136_v18 = vadd.f32 %v1131_v16, %v1058_v15  ;;  %v1133_v19 = vpop.f32.mrb[3].mxu0 }
 0x386   : > { %v1137_v20 = vadd.f32 %v1133_v19, %v1059_v17 }
 0x387   : > { %v1140_v21 = vmin.f32 %v1136_v18, 0.0  ;;  %vm1138_vm9 = vcmp.gt.f32.partialorder %v1136_v18, 0.0 }
 0x388   : > { %v1141_v22 = vmin.f32 %v1137_v20, 0.0  ;;  %vm1139_vm8 = vcmp.gt.f32.partialorder %v1137_v20, 0.0 }
 0x389   : > { %v1142_v23 = vmul.f32 1.442695, %v1140_v21 }
 0x38a   : > { %v1144_v24 = vmul.f32 1.442695, %v1141_v22 }
 0x38b   : > { %1500 = vpow2.f32 %v1142_v23 }
 0x38c   : > { %1502 = vpow2.f32 %v1144_v24 }
 0x395   : > { %v1501_v25 = vpop.eup %1500 }
 0x396   : > { %v1503_v26 = vpop.eup %1502  ;;  %v1392_v27 = vadd.f32 -1.0, %v1501_v25 }
 0x397   : > { %v1393_v28 = vadd.f32 -1.0, %v1503_v26 }
 0x398   : > { %v1148_v31 = vsel %vm1138_vm9, %v1136_v18, %v1392_v27 }
 0x399   : > { %v1149_v29 = vsel %vm1139_vm8, %v1137_v20, %v1393_v28 }
 0x39a   : > { %1160 = vmatprep.subr.mxu1 %v1149_v29 }
 0x39b   : > { %1161 = vmatpush1.msra.mxu1 %v1148_v31 }
 0x39c   : > { %1394 = vmatmul.mubr.msk.f32.vlgmr.msra.gmra.mrb[2].mxu1 %vm1061_vm7, %v1150_v30 }
 0x46f   : > { %v1226_v33 = vpop.f32.mrb[2].mxu1 }
 0x470   : > { %v1227_v34 = vadd.f32 %v1226_v33, %v1155_v32  ;;  %v1228_v35 = vpop.f32.mrb[3].mxu1 }
 0x471   : > { %v1229_v36 = vadd.f32 %v1228_v35, %v1155_v32 }
 0x473   : > { %v1233_v37 = vcombine.low %v1227_v34, %v1229_v36 }
 0x475   : > { %1235 = vst [vmem:[%s543_s25] sm:$0xff] %v1233_v37 }
 0x476 PF: > { %s22_s23 = sadd.s32 1, %s1526_s23   ;;  %s1742_s21 = smov %s1522_s22 }
 0x477   : > { %p19_p5 = scmp.ge.s32.totalorder %s22_s23, 4   ;;  %s1743_s22 = smov %s1745_s24 }
 0x479   :  { %21 = sbr.rel (!%p19_p5) target bundleno = 2 (0x2), region = 107 }

// kernel: edge_score_network_forward.9
= control target key start
LH: loop header
LB: loop body
LE: loop exit
PB: predicated region body
PF: predicated region fallthrough
CT: control target
= control target key end

     0   :  { %s2941_s21 = smov 0   ;;  %s3217_s0 = inlined_call_operand.vmem [shape: f32[2,16,16], index: 0, kind: input, shape index: {}]   ;;  %s3218_s1 = inlined_call_operand.vmem [shape: f32[2,2,16,16], index: 1, kind: input, shape index: {}]   ;;  %s3219_s2 = inlined_call_operand.vmem [shape: f32[2,16,1], index: 2, kind: input, shape index: {}]   ;;  %s3220_s3 = inlined_call_operand.vmem [shape: f32[2,16,32], index: 3, kind: input, shape index: {}]   ;;  %s3221_s4 = inlined_call_operand.vmem [shape: f32[2,1,32], index: 4, kind: input, shape index: {}]   ;;  %s3222_s5 = inlined_call_operand.vmem [shape: f32[2,16,16], index: 5, kind: input, shape index: {}]   ;;  %s3223_s6 = inlined_call_operand.vmem [shape: f32[2,1,16], index: 6, kind: input, shape index: {}]   ;;  %s3224_s7 = inlined_call_operand.vmem [shape: f32[32,8], index: 7, kind: input, shape index: {}]   ;;  %s3225_s8 = inlined_call_operand.vmem [shape: f32[1,8], index: 8, kind: input, shape index: {}]   ;;  %s3226_s9 = inlined_call_operand.vmem [shape: f32[8,16], index: 9, kind: input, shape index: {}]   ;;  %s3227_s10 = inlined_call_operand.vmem [shape: f32[1,16], index: 10, kind: input, shape index: {}]   ;;  %s3228_s11 = inlined_call_operand.vmem [shape: f32[2,2,16,16], index: 11, kind: output, shape index: {0}]   ;;  %s3229_s12 = inlined_call_operand.vmem [shape: f32[2,16,16], index: 12, kind: output, shape index: {1}]  }
   0x1 LB: > { %s2367_s22 = sadd.s32 4294967295, %s2864_s21   ;;  %p2371_p0 = scmp.ge.s32.totalorder %s2864_s21, 1  ;;  %s2864_s21 = sphi %s2941_s21, %s23_s21  }
   0x2   : > { %p385_p1 = scmp.lt.s32.totalorder %s2864_s21, 3 }
   0x4   : > { %p386_p2 = pnand %p2371_p0, %p385_p1 }
   0x5   : > { %v499_v0 = vld [vmem:[%s3220_s3] sm:$0xff] (!%p386_p2)  ;;  %v500_v1 = vld [vmem:[%s3220_s3 + $0x8] sm:$0xff] (!%p386_p2)  ;;  %p442_p3 = scmp.lt.s32.totalorder (!%p386_p2), %s2367_s22, 1  ;;  %v469_v3 = vlaneseq (!%p386_p2)  ;;  %vm488_vm0 = vcmask (!%p386_p2), 130048   ;;  %v2866_v10 = vmov (!%p386_p2), 0.0   ;;  %vm847_vm3 = vcmask (!%p386_p2), 31744  }
   0x6   : > { %389 = sbr.rel (%p386_p2) target bundleno = 1644 (0x66c), region = 64  ;;  %v676_v2 = vld [vmem:[%s3222_s5] sm:$0xff] (!%p386_p2)  ;;  %v2662_v4 = vpack.c.bf16 (!%p386_p2), %v500_v1, %v499_v0  ;;  %v677_v5 = vld [vmem:[%s3222_s5 + $0x8] sm:$0xff] (!%p386_p2)  ;;  %s2867_s25 = smov (!%p386_p2), 120   ;;  %vm3047_vm4 = vmpackc.low (!%p386_p2), %vm847_vm3, %vm847_vm3  ;;  %vm2053_vm5 = vcmask (!%p386_p2), 261120   ;;  %vm2155_vm6 = vcmask (!%p386_p2), 64512  }
   0x7   : > { %v2670_v6 = vpack.c.bf16 (!%p386_p2), %v677_v5, %v676_v2  ;;  %v470_v7 = vshrl.u32 (!%p386_p2), %v469_v3, 7  ;;  %v473_v8 = vand.u32 (!%p386_p2), 127, %v469_v3  ;;  %v2388_v42 = vld [vmem:[%s3221_s4] ss:$0 sm:$0xff] (!%p386_p2)  ;;  %s2868_s26 = smov (!%p386_p2), 112   ;;  %s2869_s27 = smov (!%p386_p2), 104  }
   0x8   : > { %2663 = vmatprep.subr.bf16.mxu0 (!%p386_p2), %v2662_v4  ;;  %s2870_s28 = smov (!%p386_p2), 100   ;;  %s2871_s29 = smov (!%p386_p2), 108   ;;  %v2413_v5 = vld [vmem:[%s3220_s3 + $0x18] sm:$0xff] (!%p386_p2) }
   0x9   : > { %2665 = vmatpush3.bf16.msra.mxu0 (!%p386_p2), %v2662_v4  ;;  %vm474_vm1 = vcmp.eq.s32.totalorder (!%p386_p2), %v470_v7, %v473_v8  ;;  %v471_v9 = vadd.s32 (!%p386_p2), 8, %v470_v7  ;;  %s2872_s30 = smov (!%p386_p2), 124   ;;  %s2873_s15 = smov (!%p386_p2), 116   ;;  %v2412_v4 = vld [vmem:[%s3220_s3 + $0x10] sm:$0xff] (!%p386_p2) }
   0xa   : > { %2671 = vmatprep.subr.bf16.mxu0 (!%p386_p2), %v2670_v6  ;;  %v2971_v11 = vsel (!%p386_p2), %vm474_vm1, 1.0, %v2866_v10  ;;  %s2875_s23 = smov (!%p386_p2), 16  }
   0xb   : > { %v482_v14 = vsub.f32 (!%p386_p2), 1.0, %v2971_v11  ;;  %vm475_vm2 = vcmp.eq.s32.totalorder (!%p386_p2), %v471_v9, %v473_v8  ;;  %v2420_v8 = vld [vmem:[%s3222_s5 + $0x10] sm:$0xff] (!%p386_p2)  ;;  %v2421_v9 = vld [vmem:[%s3222_s5 + $0x18] sm:$0xff] (!%p386_p2) }
   0xc   : > { %v2383_v16 = vsel (!%p386_p2), %vm475_vm2, 1.0, %v2866_v10  ;;  %v2710_v10 = vpack.c.bf16 (!%p386_p2), %v2421_v9, %v2420_v8 }
   0xd   : > { %s3233_s22 = smov (!%p442_p3, %s2367_s22), 1  ;;  %v483_v19 = vsub.f32 1.0, %v2383_v16 }
   0xe   : > { %s2964_s13 = sshll.u32 %s3233_s22, 4  ;;  %s2457_s14 = sshll.u32 %s3233_s22, 5 }
   0xf   : > { %s446_s17 = scalar_lea.vmem %s3217_s0, %s2964_s13  ;;  %s2982_s20 = scalar_lea.vmem %s3218_s1, %s2457_s14 }
  0x10   : > { %v2973_v12 = vld [vmem:[%s446_s17] sm:$0xff]  ;;  %v2975_v13 = vld [vmem:[%s446_s17 + $0x8] sm:$0xff]  ;;  %v2411_v51 = vld [vmem:[%s2982_s20 + $0x18] sm:$0xff]  ;;  %s3121_s24 = scalar_lea.vmem %s3219_s2, %s2964_s13  ;;  %s466_s16 = scalar_lea.vmem %s3229_s12, %s2964_s13 }
  0x11   : > { %2538 = vmatprep.mubr.msk.f32.mxu0 %vm488_vm0, %v2973_v12  ;;  %v480_v15 = vld [vmem:[%s2982_s20] sm:$0xff]  ;;  %v481_v17 = vld [vmem:[%s2982_s20 + $0x8] sm:$0xff]  ;;  %v1262_v52 = vmul.f32 %v2411_v51, %v483_v19  ;;  %v2410_v55 = vld [vmem:[%s2982_s20 + $0x10] sm:$0xff] }
  0x12   : > { %2539 = vmatmul.mubr.msk.f32.vlgmr.msra.gmra.mrb[0].mxu0 %vm488_vm0, %v2975_v13  ;;  %v484_v18 = vmul.f32 %v482_v14, %v480_v15  ;;  %v485_v21 = vmul.f32 %v483_v19, %v481_v17  ;;  %v1261_v56 = vmul.f32 %v2410_v55, %v482_v14 }
  0x13   : > { %2673 = vmatpush3.bf16.msra.mxu0 %v2670_v6  ;;  %2552 = vmatprep.mubr.msk.f32.mxu0 %vm488_vm0, %v2973_v12  ;;  %v3027_v53 = vadd.f32 %v2383_v16, %v1262_v52  ;;  %v2702_v6 = vpack.c.bf16 %v2413_v5, %v2412_v4  ;;  %v2419_v5 = vld [vmem:[%s3221_s4 + $0x1] ss:$0 sm:$0xff] }
  0x14   : > { %v486_v20 = vadd.f32 %v2971_v11, %v484_v18  ;;  %v487_v23 = vadd.f32 %v2383_v16, %v485_v21  ;;  %v3035_v57 = vadd.f32 %v2971_v11, %v1261_v56 }
  0x15   : > { %v1268_v54 = vsel %vm488_vm0, %v3027_v53, 0.0 }
  0x16   : > { %2553 = vmatmul.mubr.msk.f32.vlgmr.msra.gmra.mrb[2].mxu0 %vm488_vm0, %v2975_v13  ;;  %v489_v22 = vsel %vm488_vm0, %v486_v20, 0.0  ;;  %2545 = vmatprep.mubr.msk.f32.mxu1 %vm488_vm0, %v486_v20  ;;  %v492_v24 = vsel %vm488_vm0, %v487_v23, 0.0  ;;  %v1265_v58 = vsel %vm488_vm0, %v3035_v57, 0.0 }
  0x17   : > { %490 = vadd.xlane.f32.xlu0 %v489_v22 }
  0x1b   : > { %493 = vadd.xlane.f32.xlu0 %v492_v24 }
  0xa4   : > { %v491_v25 = vpop.xlane.xlu0 %490 }
  0xa5   : > { %v495_v28 = vmax.f32 %v491_v25, 1.0 }
  0xa8   : > { %v494_v26 = vpop.xlane.xlu0 %493 }
  0xa9   : > { %v496_v27 = vmax.f32 %v494_v26, 1.0 }
  0xab   : > { %2810 = vrsqrt.f32 %v496_v27 }
  0xac   : > { %2812 = vrsqrt.f32 %v495_v28 }
  0xb5   : > { %v3001_v29 = vpop.eup %2810 }
  0xb6   : > { %v3003_v31 = vpop.eup %2812 }
  0xe5   : > { %v2540_v30 = vpop.f32.mrb[0].mxu0 }
  0xe6   : > { %v583_v32 = vmul.f32 %v3001_v29, %v2540_v30  ;;  %v573_v33 = vpop.f32.mrb[1].mxu0 }
  0xe7   : > { %v582_v34 = vmul.f32 %v3003_v31, %v573_v33 }
  0xe9   : > { %v2554_v35 = vpop.f32.mrb[2].mxu0  ;;  %v2666_v36 = vpack.c.bf16 %v583_v32, %v582_v34 }
  0xea   : > { %v754_v37 = vmul.f32 %v3001_v29, %v2554_v35  ;;  %v744_v38 = vpop.f32.mrb[3].mxu0 }
  0xeb   : > { %v753_v39 = vmul.f32 %v3003_v31, %v744_v38  ;;  %2667 = vmatprep.subr.bf16.mxu1 %v2666_v36 }
  0xec   : > { %2669 = vmatpush3.bf16.msra.mxu1 %v2666_v36 }
  0xed   : > { %v2674_v40 = vpack.c.bf16 %v754_v37, %v753_v39 }
  0xef   : > { %2546 = vmatmul.mubr.msk.f32.vlgmr.msra.gmra.mrb[0].mxu1 %vm488_vm0, %v487_v23  ;;  %2675 = vmatprep.subr.bf16.mxu1 %v2674_v40 }
  0xf0   : > { %2677 = vmatpush3.bf16.msra.mxu1 %v2674_v40  ;;  %2559 = vmatprep.mubr.msk.f32.mxu1 %vm488_vm0, %v486_v20 }
  0xf3   : > { %2560 = vmatmul.mubr.msk.f32.vlgmr.msra.gmra.mrb[2].mxu1 %vm488_vm0, %v487_v23 }
 0x1c2   : > { %v2547_v41 = vpop.f32.mrb[0].mxu1 }
 0x1c3   : > { %v666_v43 = vmul.f32 %v3001_v29, %v2547_v41  ;;  %v656_v44 = vpop.f32.mrb[1].mxu1 }
 0x1c4   : > { %v665_v45 = vmul.f32 %v3003_v31, %v656_v44 }
 0x1c5   : > { %v675_v46 = vadd.f32 %v2388_v42, %v666_v43 }
 0x1c6   : > { %v674_v47 = vadd.f32 %v2388_v42, %v665_v45  ;;  %v3017_v48 = vpop.f32.mrb[2].mxu1 }
 0x1c7   : > { %v3019_v49 = vpop.f32.mrb[3].mxu1 }
 0x1c8   : > { %1028 = vrot.lane.b32.xlu0 %v674_v47, %s2867_s25  ;;  %2566 = vmatprep.mubr.msk.f32.mxu0 %vm847_vm3, %v674_v47  ;;  %v2768_v50 = vpack.i.bf16 %v675_v46, %v674_v47 }
 0x1ca   : > { %2769 = vrot.lane.b32.xlu1 %v2768_v50, %s2868_s26 }
 0x1ce   : > { %2774 = vrot.lane.b32.xlu1 %v2768_v50, %s2869_s27 }
 0x1d2   : > { %1030 = vrot.lane.b32.xlu1 %v675_v46, %s2867_s25 }
 0x1e7   : > { %1269 = vadd.xlane.f32.xlu0 %v1268_v54 }
 0x1f6   : > { %1266 = vadd.xlane.f32.xlu1 %v1265_v58 }
 0x1fd   : > { %2784 = vrot.lane.b32.xlu0 %v2768_v50, %s2870_s28 }
 0x207   : > { %2779 = vrot.lane.b32.xlu1 %v2768_v50, %s2871_s29 }
 0x20b   : > { %935 = vrot.lane.b32.xlu1 %v675_v46, %s2872_s30 }
 0x20f   : > { %933 = vrot.lane.b32.xlu1 %v674_v47, %s2872_s30 }
 0x213   : > { %1123 = vrot.lane.b32.xlu1 %v674_v47, %s2873_s15 }
 0x217   : > { %1125 = vrot.lane.b32.xlu1 %v675_v46, %s2873_s15 }
 0x23a   : > { %v1029_v7 = vpop.permute.xlu0 %1028 }
 0x23c   : > { %v2770_v59 = vpop.permute.xlu1 %2769 }
 0x23d   : > { %v2772_v60 = vunpack.i.h.bf16 %v2770_v59  ;;  %v2771_v61 = vunpack.i.l.bf16 %v2770_v59 }
 0x23f   : > { %v2678_v63 = vpack.c.bf16 %v2772_v60, %v2771_v61 }
 0x240   : > { %v2775_v0 = vpop.permute.xlu1 %2774 }
 0x241   : > { %v2777_v1 = vunpack.i.h.bf16 %v2775_v0  ;;  %v2776_v2 = vunpack.i.l.bf16 %v2775_v0  ;;  %2680 = vmatprep.subr.msk.bf16.mxu0 %vm3047_vm4, %v2678_v63 }
 0x242   : > { %2683 = vmatpush3.bf16.xpose.msk.msra.mxu0 %vm3047_vm4, %v2678_v63 }
 0x243   : > { %v2690_v3 = vpack.c.bf16 %v2777_v1, %v2776_v2 }
 0x244   : > { %v1031_v11 = vpop.permute.xlu1 %1030 }
 0x245   : > { %2692 = vmatprep.subr.msk.bf16.mxu0 %vm3047_vm4, %v2690_v3 }
 0x249   : > { %2567 = vmatmul.mubr.msk.f32.vlgmr.msra.gmra.mrb[4].mxu0 %vm847_vm3, %v675_v46 }
 0x24a   : > { %2695 = vmatpush3.bf16.xpose.msk.msra.mxu0 %vm3047_vm4, %v2690_v3  ;;  %2580 = vmatprep.mubr.msk.f32.mxu0 %vm847_vm3, %v1029_v7  ;;  %v2874_v3 = vmov 0  }
 0x24b   : > { %2703 = vmatprep.subr.bf16.mxu0 %v2702_v6  ;;  %2808 = vset.pattern.permute.xlu1 %v2874_v3 }
 0x24c   : > { %2809 = vset.pattern.permute.xlu0 %v2874_v3  ;;  %v2147_v3 = vld [vmem:[%s3226_s9] sm:$0xff] }
 0x251   : > { %2581 = vmatmul.mubr.msk.f32.vlgmr.msra.gmra.mrb[6].mxu0 %vm847_vm3, %v1031_v11 }
 0x252   : > { %2705 = vmatpush3.bf16.msra.mxu0 %v2702_v6  ;;  %2594 = vmatprep.mubr.msk.f32.mxu0 %vm488_vm0, %v2973_v12 }
 0x253   : > { %2711 = vmatprep.subr.bf16.mxu0 %v2710_v10 }
 0x255   : > { %2595 = vmatmul.mubr.msk.f32.vlgmr.msra.gmra.mrb[8].mxu0 %vm488_vm0, %v2975_v13 }
 0x256   : > { %2713 = vmatpush3.bf16.msra.mxu0 %v2710_v10  ;;  %2608 = vmatprep.mubr.msk.f32.mxu0 %vm488_vm0, %v2973_v12 }
 0x259   : > { %2609 = vmatmul.mubr.msk.f32.vlgmr.msra.gmra.mrb[10].mxu0 %vm488_vm0, %v2975_v13 }
 0x274   : > { %v1270_v14 = vpop.xlane.xlu0 %1269 }
 0x275   : > { %v1272_v26 = vmax.f32 %v1270_v14, 1.0 }
 0x277   : > { %2814 = vrsqrt.f32 %v1272_v26 }
 0x278   : > { %v2785_v16 = vpop.permute.xlu0 %2784 }
 0x279   : > { %v2787_v18 = vunpack.i.h.bf16 %v2785_v16  ;;  %v2786_v19 = vunpack.i.l.bf16 %v2785_v16 }
 0x27b   : > { %v2696_v24 = vpack.c.bf16 %v2787_v18, %v2786_v19  ;;  %v2427_v18 = vld [vmem:[%s3223_s6 + $0x1] ss:$0 sm:$0xff] }
 0x281   : > { %v2815_v34 = vpop.eup %2814 }
 0x283   : > { %v1267_v15 = vpop.xlane.xlu1 %1266 }
 0x284   : > { %v1271_v27 = vmax.f32 %v1267_v15, 1.0 }
 0x286   : > { %2816 = vrsqrt.f32 %v1271_v27 }
 0x287   : > { %v2780_v17 = vpop.permute.xlu1 %2779 }
 0x288   : > { %v2782_v20 = vunpack.i.h.bf16 %v2780_v17  ;;  %v2781_v21 = vunpack.i.l.bf16 %v2780_v17 }
 0x28a   : > { %v2684_v22 = vpack.c.bf16 %v2782_v20, %v2781_v21  ;;  %v2237_v21 = vld [vmem:[%s3121_s24] sm:$0xff] }
 0x28b   : > { %v936_v23 = vpop.permute.xlu1 %935 }
 0x28c   : > { %2686 = vmatprep.subr.msk.bf16.mxu1 %vm3047_vm4, %v2684_v22 }
 0x28d   : > { %2689 = vmatpush3.bf16.xpose.msk.msra.mxu1 %vm3047_vm4, %v2684_v22 }
 0x28e   : > { %2698 = vmatprep.subr.msk.bf16.mxu1 %vm3047_vm4, %v2696_v24 }
 0x28f   : > { %v934_v12 = vpop.permute.xlu1 %933 }
 0x290   : > { %2573 = vmatprep.mubr.msk.f32.mxu1 %vm847_vm3, %v934_v12  ;;  %v2817_v36 = vpop.eup %2816 }
 0x293   : > { %v1124_v13 = vpop.permute.xlu1 %1123 }
 0x294   : > { %2574 = vmatmul.mubr.msk.f32.vlgmr.msra.gmra.mrb[4].mxu1 %vm847_vm3, %v936_v23 }
 0x295   : > { %2701 = vmatpush3.bf16.xpose.msk.msra.mxu1 %vm3047_vm4, %v2696_v24  ;;  %2587 = vmatprep.mubr.msk.f32.mxu1 %vm847_vm3, %v1124_v13 }
 0x297   : > { %v1126_v25 = vpop.permute.xlu1 %1125 }
 0x29c   : > { %2588 = vmatmul.mubr.msk.f32.vlgmr.msra.gmra.mrb[6].mxu1 %vm847_vm3, %v1126_v25 }
 0x29d   : > { %2601 = vmatprep.mubr.msk.f32.mxu1 %vm488_vm0, %v3035_v57 }
 0x31c   : > { %v2568_v28 = vpop.f32.mrb[4].mxu0 }
 0x31d   : > { %v922_v30 = vpop.f32.mrb[5].mxu0  ;;  %2818 = vtanh.f32 %v2568_v28 }
 0x31e   : > { %2820 = vtanh.f32 %v922_v30 }
 0x324   : > { %v2582_v32 = vpop.f32.mrb[6].mxu0 }
 0x325   : > { %v1110_v33 = vpop.f32.mrb[7].mxu0 }
 0x327   : > { %v2819_v51 = vpop.eup %2818 }
 0x328   : > { %v2596_v35 = vpop.f32.mrb[8].mxu0  ;;  %v2821_v54 = vpop.eup %2820 }
 0x329   : > { %v1354_v37 = vmul.f32 %v2815_v34, %v2596_v35  ;;  %v1344_v38 = vpop.f32.mrb[9].mxu0 }
 0x32a   : > { %v1353_v39 = vmul.f32 %v2817_v36, %v1344_v38 }
 0x32c   : > { %v2706_v40 = vpack.c.bf16 %v1354_v37, %v1353_v39  ;;  %v2610_v41 = vpop.f32.mrb[10].mxu0  ;;  %v2043_v37 = vld [vmem:[%s3224_s7 + $0x8] sm:$0xff] }
 0x32d   : > { %v1527_v42 = vmul.f32 %v2815_v34, %v2610_v41  ;;  %v1517_v43 = vpop.f32.mrb[11].mxu0 }
 0x32e   : > { %v1526_v44 = vmul.f32 %v2817_v36, %v1517_v43  ;;  %2707 = vmatprep.subr.bf16.mxu1 %v2706_v40 }
 0x32f   : > { %2709 = vmatpush3.bf16.msra.mxu1 %v2706_v40 }
 0x330   : > { %v2714_v45 = vpack.c.bf16 %v1527_v42, %v1526_v44 }
 0x332   : > { %2602 = vmatmul.mubr.msk.f32.vlgmr.msra.gmra.mrb[8].mxu1 %vm488_vm0, %v3027_v53  ;;  %2715 = vmatprep.subr.bf16.mxu1 %v2714_v45 }
 0x333   : > { %2717 = vmatpush3.bf16.msra.mxu1 %v2714_v45  ;;  %2615 = vmatprep.mubr.msk.f32.mxu1 %vm488_vm0, %v3035_v57  ;;  %v830_v45 = vmul.f32 %v3003_v31, %v3019_v49 }
 0x336   : > { %2616 = vmatmul.mubr.msk.f32.vlgmr.msra.gmra.mrb[10].mxu1 %vm488_vm0, %v3027_v53 }
 0x367   : > { %v2575_v46 = vpop.f32.mrb[4].mxu1 }
 0x368   : > { %2822 = vtanh.f32 %v2575_v46  ;;  %v1015_v47 = vpop.f32.mrb[5].mxu1 }
 0x369   : > { %2824 = vtanh.f32 %v1015_v47  ;;  %v2393_v47 = vld [vmem:[%s3223_s6] ss:$0 sm:$0xff] }
 0x36a   : > { %2826 = vtanh.f32 %v2582_v32  ;;  %v839_v31 = vadd.f32 %v2393_v47, %v830_v45 }
 0x36b   : > { %2828 = vtanh.f32 %v1110_v33 }
 0x36f   : > { %v2589_v50 = vpop.f32.mrb[6].mxu1 }
 0x370   : > { %2830 = vtanh.f32 %v2589_v50  ;;  %v1205_v52 = vpop.f32.mrb[7].mxu1 }
 0x371   : > { %2832 = vtanh.f32 %v1205_v52  ;;  %v2045_v52 = vld [vmem:[%s3224_s7 + $0x18] sm:$0xff] }
 0x372   : > { %v2823_v55 = vpop.eup %2822 }
 0x373   : > { %v2825_v56 = vpop.eup %2824  ;;  %v1027_v57 = vadd.f32 %v2823_v55, %v2819_v51  ;;  %v2044_v51 = vld [vmem:[%s3224_s7 + $0x10] sm:$0xff] }
 0x374   : > { %v2827_v58 = vpop.eup %2826  ;;  %v1026_v59 = vadd.f32 %v2825_v56, %v2821_v54  ;;  %v2746_v49 = vpack.c.bf16 %v2045_v52, %v2044_v51  ;;  %v831_v56 = vmul.f32 %v3001_v29, %v3017_v48 }
 0x375   : > { %v2829_v53 = vpop.eup %2828  ;;  %v1122_v60 = vadd.f32 %v2827_v58, %v1027_v57 }
 0x376   : > { %v1121_v61 = vadd.f32 %v2829_v53, %v1026_v59  ;;  %v840_v59 = vadd.f32 %v2393_v47, %v831_v56 }
 0x37a   : > { %v2831_v63 = vpop.eup %2830 }
 0x37b   : > { %v2833_v0 = vpop.eup %2832  ;;  %v1217_v1 = vadd.f32 %v2831_v63, %v1122_v60 }
 0x37c   : > { %v1216_v2 = vadd.f32 %v2833_v0, %v1121_v61 }
 0x37d   : > { %v3129_v23 = vmul.f32 0.25, %v1217_v1 }
 0x37e   : > { %v3126_v22 = vmul.f32 0.25, %v1216_v2  ;;  %v2238_v2 = vld [vmem:[%s3121_s24 + $0x8] sm:$0xff] }
 0x405   : > { %v2603_v4 = vpop.f32.mrb[8].mxu1 }
 0x406   : > { %v1437_v6 = vmul.f32 %v2815_v34, %v2603_v4  ;;  %v1427_v7 = vpop.f32.mrb[9].mxu1 }
 0x407   : > { %v1436_v8 = vmul.f32 %v2817_v36, %v1427_v7 }
 0x408   : > { %v1447_v9 = vadd.f32 %v2419_v5, %v1437_v6 }
 0x409   : > { %v1446_v10 = vadd.f32 %v2419_v5, %v1436_v8  ;;  %v2617_v11 = vpop.f32.mrb[10].mxu1 }
 0x40a   : > { %v1594_v14 = vpop.f32.mrb[11].mxu1  ;;  %v1604_v16 = vmul.f32 %v2815_v34, %v2617_v11 }
 0x40b   : > { %2622 = vmatprep.mubr.msk.f32.mxu0 %vm847_vm3, %v1446_v10  ;;  %v2793_v15 = vpack.i.bf16 %v1447_v9, %v1446_v10  ;;  %v1603_v17 = vmul.f32 %v2817_v36, %v1594_v14  ;;  %v2042_v36 = vld [vmem:[%s3224_s7] sm:$0xff] }
 0x40c   : > { %v1614_v19 = vadd.f32 %v2427_v18, %v1604_v16  ;;  %v2742_v38 = vpack.c.bf16 %v2043_v37, %v2042_v36 }
 0x40d   : > { %2794 = vrot.lane.b32.xlu0 %v2793_v15, %s2869_s27  ;;  %2789 = vrot.lane.b32.xlu1 %v2793_v15, %s2868_s26  ;;  %v1613_v20 = vadd.f32 %v2427_v18, %v1603_v17  ;;  %s3186_s27 = scalar_lea.vmem %s3228_s11, %s2457_s14 }
 0x411   : > { %1803 = vrot.lane.b32.xlu0 %v1447_v9, %s2867_s25  ;;  %1801 = vrot.lane.b32.xlu1 %v1446_v10, %s2867_s25 }
 0x415   : > { %2036 = vrot.lane.b32.xlu0 %v1614_v19, %s2875_s23  ;;  %2034 = vrot.lane.b32.xlu1 %v1613_v20, %s2875_s23 }
 0x419   : > { %2804 = vrot.lane.b32.xlu0 %v2793_v15, %s2870_s28  ;;  %2799 = vrot.lane.b32.xlu1 %v2793_v15, %s2871_s29 }
 0x41d   : > { %1708 = vrot.lane.b32.xlu0 %v1447_v9, %s2872_s30  ;;  %1706 = vrot.lane.b32.xlu1 %v1446_v10, %s2872_s30 }
 0x421   : > { %1898 = vrot.lane.b32.xlu0 %v1447_v9, %s2873_s15  ;;  %1896 = vrot.lane.b32.xlu1 %v1446_v10, %s2873_s15  ;;  %v2446_v10 = vld [vmem:[%s3225_s8] ss:$0 sm:$0xff] }
 0x425   : > { %2241 = vperm.xlu1 %2808, %v2237_v21   ;;  %2246 = vperm.xlu0 %2809, %v2238_v2  }
 0x44e   : > { %1220 = vxpose.xlu1.b32.start [1/2] (short) (narrow) %v3126_v22, 16 }
 0x452   : > { %1221 = vxpose.xlu1.b32.end [2/2] (short) (narrow) %v3129_v23, 16 }
 0x47f   : > { %v2795_v24 = vpop.permute.xlu0 %2794  ;;  %v2790_v12 = vpop.permute.xlu1 %2789 }
 0x480   : > { %v2797_v13 = vunpack.i.h.bf16 %v2795_v24  ;;  %v2796_v25 = vunpack.i.l.bf16 %v2795_v24  ;;  %v2792_v26 = vunpack.i.h.bf16 %v2790_v12  ;;  %v2791_v27 = vunpack.i.l.bf16 %v2790_v12 }
 0x482   : > { %v2718_v28 = vpack.c.bf16 %v2792_v26, %v2791_v27  ;;  %v2730_v33 = vpack.c.bf16 %v2797_v13, %v2796_v25 }
 0x483   : > { %v1804_v30 = vpop.permute.xlu0 %1803  ;;  %v1802_v32 = vpop.permute.xlu1 %1801 }
 0x484   : > { %2720 = vmatprep.subr.msk.bf16.mxu0 %vm3047_vm4, %v2718_v28 }
 0x485   : > { %2723 = vmatpush3.bf16.xpose.msk.msra.mxu0 %vm3047_vm4, %v2718_v28 }
 0x486   : > { %2732 = vmatprep.subr.msk.bf16.mxu0 %vm3047_vm4, %v2730_v33 }
 0x487   : > { %v2037_v34 = vpop.permute.xlu0 %2036  ;;  %v2035_v35 = vpop.permute.xlu1 %2034 }
 0x488   : > { %v2040_v55 = vsel %vm488_vm0, %v839_v31, %v2035_v35  ;;  %v2041_v53 = vsel %vm488_vm0, %v840_v59, %v2037_v34  ;;  %v2451_v31 = vld [vmem:[%s3227_s10] ss:$0 sm:$0xff] }
 0x48b   : > { %v2805_v39 = vpop.permute.xlu0 %2804  ;;  %v2800_v40 = vpop.permute.xlu1 %2799 }
 0x48c   : > { %v2807_v41 = vunpack.i.h.bf16 %v2805_v39  ;;  %v2806_v42 = vunpack.i.l.bf16 %v2805_v39  ;;  %v2802_v43 = vunpack.i.h.bf16 %v2800_v40  ;;  %v2801_v44 = vunpack.i.l.bf16 %v2800_v40  ;;  %2623 = vmatmul.mubr.msk.f32.vlgmr.msra.gmra.mrb[12].mxu0 %vm847_vm3, %v1447_v9 }
 0x48d   : > { %2735 = vmatpush3.bf16.xpose.msk.msra.mxu0 %vm3047_vm4, %v2730_v33  ;;  %2636 = vmatprep.mubr.msk.f32.mxu0 %vm847_vm3, %v1802_v32 }
 0x48e   : > { %v2724_v46 = vpack.c.bf16 %v2802_v43, %v2801_v44  ;;  %2743 = vmatprep.subr.bf16.mxu0 %v2742_v38  ;;  %v2736_v54 = vpack.c.bf16 %v2807_v41, %v2806_v42 }
 0x48f   : > { %v1707_v50 = vpop.permute.xlu1 %1706  ;;  %v1709_v57 = vpop.permute.xlu0 %1708 }
 0x490   : > { %2726 = vmatprep.subr.msk.bf16.mxu1 %vm3047_vm4, %v2724_v46  ;;  %2629 = vmatprep.mubr.msk.f32.mxu1 %vm847_vm3, %v1707_v50 }
 0x491   : > { %2729 = vmatpush3.bf16.xpose.msk.msra.mxu1 %vm3047_vm4, %v2724_v46 }
 0x492   : > { %2738 = vmatprep.subr.msk.bf16.mxu1 %vm3047_vm4, %v2736_v54 }
 0x493   : > { %v1897_v58 = vpop.permute.xlu1 %1896  ;;  %v1899_v60 = vpop.permute.xlu0 %1898 }
 0x494   : > { %2637 = vmatmul.mubr.msk.f32.vlgmr.msra.gmra.mrb[14].mxu0 %vm847_vm3, %v1804_v30 }
 0x495   : > { %2745 = vmatpush3.bf16.msra.mxu0 %v2742_v38  ;;  %2654 = vmatprep.mubr.msk.f32.mxu0 %vm2053_vm5, %v2040_v55 }
 0x496   : > { %2747 = vmatprep.subr.bf16.mxu0 %v2746_v49 }
 0x498   : > { %2630 = vmatmul.mubr.msk.f32.vlgmr.msra.gmra.mrb[12].mxu1 %vm847_vm3, %v1709_v57 }
 0x499   : > { %2741 = vmatpush3.bf16.xpose.msk.msra.mxu1 %vm3047_vm4, %v2736_v54  ;;  %2643 = vmatprep.mubr.msk.f32.mxu1 %vm847_vm3, %v1897_v58 }
 0x49a   : > { %2749 = vmatpush3.bf16.msra.mxu0 %v2746_v49  ;;  %2657 = vmatprep.subr.mxu1 %v2147_v3 }
 0x49d   : > { %2655 = vmatmul.mubr.msk.f32.vlgmr.msra.gmra.mrb[16].mxu0 %vm2053_vm5, %v2041_v53 }
 0x4a0   : > { %2644 = vmatmul.mubr.msk.f32.vlgmr.msra.gmra.mrb[14].mxu1 %vm847_vm3, %v1899_v60 }
 0x4a1   : > { %2658 = vmatpush3.msra.mxu1 %v2147_v3 }
 0x4a4   : > { %v3178_v29 = vpop.permute.xlu1 %2241  ;;  %v2247_v45 = vpop.permute.xlu0 %2246 }
 0x4ce   : > { %v1236_v48 = vpop.trf.xlu1 }
 0x4cf   : > { %v1252_v61 = vadd.f32 %v1236_v48, %v3126_v22 }
 0x4d1   : > { %v1254_v62 = vmul.f32 0.5, %v1252_v61 }
 0x4d2   : > { %v1237_v63 = vpop.trf.xlu1 }
 0x4d3   : > { %1256 = vst.msk [vmem:[%s3186_s27] sm:$0xff] %vm488_vm0, %v1254_v62  ;;  %v1253_v0 = vadd.f32 %v1237_v63, %v3129_v23 }
 0x4d5   : > { %v1255_v1 = vmul.f32 0.5, %v1253_v0 }
 0x4d7   : > { %1257 = vst.msk [vmem:[%s3186_s27 + $0x8] sm:$0xff] %vm488_vm0, %v1255_v1 }
 0x55f   : > { %v2624_v4 = vpop.f32.mrb[12].mxu0 }
 0x560   : > { %v1695_v5 = vpop.f32.mrb[13].mxu0  ;;  %2834 = vtanh.f32 %v2624_v4 }
 0x561   : > { %2836 = vtanh.f32 %v1695_v5 }
 0x567   : > { %v2638_v6 = vpop.f32.mrb[14].mxu0 }
 0x568   : > { %v1883_v7 = vpop.f32.mrb[15].mxu0 }
 0x56a   : > { %v2835_v19 = vpop.eup %2834 }
 0x56b   : > { %v2631_v8 = vpop.f32.mrb[12].mxu1  ;;  %v2837_v22 = vpop.eup %2836 }
 0x56c   : > { %2838 = vtanh.f32 %v2631_v8  ;;  %v1788_v9 = vpop.f32.mrb[13].mxu1 }
 0x56d   : > { %2840 = vtanh.f32 %v1788_v9 }
 0x56e   : > { %2842 = vtanh.f32 %v2638_v6 }
 0x56f   : > { %2844 = vtanh.f32 %v1883_v7 }
 0x570   : > { %v2656_v11 = vpop.f32.mrb[16].mxu0 }
 0x571   : > { %v2132_v14 = vadd.f32 %v2656_v11, %v2446_v10  ;;  %v2126_v15 = vpop.f32.mrb[17].mxu0 }
 0x572   : > { %v2127_v16 = vadd.f32 %v2446_v10, %v2126_v15 }
 0x573   : > { %v2138_v17 = vmin.f32 %v2132_v14, 0.0  ;;  %v2645_v18 = vpop.f32.mrb[14].mxu1  ;;  %vm2136_vm8 = vcmp.gt.f32.partialorder %v2132_v14, 0.0 }
 0x574   : > { %v2137_v20 = vmin.f32 %v2127_v16, 0.0  ;;  %2846 = vtanh.f32 %v2645_v18  ;;  %v1978_v21 = vpop.f32.mrb[15].mxu1  ;;  %vm2135_vm7 = vcmp.gt.f32.partialorder %v2127_v16, 0.0 }
 0x575   : > { %v2141_v23 = vmul.f32 1.442695, %v2138_v17  ;;  %2848 = vtanh.f32 %v1978_v21 }
 0x576   : > { %v2839_v24 = vpop.eup %2838  ;;  %v2139_v12 = vmul.f32 1.442695, %v2137_v20 }
 0x577   : > { %v2841_v13 = vpop.eup %2840  ;;  %v1800_v25 = vadd.f32 %v2839_v24, %v2835_v19  ;;  %2850 = vpow2.f32 %v2141_v23 }
 0x578   : > { %v2843_v26 = vpop.eup %2842  ;;  %2852 = vpow2.f32 %v2139_v12  ;;  %v1799_v27 = vadd.f32 %v2841_v13, %v2837_v22 }
 0x579   : > { %v2845_v28 = vpop.eup %2844  ;;  %v1895_v30 = vadd.f32 %v2843_v26, %v1800_v25 }
 0x57a   : > { %v1894_v32 = vadd.f32 %v2845_v28, %v1799_v27 }
 0x57e   : > { %v2847_v33 = vpop.eup %2846 }
 0x57f   : > { %v2849_v34 = vpop.eup %2848  ;;  %v1990_v35 = vadd.f32 %v2847_v33, %v1895_v30 }
 0x580   : > { %v1989_v36 = vadd.f32 %v2849_v34, %v1894_v32 }
 0x581   : > { %v2851_v37 = vpop.eup %2850  ;;  %v1992_v44 = vmul.f32 0.25, %v1990_v35 }
 0x582   : > { %v2853_v38 = vpop.eup %2852  ;;  %v2450_v39 = vadd.f32 -1.0, %v2851_v37  ;;  %v1991_v40 = vmul.f32 0.25, %v1989_v36 }
 0x583   : > { %v2449_v41 = vadd.f32 -1.0, %v2853_v38 }
 0x584   : > { %1993 = vxpose.xlu0.b32.start [1/2] (short) (narrow) %v1991_v40, 16  ;;  %v2146_v43 = vsel %vm2136_vm8, %v2132_v14, %v2450_v39 }
 0x585   : > { %v2145_v42 = vsel %vm2135_vm7, %v2127_v16, %v2449_v41 }
 0x586   : > { %2659 = vmatprep.mubr.msk.f32.mxu1 %vm2155_vm6, %v2145_v42 }
 0x587   : > { %2660 = vmatmul.mubr.msk.f32.vlgmr.msra.gmra.mrb[16].mxu1 %vm2155_vm6, %v2146_v43 }
 0x588   : > { %1994 = vxpose.xlu0.b32.end [2/2] (short) (narrow) %v1992_v44, 16 }
 0x604   : > { %v2009_v46 = vpop.trf.xlu0 }
 0x605   : > { %v2025_v47 = vadd.f32 %v2009_v46, %v1991_v40 }
 0x607   : > { %v2027_v50 = vmul.f32 0.5, %v2025_v47 }
 0x608   : > { %v2010_v51 = vpop.trf.xlu0 }
 0x609   : > { %2444 = vst.msk [vmem:[%s3186_s27 + $0x10] sm:$0xff] %vm488_vm0, %v2027_v50  ;;  %v2026_v52 = vadd.f32 %v2010_v51, %v1992_v44 }
 0x60b   : > { %v2028_v54 = vmul.f32 0.5, %v2026_v52 }
 0x60d   : > { %2445 = vst.msk [vmem:[%s3186_s27 + $0x18] sm:$0xff] %vm488_vm0, %v2028_v54 }
 0x65a   : > { %v2661_v49 = vpop.f32.mrb[16].mxu1 }
 0x65b   : > { %v2234_v55 = vadd.f32 %v2661_v49, %v2451_v31  ;;  %v2228_v56 = vpop.f32.mrb[17].mxu1 }
 0x65c   : > { %v2229_v57 = vadd.f32 %v2451_v31, %v2228_v56 }
 0x65d   : > { %v2250_v58 = vmul.f32 %v2247_v45, %v2234_v55 }
 0x65e   : > { %v2249_v59 = vmul.f32 %v3178_v29, %v2229_v57 }
 0x65f   : > { %2854 = vtanh.f32 %v2250_v58 }
 0x660   : > { %2856 = vtanh.f32 %v2249_v59 }
 0x669   : > { %v2855_v53 = vpop.eup %2854 }
 0x66a   : > { %v2857_v60 = vpop.eup %2856  ;;  %2254 = vst.msk [vmem:[%s466_s16 + $0x8] sm:$0xff] %vm488_vm0, %v2855_v53 }
 0x66b   : > { %2253 = vst.msk [vmem:[%s466_s16] sm:$0xff] %vm488_vm0, %v2857_v60 }
 0x66c PF: > { %s23_s21 = sadd.s32 1, %s2864_s21  }
 0x66d   : > { %p20_p4 = scmp.ge.s32.totalorder %s23_s21, 4  }
 0x66f   :  { %22 = sbr.rel (!%p20_p4) target bundleno = 1 (0x1), region = 118 }

// kernel: edge_score_network_forward.12
= control target key start
LH: loop header
LB: loop body
LE: loop exit
PB: predicated region body
PF: predicated region fallthrough
CT: control target
= control target key end

     0   :  { %s1723_s21 = smov 0   ;;  %s1725_s22 = smov 0   ;;  %s1871_s0 = inlined_call_operand.vmem [shape: f32[2,4,256], index: 0, kind: input, shape index: {}]   ;;  %s1872_s1 = inlined_call_operand.vmem [shape: f32[2,4,256], index: 1, kind: input, shape index: {}]   ;;  %s1873_s2 = inlined_call_operand.vmem [shape: f32[2,16,16], index: 2, kind: input, shape index: {}, may-alias: {2,3}]   ;;  %s1874_s3 = inlined_call_operand.vmem [shape: f32[2,16,16], index: 3, kind: input, shape index: {}, may-alias: {2,3}]   ;;  %s1875_s4 = inlined_call_operand.vmem [shape: f32[16,8], index: 4, kind: input, shape index: {}]   ;;  %s1876_s5 = inlined_call_operand.vmem [shape: f32[1,8], index: 5, kind: input, shape index: {}]   ;;  %s1877_s6 = inlined_call_operand.vmem [shape: f32[8,4], index: 6, kind: input, shape index: {}]   ;;  %s1878_s7 = inlined_call_operand.vmem [shape: f32[8,4], index: 7, kind: input, shape index: {}]   ;;  %s1879_s8 = inlined_call_operand.vmem [shape: f32[8,8], index: 8, kind: input, shape index: {}]   ;;  %s1880_s9 = inlined_call_operand.vmem [shape: f32[8,1], index: 9, kind: input, shape index: {}]   ;;  %s1881_s10 = inlined_call_operand.vmem [shape: f32[4,8], index: 10, kind: input, shape index: {}]   ;;  %s1882_s11 = inlined_call_operand.vmem [shape: f32[4,1], index: 11, kind: input, shape index: {}]   ;;  %s1883_s12 = inlined_call_operand.vmem [shape: f32[2,4,256], index: 12, kind: output, shape index: {}]  }
   0x1   :  { %s1727_s23 = smov 0  }
   0x2 LB: > { %s34_s24 = sadd.s32 1, %s1628_s22  ;;  %p1479_p0 = scmp.ge.s32.totalorder %s1632_s23, 1  ;;  %s1632_s23 = sphi %s1727_s23, %s22_s23   ;;  %s1628_s22 = sphi %s1725_s22, %s1885_s22   ;;  %s1624_s21 = sphi %s1723_s21, %s1884_s21  }
   0x3   : > { %p36_p1 = scmp.ge.s32.totalorder %s34_s24, 2  ;;  %p427_p2 = scmp.lt.s32.totalorder %s1632_s23, 3 }
   0x5   : > { %s1887_s24 = smov (%p36_p1, %s34_s24), 0  ;;  %p428_p3 = pnand %p1479_p0, %p427_p2 }
   0x6   : > { %v547_v0 = vld [vmem:[%s1875_s4] sm:$0xff] (!%p428_p3)  ;;  %v548_v1 = vld [vmem:[%s1875_s4 + $0x8] sm:$0xff] (!%p428_p3)  ;;  %p501_p4 = scmp.lt.s32.totalorder (!%p428_p3), %s1624_s21, 1  ;;  %vm556_vm0 = vcmask (!%p428_p3), 130048   ;;  %v1634_v7 = vmov (!%p428_p3), 9   ;;  %v1635_v17 = vmov (!%p428_p3), 10  }
   0x7   : > { %431 = sbr.rel (%p428_p3) target bundleno = 1142 (0x476), region = 68  ;;  %v1528_v2 = vpack.c.bf16 (!%p428_p3), %v548_v1, %v547_v0  ;;  %1584 = vset.pattern.permute.xlu1 (!%p428_p3), %v1634_v7  ;;  %v1490_v8 = vld [vmem:[%s1876_s5] ss:$0 sm:$0xff] (!%p428_p3)  ;;  %v1636_v19 = vmov (!%p428_p3), 1   ;;  %v1637_v20 = vmov (!%p428_p3), 2   ;;  %v1638_v21 = vmov (!%p428_p3), 11  }
   0x8   : > { %v1639_v22 = vmov (!%p428_p3), 3   ;;  %v1640_v23 = vmov (!%p428_p3), 12   ;;  %v1641_v24 = vmov (!%p428_p3), 4   ;;  %v1642_v25 = vmov (!%p428_p3), 13   ;;  %s1650_s20 = smov (!%p428_p3), 16   ;;  %s1651_s25 = smov (!%p428_p3), 64  }
   0x9   : > { %1529 = vmatprep.subr.bf16.mxu0 (!%p428_p3), %v1528_v2  ;;  %1533 = vmatprep.subr.bf16.mxu1 (!%p428_p3), %v1528_v2  ;;  %v1643_v26 = vmov (!%p428_p3), 5   ;;  %v1644_v27 = vmov (!%p428_p3), 14   ;;  %v1645_v28 = vmov (!%p428_p3), 6   ;;  %v1646_v29 = vmov (!%p428_p3), 15   ;;  %v944_v44 = vld [vmem:[%s1877_s6] sm:$0xff] (!%p428_p3)  ;;  %s1652_s28 = smov (!%p428_p3), 32  }
   0xa   : > { %1531 = vmatpush3.bf16.msra.mxu0 (!%p428_p3), %v1528_v2  ;;  %1535 = vmatpush3.bf16.msra.mxu1 (!%p428_p3), %v1528_v2  ;;  %v1647_v30 = vmov (!%p428_p3), 7   ;;  %v1648_v31 = vmov (!%p428_p3), 8   ;;  %v1649_v32 = vmov (!%p428_p3), 0   ;;  %v945_v47 = vld [vmem:[%s1878_s7] sm:$0xff] (!%p428_p3)  ;;  %s1653_s13 = smov (!%p428_p3), 48   ;;  %s1655_s15 = smov (!%p428_p3), 96  }
   0xb   : > { %v1656_v60 = vmov (!%p428_p3), 0.0   ;;  %s1657_s16 = smov (!%p428_p3), 112   ;;  %v946_v1 = vld [vmem:[%s1880_s9] sm:$0xff] (!%p428_p3)  ;;  %vm923_vm1 = vcmask (!%p428_p3), 261120   ;;  %vm925_vm2 = vcmask (!%p428_p3), 392192   ;;  %vm927_vm3 = vcmask (!%p428_p3), 523264  }
   0xc   : > { %vm929_vm4 = vcmask (!%p428_p3), 654336   ;;  %vm931_vm5 = vcmask (!%p428_p3), 785408   ;;  %vm933_vm6 = vcmask (!%p428_p3), 916480   ;;  %vm1165_vm7 = vcmask (!%p428_p3), 64512  }
   0xe   : > { %s1889_s21 = smov (!%p501_p4, %s1624_s21), 1 }
   0xf   : > { %s1503_s29 = sshll.u32 %s1889_s21, 4  ;;  %s1814_s27 = sshll.u32 %s1889_s21, 3 }
  0x10   : > { %s528_s14 = scalar_lea.vmem %s1873_s2, %s1503_s29  ;;  %s534_s17 = scalar_lea.vmem %s1874_s3, %s1503_s29 }
  0x11   : > { %v545_v3 = vld [vmem:[%s528_s14] sm:$0xff]  ;;  %v546_v4 = vld [vmem:[%s528_s14 + $0x8] sm:$0xff]  ;;  %s1654_s14 = smov 80   ;;  %s508_s30 = scalar_lea.vmem %s1871_s0, %s1814_s27 }
  0x12   : > { %v638_v5 = vld [vmem:[%s534_s17] sm:$0xff]  ;;  %1518 = vmatprep.mubr.msk.f32.mxu0 %vm556_vm0, %v545_v3  ;;  %v639_v6 = vld [vmem:[%s534_s17 + $0x8] sm:$0xff]  ;;  %s543_s19 = scalar_lea.vmem %s1883_s12, %s1814_s27 }
  0x13   : > { %1525 = vmatprep.mubr.msk.f32.mxu1 %vm556_vm0, %v638_v5  ;;  %1519 = vmatmul.mubr.msk.f32.vlgmr.msra.gmra.mrb[0].mxu0 %vm556_vm0, %v546_v4 }
  0x14   : > { %1526 = vmatmul.mubr.msk.f32.vlgmr.msra.gmra.mrb[0].mxu1 %vm556_vm0, %v639_v6  ;;  %1233 = vmatprep.mubr.f32.mxu0 %v1656_v60 }
  0x15   : > { %1328 = vmatprep.mubr.f32.mxu1 %v1656_v60 }
  0xe6   : > { %v1520_v9 = vpop.f32.mrb[0].mxu0 }
  0xe7   : > { %v629_v10 = vpop.f32.mrb[1].mxu0  ;;  %v635_v12 = vadd.f32 %v1520_v9, %v1490_v8  ;;  %v1527_v13 = vpop.f32.mrb[0].mxu1 }
  0xe8   : > { %v630_v11 = vadd.f32 %v1490_v8, %v629_v10  ;;  %v718_v14 = vadd.f32 %v1527_v13, %v1490_v8  ;;  %v712_v15 = vpop.f32.mrb[1].mxu1 }
  0xe9   : > { %v713_v16 = vadd.f32 %v1490_v8, %v712_v15 }
  0xea   : > { %721 = vxpose.xlu0.b32.start [1/2] (short) (narrow) %v630_v11, 8 }
  0xee   : > { %722 = vxpose.xlu0.b32.end [2/2] (short) (narrow) %v635_v12, 8 }
 0x117   : > { %1586 = vset.pattern.permute.xlu0 %v1635_v17 }
 0x16a   : > { %v737_v18 = vpop.trf.xlu0 }
 0x16b   : > { %837 = vperm.xlu0 %1586, %v737_v18   ;;  %832 = vperm.xlu1 %1584, %v737_v18  }
 0x16f   : > { %1585 = vset.pattern.permute.xlu1 %v1636_v19 }
 0x170   : > { %792 = vperm.xlu1 %1585, %v737_v18  }
 0x174   : > { %1587 = vset.pattern.permute.xlu1 %v1637_v20 }
 0x175   : > { %797 = vperm.xlu1 %1587, %v737_v18  }
 0x179   : > { %1588 = vset.pattern.permute.xlu1 %v1638_v21 }
 0x17a   : > { %842 = vperm.xlu1 %1588, %v737_v18  }
 0x17e   : > { %1589 = vset.pattern.permute.xlu1 %v1639_v22 }
 0x17f   : > { %802 = vperm.xlu1 %1589, %v737_v18  }
 0x183   : > { %1590 = vset.pattern.permute.xlu1 %v1640_v23 }
 0x184   : > { %847 = vperm.xlu1 %1590, %v737_v18  }
 0x188   : > { %1591 = vset.pattern.permute.xlu1 %v1641_v24 }
 0x189   : > { %753 = vxpose.xlu0.b32.start [1/2] (short) (narrow) %v713_v16, 8  ;;  %807 = vperm.xlu1 %1591, %v737_v18  }
 0x18d   : > { %754 = vxpose.xlu0.b32.end [2/2] (short) (narrow) %v718_v14, 8  ;;  %1592 = vset.pattern.permute.xlu1 %v1642_v25 }
 0x18e   : > { %852 = vperm.xlu1 %1592, %v737_v18  }
 0x192   : > { %1593 = vset.pattern.permute.xlu1 %v1643_v26 }
 0x193   : > { %812 = vperm.xlu1 %1593, %v737_v18  }
 0x197   : > { %1594 = vset.pattern.permute.xlu1 %v1644_v27 }
 0x198   : > { %857 = vperm.xlu1 %1594, %v737_v18  }
 0x19c   : > { %1595 = vset.pattern.permute.xlu1 %v1645_v28 }
 0x19d   : > { %817 = vperm.xlu1 %1595, %v737_v18  }
 0x1a1   : > { %1596 = vset.pattern.permute.xlu1 %v1646_v29 }
 0x1a2   : > { %862 = vperm.xlu1 %1596, %v737_v18  }
 0x1a6   : > { %1597 = vset.pattern.permute.xlu1 %v1647_v30 }
 0x1a7   : > { %822 = vperm.xlu1 %1597, %v737_v18  }
 0x1ab   : > { %1598 = vset.pattern.permute.xlu1 %v1648_v31 }
 0x1ac   : > { %827 = vperm.xlu1 %1598, %v737_v18  }
 0x1b0   : > { %1599 = vset.pattern.permute.xlu1 %v1649_v32 }
 0x1b1   : > { %787 = vperm.xlu1 %1599, %v737_v18  }
 0x1b6   : > { %1600 = vset.pattern.permute.xlu0 %v1636_v19 }
 0x1ea   : > { %v833_v33 = vpop.permute.xlu1 %832  ;;  %v838_v38 = vpop.permute.xlu0 %837 }
 0x1ef   : > { %v793_v34 = vpop.permute.xlu1 %792 }
 0x1f4   : > { %v798_v35 = vpop.permute.xlu1 %797 }
 0x1f9   : > { %v843_v36 = vpop.permute.xlu1 %842 }
 0x1fe   : > { %v803_v37 = vpop.permute.xlu1 %802 }
 0x203   : > { %v848_v39 = vpop.permute.xlu1 %847 }
 0x208   : > { %v808_v46 = vpop.permute.xlu1 %807 }
 0x209   : > { %v1767_v40 = vpop.trf.xlu0 }
 0x20a   : > { %v835_v41 = vmul.f32 %v833_v33, %v1767_v40  ;;  %v850_v42 = vmul.f32 %v848_v39, %v1767_v40  ;;  %v795_v43 = vmul.f32 %v793_v34, %v1767_v40  ;;  %v840_v45 = vmul.f32 %v838_v38, %v1767_v40  ;;  %v1164_v33 = vld [vmem:[%s1879_s8] sm:$0xff] }
 0x20b   : > { %v800_v48 = vmul.f32 %v798_v35, %v1767_v40  ;;  %v845_v50 = vmul.f32 %v843_v36, %v1767_v40  ;;  %v805_v51 = vmul.f32 %v803_v37, %v1767_v40  ;;  %v810_v53 = vmul.f32 %v808_v46, %v1767_v40  ;;  %v1255_v35 = vld [vmem:[%s1882_s11] sm:$0xf] }
 0x20c   : > { %895 = vrot.lane.b32.xlu1 %v835_v41, %s1650_s20  ;;  %907 = vrot.lane.b32.xlu0 %v850_v42, %s1651_s25  ;;  %v953_v36 = vlaneseq  ;;  %v1827_v41 = vld [vmem:[%s508_s30] sm:$0xff] }
 0x20d   : > { %v853_v49 = vpop.permute.xlu1 %852 }
 0x20e   : > { %v855_v55 = vmul.f32 %v853_v49, %v1767_v40  ;;  %v1816_v38 = vshrl.u32 %v953_v36, 7 }
 0x210   : > { %867 = vrot.lane.b32.xlu1 %v795_v43, %s1650_s20  ;;  %1009 = vperm.xlu0 %1600, %v944_v44   ;;  %v959_v43 = vsub.s32 4, %v1816_v38  ;;  %v1014_v46 = vsub.s32 1, %v1816_v38 }
 0x212   : > { %v813_v52 = vpop.permute.xlu1 %812 }
 0x213   : > { %v815_v56 = vmul.f32 %v813_v52, %v1767_v40 }
 0x214   : > { %899 = vrot.lane.b32.xlu1 %v840_v45, %s1652_s28  ;;  %1603 = vset.pattern.permute.xlu0 %v1637_v20 }
 0x215   : > { %1087 = vperm.xlu0 %1603, %v945_v47  }
 0x217   : > { %v858_v54 = vpop.permute.xlu1 %857 }
 0x218   : > { %871 = vrot.lane.b32.xlu1 %v800_v48, %s1652_s28  ;;  %v860_v58 = vmul.f32 %v858_v54, %v1767_v40 }
 0x219   : > { %1605 = vset.pattern.permute.xlu0 %v1649_v32 }
 0x21a   : > { %1258 = vperm.xlu0 %1605, %v1255_v35  }
 0x21c   : > { %903 = vrot.lane.b32.xlu1 %v845_v50, %s1653_s13  ;;  %v818_v57 = vpop.permute.xlu1 %817  ;;  %v1018_v50 = vsub.s32 5, %v1816_v38 }
 0x21d   : > { %v820_v61 = vmul.f32 %v818_v57, %v1767_v40  ;;  %v1066_v57 = vsub.s32 2, %v1816_v38 }
 0x220   : > { %875 = vrot.lane.b32.xlu1 %v805_v51, %s1653_s13 }
 0x221   : > { %v863_v59 = vpop.permute.xlu1 %862 }
 0x222   : > { %v865_v62 = vmul.f32 %v863_v59, %v1767_v40  ;;  %v1070_v59 = vsub.s32 6, %v1816_v38 }
 0x224   : > { %879 = vrot.lane.b32.xlu1 %v810_v53, %s1651_s25  ;;  %v1015_v53 = vrot.slane %v1827_v41, %v1014_v46 }
 0x226   : > { %v823_v63 = vpop.permute.xlu1 %822 }
 0x227   : > { %v825_v0 = vmul.f32 %v823_v63, %v1767_v40 }
 0x228   : > { %911 = vrot.lane.b32.xlu1 %v855_v55, %s1654_s14 }
 0x22b   : > { %v828_v2 = vpop.permute.xlu1 %827 }
 0x22c   : > { %883 = vrot.lane.b32.xlu1 %v815_v56, %s1654_s14  ;;  %v830_v13 = vmul.f32 %v828_v2, %v1767_v40  ;;  %v1019_v56 = vrot.slane %v1827_v41, %v1018_v50 }
 0x230   : > { %915 = vrot.lane.b32.xlu1 %v860_v58, %s1655_s15  ;;  %v788_v3 = vpop.permute.xlu1 %787 }
 0x234   : > { %887 = vrot.lane.b32.xlu1 %v820_v61, %s1655_s15  ;;  %s518_s15 = scalar_lea.vmem %s1872_s1, %s1814_s27 }
 0x235   : > { %v1829_v42 = vld [vmem:[%s518_s15] sm:$0xff] }
 0x236   : > { %v993_v49 = vrot.slane %v1829_v42, %v959_v43  ;;  %v1041_v63 = vrot.slane %v1829_v42, %v1014_v46 }
 0x238   : > { %919 = vrot.lane.b32.xlu1 %v865_v62, %s1657_s16  ;;  %v1025_v62 = vrot.slane %v1015_v53, %v1014_v46 }
 0x23c   : > { %891 = vrot.lane.b32.xlu1 %v825_v0, %s1657_s16 }
 0x240   : > { %949 = vperm.xlu1 %1599, %v944_v44  }
 0x244   : > { %975 = vperm.xlu1 %1599, %v946_v1  }
 0x248   : > { %982 = vperm.xlu1 %1599, %v945_v47  }
 0x24c   : > { %1601 = vset.pattern.permute.xlu1 %v1636_v19  ;;  %v790_v19 = vmul.f32 %v788_v3, %v1767_v40  ;;  %v955_v40 = vsub.s32 0, %v1816_v38  ;;  %v1029_v3 = vrot.slane %v1019_v56, %v1014_v46 }
 0x24d   : > { %1035 = vperm.xlu1 %1601, %v945_v47  }
 0x24e   : > { %v989_v45 = vrot.slane %v1829_v42, %v955_v40  ;;  %v1003_v55 = vrot.slane %v993_v49, %v955_v40 }
 0x250   : > { %v999_v52 = vrot.slane %v989_v45, %v955_v40 }
 0x251   : > { %1602 = vset.pattern.permute.xlu1 %v1637_v20 }
 0x252   : > { %1061 = vperm.xlu1 %1602, %v944_v44  }
 0x256   : > { %1604 = vset.pattern.permute.xlu1 %v1639_v22 }
 0x257   : > { %1113 = vperm.xlu1 %1604, %v944_v44   ;;  %v956_v44 = vrot.slane %v1827_v41, %v955_v40 }
 0x259   : > { %v966_v51 = vrot.slane %v956_v44, %v955_v40 }
 0x25b   : > { %1139 = vperm.xlu1 %1604, %v945_v47   ;;  %v960_v47 = vrot.slane %v1827_v41, %v959_v43 }
 0x25d   : > { %v970_v54 = vrot.slane %v960_v47, %v955_v40 }
 0x27e   : > { %v896_v4 = vpop.permute.xlu1 %895  ;;  %v908_v20 = vpop.permute.xlu0 %907 }
 0x27f   : > { %v935_v15 = vsel %vm556_vm0, %v830_v13, %v896_v4  ;;  %v1045_v4 = vrot.slane %v1829_v42, %v1018_v50 }
 0x282   : > { %v868_v5 = vpop.permute.xlu1 %867 }
 0x283   : > { %v922_v22 = vsel %vm556_vm0, %v790_v19, %v868_v5 }
 0x286   : > { %v900_v6 = vpop.permute.xlu1 %899 }
 0x287   : > { %v936_v16 = vsel %vm923_vm1, %v935_v15, %v900_v6  ;;  %v1067_v6 = vrot.slane %v1827_v41, %v1066_v57 }
 0x28a   : > { %v872_v7 = vpop.permute.xlu1 %871 }
 0x28b   : > { %v924_v24 = vsel %vm923_vm1, %v922_v22, %v872_v7 }
 0x28e   : > { %v904_v8 = vpop.permute.xlu1 %903 }
 0x28f   : > { %v937_v17 = vsel %vm925_vm2, %v936_v16, %v904_v8  ;;  %v1010_v2 = vpop.permute.xlu0 %1009  ;;  %v1071_v8 = vrot.slane %v1827_v41, %v1070_v59  ;;  %v1077_v16 = vrot.slane %v1067_v6, %v1066_v57  ;;  %v1254_v6 = vld [vmem:[%s1881_s10] sm:$0xf] }
 0x290   : > { %v938_v21 = vsel %vm927_vm3, %v937_v17, %v908_v20  ;;  %v1031_v13 = vmul.f32 %v1029_v3, %v1010_v2  ;;  %v1093_v17 = vrot.slane %v1829_v42, %v1066_v57  ;;  %v1097_v20 = vrot.slane %v1829_v42, %v1070_v59 }
 0x291   : > { %v1081_v19 = vrot.slane %v1071_v8, %v1066_v57 }
 0x292   : > { %v876_v9 = vpop.permute.xlu1 %875 }
 0x293   : > { %v926_v27 = vsel %vm925_vm2, %v924_v24, %v876_v9 }
 0x296   : > { %v880_v10 = vpop.permute.xlu1 %879 }
 0x297   : > { %v928_v29 = vsel %vm927_vm3, %v926_v27, %v880_v10  ;;  %v1030_v10 = vmul.f32 %v1025_v62, %v1010_v2  ;;  %v1103_v27 = vrot.slane %v1093_v17, %v1066_v57 }
 0x29a   : > { %v912_v11 = vpop.permute.xlu1 %911 }
 0x29b   : > { %v939_v23 = vsel %vm929_vm4, %v938_v21, %v912_v11  ;;  %v1051_v11 = vrot.slane %v1041_v63, %v1014_v46  ;;  %v1122_v21 = vsub.s32 7, %v1816_v38 }
 0x29e   : > { %v884_v12 = vpop.permute.xlu1 %883 }
 0x29f   : > { %v930_v30 = vsel %vm929_vm4, %v928_v29, %v884_v12 }
 0x2a2   : > { %v916_v14 = vpop.permute.xlu1 %915 }
 0x2a3   : > { %v940_v25 = vsel %vm931_vm5, %v939_v23, %v916_v14  ;;  %v1055_v14 = vrot.slane %v1045_v4, %v1014_v46 }
 0x2a6   : > { %v888_v18 = vpop.permute.xlu1 %887 }
 0x2a7   : > { %v932_v31 = vsel %vm931_vm5, %v930_v30, %v888_v18  ;;  %v1118_v18 = vsub.s32 3, %v1816_v38  ;;  %v1088_v30 = vpop.permute.xlu0 %1087 }
 0x2a9   : > { %v1145_v35 = vrot.slane %v1829_v42, %v1118_v18 }
 0x2aa   : > { %v920_v26 = vpop.permute.xlu1 %919 }
 0x2ab   : > { %v941_v28 = vsel %vm933_vm6, %v940_v25, %v920_v26  ;;  %v1155_v46 = vrot.slane %v1145_v35, %v1118_v18  ;;  %v1259_v8 = vpop.permute.xlu0 %1258 }
 0x2ac   : > { %1169 = vmatprep.subr.mxu0 %v941_v28  ;;  %v1119_v28 = vrot.slane %v1827_v41, %v1118_v18 }
 0x2ae   : > { %v892_v32 = vpop.permute.xlu1 %891  ;;  %v1129_v40 = vrot.slane %v1119_v28, %v1118_v18 }
 0x2af   : > { %v934_v34 = vsel %vm933_vm6, %v932_v31, %v892_v32  ;;  %v1107_v31 = vrot.slane %v1097_v20, %v1066_v57 }
 0x2b0   : > { %1170 = vmatpush1.msra.mxu0 %v934_v34 }
 0x2b1   : > { %1495 = vmatmul.mubr.msk.f32.vlgmr.msra.gmra.mrb[2].mxu0 %vm1165_vm7, %v1164_v33  ;;  %v1123_v33 = vrot.slane %v1827_v41, %v1122_v21  ;;  %v1109_v44 = vmul.f32 %v1107_v31, %v1088_v30 }
 0x2b3   : > { %v1133_v45 = vrot.slane %v1123_v33, %v1118_v18 }
 0x2bf   : > { %v950_v37 = vpop.permute.xlu1 %949 }
 0x2c0   : > { %v971_v60 = vmul.f32 %v966_v51, %v950_v37  ;;  %v972_v0 = vmul.f32 %v970_v54, %v950_v37  ;;  %v1149_v37 = vrot.slane %v1829_v42, %v1122_v21 }
 0x2c3   : > { %v976_v39 = vpop.permute.xlu1 %975 }
 0x2c4   : > { %v978_v5 = vadd.f32 %v976_v39, %v971_v60  ;;  %v979_v7 = vadd.f32 %v976_v39, %v972_v0  ;;  %v1108_v39 = vmul.f32 %v1103_v27, %v1088_v30 }
 0x2c7   : > { %v983_v48 = vpop.permute.xlu1 %982 }
 0x2c8   : > { %v1004_v61 = vmul.f32 %v999_v52, %v983_v48  ;;  %v1005_v1 = vmul.f32 %v1003_v55, %v983_v48  ;;  %v1159_v48 = vrot.slane %v1149_v37, %v1118_v18 }
 0x2ca   : > { %v1006_v9 = vadd.f32 %v1004_v61, %v978_v5  ;;  %v1007_v12 = vadd.f32 %v1005_v1, %v979_v7 }
 0x2cc   : > { %v1036_v58 = vpop.permute.xlu1 %1035  ;;  %v1032_v22 = vadd.f32 %v1030_v10, %v1006_v9  ;;  %v1033_v24 = vadd.f32 %v1031_v13, %v1007_v12 }
 0x2cd   : > { %v1056_v23 = vmul.f32 %v1051_v11, %v1036_v58  ;;  %v1057_v25 = vmul.f32 %v1055_v14, %v1036_v58 }
 0x2cf   : > { %v1058_v34 = vadd.f32 %v1056_v23, %v1032_v22  ;;  %v1059_v36 = vadd.f32 %v1057_v25, %v1033_v24 }
 0x2d1   : > { %v1062_v15 = vpop.permute.xlu1 %1061 }
 0x2d2   : > { %v1082_v26 = vmul.f32 %v1077_v16, %v1062_v15  ;;  %v1083_v29 = vmul.f32 %v1081_v19, %v1062_v15 }
 0x2d4   : > { %v1084_v38 = vadd.f32 %v1082_v26, %v1058_v34  ;;  %v1085_v43 = vadd.f32 %v1083_v29, %v1059_v36 }
 0x2d6   : > { %v1114_v32 = vpop.permute.xlu1 %1113  ;;  %v1110_v49 = vadd.f32 %v1108_v39, %v1084_v38  ;;  %v1111_v51 = vadd.f32 %v1109_v44, %v1085_v43 }
 0x2d7   : > { %v1134_v50 = vmul.f32 %v1129_v40, %v1114_v32  ;;  %v1135_v52 = vmul.f32 %v1133_v45, %v1114_v32 }
 0x2d9   : > { %v1136_v54 = vadd.f32 %v1134_v50, %v1110_v49  ;;  %v1137_v55 = vadd.f32 %v1135_v52, %v1111_v51 }
 0x2da   : > { %v1140_v47 = vpop.permute.xlu1 %1139 }
 0x2db   : > { %v1160_v41 = vmul.f32 %v1155_v46, %v1140_v47  ;;  %v1161_v53 = vmul.f32 %v1159_v48, %v1140_v47 }
 0x2dd   : > { %v1162_v56 = vadd.f32 %v1160_v41, %v1136_v54  ;;  %v1163_v42 = vadd.f32 %v1161_v53, %v1137_v55 }
 0x384   : > { %v1235_v57 = vpop.f32.mrb[2].mxu0 }
 0x385   : > { %v1240_v58 = vadd.f32 %v1235_v57, %v1162_v56  ;;  %v1237_v59 = vpop.f32.mrb[3].mxu0 }
 0x386   : > { %v1241_v60 = vadd.f32 %v1237_v59, %v1163_v42 }
 0x387   : > { %v1244_v61 = vmin.f32 %v1240_v58, 0.0  ;;  %vm1242_vm9 = vcmp.gt.f32.partialorder %v1240_v58, 0.0 }
 0x388   : > { %v1245_v62 = vmin.f32 %v1241_v60, 0.0  ;;  %vm1243_vm8 = vcmp.gt.f32.partialorder %v1241_v60, 0.0 }
 0x389   : > { %v1246_v63 = vmul.f32 1.442695, %v1244_v61 }
 0x38a   : > { %v1248_v0 = vmul.f32 1.442695, %v1245_v62 }
 0x38b   : > { %1606 = vpow2.f32 %v1246_v63 }
 0x38c   : > { %1608 = vpow2.f32 %v1248_v0 }
 0x395   : > { %v1607_v1 = vpop.eup %1606 }
 0x396   : > { %v1609_v2 = vpop.eup %1608  ;;  %v1496_v3 = vadd.f32 -1.0, %v1607_v1 }
 0x397   : > { %v1497_v4 = vadd.f32 -1.0, %v1609_v2 }
 0x398   : > { %v1252_v7 = vsel %vm1242_vm9, %v1240_v58, %v1496_v3 }
 0x399   : > { %v1253_v5 = vsel %vm1243_vm8, %v1241_v60, %v1497_v4 }
 0x39a   : > { %1264 = vmatprep.subr.mxu1 %v1253_v5 }
 0x39b   : > { %1265 = vmatpush1.msra.mxu1 %v1252_v7 }
 0x39c   : > { %1498 = vmatmul.mubr.msk.f32.vlgmr.msra.gmra.mrb[2].mxu1 %vm1165_vm7, %v1254_v6 }
 0x46f   : > { %v1330_v9 = vpop.f32.mrb[2].mxu1 }
 0x470   : > { %v1331_v10 = vadd.f32 %v1330_v9, %v1259_v8  ;;  %v1332_v11 = vpop.f32.mrb[3].mxu1 }
 0x471   : > { %v1333_v12 = vadd.f32 %v1332_v11, %v1259_v8 }
 0x473   : > { %v1337_v13 = vcombine.low %v1331_v10, %v1333_v12 }
 0x475   : > { %1339 = vst [vmem:[%s543_s19] sm:$0xff] %v1337_v13 }
 0x476 PF: > { %s22_s23 = sadd.s32 1, %s1632_s23   ;;  %s1884_s21 = smov %s1628_s22 }
 0x477   : > { %p19_p5 = scmp.ge.s32.totalorder %s22_s23, 4   ;;  %s1885_s22 = smov %s1887_s24 }
 0x479   :  { %21 = sbr.rel (!%p19_p5) target bundleno = 2 (0x2), region = 107 }

// kernel: edge_score_network_forward.11
= control target key start
LH: loop header
LB: loop body
LE: loop exit
PB: predicated region body
PF: predicated region fallthrough
CT: control target
= control target key end

     0   :  { %s4947_s21 = smov 0   ;;  %s5500_s0 = inlined_call_operand.vmem [shape: f32[2,16,16], index: 0, kind: input, shape index: {}]   ;;  %s5501_s1 = inlined_call_operand.vmem [shape: f32[2,4,16,16], index: 1, kind: input, shape index: {}]   ;;  %s5502_s2 = inlined_call_operand.vmem [shape: f32[2,16,1], index: 2, kind: input, shape index: {}]   ;;  %s5503_s3 = inlined_call_operand.vmem [shape: f32[4,16,32], index: 3, kind: input, shape index: {}]   ;;  %s5504_s4 = inlined_call_operand.vmem [shape: f32[4,1,32], index: 4, kind: input, shape index: {}]   ;;  %s5505_s5 = inlined_call_operand.vmem [shape: f32[4,16,16], index: 5, kind: input, shape index: {}]   ;;  %s5506_s6 = inlined_call_operand.vmem [shape: f32[4,1,16], index: 6, kind: input, shape index: {}]   ;;  %s5507_s7 = inlined_call_operand.vmem [shape: f32[64,8], index: 7, kind: input, shape index: {}]   ;;  %s5508_s8 = inlined_call_operand.vmem [shape: f32[1,8], index: 8, kind: input, shape index: {}]   ;;  %s5509_s9 = inlined_call_operand.vmem [shape: f32[8,16], index: 9, kind: input, shape index: {}]   ;;  %s5510_s10 = inlined_call_operand.vmem [shape: f32[1,16], index: 10, kind: input, shape index: {}]   ;;  %s5511_s11 = inlined_call_operand.vmem [shape: f32[2,4,16,16], index: 11, kind: output, shape index: {0}]   ;;  %s5512_s12 = inlined_call_operand.vmem [shape: f32[2,16,16], index: 12, kind: output, shape index: {1}]  }
   0x1 LB: > { %s3941_s22 = sadd.s32 4294967295, %s4868_s21   ;;  %p3945_p0 = scmp.ge.s32.totalorder %s4868_s21, 1  ;;  %s4868_s21 = sphi %s4947_s21, %s23_s21  }
   0x2   : > { %p385_p1 = scmp.lt.s32.totalorder %s4868_s21, 3 }
   0x4   : > { %p386_p2 = pnand %p3945_p0, %p385_p1 }
   0x5   : > { %v499_v0 = vld [vmem:[%s5503_s3] sm:$0xff] (!%p386_p2)  ;;  %v500_v1 = vld [vmem:[%s5503_s3 + $0x8] sm:$0xff] (!%p386_p2)  ;;  %p442_p3 = scmp.lt.s32.totalorder (!%p386_p2), %s3941_s22, 1  ;;  %v469_v3 = vlaneseq (!%p386_p2)  ;;  %vm488_vm0 = vcmask (!%p386_p2), 130048   ;;  %v4870_v10 = vmov (!%p386_p2), 0.0   ;;  %vm847_vm3 = vcmask (!%p386_p2), 31744  }
   0x6   : > { %389 = sbr.rel (%p386_p2) target bundleno = 2810 (0xafa), region = 64  ;;  %v676_v2 = vld [vmem:[%s5505_s5] sm:$0xff] (!%p386_p2)  ;;  %v4496_v4 = vpack.c.bf16 (!%p386_p2), %v500_v1, %v499_v0  ;;  %v677_v5 = vld [vmem:[%s5505_s5 + $0x8] sm:$0xff] (!%p386_p2)  ;;  %s4871_s25 = smov (!%p386_p2), 120   ;;  %vm5062_vm4 = vmpackc.low (!%p386_p2), %vm847_vm3, %vm847_vm3  ;;  %vm3606_vm5 = vcmask (!%p386_p2), 261120   ;;  %vm3609_vm6 = vcmask (!%p386_p2), 392192  }
   0x7   : > { %v4504_v6 = vpack.c.bf16 (!%p386_p2), %v677_v5, %v676_v2  ;;  %v470_v7 = vshrl.u32 (!%p386_p2), %v469_v3, 7  ;;  %v473_v8 = vand.u32 (!%p386_p2), 127, %v469_v3  ;;  %v3962_v42 = vld [vmem:[%s5504_s4] ss:$0 sm:$0xff] (!%p386_p2)  ;;  %s4872_s26 = smov (!%p386_p2), 112   ;;  %s4873_s27 = smov (!%p386_p2), 104  }
   0x8   : > { %4497 = vmatprep.subr.bf16.mxu1 (!%p386_p2), %v4496_v4  ;;  %s4874_s28 = smov (!%p386_p2), 100   ;;  %s4875_s29 = smov (!%p386_p2), 108   ;;  %v3987_v5 = vld [vmem:[%s5503_s3 + $0x18] sm:$0xff] (!%p386_p2)  ;;  %vm3627_vm7 = vcmask (!%p386_p2), 523264   ;;  %vm3729_vm8 = vcmask (!%p386_p2), 64512  }
   0x9   : > { %4505 = vmatprep.subr.bf16.mxu0 (!%p386_p2), %v4504_v6  ;;  %4499 = vmatpush3.bf16.msra.mxu1 (!%p386_p2), %v4496_v4  ;;  %vm474_vm1 = vcmp.eq.s32.totalorder (!%p386_p2), %v470_v7, %v473_v8  ;;  %v471_v9 = vadd.s32 (!%p386_p2), 8, %v470_v7  ;;  %s4876_s30 = smov (!%p386_p2), 124   ;;  %s4877_s15 = smov (!%p386_p2), 116   ;;  %v3986_v4 = vld [vmem:[%s5503_s3 + $0x10] sm:$0xff] (!%p386_p2) }
   0xa   : > { %4507 = vmatpush3.bf16.msra.mxu0 (!%p386_p2), %v4504_v6  ;;  %v4977_v11 = vsel (!%p386_p2), %vm474_vm1, 1.0, %v4870_v10  ;;  %v4536_v6 = vpack.c.bf16 (!%p386_p2), %v3987_v5, %v3986_v4  ;;  %s4878_s16 = smov (!%p386_p2), 16   ;;  %s4880_s18 = smov (!%p386_p2), 48  }
   0xb   : > { %v4991_v14 = vsub.f32 (!%p386_p2), 1.0, %v4977_v11  ;;  %vm475_vm2 = vcmp.eq.s32.totalorder (!%p386_p2), %v471_v9, %v473_v8  ;;  %v3994_v8 = vld [vmem:[%s5505_s5 + $0x10] sm:$0xff] (!%p386_p2)  ;;  %v3995_v9 = vld [vmem:[%s5505_s5 + $0x18] sm:$0xff] (!%p386_p2) }
   0xc   : > { %v4998_v16 = vsel (!%p386_p2), %vm475_vm2, 1.0, %v4870_v10  ;;  %v4544_v10 = vpack.c.bf16 (!%p386_p2), %v3995_v9, %v3994_v8 }
   0xd   : > { %s5516_s22 = smov (!%p442_p3, %s3941_s22), 1  ;;  %v5007_v19 = vsub.f32 1.0, %v4998_v16 }
   0xe   : > { %s4970_s13 = sshll.u32 %s5516_s22, 4  ;;  %s4103_s14 = sshll.u32 %s5516_s22, 6 }
   0xf   : > { %s446_s17 = scalar_lea.vmem %s5500_s0, %s4970_s13  ;;  %s4988_s20 = scalar_lea.vmem %s5501_s1, %s4103_s14 }
  0x10   : > { %v4979_v12 = vld [vmem:[%s446_s17] sm:$0xff]  ;;  %v4981_v13 = vld [vmem:[%s446_s17 + $0x8] sm:$0xff]  ;;  %v3985_v51 = vld [vmem:[%s4988_s20 + $0x18] sm:$0xff]  ;;  %s5451_s24 = scalar_lea.vmem %s5511_s11, %s4103_s14 }
  0x11   : > { %4252 = vmatprep.mubr.msk.f32.mxu1 %vm488_vm0, %v4979_v12  ;;  %4266 = vmatprep.mubr.msk.f32.mxu0 %vm488_vm0, %v4979_v12  ;;  %v480_v15 = vld [vmem:[%s4988_s20] sm:$0xff]  ;;  %v481_v17 = vld [vmem:[%s4988_s20 + $0x8] sm:$0xff]  ;;  %v1262_v52 = vmul.f32 %v3985_v51, %v5007_v19  ;;  %v3984_v55 = vld [vmem:[%s4988_s20 + $0x10] sm:$0xff] }
  0x12   : > { %4253 = vmatmul.mubr.msk.f32.vlgmr.msra.gmra.mrb[0].mxu1 %vm488_vm0, %v4981_v13  ;;  %4267 = vmatmul.mubr.msk.f32.vlgmr.msra.gmra.mrb[0].mxu0 %vm488_vm0, %v4981_v13  ;;  %v484_v18 = vmul.f32 %v4991_v14, %v480_v15  ;;  %v485_v21 = vmul.f32 %v5007_v19, %v481_v17  ;;  %v1261_v56 = vmul.f32 %v3984_v55, %v4991_v14 }
  0x13   : > { %v5043_v53 = vadd.f32 %v4998_v16, %v1262_v52 }
  0x14   : > { %v486_v20 = vadd.f32 %v4977_v11, %v484_v18  ;;  %v487_v23 = vadd.f32 %v4998_v16, %v485_v21  ;;  %v5050_v57 = vadd.f32 %v4977_v11, %v1261_v56 }
  0x15   : > { %v1268_v54 = vsel %vm488_vm0, %v5043_v53, 0.0 }
  0x16   : > { %v489_v22 = vsel %vm488_vm0, %v486_v20, 0.0  ;;  %4259 = vmatprep.mubr.msk.f32.mxu1 %vm488_vm0, %v486_v20  ;;  %v492_v24 = vsel %vm488_vm0, %v487_v23, 0.0  ;;  %v1265_v58 = vsel %vm488_vm0, %v5050_v57, 0.0 }
  0x17   : > { %490 = vadd.xlane.f32.xlu0 %v489_v22 }
  0x1b   : > { %493 = vadd.xlane.f32.xlu0 %v492_v24 }
  0xa4   : > { %v491_v25 = vpop.xlane.xlu0 %490 }
  0xa5   : > { %v495_v28 = vmax.f32 %v491_v25, 1.0 }
  0xa8   : > { %v494_v26 = vpop.xlane.xlu0 %493 }
  0xa9   : > { %v496_v27 = vmax.f32 %v494_v26, 1.0 }
  0xab   : > { %4774 = vrsqrt.f32 %v496_v27 }
  0xac   : > { %4776 = vrsqrt.f32 %v495_v28 }
  0xb5   : > { %v5015_v29 = vpop.eup %4774 }
  0xb6   : > { %v5017_v32 = vpop.eup %4776 }
  0xe5   : > { %v4254_v30 = vpop.f32.mrb[0].mxu1  ;;  %v4268_v31 = vpop.f32.mrb[0].mxu0 }
  0xe6   : > { %v583_v33 = vmul.f32 %v5015_v29, %v4254_v30  ;;  %v754_v34 = vmul.f32 %v5015_v29, %v4268_v31  ;;  %v573_v35 = vpop.f32.mrb[1].mxu1  ;;  %v744_v36 = vpop.f32.mrb[1].mxu0 }
  0xe7   : > { %v582_v37 = vmul.f32 %v5017_v32, %v573_v35  ;;  %v753_v38 = vmul.f32 %v5017_v32, %v744_v36 }
  0xe9   : > { %v4500_v39 = vpack.c.bf16 %v583_v33, %v582_v37  ;;  %v4508_v40 = vpack.c.bf16 %v754_v34, %v753_v38 }
  0xeb   : > { %4501 = vmatprep.subr.bf16.mxu1 %v4500_v39 }
  0xec   : > { %4503 = vmatpush3.bf16.msra.mxu1 %v4500_v39 }
  0xed   : > { %4509 = vmatprep.subr.bf16.mxu1 %v4508_v40 }
  0xef   : > { %4260 = vmatmul.mubr.msk.f32.vlgmr.msra.gmra.mrb[2].mxu1 %vm488_vm0, %v487_v23 }
  0xf0   : > { %4511 = vmatpush3.bf16.msra.mxu1 %v4508_v40  ;;  %4273 = vmatprep.mubr.msk.f32.mxu1 %vm488_vm0, %v486_v20 }
  0xf3   : > { %4274 = vmatmul.mubr.msk.f32.vlgmr.msra.gmra.mrb[4].mxu1 %vm488_vm0, %v487_v23 }
 0x1c2   : > { %v4261_v41 = vpop.f32.mrb[2].mxu1 }
 0x1c3   : > { %v666_v43 = vmul.f32 %v5015_v29, %v4261_v41  ;;  %v656_v44 = vpop.f32.mrb[3].mxu1 }
 0x1c4   : > { %v665_v45 = vmul.f32 %v5017_v32, %v656_v44 }
 0x1c5   : > { %v675_v46 = vadd.f32 %v3962_v42, %v666_v43 }
 0x1c6   : > { %v674_v47 = vadd.f32 %v3962_v42, %v665_v45  ;;  %v5031_v48 = vpop.f32.mrb[4].mxu1 }
 0x1c7   : > { %v5033_v49 = vpop.f32.mrb[5].mxu1 }
 0x1c8   : > { %1028 = vrot.lane.b32.xlu0 %v674_v47, %s4871_s25  ;;  %4280 = vmatprep.mubr.msk.f32.mxu0 %vm847_vm3, %v674_v47  ;;  %v4692_v50 = vpack.i.bf16 %v675_v46, %v674_v47 }
 0x1ca   : > { %4693 = vrot.lane.b32.xlu1 %v4692_v50, %s4872_s26 }
 0x1ce   : > { %4698 = vrot.lane.b32.xlu1 %v4692_v50, %s4873_s27 }
 0x1d2   : > { %1030 = vrot.lane.b32.xlu1 %v675_v46, %s4871_s25 }
 0x1e7   : > { %1269 = vadd.xlane.f32.xlu0 %v1268_v54 }
 0x1f6   : > { %1266 = vadd.xlane.f32.xlu1 %v1265_v58 }
 0x1fd   : > { %4708 = vrot.lane.b32.xlu0 %v4692_v50, %s4874_s28 }
 0x207   : > { %4703 = vrot.lane.b32.xlu1 %v4692_v50, %s4875_s29 }
 0x20b   : > { %935 = vrot.lane.b32.xlu1 %v675_v46, %s4876_s30 }
 0x20f   : > { %933 = vrot.lane.b32.xlu1 %v674_v47, %s4876_s30 }
 0x213   : > { %1123 = vrot.lane.b32.xlu1 %v674_v47, %s4877_s15 }
 0x217   : > { %1125 = vrot.lane.b32.xlu1 %v675_v46, %s4877_s15 }
 0x23a   : > { %v1029_v7 = vpop.permute.xlu0 %1028 }
 0x23c   : > { %v4694_v59 = vpop.permute.xlu1 %4693 }
 0x23d   : > { %v4696_v60 = vunpack.i.h.bf16 %v4694_v59  ;;  %v4695_v61 = vunpack.i.l.bf16 %v4694_v59 }
 0x23f   : > { %v4512_v63 = vpack.c.bf16 %v4696_v60, %v4695_v61 }
 0x240   : > { %v4699_v0 = vpop.permute.xlu1 %4698 }
 0x241   : > { %v4701_v1 = vunpack.i.h.bf16 %v4699_v0  ;;  %v4700_v2 = vunpack.i.l.bf16 %v4699_v0  ;;  %4514 = vmatprep.subr.msk.bf16.mxu0 %vm5062_vm4, %v4512_v63 }
 0x242   : > { %4517 = vmatpush3.bf16.xpose.msk.msra.mxu0 %vm5062_vm4, %v4512_v63 }
 0x243   : > { %v4524_v3 = vpack.c.bf16 %v4701_v1, %v4700_v2 }
 0x244   : > { %v1031_v15 = vpop.permute.xlu1 %1030 }
 0x245   : > { %4526 = vmatprep.subr.msk.bf16.mxu0 %vm5062_vm4, %v4524_v3 }
 0x249   : > { %4281 = vmatmul.mubr.msk.f32.vlgmr.msra.gmra.mrb[2].mxu0 %vm847_vm3, %v675_v46 }
 0x24a   : > { %4529 = vmatpush3.bf16.xpose.msk.msra.mxu0 %vm5062_vm4, %v4524_v3  ;;  %4294 = vmatprep.mubr.msk.f32.mxu0 %vm847_vm3, %v1029_v7 }
 0x24b   : > { %4537 = vmatprep.subr.bf16.mxu0 %v4536_v6 }
 0x251   : > { %4295 = vmatmul.mubr.msk.f32.vlgmr.msra.gmra.mrb[4].mxu0 %vm847_vm3, %v1031_v15 }
 0x252   : > { %4539 = vmatpush3.bf16.msra.mxu0 %v4536_v6  ;;  %4308 = vmatprep.mubr.msk.f32.mxu0 %vm488_vm0, %v4979_v12 }
 0x253   : > { %4545 = vmatprep.subr.bf16.mxu0 %v4544_v10 }
 0x255   : > { %4309 = vmatmul.mubr.msk.f32.vlgmr.msra.gmra.mrb[6].mxu0 %vm488_vm0, %v4981_v13 }
 0x256   : > { %4547 = vmatpush3.bf16.msra.mxu0 %v4544_v10  ;;  %4322 = vmatprep.mubr.msk.f32.mxu0 %vm488_vm0, %v4979_v12  ;;  %v3993_v10 = vld [vmem:[%s5504_s4 + $0x1] ss:$0 sm:$0xff] }
 0x259   : > { %4323 = vmatmul.mubr.msk.f32.vlgmr.msra.gmra.mrb[8].mxu0 %vm488_vm0, %v4981_v13 }
 0x274   : > { %v1270_v17 = vpop.xlane.xlu0 %1269 }
 0x275   : > { %v1272_v34 = vmax.f32 %v1270_v17, 1.0 }
 0x277   : > { %4778 = vrsqrt.f32 %v1272_v34 }
 0x278   : > { %v4709_v20 = vpop.permute.xlu0 %4708 }
 0x279   : > { %v4711_v22 = vunpack.i.h.bf16 %v4709_v20  ;;  %v4710_v23 = vunpack.i.l.bf16 %v4709_v20 }
 0x27b   : > { %v4530_v28 = vpack.c.bf16 %v4711_v22, %v4710_v23 }
 0x281   : > { %v5111_v40 = vpop.eup %4778 }
 0x283   : > { %v1267_v18 = vpop.xlane.xlu1 %1266 }
 0x284   : > { %v1271_v35 = vmax.f32 %v1267_v18, 1.0 }
 0x286   : > { %4780 = vrsqrt.f32 %v1271_v35 }
 0x287   : > { %v4704_v21 = vpop.permute.xlu1 %4703 }
 0x288   : > { %v4706_v24 = vunpack.i.h.bf16 %v4704_v21  ;;  %v4705_v25 = vunpack.i.l.bf16 %v4704_v21 }
 0x28a   : > { %v4518_v26 = vpack.c.bf16 %v4706_v24, %v4705_v25  ;;  %v4021_v25 = vld [vmem:[%s4988_s20 + $0x28] sm:$0xff] }
 0x28b   : > { %v936_v27 = vpop.permute.xlu1 %935 }
 0x28c   : > { %4520 = vmatprep.subr.msk.bf16.mxu1 %vm5062_vm4, %v4518_v26 }
 0x28d   : > { %4523 = vmatpush3.bf16.xpose.msk.msra.mxu1 %vm5062_vm4, %v4518_v26  ;;  %v2036_v26 = vmul.f32 %v4021_v25, %v5007_v19 }
 0x28e   : > { %4532 = vmatprep.subr.msk.bf16.mxu1 %vm5062_vm4, %v4530_v28 }
 0x28f   : > { %v934_v30 = vpop.permute.xlu1 %933 }
 0x290   : > { %4287 = vmatprep.mubr.msk.f32.mxu1 %vm847_vm3, %v934_v30  ;;  %v5113_v42 = vpop.eup %4780 }
 0x293   : > { %v1124_v31 = vpop.permute.xlu1 %1123 }
 0x294   : > { %4288 = vmatmul.mubr.msk.f32.vlgmr.msra.gmra.mrb[6].mxu1 %vm847_vm3, %v936_v27  ;;  %v4020_v27 = vld [vmem:[%s4988_s20 + $0x20] sm:$0xff] }
 0x295   : > { %4535 = vmatpush3.bf16.xpose.msk.msra.mxu1 %vm5062_vm4, %v4530_v28  ;;  %4301 = vmatprep.mubr.msk.f32.mxu1 %vm847_vm3, %v1124_v31  ;;  %v5147_v28 = vadd.f32 %v4998_v16, %v2036_v26  ;;  %v2035_v30 = vmul.f32 %v4020_v27, %v4991_v14 }
 0x297   : > { %v1126_v33 = vpop.permute.xlu1 %1125  ;;  %v2042_v31 = vsel %vm488_vm0, %v5147_v28, 0.0 }
 0x29c   : > { %4302 = vmatmul.mubr.msk.f32.vlgmr.msra.gmra.mrb[8].mxu1 %vm847_vm3, %v1126_v33  ;;  %v5153_v33 = vadd.f32 %v4977_v11, %v2035_v30 }
 0x29d   : > { %4315 = vmatprep.mubr.msk.f32.mxu1 %vm488_vm0, %v5050_v57 }
 0x29e   : > { %v2039_v34 = vsel %vm488_vm0, %v5153_v33, 0.0 }
 0x31c   : > { %v4282_v36 = vpop.f32.mrb[2].mxu0 }
 0x31d   : > { %v922_v37 = vpop.f32.mrb[3].mxu0  ;;  %4782 = vtanh.f32 %v4282_v36 }
 0x31e   : > { %4784 = vtanh.f32 %v922_v37 }
 0x324   : > { %v4296_v38 = vpop.f32.mrb[4].mxu0 }
 0x325   : > { %v1110_v39 = vpop.f32.mrb[5].mxu0 }
 0x327   : > { %v4783_v59 = vpop.eup %4782 }
 0x328   : > { %v4310_v41 = vpop.f32.mrb[6].mxu0  ;;  %v4785_v61 = vpop.eup %4784 }
 0x329   : > { %v1354_v43 = vmul.f32 %v5111_v40, %v4310_v41  ;;  %v1344_v44 = vpop.f32.mrb[7].mxu0 }
 0x32a   : > { %v1353_v45 = vmul.f32 %v5113_v42, %v1344_v44 }
 0x32c   : > { %v4540_v46 = vpack.c.bf16 %v1354_v43, %v1353_v45  ;;  %v4324_v47 = vpop.f32.mrb[8].mxu0  ;;  %v4022_v45 = vld [vmem:[%s5503_s3 + $0x20] sm:$0xff] }
 0x32d   : > { %v1527_v50 = vmul.f32 %v5111_v40, %v4324_v47  ;;  %v1517_v51 = vpop.f32.mrb[9].mxu0 }
 0x32e   : > { %v1526_v52 = vmul.f32 %v5113_v42, %v1517_v51  ;;  %4541 = vmatprep.subr.bf16.mxu1 %v4540_v46  ;;  %v4030_v51 = vld [vmem:[%s5505_s5 + $0x20] sm:$0xff] }
 0x32f   : > { %4543 = vmatpush3.bf16.msra.mxu1 %v4540_v46  ;;  %v4023_v46 = vld [vmem:[%s5503_s3 + $0x28] sm:$0xff] }
 0x330   : > { %v4548_v54 = vpack.c.bf16 %v1527_v50, %v1526_v52  ;;  %v4576_v47 = vpack.c.bf16 %v4023_v46, %v4022_v45  ;;  %v4031_v52 = vld [vmem:[%s5505_s5 + $0x28] sm:$0xff] }
 0x332   : > { %4316 = vmatmul.mubr.msk.f32.vlgmr.msra.gmra.mrb[10].mxu1 %vm488_vm0, %v5043_v53  ;;  %4549 = vmatprep.subr.bf16.mxu1 %v4548_v54 }
 0x333   : > { %4551 = vmatpush3.bf16.msra.mxu1 %v4548_v54  ;;  %4329 = vmatprep.mubr.msk.f32.mxu1 %vm488_vm0, %v5050_v57  ;;  %v4584_v54 = vpack.c.bf16 %v4031_v52, %v4030_v51 }
 0x336   : > { %4330 = vmatmul.mubr.msk.f32.vlgmr.msra.gmra.mrb[12].mxu1 %vm488_vm0, %v5043_v53 }
 0x367   : > { %v4289_v55 = vpop.f32.mrb[6].mxu1 }
 0x368   : > { %4786 = vtanh.f32 %v4289_v55  ;;  %v1015_v56 = vpop.f32.mrb[7].mxu1 }
 0x369   : > { %4788 = vtanh.f32 %v1015_v56 }
 0x36a   : > { %4790 = vtanh.f32 %v4296_v38 }
 0x36b   : > { %4792 = vtanh.f32 %v1110_v39 }
 0x36f   : > { %v4303_v58 = vpop.f32.mrb[8].mxu1 }
 0x370   : > { %4794 = vtanh.f32 %v4303_v58  ;;  %v1205_v60 = vpop.f32.mrb[9].mxu1 }
 0x371   : > { %4796 = vtanh.f32 %v1205_v60 }
 0x372   : > { %v4787_v63 = vpop.eup %4786 }
 0x373   : > { %v4789_v0 = vpop.eup %4788  ;;  %v1027_v57 = vadd.f32 %v4787_v63, %v4783_v59 }
 0x374   : > { %v4791_v1 = vpop.eup %4790  ;;  %v1026_v2 = vadd.f32 %v4789_v0, %v4785_v61 }
 0x375   : > { %v4793_v53 = vpop.eup %4792  ;;  %v1122_v3 = vadd.f32 %v4791_v1, %v1027_v57 }
 0x376   : > { %v1121_v4 = vadd.f32 %v4793_v53, %v1026_v2 }
 0x37a   : > { %v4795_v5 = vpop.eup %4794 }
 0x37b   : > { %v4797_v6 = vpop.eup %4796  ;;  %v5125_v7 = vadd.f32 %v4795_v5, %v1122_v3 }
 0x37c   : > { %v5127_v8 = vadd.f32 %v4797_v6, %v1121_v4 }
 0x405   : > { %v4317_v9 = vpop.f32.mrb[10].mxu1 }
 0x406   : > { %v1437_v15 = vmul.f32 %v5111_v40, %v4317_v9  ;;  %v1427_v17 = vpop.f32.mrb[11].mxu1 }
 0x407   : > { %v1436_v18 = vmul.f32 %v5113_v42, %v1427_v17 }
 0x408   : > { %v1447_v20 = vadd.f32 %v3993_v10, %v1437_v15 }
 0x409   : > { %v1446_v21 = vadd.f32 %v3993_v10, %v1436_v18  ;;  %v5134_v22 = vpop.f32.mrb[12].mxu1 }
 0x40a   : > { %v5136_v23 = vpop.f32.mrb[13].mxu1 }
 0x40b   : > { %4336 = vmatprep.mubr.msk.f32.mxu0 %vm847_vm3, %v1446_v21  ;;  %v4717_v24 = vpack.i.bf16 %v1447_v20, %v1446_v21 }
 0x40d   : > { %4718 = vrot.lane.b32.xlu0 %v4717_v24, %s4873_s27  ;;  %4713 = vrot.lane.b32.xlu1 %v4717_v24, %s4872_s26 }
 0x411   : > { %1803 = vrot.lane.b32.xlu0 %v1447_v20, %s4871_s25  ;;  %1801 = vrot.lane.b32.xlu1 %v1446_v21, %s4871_s25 }
 0x430   : > { %2043 = vadd.xlane.f32.xlu0 %v2042_v31 }
 0x435   : > { %2040 = vadd.xlane.f32.xlu1 %v2039_v34 }
 0x446   : > { %4723 = vrot.lane.b32.xlu0 %v4717_v24, %s4875_s29  ;;  %4728 = vrot.lane.b32.xlu1 %v4717_v24, %s4874_s28 }
 0x44a   : > { %1708 = vrot.lane.b32.xlu0 %v1447_v20, %s4876_s30  ;;  %1706 = vrot.lane.b32.xlu1 %v1446_v21, %s4876_s30 }
 0x44e   : > { %1898 = vrot.lane.b32.xlu0 %v1447_v20, %s4877_s15  ;;  %1896 = vrot.lane.b32.xlu1 %v1446_v21, %s4877_s15 }
 0x47f   : > { %v4719_v35 = vpop.permute.xlu0 %4718  ;;  %v4714_v36 = vpop.permute.xlu1 %4713 }
 0x480   : > { %v4721_v37 = vunpack.i.h.bf16 %v4719_v35  ;;  %v4720_v38 = vunpack.i.l.bf16 %v4719_v35  ;;  %v4716_v39 = vunpack.i.h.bf16 %v4714_v36  ;;  %v4715_v41 = vunpack.i.l.bf16 %v4714_v36 }
 0x482   : > { %v4552_v43 = vpack.c.bf16 %v4716_v39, %v4715_v41  ;;  %v4564_v44 = vpack.c.bf16 %v4721_v37, %v4720_v38 }
 0x483   : > { %v1802_v50 = vpop.permute.xlu1 %1801  ;;  %v1804_v55 = vpop.permute.xlu0 %1803 }
 0x484   : > { %4554 = vmatprep.subr.msk.bf16.mxu0 %vm5062_vm4, %v4552_v43 }
 0x485   : > { %4557 = vmatpush3.bf16.xpose.msk.msra.mxu0 %vm5062_vm4, %v4552_v43 }
 0x486   : > { %4566 = vmatprep.subr.msk.bf16.mxu0 %vm5062_vm4, %v4564_v44 }
 0x48c   : > { %4337 = vmatmul.mubr.msk.f32.vlgmr.msra.gmra.mrb[10].mxu0 %vm847_vm3, %v1447_v20 }
 0x48d   : > { %4569 = vmatpush3.bf16.xpose.msk.msra.mxu0 %vm5062_vm4, %v4564_v44  ;;  %4350 = vmatprep.mubr.msk.f32.mxu0 %vm847_vm3, %v1802_v50 }
 0x48e   : > { %4577 = vmatprep.subr.bf16.mxu0 %v4576_v47 }
 0x494   : > { %4351 = vmatmul.mubr.msk.f32.vlgmr.msra.gmra.mrb[12].mxu0 %vm847_vm3, %v1804_v55 }
 0x495   : > { %4579 = vmatpush3.bf16.msra.mxu0 %v4576_v47  ;;  %4364 = vmatprep.mubr.msk.f32.mxu0 %vm488_vm0, %v4979_v12 }
 0x496   : > { %4585 = vmatprep.subr.bf16.mxu0 %v4584_v54 }
 0x498   : > { %4365 = vmatmul.mubr.msk.f32.vlgmr.msra.gmra.mrb[14].mxu0 %vm488_vm0, %v4981_v13 }
 0x499   : > { %4587 = vmatpush3.bf16.msra.mxu0 %v4584_v54  ;;  %4378 = vmatprep.mubr.msk.f32.mxu0 %vm488_vm0, %v4979_v12 }
 0x49c   : > { %4379 = vmatmul.mubr.msk.f32.vlgmr.msra.gmra.mrb[16].mxu0 %vm488_vm0, %v4981_v13 }
 0x4bd   : > { %v2044_v56 = vpop.xlane.xlu0 %2043 }
 0x4be   : > { %v2046_v9 = vmax.f32 %v2044_v56, 1.0 }
 0x4c1   : > { %v4724_v58 = vpop.permute.xlu0 %4723 }
 0x4c2   : > { %v4726_v59 = vunpack.i.h.bf16 %v4724_v58  ;;  %v4725_v60 = vunpack.i.l.bf16 %v4724_v58  ;;  %v2041_v61 = vpop.xlane.xlu1 %2040 }
 0x4c3   : > { %v2045_v6 = vmax.f32 %v2041_v61, 1.0  ;;  %v4029_v61 = vld [vmem:[%s5504_s4 + $0x2] ss:$0 sm:$0xff] }
 0x4c4   : > { %v4558_v63 = vpack.c.bf16 %v4726_v59, %v4725_v60 }
 0x4c5   : > { %v1709_v3 = vpop.permute.xlu0 %1708  ;;  %4798 = vrsqrt.f32 %v2045_v6 }
 0x4c6   : > { %4560 = vmatprep.subr.msk.bf16.mxu1 %vm5062_vm4, %v4558_v63  ;;  %v4729_v0 = vpop.permute.xlu1 %4728  ;;  %4800 = vrsqrt.f32 %v2046_v9  ;;  %v4056_v9 = vld [vmem:[%s4988_s20 + $0x30] sm:$0xff] }
 0x4c7   : > { %v4731_v57 = vunpack.i.h.bf16 %v4729_v0  ;;  %v4730_v1 = vunpack.i.l.bf16 %v4729_v0  ;;  %4563 = vmatpush3.bf16.xpose.msk.msra.mxu1 %vm5062_vm4, %v4558_v63 }
 0x4c9   : > { %v4570_v2 = vpack.c.bf16 %v4731_v57, %v4730_v1  ;;  %v1899_v5 = vpop.permute.xlu0 %1898 }
 0x4ca   : > { %v1707_v53 = vpop.permute.xlu1 %1706 }
 0x4cb   : > { %4343 = vmatprep.mubr.msk.f32.mxu1 %vm847_vm3, %v1707_v53  ;;  %4572 = vmatprep.subr.msk.bf16.mxu1 %vm5062_vm4, %v4570_v2 }
 0x4ce   : > { %4344 = vmatmul.mubr.msk.f32.vlgmr.msra.gmra.mrb[14].mxu1 %vm847_vm3, %v1709_v3  ;;  %v1897_v4 = vpop.permute.xlu1 %1896 }
 0x4cf   : > { %4575 = vmatpush3.bf16.xpose.msk.msra.mxu1 %vm5062_vm4, %v4570_v2  ;;  %4357 = vmatprep.mubr.msk.f32.mxu1 %vm847_vm3, %v1897_v4  ;;  %v5208_v20 = vpop.eup %4798 }
 0x4d0   : > { %v5210_v21 = vpop.eup %4800 }
 0x4d6   : > { %4358 = vmatmul.mubr.msk.f32.vlgmr.msra.gmra.mrb[16].mxu1 %vm847_vm3, %v1899_v5  ;;  %v4057_v5 = vld [vmem:[%s4988_s20 + $0x38] sm:$0xff]  ;;  %s4879_s20 = smov 32  }
 0x4d7   : > { %4371 = vmatprep.mubr.msk.f32.mxu1 %vm488_vm0, %v5153_v33  ;;  %v2810_v6 = vmul.f32 %v4057_v5, %v5007_v19 }
 0x55f   : > { %v4338_v10 = vpop.f32.mrb[10].mxu0 }
 0x560   : > { %v1695_v15 = vpop.f32.mrb[11].mxu0  ;;  %4802 = vtanh.f32 %v4338_v10  ;;  %v5244_v10 = vadd.f32 %v4998_v16, %v2810_v6 }
 0x561   : > { %4804 = vtanh.f32 %v1695_v15  ;;  %v2809_v15 = vmul.f32 %v4056_v9, %v4991_v14 }
 0x567   : > { %v4352_v17 = vpop.f32.mrb[12].mxu0 }
 0x568   : > { %v1883_v18 = vpop.f32.mrb[13].mxu0 }
 0x56a   : > { %v4803_v43 = vpop.eup %4802 }
 0x56b   : > { %v4366_v24 = vpop.f32.mrb[14].mxu0  ;;  %v4805_v45 = vpop.eup %4804 }
 0x56c   : > { %v2128_v25 = vmul.f32 %v5210_v21, %v4366_v24  ;;  %v2118_v26 = vpop.f32.mrb[15].mxu0 }
 0x56d   : > { %v2127_v27 = vmul.f32 %v5208_v20, %v2118_v26 }
 0x56f   : > { %v4580_v30 = vpack.c.bf16 %v2128_v25, %v2127_v27  ;;  %v4380_v31 = vpop.f32.mrb[16].mxu0 }
 0x570   : > { %v2301_v34 = vmul.f32 %v5210_v21, %v4380_v31  ;;  %v2291_v35 = vpop.f32.mrb[17].mxu0  ;;  %v4058_v31 = vld [vmem:[%s5503_s3 + $0x30] sm:$0xff] }
 0x571   : > { %v2300_v36 = vmul.f32 %v5208_v20, %v2291_v35  ;;  %4581 = vmatprep.subr.bf16.mxu1 %v4580_v30 }
 0x572   : > { %4583 = vmatpush3.bf16.msra.mxu1 %v4580_v30 }
 0x573   : > { %v4588_v37 = vpack.c.bf16 %v2301_v34, %v2300_v36  ;;  %v4059_v34 = vld [vmem:[%s5503_s3 + $0x38] sm:$0xff] }
 0x574   : > { %v4616_v35 = vpack.c.bf16 %v4059_v34, %v4058_v31 }
 0x575   : > { %4372 = vmatmul.mubr.msk.f32.vlgmr.msra.gmra.mrb[18].mxu1 %vm488_vm0, %v5147_v28  ;;  %4589 = vmatprep.subr.bf16.mxu1 %v4588_v37 }
 0x576   : > { %4591 = vmatpush3.bf16.msra.mxu1 %v4588_v37  ;;  %4385 = vmatprep.mubr.msk.f32.mxu1 %vm488_vm0, %v5153_v33  ;;  %v4066_v37 = vld [vmem:[%s5505_s5 + $0x30] sm:$0xff] }
 0x579   : > { %4386 = vmatmul.mubr.msk.f32.vlgmr.msra.gmra.mrb[20].mxu1 %vm488_vm0, %v5147_v28 }
 0x5a1   : > { %v4345_v38 = vpop.f32.mrb[14].mxu1 }
 0x5a2   : > { %4806 = vtanh.f32 %v4345_v38  ;;  %v1788_v39 = vpop.f32.mrb[15].mxu1  ;;  %v4067_v38 = vld [vmem:[%s5505_s5 + $0x38] sm:$0xff] }
 0x5a3   : > { %4808 = vtanh.f32 %v1788_v39  ;;  %v4624_v39 = vpack.c.bf16 %v4067_v38, %v4066_v37 }
 0x5a4   : > { %4810 = vtanh.f32 %v4352_v17  ;;  %v2816_v17 = vsel %vm488_vm0, %v5244_v10, 0.0 }
 0x5a5   : > { %4812 = vtanh.f32 %v1883_v18  ;;  %v5250_v18 = vadd.f32 %v4977_v11, %v2809_v15 }
 0x5a7   : > { %v2813_v24 = vsel %vm488_vm0, %v5250_v18, 0.0 }
 0x5a9   : > { %v4359_v41 = vpop.f32.mrb[16].mxu1 }
 0x5aa   : > { %4814 = vtanh.f32 %v4359_v41  ;;  %v1978_v44 = vpop.f32.mrb[17].mxu1 }
 0x5ab   : > { %4816 = vtanh.f32 %v1978_v44 }
 0x5ac   : > { %v4807_v46 = vpop.eup %4806 }
 0x5ad   : > { %v4809_v47 = vpop.eup %4808  ;;  %v1800_v33 = vadd.f32 %v4807_v46, %v4803_v43 }
 0x5ae   : > { %v4811_v50 = vpop.eup %4810  ;;  %v1799_v51 = vadd.f32 %v4809_v47, %v4805_v45 }
 0x5af   : > { %v4813_v28 = vpop.eup %4812  ;;  %v1895_v52 = vadd.f32 %v4811_v50, %v1800_v33 }
 0x5b0   : > { %v1894_v54 = vadd.f32 %v4813_v28, %v1799_v51 }
 0x5b4   : > { %v4815_v55 = vpop.eup %4814 }
 0x5b5   : > { %v4817_v56 = vpop.eup %4816  ;;  %v5222_v58 = vadd.f32 %v4815_v55, %v1895_v52 }
 0x5b6   : > { %v5224_v59 = vadd.f32 %v4817_v56, %v1894_v54 }
 0x648   : > { %v4373_v60 = vpop.f32.mrb[18].mxu1 }
 0x649   : > { %v2211_v63 = vmul.f32 %v5210_v21, %v4373_v60  ;;  %v2201_v0 = vpop.f32.mrb[19].mxu1 }
 0x64a   : > { %v2210_v57 = vmul.f32 %v5208_v20, %v2201_v0 }
 0x64b   : > { %v2221_v1 = vadd.f32 %v4029_v61, %v2211_v63 }
 0x64c   : > { %v2220_v2 = vadd.f32 %v4029_v61, %v2210_v57  ;;  %v5231_v53 = vpop.f32.mrb[20].mxu1 }
 0x64d   : > { %v5233_v3 = vpop.f32.mrb[21].mxu1 }
 0x64e   : > { %4392 = vmatprep.mubr.msk.f32.mxu0 %vm847_vm3, %v2220_v2  ;;  %v4737_v4 = vpack.i.bf16 %v2221_v1, %v2220_v2 }
 0x650   : > { %4738 = vrot.lane.b32.xlu0 %v4737_v4, %s4873_s27  ;;  %4733 = vrot.lane.b32.xlu1 %v4737_v4, %s4872_s26 }
 0x654   : > { %2577 = vrot.lane.b32.xlu0 %v2221_v1, %s4871_s25  ;;  %2575 = vrot.lane.b32.xlu1 %v2220_v2, %s4871_s25 }
 0x673   : > { %2817 = vadd.xlane.f32.xlu0 %v2816_v17 }
 0x678   : > { %2814 = vadd.xlane.f32.xlu1 %v2813_v24 }
 0x689   : > { %4743 = vrot.lane.b32.xlu0 %v4737_v4, %s4875_s29  ;;  %4748 = vrot.lane.b32.xlu1 %v4737_v4, %s4874_s28 }
 0x68d   : > { %2482 = vrot.lane.b32.xlu0 %v2221_v1, %s4876_s30  ;;  %2480 = vrot.lane.b32.xlu1 %v2220_v2, %s4876_s30 }
 0x691   : > { %2672 = vrot.lane.b32.xlu0 %v2221_v1, %s4877_s15  ;;  %2670 = vrot.lane.b32.xlu1 %v2220_v2, %s4877_s15 }
 0x6c2   : > { %v4739_v14 = vpop.permute.xlu0 %4738  ;;  %v4734_v11 = vpop.permute.xlu1 %4733 }
 0x6c3   : > { %v4741_v16 = vunpack.i.h.bf16 %v4739_v14  ;;  %v4740_v19 = vunpack.i.l.bf16 %v4739_v14  ;;  %v4736_v25 = vunpack.i.h.bf16 %v4734_v11  ;;  %v4735_v26 = vunpack.i.l.bf16 %v4734_v11 }
 0x6c5   : > { %v4592_v27 = vpack.c.bf16 %v4736_v25, %v4735_v26  ;;  %v4604_v30 = vpack.c.bf16 %v4741_v16, %v4740_v19 }
 0x6c6   : > { %v2576_v36 = vpop.permute.xlu1 %2575  ;;  %v2578_v41 = vpop.permute.xlu0 %2577 }
 0x6c7   : > { %4594 = vmatprep.subr.msk.bf16.mxu0 %vm5062_vm4, %v4592_v27 }
 0x6c8   : > { %4597 = vmatpush3.bf16.xpose.msk.msra.mxu0 %vm5062_vm4, %v4592_v27 }
 0x6c9   : > { %4606 = vmatprep.subr.msk.bf16.mxu0 %vm5062_vm4, %v4604_v30 }
 0x6cf   : > { %4393 = vmatmul.mubr.msk.f32.vlgmr.msra.gmra.mrb[18].mxu0 %vm847_vm3, %v2221_v1 }
 0x6d0   : > { %4609 = vmatpush3.bf16.xpose.msk.msra.mxu0 %vm5062_vm4, %v4604_v30  ;;  %4406 = vmatprep.mubr.msk.f32.mxu0 %vm847_vm3, %v2576_v36 }
 0x6d1   : > { %4617 = vmatprep.subr.bf16.mxu0 %v4616_v35 }
 0x6d7   : > { %4407 = vmatmul.mubr.msk.f32.vlgmr.msra.gmra.mrb[20].mxu0 %vm847_vm3, %v2578_v41 }
 0x6d8   : > { %4619 = vmatpush3.bf16.msra.mxu0 %v4616_v35  ;;  %4420 = vmatprep.mubr.msk.f32.mxu0 %vm488_vm0, %v4979_v12 }
 0x6d9   : > { %4625 = vmatprep.subr.bf16.mxu0 %v4624_v39 }
 0x6db   : > { %4421 = vmatmul.mubr.msk.f32.vlgmr.msra.gmra.mrb[22].mxu0 %vm488_vm0, %v4981_v13 }
 0x6dc   : > { %4627 = vmatpush3.bf16.msra.mxu0 %v4624_v39  ;;  %4434 = vmatprep.mubr.msk.f32.mxu0 %vm488_vm0, %v4979_v12 }
 0x6df   : > { %4435 = vmatmul.mubr.msk.f32.vlgmr.msra.gmra.mrb[24].mxu0 %vm488_vm0, %v4981_v13 }
 0x700   : > { %v2818_v43 = vpop.xlane.xlu0 %2817 }
 0x701   : > { %v2820_v60 = vmax.f32 %v2818_v43, 1.0 }
 0x704   : > { %v4744_v44 = vpop.permute.xlu0 %4743 }
 0x705   : > { %v4746_v45 = vunpack.i.h.bf16 %v4744_v44  ;;  %v4745_v46 = vunpack.i.l.bf16 %v4744_v44  ;;  %v2815_v47 = vpop.xlane.xlu1 %2814 }
 0x706   : > { %v2819_v56 = vmax.f32 %v2815_v47, 1.0  ;;  %v4065_v47 = vld [vmem:[%s5504_s4 + $0x3] ss:$0 sm:$0xff] }
 0x707   : > { %v4598_v33 = vpack.c.bf16 %v4746_v45, %v4745_v46 }
 0x708   : > { %v2483_v13 = vpop.permute.xlu0 %2482  ;;  %4818 = vrsqrt.f32 %v2819_v56  ;;  %v1603_v56 = vmul.f32 %v5113_v42, %v5136_v23  ;;  %v4037_v42 = vld [vmem:[%s5506_s6 + $0x2] ss:$0 sm:$0xff] }
 0x709   : > { %4600 = vmatprep.subr.msk.bf16.mxu1 %vm5062_vm4, %v4598_v33  ;;  %v4749_v50 = vpop.permute.xlu1 %4748  ;;  %4820 = vrsqrt.f32 %v2820_v60  ;;  %v4001_v60 = vld [vmem:[%s5506_s6 + $0x1] ss:$0 sm:$0xff] }
 0x70a   : > { %v4751_v51 = vunpack.i.h.bf16 %v4749_v50  ;;  %v4750_v28 = vunpack.i.l.bf16 %v4749_v50  ;;  %4603 = vmatpush3.bf16.xpose.msk.msra.mxu1 %vm5062_vm4, %v4598_v33 }
 0x70c   : > { %v4610_v52 = vpack.c.bf16 %v4751_v51, %v4750_v28  ;;  %v2673_v55 = vpop.permute.xlu0 %2672 }
 0x70d   : > { %v2481_v12 = vpop.permute.xlu1 %2480 }
 0x70e   : > { %4399 = vmatprep.mubr.msk.f32.mxu1 %vm847_vm3, %v2481_v12  ;;  %4612 = vmatprep.subr.msk.bf16.mxu1 %vm5062_vm4, %v4610_v52 }
 0x711   : > { %4400 = vmatmul.mubr.msk.f32.vlgmr.msra.gmra.mrb[22].mxu1 %vm847_vm3, %v2483_v13  ;;  %v2671_v54 = vpop.permute.xlu1 %2670 }
 0x712   : > { %4615 = vmatpush3.bf16.xpose.msk.msra.mxu1 %vm5062_vm4, %v4610_v52  ;;  %4413 = vmatprep.mubr.msk.f32.mxu1 %vm847_vm3, %v2671_v54  ;;  %v5305_v1 = vpop.eup %4818 }
 0x713   : > { %v5307_v2 = vpop.eup %4820 }
 0x719   : > { %4414 = vmatmul.mubr.msk.f32.vlgmr.msra.gmra.mrb[24].mxu1 %vm847_vm3, %v2673_v55  ;;  %v1604_v55 = vmul.f32 %v5111_v40, %v5134_v22  ;;  %v2377_v40 = vmul.f32 %v5208_v20, %v5233_v3  ;;  %v5361_v3 = vmul.f32 0.25, %v5224_v59  ;;  %v5379_v59 = vmul.f32 0.25, %v5125_v7 }
 0x71a   : > { %4427 = vmatprep.mubr.msk.f32.mxu1 %vm488_vm0, %v5250_v18 }
 0x71b   : > { %v2387_v23 = vadd.f32 %v4037_v42, %v2377_v40 }
 0x7a2   : > { %v4394_v61 = vpop.f32.mrb[18].mxu0 }
 0x7a3   : > { %v2469_v63 = vpop.f32.mrb[19].mxu0  ;;  %4822 = vtanh.f32 %v4394_v61  ;;  %v1614_v61 = vadd.f32 %v4001_v60, %v1604_v55  ;;  %v3619_v55 = vld [vmem:[%s5507_s7 + $0x38] sm:$0xff] }
 0x7a4   : > { %4824 = vtanh.f32 %v2469_v63  ;;  %v1613_v63 = vadd.f32 %v4001_v60, %v1603_v56 }
 0x7aa   : > { %v4408_v0 = vpop.f32.mrb[20].mxu0 }
 0x7ab   : > { %v2657_v57 = vpop.f32.mrb[21].mxu0 }
 0x7ad   : > { %v4823_v27 = vpop.eup %4822 }
 0x7ae   : > { %v4422_v4 = vpop.f32.mrb[22].mxu0  ;;  %v4825_v31 = vpop.eup %4824 }
 0x7af   : > { %v2902_v5 = vmul.f32 %v5307_v2, %v4422_v4  ;;  %v2892_v6 = vpop.f32.mrb[23].mxu0 }
 0x7b0   : > { %v2901_v9 = vmul.f32 %v5305_v1, %v2892_v6 }
 0x7b2   : > { %v4620_v15 = vpack.c.bf16 %v2902_v5, %v2901_v9  ;;  %v4436_v17 = vpop.f32.mrb[24].mxu0  ;;  %v5372_v5 = vmul.f32 0.25, %v5127_v8 }
 0x7b3   : > { %v3075_v24 = vmul.f32 %v5307_v2, %v4436_v17  ;;  %v3065_v14 = vpop.f32.mrb[25].mxu0 }
 0x7b4   : > { %v3074_v11 = vmul.f32 %v5305_v1, %v3065_v14  ;;  %4621 = vmatprep.subr.bf16.mxu1 %v4620_v15 }
 0x7b5   : > { %4623 = vmatpush3.bf16.msra.mxu1 %v4620_v15 }
 0x7b6   : > { %v4628_v16 = vpack.c.bf16 %v3075_v24, %v3074_v11 }
 0x7b8   : > { %4428 = vmatmul.mubr.msk.f32.vlgmr.msra.gmra.mrb[26].mxu1 %vm488_vm0, %v5244_v10  ;;  %4629 = vmatprep.subr.bf16.mxu1 %v4628_v16 }
 0x7b9   : > { %4631 = vmatpush3.bf16.msra.mxu1 %v4628_v16  ;;  %4441 = vmatprep.mubr.msk.f32.mxu1 %vm488_vm0, %v5250_v18 }
 0x7bc   : > { %4442 = vmatmul.mubr.msk.f32.vlgmr.msra.gmra.mrb[28].mxu1 %vm488_vm0, %v5244_v10 }
 0x7e4   : > { %v4401_v19 = vpop.f32.mrb[22].mxu1 }
 0x7e5   : > { %4826 = vtanh.f32 %v4401_v19  ;;  %v2562_v25 = vpop.f32.mrb[23].mxu1 }
 0x7e6   : > { %4828 = vtanh.f32 %v2562_v25 }
 0x7e7   : > { %4830 = vtanh.f32 %v4408_v0  ;;  %v2378_v0 = vmul.f32 %v5210_v21, %v5231_v53  ;;  %v4073_v21 = vld [vmem:[%s5506_s6 + $0x3] ss:$0 sm:$0xff] }
 0x7e8   : > { %4832 = vtanh.f32 %v2657_v57 }
 0x7e9   : > { %v2388_v22 = vadd.f32 %v4037_v42, %v2378_v0 }
 0x7ec   : > { %v4415_v26 = vpop.f32.mrb[24].mxu1 }
 0x7ed   : > { %4834 = vtanh.f32 %v4415_v26  ;;  %v2752_v30 = vpop.f32.mrb[25].mxu1  ;;  %v3612_v26 = vld [vmem:[%s5507_s7] sm:$0xff] }
 0x7ee   : > { %4836 = vtanh.f32 %v2752_v30 }
 0x7ef   : > { %v4827_v34 = vpop.eup %4826 }
 0x7f0   : > { %v4829_v35 = vpop.eup %4828  ;;  %v2574_v18 = vadd.f32 %v4827_v34, %v4823_v27  ;;  %v3613_v27 = vld [vmem:[%s5507_s7 + $0x8] sm:$0xff] }
 0x7f1   : > { %v4831_v36 = vpop.eup %4830  ;;  %v2573_v37 = vadd.f32 %v4829_v35, %v4825_v31  ;;  %v4656_v30 = vpack.c.bf16 %v3613_v27, %v3612_v26  ;;  %v830_v31 = vmul.f32 %v5017_v32, %v5033_v49  ;;  %v3614_v32 = vld [vmem:[%s5507_s7 + $0x10] sm:$0xff]  ;;  %v3615_v49 = vld [vmem:[%s5507_s7 + $0x18] sm:$0xff] }
 0x7f2   : > { %v4833_v10 = vpop.eup %4832  ;;  %v2669_v38 = vadd.f32 %v4831_v36, %v2574_v18  ;;  %v3967_v18 = vld [vmem:[%s5506_s6] ss:$0 sm:$0xff] }
 0x7f3   : > { %v2668_v39 = vadd.f32 %v4833_v10, %v2573_v37  ;;  %v839_v36 = vadd.f32 %v3967_v18, %v830_v31 }
 0x7f7   : > { %v4835_v41 = vpop.eup %4834 }
 0x7f8   : > { %v4837_v43 = vpop.eup %4836  ;;  %v2764_v44 = vadd.f32 %v4835_v41, %v2669_v38  ;;  %v4660_v41 = vpack.c.bf16 %v3615_v49, %v3614_v32 }
 0x7f9   : > { %v2763_v45 = vadd.f32 %v4837_v43, %v2668_v39 }
 0x7fa   : > { %v5374_v6 = vmul.f32 0.25, %v2764_v44 }
 0x88b   : > { %v4429_v46 = vpop.f32.mrb[26].mxu1 }
 0x88c   : > { %v2985_v33 = vmul.f32 %v5307_v2, %v4429_v46  ;;  %v2975_v50 = vpop.f32.mrb[27].mxu1  ;;  %v3616_v46 = vld [vmem:[%s5507_s7 + $0x20] sm:$0xff] }
 0x88d   : > { %v2984_v51 = vmul.f32 %v5305_v1, %v2975_v50 }
 0x88e   : > { %v5324_v28 = vadd.f32 %v4065_v47, %v2985_v33 }
 0x88f   : > { %v2994_v52 = vadd.f32 %v4065_v47, %v2984_v51  ;;  %v4443_v12 = vpop.f32.mrb[28].mxu1  ;;  %v3617_v47 = vld [vmem:[%s5507_s7 + $0x28] sm:$0xff] }
 0x890   : > { %v3142_v13 = vpop.f32.mrb[29].mxu1  ;;  %v3152_v57 = vmul.f32 %v5307_v2, %v4443_v12  ;;  %v5368_v2 = vmul.f32 0.25, %v2763_v45  ;;  %v4664_v12 = vpack.c.bf16 %v3617_v47, %v3616_v46 }
 0x891   : > { %4448 = vmatprep.mubr.msk.f32.mxu0 %vm847_vm3, %v2994_v52  ;;  %v4757_v54 = vpack.i.bf16 %v5324_v28, %v2994_v52  ;;  %v3151_v4 = vmul.f32 %v5305_v1, %v3142_v13  ;;  %v5365_v1 = vmul.f32 0.25, %v5222_v58 }
 0x892   : > { %v3162_v20 = vadd.f32 %v4073_v21, %v3152_v57 }
 0x893   : > { %4758 = vrot.lane.b32.xlu0 %v4757_v54, %s4873_s27  ;;  %4753 = vrot.lane.b32.xlu1 %v4757_v54, %s4872_s26  ;;  %v3161_v53 = vadd.f32 %v4073_v21, %v3151_v4 }
 0x897   : > { %3351 = vrot.lane.b32.xlu0 %v5324_v28, %s4871_s25  ;;  %3349 = vrot.lane.b32.xlu1 %v2994_v52, %s4871_s25 }
 0x89b   : > { %3584 = vrot.lane.b32.xlu0 %v1614_v61, %s4878_s16  ;;  %3582 = vrot.lane.b32.xlu1 %v1613_v63, %s4878_s16  ;;  %v831_v61 = vmul.f32 %v5015_v29, %v5031_v48  ;;  %s5477_s16 = scalar_lea.vmem %s5502_s2, %s4970_s13 }
 0x89d   : > { %v840_v0 = vadd.f32 %v3967_v18, %v831_v61 }
 0x89f   : > { %3592 = vrot.lane.b32.xlu0 %v2388_v22, %s4879_s20  ;;  %3590 = vrot.lane.b32.xlu1 %v2387_v23, %s4879_s20 }
 0x8a3   : > { %3600 = vrot.lane.b32.xlu0 %v3162_v20, %s4880_s18  ;;  %3598 = vrot.lane.b32.xlu1 %v3161_v53, %s4880_s18 }
 0x8a7   : > { %4768 = vrot.lane.b32.xlu0 %v4757_v54, %s4874_s28  ;;  %4763 = vrot.lane.b32.xlu1 %v4757_v54, %s4875_s29  ;;  %v3618_v54 = vld [vmem:[%s5507_s7 + $0x30] sm:$0xff] }
 0x8a8   : > { %v4668_v60 = vpack.c.bf16 %v3619_v55, %v3618_v54 }
 0x8ab   : > { %3256 = vrot.lane.b32.xlu0 %v5324_v28, %s4876_s30  ;;  %3254 = vrot.lane.b32.xlu1 %v2994_v52, %s4876_s30  ;;  %s466_s30 = scalar_lea.vmem %s5512_s12, %s4970_s13 }
 0x8af   : > { %3446 = vrot.lane.b32.xlu0 %v5324_v28, %s4877_s15  ;;  %3444 = vrot.lane.b32.xlu1 %v2994_v52, %s4877_s15 }
 0x8cd   : > { %1993 = vxpose.xlu0.b32.start [1/2] (short) (narrow) %v5361_v3, 16 }
 0x8d1   : > { %1994 = vxpose.xlu0.b32.end [2/2] (short) (narrow) %v5365_v1, 16 }
 0x8d5   : > { %2767 = vxpose.xlu0.b32.start [1/2] (short) (narrow) %v5368_v2, 16 }
 0x8d8   : > { %1220 = vxpose.xlu1.b32.start [1/2] (short) (narrow) %v5372_v5, 16 }
 0x8d9   : > { %2768 = vxpose.xlu0.b32.end [2/2] (short) (narrow) %v5374_v6, 16 }
 0x8dc   : > { %1221 = vxpose.xlu1.b32.end [2/2] (short) (narrow) %v5379_v59, 16 }
 0x905   : > { %v4759_v58 = vpop.permute.xlu0 %4758  ;;  %v4754_v9 = vpop.permute.xlu1 %4753 }
 0x906   : > { %v4761_v15 = vunpack.i.h.bf16 %v4759_v58  ;;  %v4760_v17 = vunpack.i.l.bf16 %v4759_v58  ;;  %v4756_v24 = vunpack.i.h.bf16 %v4754_v9  ;;  %v4755_v14 = vunpack.i.l.bf16 %v4754_v9 }
 0x908   : > { %v4632_v11 = vpack.c.bf16 %v4756_v24, %v4755_v14  ;;  %v4644_v19 = vpack.c.bf16 %v4761_v15, %v4760_v17 }
 0x909   : > { %v3352_v8 = vpop.permute.xlu0 %3351  ;;  %v3350_v16 = vpop.permute.xlu1 %3349 }
 0x90a   : > { %4634 = vmatprep.subr.msk.bf16.mxu0 %vm5062_vm4, %v4632_v11 }
 0x90b   : > { %4637 = vmatpush3.bf16.xpose.msk.msra.mxu0 %vm5062_vm4, %v4632_v11 }
 0x90c   : > { %4646 = vmatprep.subr.msk.bf16.mxu0 %vm5062_vm4, %v4644_v19 }
 0x90d   : > { %v3585_v7 = vpop.permute.xlu0 %3584  ;;  %v3583_v25 = vpop.permute.xlu1 %3582 }
 0x90e   : > { %v3604_v38 = vsel %vm488_vm0, %v839_v36, %v3583_v25  ;;  %v3605_v42 = vsel %vm488_vm0, %v840_v0, %v3585_v7 }
 0x911   : > { %v3593_v34 = vpop.permute.xlu0 %3592  ;;  %v3591_v35 = vpop.permute.xlu1 %3590 }
 0x912   : > { %4449 = vmatmul.mubr.msk.f32.vlgmr.msra.gmra.mrb[26].mxu0 %vm847_vm3, %v5324_v28  ;;  %v3607_v39 = vsel %vm3606_vm5, %v3604_v38, %v3591_v35  ;;  %v3608_v22 = vsel %vm3606_vm5, %v3605_v42, %v3593_v34  ;;  %v3812_v42 = vld [vmem:[%s5477_s16 + $0x8] sm:$0xff] }
 0x913   : > { %4649 = vmatpush3.bf16.xpose.msk.msra.mxu0 %vm5062_vm4, %v4644_v19  ;;  %4462 = vmatprep.mubr.msk.f32.mxu0 %vm847_vm3, %v3350_v16  ;;  %v4881_v16 = vmov 0  }
 0x914   : > { %4657 = vmatprep.subr.bf16.mxu0 %v4656_v30  ;;  %4772 = vset.pattern.permute.xlu1 %v4881_v16 }
 0x915   : > { %v3601_v37 = vpop.permute.xlu0 %3600  ;;  %v3599_v10 = vpop.permute.xlu1 %3598 }
 0x916   : > { %v3610_v43 = vsel %vm3609_vm6, %v3607_v39, %v3599_v10  ;;  %v3611_v29 = vsel %vm3609_vm6, %v3608_v22, %v3601_v37 }
 0x919   : > { %v4769_v44 = vpop.permute.xlu0 %4768  ;;  %v4764_v45 = vpop.permute.xlu1 %4763 }
 0x91a   : > { %v4771_v33 = vunpack.i.h.bf16 %v4769_v44  ;;  %v4770_v50 = vunpack.i.l.bf16 %v4769_v44  ;;  %v4766_v51 = vunpack.i.h.bf16 %v4764_v45  ;;  %v4765_v28 = vunpack.i.l.bf16 %v4764_v45  ;;  %4463 = vmatmul.mubr.msk.f32.vlgmr.msra.gmra.mrb[28].mxu0 %vm847_vm3, %v3352_v8 }
 0x91b   : > { %4659 = vmatpush3.bf16.msra.mxu0 %v4656_v30  ;;  %4488 = vmatprep.mubr.msk.f32.mxu0 %vm3627_vm7, %v3610_v43  ;;  %v4092_v30 = vld [vmem:[%s5508_s8] ss:$0 sm:$0xff] }
 0x91c   : > { %v4638_v52 = vpack.c.bf16 %v4766_v51, %v4765_v28  ;;  %4661 = vmatprep.subr.bf16.mxu0 %v4660_v41  ;;  %v4650_v56 = vpack.c.bf16 %v4771_v33, %v4770_v50 }
 0x91d   : > { %v3255_v13 = vpop.permute.xlu1 %3254  ;;  %v3257_v63 = vpop.permute.xlu0 %3256 }
 0x91e   : > { %4640 = vmatprep.subr.msk.bf16.mxu1 %vm5062_vm4, %v4638_v52  ;;  %4455 = vmatprep.mubr.msk.f32.mxu1 %vm847_vm3, %v3255_v13 }
 0x91f   : > { %4643 = vmatpush3.bf16.xpose.msk.msra.mxu1 %vm5062_vm4, %v4638_v52  ;;  %4663 = vmatpush3.bf16.msra.mxu0 %v4660_v41 }
 0x920   : > { %4652 = vmatprep.subr.msk.bf16.mxu1 %vm5062_vm4, %v4650_v56  ;;  %4665 = vmatprep.subr.bf16.mxu0 %v4664_v12 }
 0x921   : > { %v3445_v40 = vpop.permute.xlu1 %3444  ;;  %v3447_v48 = vpop.permute.xlu0 %3446 }
 0x923   : > { %4667 = vmatpush3.bf16.msra.mxu0 %v4664_v12 }
 0x924   : > { %4669 = vmatprep.subr.bf16.mxu0 %v4668_v60 }
 0x926   : > { %4456 = vmatmul.mubr.msk.f32.vlgmr.msra.gmra.mrb[30].mxu1 %vm847_vm3, %v3257_v63 }
 0x927   : > { %4655 = vmatpush3.bf16.xpose.msk.msra.mxu1 %vm5062_vm4, %v4650_v56  ;;  %4469 = vmatprep.mubr.msk.f32.mxu1 %vm847_vm3, %v3445_v40 }
 0x928   : > { %4671 = vmatpush3.bf16.msra.mxu0 %v4668_v60 }
 0x92b   : > { %4489 = vmatmul.mubr.msk.f32.vlgmr.msra.gmra.mrb[30].mxu0 %vm3627_vm7, %v3611_v29 }
 0x92e   : > { %4470 = vmatmul.mubr.msk.f32.vlgmr.msra.gmra.mrb[32].mxu1 %vm847_vm3, %v3447_v48 }
 0x94d   : > { %v2009_v23 = vpop.trf.xlu0 }
 0x94e   : > { %v2025_v57 = vadd.f32 %v2009_v23, %v5361_v3 }
 0x950   : > { %v2027_v62 = vmul.f32 0.5, %v2025_v57 }
 0x951   : > { %v2010_v4 = vpop.trf.xlu0 }
 0x952   : > { %4018 = vst.msk [vmem:[%s5451_s24 + $0x10] sm:$0xff] %vm488_vm0, %v2027_v62  ;;  %v2026_v21 = vadd.f32 %v2010_v4, %v5365_v1  ;;  %v4097_v4 = vld [vmem:[%s5510_s10] ss:$0 sm:$0xff] }
 0x954   : > { %v2028_v20 = vmul.f32 0.5, %v2026_v21 }
 0x955   : > { %v2783_v53 = vpop.trf.xlu0 }
 0x956   : > { %4019 = vst.msk [vmem:[%s5451_s24 + $0x18] sm:$0xff] %vm488_vm0, %v2028_v20  ;;  %v2799_v3 = vadd.f32 %v2783_v53, %v5368_v2 }
 0x958   : > { %v2801_v58 = vmul.f32 0.5, %v2799_v3  ;;  %v1236_v9 = vpop.trf.xlu1 }
 0x959   : > { %v1252_v15 = vadd.f32 %v1236_v9, %v5372_v5  ;;  %v2784_v17 = vpop.trf.xlu0  ;;  %v3721_v5 = vld [vmem:[%s5509_s9] sm:$0xff] }
 0x95a   : > { %4054 = vst.msk [vmem:[%s5451_s24 + $0x20] sm:$0xff] %vm488_vm0, %v2801_v58  ;;  %v2800_v24 = vadd.f32 %v2784_v17, %v5374_v6  ;;  %4491 = vmatprep.subr.mxu1 %v3721_v5  ;;  %v3811_v6 = vld [vmem:[%s5477_s16] sm:$0xff] }
 0x95b   : > { %v1254_v14 = vmul.f32 0.5, %v1252_v15  ;;  %4492 = vmatpush3.msra.mxu1 %v3721_v5  ;;  %3815 = vperm.xlu1 %4772, %v3811_v6  }
 0x95c   : > { %v2802_v1 = vmul.f32 0.5, %v2800_v24  ;;  %v1237_v11 = vpop.trf.xlu1 }
 0x95d   : > { %1256 = vst.msk [vmem:[%s5451_s24] sm:$0xff] %vm488_vm0, %v1254_v14  ;;  %v1253_v8 = vadd.f32 %v1237_v11, %v5379_v59 }
 0x95e   : > { %4055 = vst.msk [vmem:[%s5451_s24 + $0x28] sm:$0xff] %vm488_vm0, %v2802_v1 }
 0x95f   : > { %v1255_v2 = vmul.f32 0.5, %v1253_v8 }
 0x961   : > { %1257 = vst.msk [vmem:[%s5451_s24 + $0x8] sm:$0xff] %vm488_vm0, %v1255_v2 }
 0x9da   : > { %v3816_v58 = vpop.permute.xlu1 %3815 }
 0x9e5   : > { %v4450_v59 = vpop.f32.mrb[26].mxu0 }
 0x9e6   : > { %v3243_v19 = vpop.f32.mrb[27].mxu0  ;;  %4838 = vtanh.f32 %v4450_v59 }
 0x9e7   : > { %4840 = vtanh.f32 %v3243_v19 }
 0x9ed   : > { %v4464_v7 = vpop.f32.mrb[28].mxu0 }
 0x9ee   : > { %v3431_v25 = vpop.f32.mrb[29].mxu0 }
 0x9f0   : > { %v4839_v10 = vpop.eup %4838 }
 0x9f1   : > { %v4841_v38 = vpop.eup %4840 }
 0x9f9   : > { %v4457_v26 = vpop.f32.mrb[30].mxu1 }
 0x9fa   : > { %4842 = vtanh.f32 %v4457_v26  ;;  %v3336_v27 = vpop.f32.mrb[31].mxu1 }
 0x9fb   : > { %4844 = vtanh.f32 %v3336_v27 }
 0x9fc   : > { %4846 = vtanh.f32 %v4464_v7 }
 0x9fd   : > { %4848 = vtanh.f32 %v3431_v25 }
 0x9fe   : > { %v4490_v31 = vpop.f32.mrb[30].mxu0 }
 0x9ff   : > { %v3706_v34 = vadd.f32 %v4490_v31, %v4092_v30  ;;  %v3700_v35 = vpop.f32.mrb[31].mxu0 }
 0xa00   : > { %v3701_v18 = vadd.f32 %v4092_v30, %v3700_v35 }
 0xa01   : > { %v3712_v36 = vmin.f32 %v3706_v34, 0.0  ;;  %v4471_v37 = vpop.f32.mrb[32].mxu1  ;;  %vm3710_vm10 = vcmp.gt.f32.partialorder %v3706_v34, 0.0 }
 0xa02   : > { %v3711_v32 = vmin.f32 %v3701_v18, 0.0  ;;  %4850 = vtanh.f32 %v4471_v37  ;;  %v3526_v49 = vpop.f32.mrb[33].mxu1  ;;  %vm3709_vm9 = vcmp.gt.f32.partialorder %v3701_v18, 0.0 }
 0xa03   : > { %v3715_v39 = vmul.f32 1.442695, %v3712_v36  ;;  %4852 = vtanh.f32 %v3526_v49 }
 0xa04   : > { %v4843_v41 = vpop.eup %4842  ;;  %v3713_v43 = vmul.f32 1.442695, %v3711_v32 }
 0xa05   : > { %v4845_v44 = vpop.eup %4844  ;;  %4854 = vpow2.f32 %v3715_v39  ;;  %v3348_v45 = vadd.f32 %v4843_v41, %v4839_v10 }
 0xa06   : > { %v4847_v46 = vpop.eup %4846  ;;  %4856 = vpow2.f32 %v3713_v43  ;;  %v3347_v47 = vadd.f32 %v4845_v44, %v4841_v38 }
 0xa07   : > { %v4849_v33 = vpop.eup %4848  ;;  %v3443_v50 = vadd.f32 %v4847_v46, %v3348_v45 }
 0xa08   : > { %v3442_v51 = vadd.f32 %v4849_v33, %v3347_v47 }
 0xa0c   : > { %v4851_v28 = vpop.eup %4850 }
 0xa0d   : > { %v4853_v52 = vpop.eup %4852  ;;  %v3538_v12 = vadd.f32 %v4851_v28, %v3443_v50 }
 0xa0e   : > { %v3537_v13 = vadd.f32 %v4853_v52, %v3442_v51 }
 0xa0f   : > { %v4855_v54 = vpop.eup %4854  ;;  %v3540_v40 = vmul.f32 0.25, %v3538_v12 }
 0xa10   : > { %v4857_v55 = vpop.eup %4856  ;;  %v4096_v56 = vadd.f32 -1.0, %v4855_v54  ;;  %v3539_v60 = vmul.f32 0.25, %v3537_v13 }
 0xa11   : > { %v4095_v61 = vadd.f32 -1.0, %v4857_v55 }
 0xa12   : > { %3541 = vxpose.xlu0.b32.start [1/2] (short) (narrow) %v3539_v60, 16  ;;  %v3720_v0 = vsel %vm3710_vm10, %v3706_v34, %v4096_v56 }
 0xa13   : > { %v3719_v63 = vsel %vm3709_vm9, %v3701_v18, %v4095_v61 }
 0xa14   : > { %4493 = vmatprep.mubr.msk.f32.mxu1 %vm3729_vm8, %v3719_v63 }
 0xa15   : > { %4494 = vmatmul.mubr.msk.f32.vlgmr.msra.gmra.mrb[34].mxu1 %vm3729_vm8, %v3720_v0 }
 0xa16   : > { %3542 = vxpose.xlu0.b32.end [2/2] (short) (narrow) %v3540_v40, 16 }
 0xa3f   : > { %4773 = vset.pattern.permute.xlu0 %v4881_v16 }
 0xa40   : > { %3820 = vperm.xlu0 %4773, %v3812_v42  }
 0xa92   : > { %v3557_v22 = vpop.trf.xlu0 }
 0xa93   : > { %v3573_v29 = vadd.f32 %v3557_v22, %v3539_v60 }
 0xa95   : > { %v3575_v48 = vmul.f32 0.5, %v3573_v29 }
 0xa96   : > { %v3558_v23 = vpop.trf.xlu0 }
 0xa97   : > { %4090 = vst.msk [vmem:[%s5451_s24 + $0x30] sm:$0xff] %vm488_vm0, %v3575_v48  ;;  %v3574_v57 = vadd.f32 %v3558_v23, %v3540_v40 }
 0xa99   : > { %v3576_v62 = vmul.f32 0.5, %v3574_v57 }
 0xa9b   : > { %4091 = vst.msk [vmem:[%s5451_s24 + $0x38] sm:$0xff] %vm488_vm0, %v3576_v62 }
 0xabf   : > { %v3821_v20 = vpop.permute.xlu0 %3820 }
 0xae8   : > { %v4495_v21 = vpop.f32.mrb[34].mxu1 }
 0xae9   : > { %v3808_v53 = vadd.f32 %v4495_v21, %v4097_v4  ;;  %v3802_v3 = vpop.f32.mrb[35].mxu1 }
 0xaea   : > { %v3803_v9 = vadd.f32 %v4097_v4, %v3802_v3 }
 0xaeb   : > { %v3824_v15 = vmul.f32 %v3821_v20, %v3808_v53 }
 0xaec   : > { %v3823_v17 = vmul.f32 %v3816_v58, %v3803_v9 }
 0xaed   : > { %4858 = vtanh.f32 %v3824_v15 }
 0xaee   : > { %4860 = vtanh.f32 %v3823_v17 }
 0xaf7   : > { %v4859_v24 = vpop.eup %4858 }
 0xaf8   : > { %v4861_v14 = vpop.eup %4860  ;;  %3828 = vst.msk [vmem:[%s466_s30 + $0x8] sm:$0xff] %vm488_vm0, %v4859_v24 }
 0xaf9   : > { %3827 = vst.msk [vmem:[%s466_s30] sm:$0xff] %vm488_vm0, %v4861_v14 }
 0xafa PF: > { %s23_s21 = sadd.s32 1, %s4868_s21  }
 0xafb   : > { %p20_p4 = scmp.ge.s32.totalorder %s23_s21, 4  }
 0xafd   :  { %22 = sbr.rel (!%p20_p4) target bundleno = 1 (0x1), region = 130 }

// kernel: edge_score_network_forward.13
= control target key start
LH: loop header
LB: loop body
LE: loop exit
PB: predicated region body
PF: predicated region fallthrough
CT: control target
= control target key end

     0   :  { %s5697_s0 = inlined_call_operand.vmem [shape: f32[2,16,16], index: 0, kind: input, shape index: {}]   ;;  %s5698_s1 = inlined_call_operand.vmem [shape: f32[2,4,16,16], index: 1, kind: input, shape index: {}]   ;;  %s5699_s2 = inlined_call_operand.vmem [shape: f32[2,16,1], index: 2, kind: input, shape index: {}]   ;;  %s5700_s3 = inlined_call_operand.vmem [shape: f32[4,16,32], index: 3, kind: input, shape index: {}]   ;;  %s5701_s4 = inlined_call_operand.vmem [shape: f32[4,1,32], index: 4, kind: input, shape index: {}]   ;;  %s5702_s5 = inlined_call_operand.vmem [shape: f32[4,16,16], index: 5, kind: input, shape index: {}]   ;;  %s5703_s6 = inlined_call_operand.vmem [shape: f32[4,1,16], index: 6, kind: input, shape index: {}]   ;;  %s5704_s7 = inlined_call_operand.vmem [shape: f32[64,8], index: 7, kind: input, shape index: {}]   ;;  %s5705_s8 = inlined_call_operand.vmem [shape: f32[1,8], index: 8, kind: input, shape index: {}]   ;;  %s5706_s9 = inlined_call_operand.vmem [shape: f32[8,16], index: 9, kind: input, shape index: {}]   ;;  %s5707_s10 = inlined_call_operand.vmem [shape: f32[1,16], index: 10, kind: input, shape index: {}]   ;;  %s5708_s11 = inlined_call_operand.vmem [shape: f32[2,4,16,16], index: 11, kind: output, shape index: {0}]   ;;  %s5709_s12 = inlined_call_operand.hbm [shape: f32[2,16,16], index: 12, kind: output, shape index: {1}]  }
   0x1   :  { %5729 = sst [smem:[#allocation8_spill]] %s5697_s0 }
   0x2   :  { %5730 = sst [smem:[#allocation9_spill]] %s5698_s1 }
   0x3   :  { %18 = vsyncpa [#allocation3], 0 }
   0x4   :  { %20 = vsyncpa [#allocation3 + $0x1], 0  ;;  %s5059_s21 = smov 0   ;;  %s5061_s22 = smov 0  }
   0x5   :  { %s5063_s23 = smov 0   ;;  %s5065_s24 = smov 0  }
   0x6 LB: > { %5731 = sst [smem:[#allocation5_spill]] %s4973_s23  ;;  %s5080_s25 = sadd.s32 4294967295, %s4977_s24   ;;  %s4977_s24 = sphi %s5065_s24, %s5749_s24   ;;  %s4973_s23 = sphi %s5063_s23, %s5751_s23   ;;  %s4969_s22 = sphi %s5061_s22, %s5753_s22   ;;  %s4965_s21 = sphi %s5059_s21, %s5752_s21  }
   0x7   : > { %s3960_s26 = sadd.s32 4294967294, %s4977_s24   ;;  %s5084_s27 = sadd.s32 1, %s4977_s24  }
   0x8   : > { %5732 = sst [smem:[#allocation6_spill]] %s5084_s27  ;;  %s305_s28 = sadd.s32 1, %s4973_s23 }
   0x9   : > { %s302_s29 = ssub.s32 %s4977_s24, %s5084_s27  ;;  %p315_p0 = scmp.ne.s32.totalorder %s4973_s23, %s4969_s22 }
   0xa   : > { %p303_p1 = scmp.eq.s32.totalorder %s302_s29, 0  ;;  %p316_p2 = scmp.eq.s32.totalorder %s5080_s25, 1 }
   0xb   : > { %p321_p3 = scmp.ne.s32.totalorder %s4969_s22, %s4965_s21  ;;  %p322_p4 = scmp.eq.s32.totalorder %s3960_s26, 1 }
   0xc   : > { %s5095_s30 = scalar_select %p303_p1, %s4973_s23, %s305_s28  }
   0xd   : > { %p5097_p5 = por %p316_p2, %p315_p0  ;;  %p5101_p6 = por %p322_p4, %p321_p3 }
   0xe   : > { %5733 = sst [smem:[#allocation7_spill]] %s5095_s30  ;;  %p3963_p7 = scmp.ge.s32.totalorder %s4977_s24, 1 }
   0xf   : > { %p388_p8 = scmp.lt.s32.totalorder %s4977_s24, 3 }
  0x11   : > { %p389_p9 = pnand %p3963_p7, %p388_p8 }
  0x12   : > { %v497_v0 = vld [vmem:[%s5700_s3] sm:$0xff] (!%p389_p9)  ;;  %v498_v1 = vld [vmem:[%s5700_s3 + $0x8] sm:$0xff] (!%p389_p9)  ;;  %p445_p10 = scmp.lt.s32.totalorder (!%p389_p9), %s5080_s25, 1  ;;  %v467_v3 = vlaneseq (!%p389_p9)  ;;  %vm486_vm0 = vcmask (!%p389_p9), 130048   ;;  %s5736_s0 = sld [smem:[#allocation8_spill]] (!%p389_p9)  ;;  %v4979_v10 = vmov (!%p389_p9), 0.0  }
  0x13   : > { %392 = sbr.rel (%p389_p9) target bundleno = 2838 (0xb16), region = 64  ;;  %v674_v2 = vld [vmem:[%s5702_s5] sm:$0xff] (!%p389_p9)  ;;  %v4516_v4 = vpack.c.bf16 (!%p389_p9), %v498_v1, %v497_v0  ;;  %v675_v5 = vld [vmem:[%s5702_s5 + $0x8] sm:$0xff] (!%p389_p9)  ;;  %s5737_s1 = sld [smem:[#allocation9_spill]] (!%p389_p9)  ;;  %vm845_vm3 = vcmask (!%p389_p9), 31744   ;;  %vm3604_vm5 = vcmask (!%p389_p9), 261120  }
  0x14   : > { %v4524_v6 = vpack.c.bf16 (!%p389_p9), %v675_v5, %v674_v2  ;;  %v468_v7 = vshrl.u32 (!%p389_p9), %v467_v3, 7  ;;  %v471_v8 = vand.u32 (!%p389_p9), 127, %v467_v3  ;;  %v3979_v42 = vld [vmem:[%s5701_s4] ss:$0 sm:$0xff] (!%p389_p9)  ;;  %s5722_s20 = smov (!%p389_p9), 112   ;;  %s5724_s26 = smov (!%p389_p9), 104   ;;  %vm5215_vm4 = vmpackc.low (!%p389_p9), %vm845_vm3, %vm845_vm3 }
  0x15   : > { %4517 = vmatprep.subr.bf16.mxu1 (!%p389_p9), %v4516_v4  ;;  %s5716_s17 = smov (!%p389_p9), 100   ;;  %s5718_s18 = smov (!%p389_p9), 108   ;;  %v4004_v5 = vld [vmem:[%s5700_s3 + $0x18] sm:$0xff] (!%p389_p9)  ;;  %vm3607_vm6 = vcmask (!%p389_p9), 392192   ;;  %vm3625_vm7 = vcmask (!%p389_p9), 523264   ;;  %vm3727_vm8 = vcmask (!%p389_p9), 64512  }
  0x16   : > { %4525 = vmatprep.subr.bf16.mxu0 (!%p389_p9), %v4524_v6  ;;  %4519 = vmatpush3.bf16.msra.mxu1 (!%p389_p9), %v4516_v4  ;;  %vm472_vm1 = vcmp.eq.s32.totalorder (!%p389_p9), %v468_v7, %v471_v8  ;;  %v469_v9 = vadd.s32 (!%p389_p9), 8, %v468_v7  ;;  %v4003_v4 = vld [vmem:[%s5700_s3 + $0x10] sm:$0xff] (!%p389_p9)  ;;  %s5745_s23 = smov (!%p389_p9), 104   ;;  %s5746_s30 = smov (!%p389_p9), 112  }
  0x17   : > { %4527 = vmatpush3.bf16.msra.mxu0 (!%p389_p9), %v4524_v6  ;;  %v5137_v11 = vsel (!%p389_p9), %vm472_vm1, 1.0, %v4979_v10  ;;  %v4556_v6 = vpack.c.bf16 (!%p389_p9), %v4004_v5, %v4003_v4  ;;  %s4988_s27 = smov (!%p389_p9), 32  }
  0x18   : > { %v5145_v15 = vsub.f32 (!%p389_p9), 1.0, %v5137_v11  ;;  %vm473_vm2 = vcmp.eq.s32.totalorder (!%p389_p9), %v469_v9, %v471_v8  ;;  %v4011_v8 = vld [vmem:[%s5702_s5 + $0x10] sm:$0xff] (!%p389_p9)  ;;  %v4012_v9 = vld [vmem:[%s5702_s5 + $0x18] sm:$0xff] (!%p389_p9) }
  0x19   : > { %v5151_v16 = vsel (!%p389_p9), %vm473_vm2, 1.0, %v4979_v10  ;;  %v4564_v10 = vpack.c.bf16 (!%p389_p9), %v4012_v9, %v4011_v8 }
  0x1a   : > { %s5121_s29 = scalar_select %p445_p10, %s5080_s25, 1  ;;  %v5160_v19 = vsub.f32 1.0, %v5151_v16 }
  0x1c   : > { %s5710_s15 = sshll.u32 %s5121_s29, 4  ;;  %s5711_s16 = sshll.u32 %s5121_s29, 6 }
  0x1d   : > { %s449_s19 = scalar_lea.vmem %s5736_s0, %s5710_s15  ;;  %s5135_s28 = scalar_lea.vmem %s5737_s1, %s5711_s16 }
  0x1e   : > { %v5139_v12 = vld [vmem:[%s449_s19] sm:$0xff]  ;;  %v5141_v13 = vld [vmem:[%s449_s19 + $0x8] sm:$0xff]  ;;  %s5720_s19 = smov 120   ;;  %v4002_v51 = vld [vmem:[%s5135_s28 + $0x18] sm:$0xff]  ;;  %s5714_s15 = smov 124  }
  0x1f   : > { %v478_v14 = vld [vmem:[%s5135_s28] sm:$0xff]  ;;  %4272 = vmatprep.mubr.msk.f32.mxu1 %vm486_vm0, %v5139_v12  ;;  %4286 = vmatprep.mubr.msk.f32.mxu0 %vm486_vm0, %v5139_v12  ;;  %v479_v17 = vld [vmem:[%s5135_s28 + $0x8] sm:$0xff]  ;;  %v1260_v52 = vmul.f32 %v4002_v51, %v5160_v19  ;;  %v4001_v55 = vld [vmem:[%s5135_s28 + $0x10] sm:$0xff]  ;;  %s5712_s16 = smov 116   ;;  %s5747_s1 = sshll.u32 %s5121_s29, 6 }
  0x20   : > { %4273 = vmatmul.mubr.msk.f32.vlgmr.msra.gmra.mrb[0].mxu1 %vm486_vm0, %v5141_v13  ;;  %4287 = vmatmul.mubr.msk.f32.vlgmr.msra.gmra.mrb[0].mxu0 %vm486_vm0, %v5141_v13  ;;  %v482_v18 = vmul.f32 %v5145_v15, %v478_v14  ;;  %v483_v21 = vmul.f32 %v5160_v19, %v479_v17  ;;  %v1259_v56 = vmul.f32 %v4001_v55, %v5145_v15 }
  0x21   : > { %v5196_v53 = vadd.f32 %v5151_v16, %v1260_v52 }
  0x22   : > { %v484_v20 = vadd.f32 %v5137_v11, %v482_v18  ;;  %v485_v23 = vadd.f32 %v5151_v16, %v483_v21  ;;  %v5203_v57 = vadd.f32 %v5137_v11, %v1259_v56 }
  0x23   : > { %v1266_v54 = vsel %vm486_vm0, %v5196_v53, 0.0 }
  0x24   : > { %v487_v22 = vsel %vm486_vm0, %v484_v20, 0.0  ;;  %4279 = vmatprep.mubr.msk.f32.mxu1 %vm486_vm0, %v484_v20  ;;  %v490_v24 = vsel %vm486_vm0, %v485_v23, 0.0  ;;  %v1263_v58 = vsel %vm486_vm0, %v5203_v57, 0.0 }
  0x25   : > { %488 = vadd.xlane.f32.xlu0 %v487_v22 }
  0x29   : > { %491 = vadd.xlane.f32.xlu0 %v490_v24 }
  0xb2   : > { %v489_v25 = vpop.xlane.xlu0 %488 }
  0xb3   : > { %v493_v28 = vmax.f32 %v489_v25, 1.0 }
  0xb6   : > { %v492_v26 = vpop.xlane.xlu0 %491 }
  0xb7   : > { %v494_v27 = vmax.f32 %v492_v26, 1.0 }
  0xb9   : > { %4827 = vrsqrt.f32 %v494_v27 }
  0xba   : > { %4829 = vrsqrt.f32 %v493_v28 }
  0xc3   : > { %v5168_v29 = vpop.eup %4827 }
  0xc4   : > { %v5170_v32 = vpop.eup %4829 }
  0xf3   : > { %v4274_v30 = vpop.f32.mrb[0].mxu1  ;;  %v4288_v31 = vpop.f32.mrb[0].mxu0 }
  0xf4   : > { %v581_v33 = vmul.f32 %v5168_v29, %v4274_v30  ;;  %v752_v34 = vmul.f32 %v5168_v29, %v4288_v31  ;;  %v571_v35 = vpop.f32.mrb[1].mxu1  ;;  %v742_v36 = vpop.f32.mrb[1].mxu0 }
  0xf5   : > { %v580_v37 = vmul.f32 %v5170_v32, %v571_v35  ;;  %v751_v38 = vmul.f32 %v5170_v32, %v742_v36 }
  0xf7   : > { %v4520_v39 = vpack.c.bf16 %v581_v33, %v580_v37  ;;  %v4528_v40 = vpack.c.bf16 %v752_v34, %v751_v38 }
  0xf9   : > { %4521 = vmatprep.subr.bf16.mxu1 %v4520_v39 }
  0xfa   : > { %4523 = vmatpush3.bf16.msra.mxu1 %v4520_v39 }
  0xfb   : > { %4529 = vmatprep.subr.bf16.mxu1 %v4528_v40 }
  0xfd   : > { %4280 = vmatmul.mubr.msk.f32.vlgmr.msra.gmra.mrb[2].mxu1 %vm486_vm0, %v485_v23 }
  0xfe   : > { %4531 = vmatpush3.bf16.msra.mxu1 %v4528_v40  ;;  %4293 = vmatprep.mubr.msk.f32.mxu1 %vm486_vm0, %v484_v20 }
 0x101   : > { %4294 = vmatmul.mubr.msk.f32.vlgmr.msra.gmra.mrb[4].mxu1 %vm486_vm0, %v485_v23 }
 0x1d0   : > { %v4281_v41 = vpop.f32.mrb[2].mxu1 }
 0x1d1   : > { %v664_v43 = vmul.f32 %v5168_v29, %v4281_v41  ;;  %v654_v44 = vpop.f32.mrb[3].mxu1 }
 0x1d2   : > { %v663_v45 = vmul.f32 %v5170_v32, %v654_v44 }
 0x1d3   : > { %v673_v46 = vadd.f32 %v3979_v42, %v664_v43 }
 0x1d4   : > { %v672_v47 = vadd.f32 %v3979_v42, %v663_v45  ;;  %v5184_v48 = vpop.f32.mrb[4].mxu1 }
 0x1d5   : > { %v5186_v49 = vpop.f32.mrb[5].mxu1 }
 0x1d6   : > { %1026 = vrot.lane.b32.xlu0 %v672_v47, %s5720_s19  ;;  %4300 = vmatprep.mubr.msk.f32.mxu0 %vm845_vm3, %v672_v47  ;;  %v4745_v50 = vpack.i.bf16 %v673_v46, %v672_v47 }
 0x1d8   : > { %4746 = vrot.lane.b32.xlu1 %v4745_v50, %s5722_s20 }
 0x1dc   : > { %4751 = vrot.lane.b32.xlu1 %v4745_v50, %s5724_s26 }
 0x1e0   : > { %1028 = vrot.lane.b32.xlu1 %v673_v46, %s5720_s19  ;;  %s5743_s19 = smov 124  }
 0x1f5   : > { %1267 = vadd.xlane.f32.xlu0 %v1266_v54 }
 0x204   : > { %1264 = vadd.xlane.f32.xlu1 %v1263_v58 }
 0x20b   : > { %4761 = vrot.lane.b32.xlu0 %v4745_v50, %s5716_s17  ;;  %s5742_s17 = smov 100  }
 0x215   : > { %4756 = vrot.lane.b32.xlu1 %v4745_v50, %s5718_s18  ;;  %s5744_s18 = smov 116  }
 0x219   : > { %933 = vrot.lane.b32.xlu1 %v673_v46, %s5714_s15 }
 0x21d   : > { %931 = vrot.lane.b32.xlu1 %v672_v47, %s5714_s15  ;;  %s5740_s15 = smov 120  }
 0x221   : > { %1121 = vrot.lane.b32.xlu1 %v672_v47, %s5712_s16 }
 0x225   : > { %1123 = vrot.lane.b32.xlu1 %v673_v46, %s5712_s16  ;;  %s5741_s16 = smov 108  }
 0x248   : > { %v1027_v7 = vpop.permute.xlu0 %1026 }
 0x24a   : > { %v4747_v59 = vpop.permute.xlu1 %4746 }
 0x24b   : > { %v4749_v60 = vunpack.i.h.bf16 %v4747_v59  ;;  %v4748_v61 = vunpack.i.l.bf16 %v4747_v59 }
 0x24d   : > { %v4532_v63 = vpack.c.bf16 %v4749_v60, %v4748_v61 }
 0x24e   : > { %v4752_v0 = vpop.permute.xlu1 %4751 }
 0x24f   : > { %v4754_v1 = vunpack.i.h.bf16 %v4752_v0  ;;  %v4753_v2 = vunpack.i.l.bf16 %v4752_v0  ;;  %4534 = vmatprep.subr.msk.bf16.mxu0 %vm5215_vm4, %v4532_v63 }
 0x250   : > { %4537 = vmatpush3.bf16.xpose.msk.msra.mxu0 %vm5215_vm4, %v4532_v63 }
 0x251   : > { %v4544_v3 = vpack.c.bf16 %v4754_v1, %v4753_v2 }
 0x252   : > { %v1029_v14 = vpop.permute.xlu1 %1028 }
 0x253   : > { %4546 = vmatprep.subr.msk.bf16.mxu0 %vm5215_vm4, %v4544_v3 }
 0x257   : > { %4301 = vmatmul.mubr.msk.f32.vlgmr.msra.gmra.mrb[2].mxu0 %vm845_vm3, %v673_v46 }
 0x258   : > { %4549 = vmatpush3.bf16.xpose.msk.msra.mxu0 %vm5215_vm4, %v4544_v3  ;;  %4314 = vmatprep.mubr.msk.f32.mxu0 %vm845_vm3, %v1027_v7 }
 0x259   : > { %4557 = vmatprep.subr.bf16.mxu0 %v4556_v6 }
 0x25f   : > { %4315 = vmatmul.mubr.msk.f32.vlgmr.msra.gmra.mrb[4].mxu0 %vm845_vm3, %v1029_v14 }
 0x260   : > { %4559 = vmatpush3.bf16.msra.mxu0 %v4556_v6  ;;  %4328 = vmatprep.mubr.msk.f32.mxu0 %vm486_vm0, %v5139_v12 }
 0x261   : > { %4565 = vmatprep.subr.bf16.mxu0 %v4564_v10 }
 0x263   : > { %4329 = vmatmul.mubr.msk.f32.vlgmr.msra.gmra.mrb[6].mxu0 %vm486_vm0, %v5141_v13 }
 0x264   : > { %4567 = vmatpush3.bf16.msra.mxu0 %v4564_v10  ;;  %4342 = vmatprep.mubr.msk.f32.mxu0 %vm486_vm0, %v5139_v12  ;;  %v4010_v10 = vld [vmem:[%s5701_s4 + $0x1] ss:$0 sm:$0xff] }
 0x267   : > { %4343 = vmatmul.mubr.msk.f32.vlgmr.msra.gmra.mrb[8].mxu0 %vm486_vm0, %v5141_v13 }
 0x282   : > { %v1268_v17 = vpop.xlane.xlu0 %1267 }
 0x283   : > { %v1270_v34 = vmax.f32 %v1268_v17, 1.0 }
 0x285   : > { %4831 = vrsqrt.f32 %v1270_v34 }
 0x286   : > { %v4762_v20 = vpop.permute.xlu0 %4761 }
 0x287   : > { %v4764_v22 = vunpack.i.h.bf16 %v4762_v20  ;;  %v4763_v23 = vunpack.i.l.bf16 %v4762_v20 }
 0x289   : > { %v4550_v28 = vpack.c.bf16 %v4764_v22, %v4763_v23 }
 0x28f   : > { %v5264_v40 = vpop.eup %4831 }
 0x291   : > { %v1265_v18 = vpop.xlane.xlu1 %1264 }
 0x292   : > { %v1269_v35 = vmax.f32 %v1265_v18, 1.0 }
 0x294   : > { %4833 = vrsqrt.f32 %v1269_v35 }
 0x295   : > { %v4757_v21 = vpop.permute.xlu1 %4756 }
 0x296   : > { %v4759_v24 = vunpack.i.h.bf16 %v4757_v21  ;;  %v4758_v25 = vunpack.i.l.bf16 %v4757_v21 }
 0x298   : > { %v4538_v26 = vpack.c.bf16 %v4759_v24, %v4758_v25  ;;  %v4038_v25 = vld [vmem:[%s5135_s28 + $0x28] sm:$0xff] }
 0x299   : > { %v934_v27 = vpop.permute.xlu1 %933 }
 0x29a   : > { %4540 = vmatprep.subr.msk.bf16.mxu1 %vm5215_vm4, %v4538_v26 }
 0x29b   : > { %4543 = vmatpush3.bf16.xpose.msk.msra.mxu1 %vm5215_vm4, %v4538_v26  ;;  %v2034_v26 = vmul.f32 %v4038_v25, %v5160_v19 }
 0x29c   : > { %4552 = vmatprep.subr.msk.bf16.mxu1 %vm5215_vm4, %v4550_v28 }
 0x29d   : > { %v932_v30 = vpop.permute.xlu1 %931 }
 0x29e   : > { %4307 = vmatprep.mubr.msk.f32.mxu1 %vm845_vm3, %v932_v30  ;;  %v5266_v42 = vpop.eup %4833 }
 0x2a1   : > { %v1122_v31 = vpop.permute.xlu1 %1121 }
 0x2a2   : > { %4308 = vmatmul.mubr.msk.f32.vlgmr.msra.gmra.mrb[6].mxu1 %vm845_vm3, %v934_v27  ;;  %v4037_v27 = vld [vmem:[%s5135_s28 + $0x20] sm:$0xff] }
 0x2a3   : > { %4555 = vmatpush3.bf16.xpose.msk.msra.mxu1 %vm5215_vm4, %v4550_v28  ;;  %4321 = vmatprep.mubr.msk.f32.mxu1 %vm845_vm3, %v1122_v31  ;;  %v5300_v28 = vadd.f32 %v5151_v16, %v2034_v26  ;;  %v2033_v30 = vmul.f32 %v4037_v27, %v5145_v15 }
 0x2a5   : > { %v1124_v33 = vpop.permute.xlu1 %1123  ;;  %v2040_v31 = vsel %vm486_vm0, %v5300_v28, 0.0 }
 0x2aa   : > { %4322 = vmatmul.mubr.msk.f32.vlgmr.msra.gmra.mrb[8].mxu1 %vm845_vm3, %v1124_v33  ;;  %v5306_v33 = vadd.f32 %v5137_v11, %v2033_v30 }
 0x2ab   : > { %4335 = vmatprep.mubr.msk.f32.mxu1 %vm486_vm0, %v5203_v57 }
 0x2ac   : > { %v2037_v34 = vsel %vm486_vm0, %v5306_v33, 0.0 }
 0x32a   : > { %v4302_v36 = vpop.f32.mrb[2].mxu0 }
 0x32b   : > { %v920_v37 = vpop.f32.mrb[3].mxu0  ;;  %4835 = vtanh.f32 %v4302_v36 }
 0x32c   : > { %4837 = vtanh.f32 %v920_v37 }
 0x332   : > { %v4316_v38 = vpop.f32.mrb[4].mxu0 }
 0x333   : > { %v1108_v39 = vpop.f32.mrb[5].mxu0 }
 0x335   : > { %v4836_v59 = vpop.eup %4835 }
 0x336   : > { %v4330_v41 = vpop.f32.mrb[6].mxu0  ;;  %v4838_v61 = vpop.eup %4837 }
 0x337   : > { %v1352_v43 = vmul.f32 %v5264_v40, %v4330_v41  ;;  %v1342_v44 = vpop.f32.mrb[7].mxu0 }
 0x338   : > { %v1351_v45 = vmul.f32 %v5266_v42, %v1342_v44 }
 0x33a   : > { %v4560_v46 = vpack.c.bf16 %v1352_v43, %v1351_v45  ;;  %v4344_v47 = vpop.f32.mrb[8].mxu0  ;;  %v4039_v45 = vld [vmem:[%s5700_s3 + $0x20] sm:$0xff] }
 0x33b   : > { %v1525_v50 = vmul.f32 %v5264_v40, %v4344_v47  ;;  %v1515_v51 = vpop.f32.mrb[9].mxu0 }
 0x33c   : > { %v1524_v52 = vmul.f32 %v5266_v42, %v1515_v51  ;;  %4561 = vmatprep.subr.bf16.mxu1 %v4560_v46  ;;  %v4047_v51 = vld [vmem:[%s5702_s5 + $0x20] sm:$0xff] }
 0x33d   : > { %4563 = vmatpush3.bf16.msra.mxu1 %v4560_v46  ;;  %v4040_v46 = vld [vmem:[%s5700_s3 + $0x28] sm:$0xff] }
 0x33e   : > { %v4568_v54 = vpack.c.bf16 %v1525_v50, %v1524_v52  ;;  %v4596_v47 = vpack.c.bf16 %v4040_v46, %v4039_v45  ;;  %v4048_v52 = vld [vmem:[%s5702_s5 + $0x28] sm:$0xff] }
 0x340   : > { %4336 = vmatmul.mubr.msk.f32.vlgmr.msra.gmra.mrb[10].mxu1 %vm486_vm0, %v5196_v53  ;;  %4569 = vmatprep.subr.bf16.mxu1 %v4568_v54 }
 0x341   : > { %4571 = vmatpush3.bf16.msra.mxu1 %v4568_v54  ;;  %4349 = vmatprep.mubr.msk.f32.mxu1 %vm486_vm0, %v5203_v57  ;;  %v4604_v54 = vpack.c.bf16 %v4048_v52, %v4047_v51 }
 0x344   : > { %4350 = vmatmul.mubr.msk.f32.vlgmr.msra.gmra.mrb[12].mxu1 %vm486_vm0, %v5196_v53 }
 0x375   : > { %v4309_v55 = vpop.f32.mrb[6].mxu1 }
 0x376   : > { %4839 = vtanh.f32 %v4309_v55  ;;  %v1013_v56 = vpop.f32.mrb[7].mxu1 }
 0x377   : > { %4841 = vtanh.f32 %v1013_v56 }
 0x378   : > { %4843 = vtanh.f32 %v4316_v38 }
 0x379   : > { %4845 = vtanh.f32 %v1108_v39 }
 0x37d   : > { %v4323_v58 = vpop.f32.mrb[8].mxu1 }
 0x37e   : > { %4847 = vtanh.f32 %v4323_v58  ;;  %v1203_v60 = vpop.f32.mrb[9].mxu1 }
 0x37f   : > { %4849 = vtanh.f32 %v1203_v60 }
 0x380   : > { %v4840_v63 = vpop.eup %4839 }
 0x381   : > { %v4842_v0 = vpop.eup %4841  ;;  %v1025_v57 = vadd.f32 %v4840_v63, %v4836_v59 }
 0x382   : > { %v4844_v1 = vpop.eup %4843  ;;  %v1024_v2 = vadd.f32 %v4842_v0, %v4838_v61 }
 0x383   : > { %v4846_v53 = vpop.eup %4845  ;;  %v1120_v3 = vadd.f32 %v4844_v1, %v1025_v57 }
 0x384   : > { %v1119_v4 = vadd.f32 %v4846_v53, %v1024_v2 }
 0x388   : > { %v4848_v5 = vpop.eup %4847 }
 0x389   : > { %v4850_v6 = vpop.eup %4849  ;;  %v5278_v7 = vadd.f32 %v4848_v5, %v1120_v3 }
 0x38a   : > { %v5280_v8 = vadd.f32 %v4850_v6, %v1119_v4 }
 0x413   : > { %v4337_v9 = vpop.f32.mrb[10].mxu1 }
 0x414   : > { %v1435_v14 = vmul.f32 %v5264_v40, %v4337_v9  ;;  %v1425_v17 = vpop.f32.mrb[11].mxu1 }
 0x415   : > { %v1434_v18 = vmul.f32 %v5266_v42, %v1425_v17 }
 0x416   : > { %v1445_v20 = vadd.f32 %v4010_v10, %v1435_v14 }
 0x417   : > { %v1444_v21 = vadd.f32 %v4010_v10, %v1434_v18  ;;  %v5287_v22 = vpop.f32.mrb[12].mxu1 }
 0x418   : > { %v5289_v23 = vpop.f32.mrb[13].mxu1 }
 0x419   : > { %4356 = vmatprep.mubr.msk.f32.mxu0 %vm845_vm3, %v1444_v21  ;;  %v4770_v24 = vpack.i.bf16 %v1445_v20, %v1444_v21 }
 0x41b   : > { %4771 = vrot.lane.b32.xlu0 %v4770_v24, %s5724_s26  ;;  %4766 = vrot.lane.b32.xlu1 %v4770_v24, %s5722_s20  ;;  %s4989_s26 = smov 48  }
 0x41f   : > { %1801 = vrot.lane.b32.xlu0 %v1445_v20, %s5740_s15  ;;  %1799 = vrot.lane.b32.xlu1 %v1444_v21, %s5740_s15 }
 0x43e   : > { %2041 = vadd.xlane.f32.xlu0 %v2040_v31 }
 0x443   : > { %2038 = vadd.xlane.f32.xlu1 %v2037_v34 }
 0x454   : > { %4776 = vrot.lane.b32.xlu0 %v4770_v24, %s5741_s16  ;;  %4781 = vrot.lane.b32.xlu1 %v4770_v24, %s5742_s17 }
 0x458   : > { %1706 = vrot.lane.b32.xlu0 %v1445_v20, %s5743_s19  ;;  %1704 = vrot.lane.b32.xlu1 %v1444_v21, %s5743_s19 }
 0x45c   : > { %1896 = vrot.lane.b32.xlu0 %v1445_v20, %s5744_s18  ;;  %1894 = vrot.lane.b32.xlu1 %v1444_v21, %s5744_s18 }
 0x48d   : > { %v4772_v35 = vpop.permute.xlu0 %4771  ;;  %v4767_v36 = vpop.permute.xlu1 %4766 }
 0x48e   : > { %v4774_v37 = vunpack.i.h.bf16 %v4772_v35  ;;  %v4773_v38 = vunpack.i.l.bf16 %v4772_v35  ;;  %v4769_v39 = vunpack.i.h.bf16 %v4767_v36  ;;  %v4768_v41 = vunpack.i.l.bf16 %v4767_v36 }
 0x490   : > { %v4572_v43 = vpack.c.bf16 %v4769_v39, %v4768_v41  ;;  %v4584_v44 = vpack.c.bf16 %v4774_v37, %v4773_v38 }
 0x491   : > { %v1800_v50 = vpop.permute.xlu1 %1799  ;;  %v1802_v55 = vpop.permute.xlu0 %1801 }
 0x492   : > { %4574 = vmatprep.subr.msk.bf16.mxu0 %vm5215_vm4, %v4572_v43 }
 0x493   : > { %4577 = vmatpush3.bf16.xpose.msk.msra.mxu0 %vm5215_vm4, %v4572_v43 }
 0x494   : > { %4586 = vmatprep.subr.msk.bf16.mxu0 %vm5215_vm4, %v4584_v44 }
 0x49a   : > { %4357 = vmatmul.mubr.msk.f32.vlgmr.msra.gmra.mrb[10].mxu0 %vm845_vm3, %v1445_v20 }
 0x49b   : > { %4589 = vmatpush3.bf16.xpose.msk.msra.mxu0 %vm5215_vm4, %v4584_v44  ;;  %4370 = vmatprep.mubr.msk.f32.mxu0 %vm845_vm3, %v1800_v50 }
 0x49c   : > { %4597 = vmatprep.subr.bf16.mxu0 %v4596_v47 }
 0x4a2   : > { %4371 = vmatmul.mubr.msk.f32.vlgmr.msra.gmra.mrb[12].mxu0 %vm845_vm3, %v1802_v55 }
 0x4a3   : > { %4599 = vmatpush3.bf16.msra.mxu0 %v4596_v47  ;;  %4384 = vmatprep.mubr.msk.f32.mxu0 %vm486_vm0, %v5139_v12 }
 0x4a4   : > { %4605 = vmatprep.subr.bf16.mxu0 %v4604_v54 }
 0x4a6   : > { %4385 = vmatmul.mubr.msk.f32.vlgmr.msra.gmra.mrb[14].mxu0 %vm486_vm0, %v5141_v13 }
 0x4a7   : > { %4607 = vmatpush3.bf16.msra.mxu0 %v4604_v54  ;;  %4398 = vmatprep.mubr.msk.f32.mxu0 %vm486_vm0, %v5139_v12 }
 0x4aa   : > { %4399 = vmatmul.mubr.msk.f32.vlgmr.msra.gmra.mrb[16].mxu0 %vm486_vm0, %v5141_v13 }
 0x4cb   : > { %v2042_v56 = vpop.xlane.xlu0 %2041 }
 0x4cc   : > { %v2044_v9 = vmax.f32 %v2042_v56, 1.0 }
 0x4cf   : > { %v4777_v58 = vpop.permute.xlu0 %4776 }
 0x4d0   : > { %v4779_v59 = vunpack.i.h.bf16 %v4777_v58  ;;  %v4778_v60 = vunpack.i.l.bf16 %v4777_v58  ;;  %v2039_v61 = vpop.xlane.xlu1 %2038 }
 0x4d1   : > { %v2043_v6 = vmax.f32 %v2039_v61, 1.0  ;;  %v4046_v61 = vld [vmem:[%s5701_s4 + $0x2] ss:$0 sm:$0xff] }
 0x4d2   : > { %v4578_v63 = vpack.c.bf16 %v4779_v59, %v4778_v60 }
 0x4d3   : > { %v1707_v3 = vpop.permute.xlu0 %1706  ;;  %4851 = vrsqrt.f32 %v2043_v6 }
 0x4d4   : > { %4580 = vmatprep.subr.msk.bf16.mxu1 %vm5215_vm4, %v4578_v63  ;;  %v4782_v0 = vpop.permute.xlu1 %4781  ;;  %4853 = vrsqrt.f32 %v2044_v9  ;;  %v4073_v9 = vld [vmem:[%s5135_s28 + $0x30] sm:$0xff] }
 0x4d5   : > { %v4784_v57 = vunpack.i.h.bf16 %v4782_v0  ;;  %v4783_v1 = vunpack.i.l.bf16 %v4782_v0  ;;  %4583 = vmatpush3.bf16.xpose.msk.msra.mxu1 %vm5215_vm4, %v4578_v63 }
 0x4d7   : > { %v4590_v2 = vpack.c.bf16 %v4784_v57, %v4783_v1  ;;  %v1897_v5 = vpop.permute.xlu0 %1896 }
 0x4d8   : > { %v1705_v53 = vpop.permute.xlu1 %1704 }
 0x4d9   : > { %4363 = vmatprep.mubr.msk.f32.mxu1 %vm845_vm3, %v1705_v53  ;;  %4592 = vmatprep.subr.msk.bf16.mxu1 %vm5215_vm4, %v4590_v2 }
 0x4dc   : > { %4364 = vmatmul.mubr.msk.f32.vlgmr.msra.gmra.mrb[14].mxu1 %vm845_vm3, %v1707_v3  ;;  %v1895_v4 = vpop.permute.xlu1 %1894 }
 0x4dd   : > { %4595 = vmatpush3.bf16.xpose.msk.msra.mxu1 %vm5215_vm4, %v4590_v2  ;;  %4377 = vmatprep.mubr.msk.f32.mxu1 %vm845_vm3, %v1895_v4  ;;  %v5361_v20 = vpop.eup %4851 }
 0x4de   : > { %v5363_v21 = vpop.eup %4853 }
 0x4e4   : > { %4378 = vmatmul.mubr.msk.f32.vlgmr.msra.gmra.mrb[16].mxu1 %vm845_vm3, %v1897_v5  ;;  %v4074_v5 = vld [vmem:[%s5135_s28 + $0x38] sm:$0xff]  ;;  %s4987_s28 = smov 16  }
 0x4e5   : > { %4391 = vmatprep.mubr.msk.f32.mxu1 %vm486_vm0, %v5306_v33  ;;  %v2808_v6 = vmul.f32 %v4074_v5, %v5160_v19 }
 0x56d   : > { %v4358_v10 = vpop.f32.mrb[10].mxu0 }
 0x56e   : > { %v1693_v14 = vpop.f32.mrb[11].mxu0  ;;  %4855 = vtanh.f32 %v4358_v10  ;;  %v5397_v10 = vadd.f32 %v5151_v16, %v2808_v6 }
 0x56f   : > { %4857 = vtanh.f32 %v1693_v14  ;;  %v2807_v14 = vmul.f32 %v4073_v9, %v5145_v15 }
 0x575   : > { %v4372_v17 = vpop.f32.mrb[12].mxu0 }
 0x576   : > { %v1881_v18 = vpop.f32.mrb[13].mxu0 }
 0x578   : > { %v4856_v43 = vpop.eup %4855 }
 0x579   : > { %v4386_v24 = vpop.f32.mrb[14].mxu0  ;;  %v4858_v45 = vpop.eup %4857 }
 0x57a   : > { %v2126_v25 = vmul.f32 %v5363_v21, %v4386_v24  ;;  %v2116_v26 = vpop.f32.mrb[15].mxu0 }
 0x57b   : > { %v2125_v27 = vmul.f32 %v5361_v20, %v2116_v26 }
 0x57d   : > { %v4600_v30 = vpack.c.bf16 %v2126_v25, %v2125_v27  ;;  %v4400_v31 = vpop.f32.mrb[16].mxu0 }
 0x57e   : > { %v2299_v34 = vmul.f32 %v5363_v21, %v4400_v31  ;;  %v2289_v35 = vpop.f32.mrb[17].mxu0  ;;  %v4075_v31 = vld [vmem:[%s5700_s3 + $0x30] sm:$0xff] }
 0x57f   : > { %v2298_v36 = vmul.f32 %v5361_v20, %v2289_v35  ;;  %4601 = vmatprep.subr.bf16.mxu1 %v4600_v30 }
 0x580   : > { %4603 = vmatpush3.bf16.msra.mxu1 %v4600_v30 }
 0x581   : > { %v4608_v37 = vpack.c.bf16 %v2299_v34, %v2298_v36  ;;  %v4076_v34 = vld [vmem:[%s5700_s3 + $0x38] sm:$0xff] }
 0x582   : > { %v4636_v35 = vpack.c.bf16 %v4076_v34, %v4075_v31 }
 0x583   : > { %4392 = vmatmul.mubr.msk.f32.vlgmr.msra.gmra.mrb[18].mxu1 %vm486_vm0, %v5300_v28  ;;  %4609 = vmatprep.subr.bf16.mxu1 %v4608_v37 }
 0x584   : > { %4611 = vmatpush3.bf16.msra.mxu1 %v4608_v37  ;;  %4405 = vmatprep.mubr.msk.f32.mxu1 %vm486_vm0, %v5306_v33  ;;  %v4083_v37 = vld [vmem:[%s5702_s5 + $0x30] sm:$0xff] }
 0x587   : > { %4406 = vmatmul.mubr.msk.f32.vlgmr.msra.gmra.mrb[20].mxu1 %vm486_vm0, %v5300_v28 }
 0x5af   : > { %v4365_v38 = vpop.f32.mrb[14].mxu1 }
 0x5b0   : > { %4859 = vtanh.f32 %v4365_v38  ;;  %v1786_v39 = vpop.f32.mrb[15].mxu1  ;;  %v4084_v38 = vld [vmem:[%s5702_s5 + $0x38] sm:$0xff] }
 0x5b1   : > { %4861 = vtanh.f32 %v1786_v39  ;;  %v4644_v39 = vpack.c.bf16 %v4084_v38, %v4083_v37 }
 0x5b2   : > { %4863 = vtanh.f32 %v4372_v17  ;;  %v2814_v17 = vsel %vm486_vm0, %v5397_v10, 0.0 }
 0x5b3   : > { %4865 = vtanh.f32 %v1881_v18  ;;  %v5403_v18 = vadd.f32 %v5137_v11, %v2807_v14 }
 0x5b5   : > { %v2811_v24 = vsel %vm486_vm0, %v5403_v18, 0.0 }
 0x5b7   : > { %v4379_v41 = vpop.f32.mrb[16].mxu1 }
 0x5b8   : > { %4867 = vtanh.f32 %v4379_v41  ;;  %v1976_v44 = vpop.f32.mrb[17].mxu1 }
 0x5b9   : > { %4869 = vtanh.f32 %v1976_v44 }
 0x5ba   : > { %v4860_v46 = vpop.eup %4859 }
 0x5bb   : > { %v4862_v47 = vpop.eup %4861  ;;  %v1798_v33 = vadd.f32 %v4860_v46, %v4856_v43 }
 0x5bc   : > { %v4864_v50 = vpop.eup %4863  ;;  %v1797_v51 = vadd.f32 %v4862_v47, %v4858_v45 }
 0x5bd   : > { %v4866_v28 = vpop.eup %4865  ;;  %v1893_v52 = vadd.f32 %v4864_v50, %v1798_v33 }
 0x5be   : > { %v1892_v54 = vadd.f32 %v4866_v28, %v1797_v51 }
 0x5c2   : > { %v4868_v55 = vpop.eup %4867 }
 0x5c3   : > { %v4870_v56 = vpop.eup %4869  ;;  %v5375_v58 = vadd.f32 %v4868_v55, %v1893_v52 }
 0x5c4   : > { %v5377_v59 = vadd.f32 %v4870_v56, %v1892_v54 }
 0x656   : > { %v4393_v60 = vpop.f32.mrb[18].mxu1 }
 0x657   : > { %v2209_v63 = vmul.f32 %v5363_v21, %v4393_v60  ;;  %v2199_v0 = vpop.f32.mrb[19].mxu1 }
 0x658   : > { %v2208_v57 = vmul.f32 %v5361_v20, %v2199_v0 }
 0x659   : > { %v2219_v1 = vadd.f32 %v4046_v61, %v2209_v63 }
 0x65a   : > { %v2218_v2 = vadd.f32 %v4046_v61, %v2208_v57  ;;  %v5384_v53 = vpop.f32.mrb[20].mxu1 }
 0x65b   : > { %v5386_v3 = vpop.f32.mrb[21].mxu1 }
 0x65c   : > { %4412 = vmatprep.mubr.msk.f32.mxu0 %vm845_vm3, %v2218_v2  ;;  %v4790_v4 = vpack.i.bf16 %v2219_v1, %v2218_v2 }
 0x65e   : > { %4791 = vrot.lane.b32.xlu0 %v4790_v4, %s5745_s23  ;;  %4786 = vrot.lane.b32.xlu1 %v4790_v4, %s5746_s30 }
 0x662   : > { %2575 = vrot.lane.b32.xlu0 %v2219_v1, %s5740_s15  ;;  %2573 = vrot.lane.b32.xlu1 %v2218_v2, %s5740_s15 }
 0x681   : > { %2815 = vadd.xlane.f32.xlu0 %v2814_v17 }
 0x686   : > { %2812 = vadd.xlane.f32.xlu1 %v2811_v24 }
 0x697   : > { %4796 = vrot.lane.b32.xlu0 %v4790_v4, %s5741_s16  ;;  %4801 = vrot.lane.b32.xlu1 %v4790_v4, %s5742_s17 }
 0x69b   : > { %2480 = vrot.lane.b32.xlu0 %v2219_v1, %s5743_s19  ;;  %2478 = vrot.lane.b32.xlu1 %v2218_v2, %s5743_s19 }
 0x69f   : > { %2670 = vrot.lane.b32.xlu0 %v2219_v1, %s5744_s18  ;;  %2668 = vrot.lane.b32.xlu1 %v2218_v2, %s5744_s18 }
 0x6d0   : > { %v4792_v15 = vpop.permute.xlu0 %4791  ;;  %v4787_v11 = vpop.permute.xlu1 %4786 }
 0x6d1   : > { %v4794_v16 = vunpack.i.h.bf16 %v4792_v15  ;;  %v4793_v19 = vunpack.i.l.bf16 %v4792_v15  ;;  %v4789_v25 = vunpack.i.h.bf16 %v4787_v11  ;;  %v4788_v26 = vunpack.i.l.bf16 %v4787_v11 }
 0x6d3   : > { %v4612_v27 = vpack.c.bf16 %v4789_v25, %v4788_v26  ;;  %v4624_v30 = vpack.c.bf16 %v4794_v16, %v4793_v19 }
 0x6d4   : > { %v2574_v36 = vpop.permute.xlu1 %2573  ;;  %v2576_v41 = vpop.permute.xlu0 %2575 }
 0x6d5   : > { %4614 = vmatprep.subr.msk.bf16.mxu0 %vm5215_vm4, %v4612_v27 }
 0x6d6   : > { %4617 = vmatpush3.bf16.xpose.msk.msra.mxu0 %vm5215_vm4, %v4612_v27 }
 0x6d7   : > { %4626 = vmatprep.subr.msk.bf16.mxu0 %vm5215_vm4, %v4624_v30 }
 0x6dd   : > { %4413 = vmatmul.mubr.msk.f32.vlgmr.msra.gmra.mrb[18].mxu0 %vm845_vm3, %v2219_v1 }
 0x6de   : > { %4629 = vmatpush3.bf16.xpose.msk.msra.mxu0 %vm5215_vm4, %v4624_v30  ;;  %4426 = vmatprep.mubr.msk.f32.mxu0 %vm845_vm3, %v2574_v36 }
 0x6df   : > { %4637 = vmatprep.subr.bf16.mxu0 %v4636_v35 }
 0x6e5   : > { %4427 = vmatmul.mubr.msk.f32.vlgmr.msra.gmra.mrb[20].mxu0 %vm845_vm3, %v2576_v41 }
 0x6e6   : > { %4639 = vmatpush3.bf16.msra.mxu0 %v4636_v35  ;;  %4440 = vmatprep.mubr.msk.f32.mxu0 %vm486_vm0, %v5139_v12 }
 0x6e7   : > { %4645 = vmatprep.subr.bf16.mxu0 %v4644_v39 }
 0x6e9   : > { %4441 = vmatmul.mubr.msk.f32.vlgmr.msra.gmra.mrb[22].mxu0 %vm486_vm0, %v5141_v13 }
 0x6ea   : > { %4647 = vmatpush3.bf16.msra.mxu0 %v4644_v39  ;;  %4454 = vmatprep.mubr.msk.f32.mxu0 %vm486_vm0, %v5139_v12 }
 0x6ed   : > { %4455 = vmatmul.mubr.msk.f32.vlgmr.msra.gmra.mrb[24].mxu0 %vm486_vm0, %v5141_v13 }
 0x70e   : > { %v2816_v43 = vpop.xlane.xlu0 %2815 }
 0x70f   : > { %v2818_v60 = vmax.f32 %v2816_v43, 1.0 }
 0x712   : > { %v4797_v44 = vpop.permute.xlu0 %4796 }
 0x713   : > { %v4799_v45 = vunpack.i.h.bf16 %v4797_v44  ;;  %v4798_v46 = vunpack.i.l.bf16 %v4797_v44  ;;  %v2813_v47 = vpop.xlane.xlu1 %2812 }
 0x714   : > { %v2817_v56 = vmax.f32 %v2813_v47, 1.0  ;;  %v4082_v47 = vld [vmem:[%s5701_s4 + $0x3] ss:$0 sm:$0xff] }
 0x715   : > { %v4618_v33 = vpack.c.bf16 %v4799_v45, %v4798_v46 }
 0x716   : > { %v2481_v13 = vpop.permute.xlu0 %2480  ;;  %4871 = vrsqrt.f32 %v2817_v56  ;;  %v1601_v56 = vmul.f32 %v5266_v42, %v5289_v23  ;;  %v4054_v42 = vld [vmem:[%s5703_s6 + $0x2] ss:$0 sm:$0xff] }
 0x717   : > { %4620 = vmatprep.subr.msk.bf16.mxu1 %vm5215_vm4, %v4618_v33  ;;  %v4802_v50 = vpop.permute.xlu1 %4801  ;;  %4873 = vrsqrt.f32 %v2818_v60  ;;  %v4018_v60 = vld [vmem:[%s5703_s6 + $0x1] ss:$0 sm:$0xff] }
 0x718   : > { %v4804_v51 = vunpack.i.h.bf16 %v4802_v50  ;;  %v4803_v28 = vunpack.i.l.bf16 %v4802_v50  ;;  %4623 = vmatpush3.bf16.xpose.msk.msra.mxu1 %vm5215_vm4, %v4618_v33 }
 0x71a   : > { %v4630_v52 = vpack.c.bf16 %v4804_v51, %v4803_v28  ;;  %v2671_v55 = vpop.permute.xlu0 %2670 }
 0x71b   : > { %v2479_v12 = vpop.permute.xlu1 %2478 }
 0x71c   : > { %4419 = vmatprep.mubr.msk.f32.mxu1 %vm845_vm3, %v2479_v12  ;;  %4632 = vmatprep.subr.msk.bf16.mxu1 %vm5215_vm4, %v4630_v52 }
 0x71f   : > { %4420 = vmatmul.mubr.msk.f32.vlgmr.msra.gmra.mrb[22].mxu1 %vm845_vm3, %v2481_v13  ;;  %v2669_v54 = vpop.permute.xlu1 %2668 }
 0x720   : > { %4635 = vmatpush3.bf16.xpose.msk.msra.mxu1 %vm5215_vm4, %v4630_v52  ;;  %4433 = vmatprep.mubr.msk.f32.mxu1 %vm845_vm3, %v2669_v54  ;;  %v5458_v1 = vpop.eup %4871 }
 0x721   : > { %v5460_v2 = vpop.eup %4873 }
 0x727   : > { %4434 = vmatmul.mubr.msk.f32.vlgmr.msra.gmra.mrb[24].mxu1 %vm845_vm3, %v2671_v55  ;;  %v1602_v55 = vmul.f32 %v5264_v40, %v5287_v22  ;;  %v2375_v40 = vmul.f32 %v5361_v20, %v5386_v3  ;;  %v5514_v3 = vmul.f32 0.25, %v5377_v59  ;;  %v5532_v59 = vmul.f32 0.25, %v5278_v7 }
 0x728   : > { %4447 = vmatprep.mubr.msk.f32.mxu1 %vm486_vm0, %v5403_v18 }
 0x729   : > { %v2385_v23 = vadd.f32 %v4054_v42, %v2375_v40 }
 0x7b0   : > { %v4414_v61 = vpop.f32.mrb[18].mxu0 }
 0x7b1   : > { %v2467_v63 = vpop.f32.mrb[19].mxu0  ;;  %4875 = vtanh.f32 %v4414_v61  ;;  %v1612_v61 = vadd.f32 %v4018_v60, %v1602_v55  ;;  %v3617_v55 = vld [vmem:[%s5704_s7 + $0x38] sm:$0xff] }
 0x7b2   : > { %4877 = vtanh.f32 %v2467_v63  ;;  %v1611_v63 = vadd.f32 %v4018_v60, %v1601_v56 }
 0x7b8   : > { %v4428_v0 = vpop.f32.mrb[20].mxu0 }
 0x7b9   : > { %v2655_v57 = vpop.f32.mrb[21].mxu0 }
 0x7bb   : > { %v4876_v27 = vpop.eup %4875 }
 0x7bc   : > { %v4442_v4 = vpop.f32.mrb[22].mxu0  ;;  %v4878_v31 = vpop.eup %4877 }
 0x7bd   : > { %v2900_v5 = vmul.f32 %v5460_v2, %v4442_v4  ;;  %v2890_v6 = vpop.f32.mrb[23].mxu0 }
 0x7be   : > { %v2899_v9 = vmul.f32 %v5458_v1, %v2890_v6 }
 0x7c0   : > { %v4640_v14 = vpack.c.bf16 %v2900_v5, %v2899_v9  ;;  %v4456_v17 = vpop.f32.mrb[24].mxu0  ;;  %v5525_v5 = vmul.f32 0.25, %v5280_v8 }
 0x7c1   : > { %v3073_v24 = vmul.f32 %v5460_v2, %v4456_v17  ;;  %v3063_v15 = vpop.f32.mrb[25].mxu0 }
 0x7c2   : > { %v3072_v11 = vmul.f32 %v5458_v1, %v3063_v15  ;;  %4641 = vmatprep.subr.bf16.mxu1 %v4640_v14 }
 0x7c3   : > { %4643 = vmatpush3.bf16.msra.mxu1 %v4640_v14 }
 0x7c4   : > { %v4648_v16 = vpack.c.bf16 %v3073_v24, %v3072_v11 }
 0x7c6   : > { %4448 = vmatmul.mubr.msk.f32.vlgmr.msra.gmra.mrb[26].mxu1 %vm486_vm0, %v5397_v10  ;;  %4649 = vmatprep.subr.bf16.mxu1 %v4648_v16 }
 0x7c7   : > { %4651 = vmatpush3.bf16.msra.mxu1 %v4648_v16  ;;  %4461 = vmatprep.mubr.msk.f32.mxu1 %vm486_vm0, %v5403_v18 }
 0x7ca   : > { %4462 = vmatmul.mubr.msk.f32.vlgmr.msra.gmra.mrb[28].mxu1 %vm486_vm0, %v5397_v10 }
 0x7f2   : > { %v4421_v19 = vpop.f32.mrb[22].mxu1 }
 0x7f3   : > { %4879 = vtanh.f32 %v4421_v19  ;;  %v2560_v25 = vpop.f32.mrb[23].mxu1 }
 0x7f4   : > { %4881 = vtanh.f32 %v2560_v25 }
 0x7f5   : > { %4883 = vtanh.f32 %v4428_v0  ;;  %v2376_v0 = vmul.f32 %v5363_v21, %v5384_v53  ;;  %v4090_v21 = vld [vmem:[%s5703_s6 + $0x3] ss:$0 sm:$0xff] }
 0x7f6   : > { %4885 = vtanh.f32 %v2655_v57 }
 0x7f7   : > { %v2386_v22 = vadd.f32 %v4054_v42, %v2376_v0 }
 0x7fa   : > { %v4435_v26 = vpop.f32.mrb[24].mxu1 }
 0x7fb   : > { %4887 = vtanh.f32 %v4435_v26  ;;  %v2750_v30 = vpop.f32.mrb[25].mxu1  ;;  %v3610_v26 = vld [vmem:[%s5704_s7] sm:$0xff] }
 0x7fc   : > { %4889 = vtanh.f32 %v2750_v30 }
 0x7fd   : > { %v4880_v34 = vpop.eup %4879 }
 0x7fe   : > { %v4882_v35 = vpop.eup %4881  ;;  %v2572_v18 = vadd.f32 %v4880_v34, %v4876_v27  ;;  %v3611_v27 = vld [vmem:[%s5704_s7 + $0x8] sm:$0xff] }
 0x7ff   : > { %v4884_v36 = vpop.eup %4883  ;;  %v2571_v37 = vadd.f32 %v4882_v35, %v4878_v31  ;;  %v4676_v30 = vpack.c.bf16 %v3611_v27, %v3610_v26  ;;  %v828_v31 = vmul.f32 %v5170_v32, %v5186_v49  ;;  %v3612_v32 = vld [vmem:[%s5704_s7 + $0x10] sm:$0xff]  ;;  %v3613_v49 = vld [vmem:[%s5704_s7 + $0x18] sm:$0xff] }
 0x800   : > { %v4886_v10 = vpop.eup %4885  ;;  %v2667_v38 = vadd.f32 %v4884_v36, %v2572_v18  ;;  %v3984_v18 = vld [vmem:[%s5703_s6] ss:$0 sm:$0xff] }
 0x801   : > { %v2666_v39 = vadd.f32 %v4886_v10, %v2571_v37  ;;  %v837_v36 = vadd.f32 %v3984_v18, %v828_v31 }
 0x805   : > { %v4888_v41 = vpop.eup %4887 }
 0x806   : > { %v4890_v43 = vpop.eup %4889  ;;  %v2762_v44 = vadd.f32 %v4888_v41, %v2667_v38  ;;  %v4680_v41 = vpack.c.bf16 %v3613_v49, %v3612_v32 }
 0x807   : > { %v2761_v45 = vadd.f32 %v4890_v43, %v2666_v39 }
 0x808   : > { %v5527_v6 = vmul.f32 0.25, %v2762_v44 }
 0x899   : > { %v4449_v46 = vpop.f32.mrb[26].mxu1 }
 0x89a   : > { %v2983_v33 = vmul.f32 %v5460_v2, %v4449_v46  ;;  %v2973_v50 = vpop.f32.mrb[27].mxu1  ;;  %v3614_v46 = vld [vmem:[%s5704_s7 + $0x20] sm:$0xff] }
 0x89b   : > { %v2982_v51 = vmul.f32 %v5458_v1, %v2973_v50 }
 0x89c   : > { %v5477_v28 = vadd.f32 %v4082_v47, %v2983_v33 }
 0x89d   : > { %v2992_v52 = vadd.f32 %v4082_v47, %v2982_v51  ;;  %v4463_v12 = vpop.f32.mrb[28].mxu1  ;;  %v3615_v47 = vld [vmem:[%s5704_s7 + $0x28] sm:$0xff] }
 0x89e   : > { %v3140_v13 = vpop.f32.mrb[29].mxu1  ;;  %v3150_v57 = vmul.f32 %v5460_v2, %v4463_v12  ;;  %v5521_v2 = vmul.f32 0.25, %v2761_v45  ;;  %v4684_v12 = vpack.c.bf16 %v3615_v47, %v3614_v46 }
 0x89f   : > { %4468 = vmatprep.mubr.msk.f32.mxu0 %vm845_vm3, %v2992_v52  ;;  %v4810_v54 = vpack.i.bf16 %v5477_v28, %v2992_v52  ;;  %v3149_v4 = vmul.f32 %v5458_v1, %v3140_v13  ;;  %v5518_v1 = vmul.f32 0.25, %v5375_v58 }
 0x8a0   : > { %v3160_v20 = vadd.f32 %v4090_v21, %v3150_v57 }
 0x8a1   : > { %4811 = vrot.lane.b32.xlu0 %v4810_v54, %s5745_s23  ;;  %4806 = vrot.lane.b32.xlu1 %v4810_v54, %s5746_s30  ;;  %v3159_v53 = vadd.f32 %v4090_v21, %v3149_v4  ;;  %s4126_s30 = sshll.u32 %s5080_s25, 8 }
 0x8a5   : > { %3349 = vrot.lane.b32.xlu0 %v5477_v28, %s5740_s15  ;;  %3347 = vrot.lane.b32.xlu1 %v2992_v52, %s5740_s15 }
 0x8a9   : > { %3582 = vrot.lane.b32.xlu0 %v1612_v61, %s4987_s28  ;;  %3580 = vrot.lane.b32.xlu1 %v1611_v63, %s4987_s28  ;;  %v829_v61 = vmul.f32 %v5168_v29, %v5184_v48  ;;  %s5604_s28 = scalar_lea.vmem %s5708_s11, %s5747_s1  ;;  %s442_s1 = sand.u32 1, %s4969_s22  }
 0x8aa   : > { %s3964_s23 = sshll.u32 %s442_s1, 4 }
 0x8ab   : > { %v838_v0 = vadd.f32 %v3984_v18, %v829_v61  ;;  %s444_s15 = scalar_lea.vmem [#allocation2], %s3964_s23 }
 0x8ad   : > { %3590 = vrot.lane.b32.xlu0 %v2386_v22, %s4988_s27  ;;  %3588 = vrot.lane.b32.xlu1 %v2385_v23, %s4988_s27  ;;  %s5748_s27 = sshll.u32 %s5121_s29, 4 }
 0x8b1   : > { %3598 = vrot.lane.b32.xlu0 %v3160_v20, %s4989_s26  ;;  %3596 = vrot.lane.b32.xlu1 %v3159_v53, %s4989_s26  ;;  %s5650_s26 = scalar_lea.hbm %s5709_s12, %s4126_s30 }
 0x8b5   : > { %4821 = vrot.lane.b32.xlu0 %v4810_v54, %s5742_s17  ;;  %4816 = vrot.lane.b32.xlu1 %v4810_v54, %s5741_s16  ;;  %v3616_v54 = vld [vmem:[%s5704_s7 + $0x30] sm:$0xff]  ;;  %s5631_s17 = scalar_lea.vmem %s5699_s2, %s5748_s27  ;;  %s5656_s16 = scalar_lea.sflag [#allocation3], %s442_s1 }
 0x8b6   : > { %v4688_v60 = vpack.c.bf16 %v3617_v55, %v3616_v54 }
 0x8b9   : > { %3254 = vrot.lane.b32.xlu0 %v5477_v28, %s5743_s19  ;;  %3252 = vrot.lane.b32.xlu1 %v2992_v52, %s5743_s19 }
 0x8bd   : > { %3444 = vrot.lane.b32.xlu0 %v5477_v28, %s5744_s18  ;;  %3442 = vrot.lane.b32.xlu1 %v2992_v52, %s5744_s18 }
 0x8db   : > { %1991 = vxpose.xlu0.b32.start [1/2] (short) (narrow) %v5514_v3, 16 }
 0x8df   : > { %1992 = vxpose.xlu0.b32.end [2/2] (short) (narrow) %v5518_v1, 16 }
 0x8e3   : > { %2765 = vxpose.xlu0.b32.start [1/2] (short) (narrow) %v5521_v2, 16 }
 0x8e6   : > { %1218 = vxpose.xlu1.b32.start [1/2] (short) (narrow) %v5525_v5, 16 }
 0x8e7   : > { %2766 = vxpose.xlu0.b32.end [2/2] (short) (narrow) %v5527_v6, 16 }
 0x8ea   : > { %1219 = vxpose.xlu1.b32.end [2/2] (short) (narrow) %v5532_v59, 16 }
 0x913   : > { %v4812_v58 = vpop.permute.xlu0 %4811  ;;  %v4807_v9 = vpop.permute.xlu1 %4806 }
 0x914   : > { %v4814_v14 = vunpack.i.h.bf16 %v4812_v58  ;;  %v4813_v17 = vunpack.i.l.bf16 %v4812_v58  ;;  %v4809_v24 = vunpack.i.h.bf16 %v4807_v9  ;;  %v4808_v15 = vunpack.i.l.bf16 %v4807_v9 }
 0x916   : > { %v4652_v11 = vpack.c.bf16 %v4809_v24, %v4808_v15  ;;  %v4664_v19 = vpack.c.bf16 %v4814_v14, %v4813_v17 }
 0x917   : > { %v3350_v8 = vpop.permute.xlu0 %3349  ;;  %v3348_v16 = vpop.permute.xlu1 %3347 }
 0x918   : > { %4654 = vmatprep.subr.msk.bf16.mxu0 %vm5215_vm4, %v4652_v11 }
 0x919   : > { %4657 = vmatpush3.bf16.xpose.msk.msra.mxu0 %vm5215_vm4, %v4652_v11 }
 0x91a   : > { %4666 = vmatprep.subr.msk.bf16.mxu0 %vm5215_vm4, %v4664_v19 }
 0x91b   : > { %v3583_v7 = vpop.permute.xlu0 %3582  ;;  %v3581_v25 = vpop.permute.xlu1 %3580 }
 0x91c   : > { %v3602_v38 = vsel %vm486_vm0, %v837_v36, %v3581_v25  ;;  %v3603_v42 = vsel %vm486_vm0, %v838_v0, %v3583_v7 }
 0x91f   : > { %v3591_v34 = vpop.permute.xlu0 %3590  ;;  %v3589_v35 = vpop.permute.xlu1 %3588 }
 0x920   : > { %4469 = vmatmul.mubr.msk.f32.vlgmr.msra.gmra.mrb[26].mxu0 %vm845_vm3, %v5477_v28  ;;  %v3605_v39 = vsel %vm3604_vm5, %v3602_v38, %v3589_v35  ;;  %v3606_v22 = vsel %vm3604_vm5, %v3603_v42, %v3591_v34  ;;  %v3810_v42 = vld [vmem:[%s5631_s17 + $0x8] sm:$0xff] }
 0x921   : > { %4669 = vmatpush3.bf16.xpose.msk.msra.mxu0 %vm5215_vm4, %v4664_v19  ;;  %4482 = vmatprep.mubr.msk.f32.mxu0 %vm845_vm3, %v3348_v16  ;;  %v4990_v16 = vmov 0  }
 0x922   : > { %4677 = vmatprep.subr.bf16.mxu0 %v4676_v30  ;;  %4825 = vset.pattern.permute.xlu1 %v4990_v16 }
 0x923   : > { %v3599_v37 = vpop.permute.xlu0 %3598  ;;  %v3597_v10 = vpop.permute.xlu1 %3596 }
 0x924   : > { %v3608_v43 = vsel %vm3607_vm6, %v3605_v39, %v3597_v10  ;;  %v3609_v29 = vsel %vm3607_vm6, %v3606_v22, %v3599_v37 }
 0x927   : > { %v4822_v44 = vpop.permute.xlu0 %4821  ;;  %v4817_v45 = vpop.permute.xlu1 %4816 }
 0x928   : > { %v4824_v33 = vunpack.i.h.bf16 %v4822_v44  ;;  %v4823_v50 = vunpack.i.l.bf16 %v4822_v44  ;;  %v4819_v51 = vunpack.i.h.bf16 %v4817_v45  ;;  %v4818_v28 = vunpack.i.l.bf16 %v4817_v45  ;;  %4483 = vmatmul.mubr.msk.f32.vlgmr.msra.gmra.mrb[28].mxu0 %vm845_vm3, %v3350_v8 }
 0x929   : > { %4679 = vmatpush3.bf16.msra.mxu0 %v4676_v30  ;;  %4508 = vmatprep.mubr.msk.f32.mxu0 %vm3625_vm7, %v3608_v43  ;;  %v4109_v30 = vld [vmem:[%s5705_s8] ss:$0 sm:$0xff] }
 0x92a   : > { %v4658_v52 = vpack.c.bf16 %v4819_v51, %v4818_v28  ;;  %4681 = vmatprep.subr.bf16.mxu0 %v4680_v41  ;;  %v4670_v56 = vpack.c.bf16 %v4824_v33, %v4823_v50 }
 0x92b   : > { %v3253_v13 = vpop.permute.xlu1 %3252  ;;  %v3255_v63 = vpop.permute.xlu0 %3254 }
 0x92c   : > { %4660 = vmatprep.subr.msk.bf16.mxu1 %vm5215_vm4, %v4658_v52  ;;  %4475 = vmatprep.mubr.msk.f32.mxu1 %vm845_vm3, %v3253_v13 }
 0x92d   : > { %4663 = vmatpush3.bf16.xpose.msk.msra.mxu1 %vm5215_vm4, %v4658_v52  ;;  %4683 = vmatpush3.bf16.msra.mxu0 %v4680_v41 }
 0x92e   : > { %4672 = vmatprep.subr.msk.bf16.mxu1 %vm5215_vm4, %v4670_v56  ;;  %4685 = vmatprep.subr.bf16.mxu0 %v4684_v12 }
 0x92f   : > { %v3443_v40 = vpop.permute.xlu1 %3442  ;;  %v3445_v48 = vpop.permute.xlu0 %3444 }
 0x931   : > { %4687 = vmatpush3.bf16.msra.mxu0 %v4684_v12 }
 0x932   : > { %4689 = vmatprep.subr.bf16.mxu0 %v4688_v60 }
 0x934   : > { %4476 = vmatmul.mubr.msk.f32.vlgmr.msra.gmra.mrb[30].mxu1 %vm845_vm3, %v3255_v63 }
 0x935   : > { %4675 = vmatpush3.bf16.xpose.msk.msra.mxu1 %vm5215_vm4, %v4670_v56  ;;  %4489 = vmatprep.mubr.msk.f32.mxu1 %vm845_vm3, %v3443_v40 }
 0x936   : > { %4691 = vmatpush3.bf16.msra.mxu0 %v4688_v60 }
 0x939   : > { %4509 = vmatmul.mubr.msk.f32.vlgmr.msra.gmra.mrb[30].mxu0 %vm3625_vm7, %v3609_v29 }
 0x93c   : > { %4490 = vmatmul.mubr.msk.f32.vlgmr.msra.gmra.mrb[32].mxu1 %vm845_vm3, %v3445_v48 }
 0x95b   : > { %v2007_v23 = vpop.trf.xlu0 }
 0x95c   : > { %v2023_v57 = vadd.f32 %v2007_v23, %v5514_v3 }
 0x95e   : > { %v2025_v62 = vmul.f32 0.5, %v2023_v57 }
 0x95f   : > { %v2008_v4 = vpop.trf.xlu0 }
 0x960   : > { %4035 = vst.msk [vmem:[%s5604_s28 + $0x10] sm:$0xff] %vm486_vm0, %v2025_v62  ;;  %v2024_v21 = vadd.f32 %v2008_v4, %v5518_v1  ;;  %v4114_v4 = vld [vmem:[%s5707_s10] ss:$0 sm:$0xff] }
 0x962   : > { %v2026_v20 = vmul.f32 0.5, %v2024_v21 }
 0x963   : > { %v2781_v53 = vpop.trf.xlu0 }
 0x964   : > { %4036 = vst.msk [vmem:[%s5604_s28 + $0x18] sm:$0xff] %vm486_vm0, %v2026_v20  ;;  %v2797_v3 = vadd.f32 %v2781_v53, %v5521_v2 }
 0x966   : > { %v2799_v58 = vmul.f32 0.5, %v2797_v3  ;;  %v1234_v9 = vpop.trf.xlu1 }
 0x967   : > { %v1250_v14 = vadd.f32 %v1234_v9, %v5525_v5  ;;  %v2782_v17 = vpop.trf.xlu0  ;;  %v3719_v5 = vld [vmem:[%s5706_s9] sm:$0xff] }
 0x968   : > { %4071 = vst.msk [vmem:[%s5604_s28 + $0x20] sm:$0xff] %vm486_vm0, %v2799_v58  ;;  %v2798_v24 = vadd.f32 %v2782_v17, %v5527_v6  ;;  %4511 = vmatprep.subr.mxu1 %v3719_v5  ;;  %v3809_v6 = vld [vmem:[%s5631_s17] sm:$0xff]  ;;  %s4991_s17 = smov [#allocation2]  }
 0x969   : > { %v1252_v15 = vmul.f32 0.5, %v1250_v14  ;;  %4512 = vmatpush3.msra.mxu1 %v3719_v5  ;;  %3813 = vperm.xlu1 %4825, %v3809_v6   ;;  %s4919_s29 = sshll.u32 %s4991_s17, 4  ;;  %s4920_s29 = int_to_ptr.vmem [resolvable:$false] %s4919_s29 }
 0x96a   : > { %v2800_v1 = vmul.f32 0.5, %v2798_v24  ;;  %v1235_v11 = vpop.trf.xlu1  ;;  %s4921_s19 = scalar_lea.vmem %s4920_s29, 512 }
 0x96b   : > { %1254 = vst.msk [vmem:[%s5604_s28] sm:$0xff] %vm486_vm0, %v1252_v15  ;;  %v1251_v8 = vadd.f32 %v1235_v11, %v5532_v59 }
 0x96c   : > { %4072 = vst.msk [vmem:[%s5604_s28 + $0x28] sm:$0xff] %vm486_vm0, %v2800_v1 }
 0x96d   : > { %v1253_v2 = vmul.f32 0.5, %v1251_v8 }
 0x96f   : > { %1255 = vst.msk [vmem:[%s5604_s28 + $0x8] sm:$0xff] %vm486_vm0, %v1253_v2 }
 0x9e8   : > { %v3814_v58 = vpop.permute.xlu1 %3813 }
 0x9f3   : > { %v4470_v59 = vpop.f32.mrb[26].mxu0 }
 0x9f4   : > { %v3241_v19 = vpop.f32.mrb[27].mxu0  ;;  %4891 = vtanh.f32 %v4470_v59 }
 0x9f5   : > { %4893 = vtanh.f32 %v3241_v19 }
 0x9fb   : > { %v4484_v7 = vpop.f32.mrb[28].mxu0 }
 0x9fc   : > { %v3429_v25 = vpop.f32.mrb[29].mxu0 }
 0x9fe   : > { %v4892_v10 = vpop.eup %4891 }
 0x9ff   : > { %v4894_v38 = vpop.eup %4893 }
 0xa07   : > { %v4477_v26 = vpop.f32.mrb[30].mxu1 }
 0xa08   : > { %4895 = vtanh.f32 %v4477_v26  ;;  %v3334_v27 = vpop.f32.mrb[31].mxu1 }
 0xa09   : > { %4897 = vtanh.f32 %v3334_v27 }
 0xa0a   : > { %4899 = vtanh.f32 %v4484_v7 }
 0xa0b   : > { %4901 = vtanh.f32 %v3429_v25 }
 0xa0c   : > { %v4510_v31 = vpop.f32.mrb[30].mxu0 }
 0xa0d   : > { %v3704_v34 = vadd.f32 %v4510_v31, %v4109_v30  ;;  %v3698_v35 = vpop.f32.mrb[31].mxu0 }
 0xa0e   : > { %v3699_v18 = vadd.f32 %v4109_v30, %v3698_v35 }
 0xa0f   : > { %v3710_v36 = vmin.f32 %v3704_v34, 0.0  ;;  %v4491_v37 = vpop.f32.mrb[32].mxu1  ;;  %vm3708_vm10 = vcmp.gt.f32.partialorder %v3704_v34, 0.0 }
 0xa10   : > { %v3709_v32 = vmin.f32 %v3699_v18, 0.0  ;;  %4903 = vtanh.f32 %v4491_v37  ;;  %v3524_v49 = vpop.f32.mrb[33].mxu1  ;;  %vm3707_vm9 = vcmp.gt.f32.partialorder %v3699_v18, 0.0 }
 0xa11   : > { %v3713_v39 = vmul.f32 1.442695, %v3710_v36  ;;  %4905 = vtanh.f32 %v3524_v49 }
 0xa12   : > { %v4896_v41 = vpop.eup %4895  ;;  %v3711_v43 = vmul.f32 1.442695, %v3709_v32 }
 0xa13   : > { %v4898_v44 = vpop.eup %4897  ;;  %4907 = vpow2.f32 %v3713_v39  ;;  %v3346_v45 = vadd.f32 %v4896_v41, %v4892_v10 }
 0xa14   : > { %v4900_v46 = vpop.eup %4899  ;;  %4909 = vpow2.f32 %v3711_v43  ;;  %v3345_v47 = vadd.f32 %v4898_v44, %v4894_v38 }
 0xa15   : > { %v4902_v33 = vpop.eup %4901  ;;  %v3441_v50 = vadd.f32 %v4900_v46, %v3346_v45 }
 0xa16   : > { %v3440_v51 = vadd.f32 %v4902_v33, %v3345_v47 }
 0xa1a   : > { %v4904_v28 = vpop.eup %4903 }
 0xa1b   : > { %v4906_v52 = vpop.eup %4905  ;;  %v3536_v12 = vadd.f32 %v4904_v28, %v3441_v50 }
 0xa1c   : > { %v3535_v13 = vadd.f32 %v4906_v52, %v3440_v51 }
 0xa1d   : > { %v4908_v54 = vpop.eup %4907  ;;  %v3538_v40 = vmul.f32 0.25, %v3536_v12 }
 0xa1e   : > { %v4910_v55 = vpop.eup %4909  ;;  %v4113_v56 = vadd.f32 -1.0, %v4908_v54  ;;  %v3537_v60 = vmul.f32 0.25, %v3535_v13 }
 0xa1f   : > { %v4112_v61 = vadd.f32 -1.0, %v4910_v55 }
 0xa20   : > { %3539 = vxpose.xlu0.b32.start [1/2] (short) (narrow) %v3537_v60, 16  ;;  %v3718_v0 = vsel %vm3708_vm10, %v3704_v34, %v4113_v56 }
 0xa21   : > { %v3717_v63 = vsel %vm3707_vm9, %v3699_v18, %v4112_v61 }
 0xa22   : > { %4513 = vmatprep.mubr.msk.f32.mxu1 %vm3727_vm8, %v3717_v63 }
 0xa23   : > { %4514 = vmatmul.mubr.msk.f32.vlgmr.msra.gmra.mrb[34].mxu1 %vm3727_vm8, %v3718_v0 }
 0xa24   : > { %3540 = vxpose.xlu0.b32.end [2/2] (short) (narrow) %v3538_v40, 16 }
 0xa4d   : > { %4826 = vset.pattern.permute.xlu0 %v4990_v16 }
 0xa4e   : > { %3818 = vperm.xlu0 %4826, %v3810_v42  }
 0xaa0   : > { %v3555_v22 = vpop.trf.xlu0 }
 0xaa1   : > { %v3571_v29 = vadd.f32 %v3555_v22, %v3537_v60 }
 0xaa3   : > { %v3573_v48 = vmul.f32 0.5, %v3571_v29 }
 0xaa4   : > { %v3556_v23 = vpop.trf.xlu0 }
 0xaa5   : > { %4107 = vst.msk [vmem:[%s5604_s28 + $0x30] sm:$0xff] %vm486_vm0, %v3573_v48  ;;  %v3572_v57 = vadd.f32 %v3556_v23, %v3538_v40 }
 0xaa7   : > { %v3574_v62 = vmul.f32 0.5, %v3572_v57 }
 0xaa9   : > { %4108 = vst.msk [vmem:[%s5604_s28 + $0x38] sm:$0xff] %vm486_vm0, %v3574_v62  ;;  %s3849_s28 = sshll.u32 %s444_s15, 4  ;;  %s5652_s28 = int_to_ptr.vmem [resolvable:$true] %s3849_s28 }
 0xaaa   : > { %s4915_s25 = scalar_lea.vmem %s5652_s28, 256  ;;  %p4922_p0 = scmp.lt.s32.totalorder %s5652_s28, %s4920_s29 }
 0xaab   : > { %p4916_p11 = scmp.ne.s32.totalorder %s5652_s28, %s4915_s25  ;;  %p4923_p1 = scmp.lt.s32.totalorder %s4921_s19, %s4915_s25 }
 0xaad   : > { %p4917_p12 = pnand %p4916_p11, %p5097_p5  ;;  %p4924_p2 = por %p4923_p1, %p4922_p0 }
 0xaaf   : > { %p4918_p13 = pneg %p4917_p12 }
 0xab1   : > { %p4925_p3 = pnand %p4924_p2, %p4918_p13 }
 0xacd   : > { %v3819_v20 = vpop.permute.xlu0 %3818 }
 0xaf6   : > { %v4515_v21 = vpop.f32.mrb[34].mxu1 }
 0xaf7   : > { %v3806_v53 = vadd.f32 %v4515_v21, %v4114_v4  ;;  %v3800_v3 = vpop.f32.mrb[35].mxu1 }
 0xaf8   : > { %v3801_v9 = vadd.f32 %v4114_v4, %v3800_v3 }
 0xaf9   : > { %v3822_v14 = vmul.f32 %v3819_v20, %v3806_v53 }
 0xafa   : > { %v3821_v17 = vmul.f32 %v3814_v58, %v3801_v9 }
 0xafb   : > { %4911 = vtanh.f32 %v3822_v14 }
 0xafc   : > { %4913 = vtanh.f32 %v3821_v17 }
 0xb05   : > { %v4912_v24 = vpop.eup %4911 }
 0xb06   : > { %v4914_v15 = vpop.eup %4913  ;;  %3826 = vst.msk [vmem:[%s444_s15 + $0x8] sm:$0xff] %vm486_vm0, %v4912_v24 }
 0xb07   : > { %3825 = vst.msk [vmem:[%s444_s15] sm:$0xff] %vm486_vm0, %v4914_v15 }
 0xb08   : > { %4928 = shalt.err (!%p4925_p3)
}
 0xb09   : > { %s4929_s18 = scalar_lea.hbm %s5650_s26, 256  ;;  %s4933_s23 = scalar_lea.hbm %s5709_s12, 512 }
 0xb0a   : > { %p4930_p4 = scmp.ne.s32.totalorder %s5650_s26, %s4929_s18  ;;  %p4934_p9 = scmp.lt.u32.totalorder %s5650_s26, %s5709_s12 }
 0xb0b   : > { %p4935_p10 = scmp.lt.u32.totalorder %s4933_s23, %s4929_s18  ;;  %p4937_p12 = scmp.lt.u32.totalorder %s4929_s18, %s5650_s26 }
 0xb0c   : > { %p4931_p7 = pnand %p4930_p4, %p5097_p5 }
 0xb0d   : > { %p4936_p11 = por %p4935_p10, %p4934_p9 }
 0xb0e   : > { %p4932_p8 = pneg %p4931_p7 }
 0xb0f   : > { %p4938_p13 = por %p4937_p12, %p4936_p11 }
 0xb11   : > { %p4939_p0 = pnand %p4938_p13, %p4932_p8 }
 0xb13   : > { %4942 = shalt.err (!%p4939_p0)
}
 0xb14   : > { %s4992_s20 = smov 128   ;;  %s4993_s27 = smov 8  }
 0xb15   : > { %4692 = dma.vmem_to_hbm [thread:$0]  (%p5097_p5), %s5652_s28, 256, %s5650_s26, %s5656_s16, %s4992_s20, %s4992_s20, %s4993_s27  }
 0xb16 PF: > { %p4698_p1 = scmp.ge.s32.totalorder %s4977_s24, 2  ;;  %s3872_s25 = sand.u32 1, %s4965_s21  }
 0xb17   : > { %s3873_s17 = scalar_lea.sflag [#allocation3], %s3872_s25 }
 0xb18   : > { %p4695_p2 = pnand %p4698_p1, %p5101_p6 }
 0xb1a   : > { %4960 = dma.done.wait (!%p4695_p2), %s3873_s17, 256  }
 0xb1b   : > { %4962 = vsyncadd (!%p4695_p2), %s3873_s17, 4294967040  ;;  %s5749_s24 = sld [smem:[#allocation6_spill]]  ;;  %s5750_s29 = sld [smem:[#allocation5_spill]] }
 0xb1c   : > { %s5751_s23 = sld [smem:[#allocation7_spill]]  ;;  %s5752_s21 = smov %s4969_s22 }
 0xb21   : > { %p23_p3 = scmp.ge.s32.totalorder %s5749_s24, 4   ;;  %s5753_s22 = smov %s5750_s29 }
 0xb23   :  { %25 = sbr.rel (!%p23_p3) target bundleno = 6 (0x6), region = 135 }
 0xb2a   :  { %3878 = vsyncpa [#allocation3], 1 }
 0xb2b   :  { %3880 = vsyncpa [#allocation3 + $0x1], 1 }

// kernel: edge_score_network_forward.15
= control target key start
LH: loop header
LB: loop body
LE: loop exit
PB: predicated region body
PF: predicated region fallthrough
CT: control target
= control target key end

     0   :  { %s2190_s15 = smov 0   ;;  %s2192_s16 = smov 0   ;;  %s2857_s0 = inlined_call_operand.vmem [shape: f32[2,2,256], index: 0, kind: input, shape index: {}]   ;;  %s2858_s1 = inlined_call_operand.vmem [shape: f32[2,4,256], index: 1, kind: input, shape index: {}]   ;;  %s2859_s2 = inlined_call_operand.vmem [shape: f32[2,4,256], index: 2, kind: input, shape index: {}]   ;;  %s2860_s3 = inlined_call_operand.vmem [shape: f32[2,4,256], index: 3, kind: input, shape index: {}]   ;;  %s2861_s4 = inlined_call_operand.vmem [shape: f32[2,1,256], index: 4, kind: input, shape index: {}]   ;;  %s2862_s5 = inlined_call_operand.vmem [shape: f32[28,2], index: 5, kind: input, shape index: {}]   ;;  %s2863_s6 = inlined_call_operand.vmem [shape: f32[28,4], index: 6, kind: input, shape index: {}]   ;;  %s2864_s7 = inlined_call_operand.vmem [shape: f32[28,4], index: 7, kind: input, shape index: {}]   ;;  %s2865_s8 = inlined_call_operand.vmem [shape: f32[28,4], index: 8, kind: input, shape index: {}]   ;;  %s2866_s9 = inlined_call_operand.vmem [shape: f32[28,1], index: 9, kind: input, shape index: {}]   ;;  %s2867_s10 = inlined_call_operand.vmem [shape: f32[28,28], index: 10, kind: input, shape index: {}]   ;;  %s2868_s11 = inlined_call_operand.vmem [shape: f32[28,1], index: 11, kind: input, shape index: {}]   ;;  %s2869_s12 = inlined_call_operand.vmem [shape: f32[28,1], index: 12, kind: input, shape index: {}]   ;;  %s2870_s13 = inlined_call_operand.<no memory space> [shape: f32[1,1], index: 13, kind: input, shape index: {}]   ;;  %s2871_s14 = inlined_call_operand.vmem [shape: f32[2,1,256], index: 14, kind: output, shape index: {}]  }
   0x1   :  { %v19_v0 = vstv %s2870_s13  ;;  %s2194_s17 = smov 0  }
   0x2   :  { %20 = vst [vmem:[#allocation2] sm:$0x1] %v19_v0 }
   0x3 LB: > { %s38_s13 = sadd.s32 1, %s2099_s16  ;;  %p1916_p0 = scmp.ge.s32.totalorder %s2103_s17, 1  ;;  %s2103_s17 = sphi %s2194_s17, %s26_s17   ;;  %s2099_s16 = sphi %s2192_s16, %s2894_s16   ;;  %s2095_s15 = sphi %s2190_s15, %s2893_s15  }
   0x4   : > { %p40_p1 = scmp.ge.s32.totalorder %s38_s13, 2  ;;  %p502_p2 = scmp.lt.s32.totalorder %s2103_s17, 3 }
   0x6   : > { %s2896_s13 = smov (%p40_p1, %s38_s13), 0  ;;  %p503_p3 = pnand %p1916_p0, %p502_p2 }
   0x8   : > { %506 = sbr.rel (%p503_p3) target bundleno = 641 (0x281), region = 76 }
   0xf   : > { %v652_v1 = vld [vmem:[%s2862_s5] sm:$0xff]  ;;  %v2105_v3 = vmov 0   ;;  %v653_v4 = vld [vmem:[%s2862_s5 + $0x8] sm:$0xff]  ;;  %v655_v6 = vld [vmem:[%s2862_s5 + $0x18] sm:$0xf]  ;;  %v2106_v7 = vmov 1   ;;  %v2872_v25 = vlaneseq }
  0x10   : > { %v648_v2 = vld [vmem:[%s2866_s9] sm:$0xff]  ;;  %1985 = vset.pattern.permute.xlu1 %v2105_v3  ;;  %1984 = vset.pattern.permute.xlu0 %v2105_v3  ;;  %v649_v5 = vld [vmem:[%s2866_s9 + $0x8] sm:$0xff]  ;;  %v650_v8 = vld [vmem:[%s2866_s9 + $0x10] sm:$0xff]  ;;  %v2107_v16 = vmov 3   ;;  %v2108_v18 = vmov 2   ;;  %p591_p4 = scmp.lt.s32.totalorder %s2095_s15, 1 }
  0x11   : > { %659 = vperm.xlu0 %1984, %v652_v1   ;;  %706 = vperm.xlu1 %1985, %v648_v2   ;;  %v654_v9 = vld [vmem:[%s2862_s5 + $0x10] sm:$0xff]  ;;  %v785_v10 = vld [vmem:[%s2863_s6 + $0x18] sm:$0xf]  ;;  %v782_v11 = vld [vmem:[%s2863_s6] sm:$0xff]  ;;  %v2318_v26 = vshrl.u32 %v2872_v25, 7  ;;  %vm1509_vm0 = vcmask 1043456  }
  0x12   : > { %v992_v12 = vld [vmem:[%s2864_s7] sm:$0xff]  ;;  %v783_v13 = vld [vmem:[%s2863_s6 + $0x8] sm:$0xff]  ;;  %v2250_v14 = vld [vmem:[%s2864_s7 + $0x10] sm:$0xff]  ;;  %s2898_s15 = smov (!%p591_p4, %s2095_s15), 1  ;;  %vm2110_vm1 = vmmov 1   ;;  %vm1496_vm3 = vcmask 228352  }
  0x13   : > { %v651_v15 = vld [vmem:[%s2866_s9 + $0x18] sm:$0xf]  ;;  %v784_v17 = vld [vmem:[%s2863_s6 + $0x10] sm:$0xff]  ;;  %v2270_v19 = vld [vmem:[%s2865_s8 + $0x8] sm:$0xff]  ;;  %s1935_s19 = sshll.u32 %s2898_s15, 2  ;;  %2879 = vst [vmem:[#allocation3_spill] sm:$0xff] %v2318_v26 }
  0x14   : > { %v2277_v20 = vld [vmem:[%s2865_s8 + $0x18] sm:$0xf]  ;;  %v993_v21 = vld [vmem:[%s2864_s7 + $0x8] sm:$0xff]  ;;  %v2292_v23 = vld [vmem:[%s2865_s8] sm:$0xff]  ;;  %s598_s22 = scalar_lea.vmem %s2857_s0, %s1935_s19  ;;  %v2326_v27 = vsub.s32 0, %v2318_v26  ;;  %v2329_v28 = vsub.s32 2, %v2318_v26 }
  0x15   : > { %664 = vperm.xlu0 %1984, %v653_v4   ;;  %711 = vperm.xlu1 %1985, %v649_v5   ;;  %v995_v22 = vld [vmem:[%s2864_s7 + $0x18] sm:$0xf]  ;;  %v2299_v24 = vld [vmem:[%s2865_s8 + $0x10] sm:$0xff]  ;;  %v656_v29 = vld [vmem:[%s598_s22] sm:$0xf]  ;;  %v2333_v30 = vsub.s32 1, %v2318_v26 }
  0x16   : > { %2880 = vst [vmem:[#allocation4_spill] sm:$0xff] %v2326_v27  ;;  %v2336_v31 = vsub.s32 3, %v2318_v26  ;;  %v681_v33 = vrot.slane %v656_v29, %v2326_v27  ;;  %v685_v34 = vrot.slane %v656_v29, %v2329_v28  ;;  %s2363_s23 = sshll.u32 %s2898_s15, 3  ;;  %v2377_v55 = vsub.s32 4, %v2318_v26  ;;  %vm1944_vm2 = vmpackc.low %vm1509_vm0, %vm2110_vm1  ;;  %s1925_s19 = sshll.u32 %s2898_s15, 1 }
  0x17   : > { %2881 = vst [vmem:[#allocation5_spill] sm:$0xff] %v2333_v30  ;;  %v751_v36 = vrot.slane %v656_v29, %v2333_v30  ;;  %s608_s26 = scalar_lea.vmem %s2858_s1, %s2363_s23  ;;  %s618_s20 = scalar_lea.vmem %s2859_s2, %s2363_s23 }
  0x18   : > { %v755_v37 = vrot.slane %v656_v29, %v2336_v31  ;;  %v2348_v38 = vrot.slane %v681_v33, %v2326_v27  ;;  %v2351_v39 = vrot.slane %v685_v34, %v2326_v27  ;;  %v2379_v57 = vld [vmem:[%s608_s26] sm:$0xff]  ;;  %v2422_v34 = vsub.s32 7, %v2318_v26  ;;  %s628_s24 = scalar_lea.vmem %s2860_s3, %s2363_s23  ;;  %s637_s22 = scalar_lea.vmem %s2861_s4, %s1925_s19 }
  0x19   : > { %674 = vperm.xlu0 %1984, %v655_v6   ;;  %1986 = vset.pattern.permute.xlu1 %v2106_v7  ;;  %v2356_v44 = vrot.slane %v751_v36, %v2333_v30  ;;  %v811_v59 = vrot.slane %v2379_v57, %v2326_v27  ;;  %v815_v60 = vrot.slane %v2379_v57, %v2377_v55  ;;  %s646_s25 = scalar_lea.vmem %s2871_s14, %s1925_s19 }
  0x1a   : > { %737 = vperm.xlu1 %1986, %v653_v4   ;;  %v2359_v45 = vrot.slane %v755_v37, %v2333_v30  ;;  %v2427_v37 = vsub.s32 5, %v2318_v26 }
  0x1b   : > { %v2393_v63 = vrot.slane %v811_v59, %v2326_v27  ;;  %v2396_v0 = vrot.slane %v815_v60, %v2326_v27 }
  0x1d   : > { %716 = vperm.xlu0 %1984, %v650_v8  }
  0x1e   : > { %1987 = vset.pattern.permute.xlu1 %v2105_v3 }
  0x1f   : > { %669 = vperm.xlu1 %1987, %v654_v9  }
  0x21   : > { %804 = vperm.xlu0 %1984, %v785_v10  }
  0x23   : > { %789 = vperm.xlu1 %1987, %v782_v11  }
  0x25   : > { %999 = vperm.xlu0 %1984, %v992_v12  }
  0x27   : > { %794 = vperm.xlu1 %1987, %v783_v13  }
  0x29   : > { %1009 = vperm.xlu0 %1984, %v2250_v14  }
  0x2b   : > { %721 = vperm.xlu1 %1987, %v651_v15  }
  0x2d   : > { %1997 = vset.pattern.permute.xlu0 %v2107_v16 }
  0x2e   : > { %947 = vperm.xlu0 %1997, %v783_v13  }
  0x2f   : > { %1988 = vset.pattern.permute.xlu1 %v2106_v7 }
  0x30   : > { %745 = vperm.xlu1 %1988, %v655_v6  }
  0x32   : > { %955 = vperm.xlu0 %1997, %v785_v10  }
  0x34   : > { %843 = vperm.xlu1 %1988, %v782_v11  }
  0x36   : > { %1153 = vperm.xlu0 %1997, %v992_v12  }
  0x38   : > { %1989 = vset.pattern.permute.xlu1 %v2105_v3 }
  0x39   : > { %799 = vperm.xlu1 %1989, %v784_v17  }
  0x3a   : > { %1161 = vperm.xlu0 %1997, %v2250_v14  }
  0x3d   : > { %1990 = vset.pattern.permute.xlu1 %v2108_v18 }
  0x3e   : > { %2004 = vset.pattern.permute.xlu0 %v2106_v7  ;;  %893 = vperm.xlu1 %1990, %v782_v11  }
  0x3f   : > { %733 = vperm.xlu0 %2004, %v652_v1  }
  0x42   : > { %897 = vperm.xlu1 %1990, %v783_v13  }
  0x43   : > { %741 = vperm.xlu0 %2004, %v654_v9  }
  0x46   : > { %1991 = vset.pattern.permute.xlu1 %v2106_v7 }
  0x47   : > { %847 = vperm.xlu0 %2004, %v783_v13   ;;  %855 = vperm.xlu1 %1991, %v785_v10  }
  0x4b   : > { %851 = vperm.xlu0 %2004, %v784_v17   ;;  %1992 = vset.pattern.permute.xlu1 %v2107_v16 }
  0x4c   : > { %943 = vperm.xlu1 %1992, %v782_v11  }
  0x4f   : > { %1267 = vperm.xlu0 %2004, %v2270_v19  }
  0x50   : > { %1993 = vset.pattern.permute.xlu1 %v2108_v18 }
  0x51   : > { %901 = vperm.xlu1 %1993, %v784_v17  }
  0x53   : > { %1275 = vperm.xlu0 %2004, %v2277_v20  }
  0x55   : > { %905 = vperm.xlu1 %1993, %v785_v10  }
  0x57   : > { %2010 = vset.pattern.permute.xlu0 %v2108_v18 }
  0x58   : > { %1107 = vperm.xlu0 %2010, %v993_v21  }
  0x59   : > { %1994 = vset.pattern.permute.xlu1 %v2105_v3 }
  0x5a   : > { %1004 = vperm.xlu1 %1994, %v993_v21  }
  0x5c   : > { %1115 = vperm.xlu0 %2010, %v995_v22  }
  0x5e   : > { %1995 = vset.pattern.permute.xlu1 %v2107_v16 }
  0x5f   : > { %951 = vperm.xlu1 %1995, %v784_v17  }
  0x60   : > { %1313 = vperm.xlu0 %2010, %v2292_v23  }
  0x63   : > { %1996 = vset.pattern.permute.xlu1 %v2106_v7 }
  0x64   : > { %1053 = vperm.xlu1 %1996, %v992_v12   ;;  %1321 = vperm.xlu0 %2010, %v2299_v24  }
  0x68   : > { %1057 = vperm.xlu1 %1996, %v993_v21   ;;  %2014 = vset.pattern.permute.xlu0 %v2107_v16 }
  0x69   : > { %1375 = vperm.xlu0 %2014, %v2277_v20  }
  0x6c   : > { %1998 = vset.pattern.permute.xlu1 %v2105_v3 }
  0x6d   : > { %1014 = vperm.xlu1 %1998, %v995_v22   ;;  %2016 = vset.pattern.permute.xlu0 %v2105_v3 }
  0x71   : > { %1999 = vset.pattern.permute.xlu1 %v2108_v18 }
  0x72   : > { %1103 = vperm.xlu1 %1999, %v992_v12  }
  0x76   : > { %2000 = vset.pattern.permute.xlu1 %v2106_v7 }
  0x77   : > { %1061 = vperm.xlu1 %2000, %v2250_v14  }
  0x7b   : > { %1065 = vperm.xlu1 %2000, %v995_v22  }
  0x7f   : > { %2001 = vset.pattern.permute.xlu1 %v2107_v16 }
  0x80   : > { %1157 = vperm.xlu1 %2001, %v993_v21  }
  0x84   : > { %2002 = vset.pattern.permute.xlu1 %v2108_v18 }
  0x85   : > { %1111 = vperm.xlu1 %2002, %v2250_v14  }
  0x89   : > { %2003 = vset.pattern.permute.xlu1 %v2105_v3 }
  0x8a   : > { %1209 = vperm.xlu1 %2003, %v2292_v23  }
  0x8e   : > { %1214 = vperm.xlu1 %2003, %v2270_v19  }
  0x90   : > { %v2338_v32 = vpop.permute.xlu0 %659  ;;  %v2342_v35 = vpop.permute.xlu1 %706 }
  0x92   : > { %2005 = vset.pattern.permute.xlu1 %v2107_v16 }
  0x93   : > { %1165 = vperm.xlu1 %2005, %v995_v22  }
  0x94   : > { %v665_v40 = vpop.permute.xlu0 %664  ;;  %v712_v41 = vpop.permute.xlu1 %711 }
  0x95   : > { %v698_v42 = vmul.f32 %v2348_v38, %v665_v40  ;;  %v699_v43 = vmul.f32 %v2351_v39, %v665_v40 }
  0x97   : > { %2006 = vset.pattern.permute.xlu1 %v2106_v7  ;;  %v726_v48 = vadd.f32 %v712_v41, %v698_v42  ;;  %v727_v49 = vadd.f32 %v712_v41, %v699_v43  ;;  %v961_v41 = vrot.slane %v2379_v57, %v2336_v31  ;;  %v861_v43 = vrot.slane %v2379_v57, %v2333_v30 }
  0x98   : > { %1263 = vperm.xlu1 %2006, %v2292_v23   ;;  %v675_v46 = vpop.permute.xlu0 %674 }
  0x99   : > { %v738_v47 = vpop.permute.xlu1 %737  ;;  %v702_v10 = vmul.f32 %v2348_v38, %v675_v46  ;;  %v703_v11 = vmul.f32 %v2351_v39, %v675_v46  ;;  %v696_v46 = vmul.f32 %v2348_v38, %v2338_v32 }
  0x9a   : > { %v768_v50 = vmul.f32 %v2356_v44, %v738_v47  ;;  %v769_v51 = vmul.f32 %v2359_v45, %v738_v47  ;;  %v697_v47 = vmul.f32 %v2351_v39, %v2338_v32  ;;  %v871_v32 = vrot.slane %v861_v43, %v2333_v30 }
  0x9c   : > { %v776_v52 = vadd.f32 %v768_v50, %v726_v48  ;;  %v777_v53 = vadd.f32 %v769_v51, %v727_v49  ;;  %2007 = vset.pattern.permute.xlu1 %v2105_v3  ;;  %v2373_v54 = vpop.permute.xlu0 %716  ;;  %v911_v48 = vrot.slane %v2379_v57, %v2329_v28  ;;  %v2453_v49 = vrot.slane %v961_v41, %v2336_v31 }
  0x9d   : > { %1219 = vperm.xlu1 %2007, %v2299_v24  }
  0x9e   : > { %v670_v56 = vpop.permute.xlu1 %669 }
  0xa0   : > { %v2381_v58 = vpop.permute.xlu0 %804 }
  0xa1   : > { %1224 = vperm.xlu1 %2007, %v2277_v20  }
  0xa2   : > { %v2388_v61 = vpop.permute.xlu1 %789 }
  0xa4   : > { %v2390_v62 = vpop.permute.xlu0 %999 }
  0xa5   : > { %2008 = vset.pattern.permute.xlu1 %v2108_v18 }
  0xa6   : > { %1317 = vperm.xlu1 %2008, %v2270_v19   ;;  %v795_v1 = vpop.permute.xlu1 %794 }
  0xa7   : > { %v828_v2 = vmul.f32 %v2393_v63, %v795_v1  ;;  %v829_v4 = vmul.f32 %v2396_v0, %v795_v1  ;;  %v725_v1 = vadd.f32 %v2342_v35, %v697_v47 }
  0xa8   : > { %v2402_v5 = vpop.permute.xlu0 %1009 }
  0xa9   : > { %v2404_v6 = vadd.f32 %v828_v2, %v776_v52  ;;  %v2406_v8 = vadd.f32 %v829_v4, %v777_v53  ;;  %v700_v52 = vmul.f32 %v2348_v38, %v670_v56  ;;  %v701_v53 = vmul.f32 %v2351_v39, %v670_v56 }
  0xaa   : > { %2009 = vset.pattern.permute.xlu1 %v2106_v7  ;;  %v722_v9 = vpop.permute.xlu1 %721  ;;  %v832_v38 = vmul.f32 %v2393_v63, %v2381_v58  ;;  %v833_v39 = vmul.f32 %v2396_v0, %v2381_v58  ;;  %v921_v56 = vrot.slane %v911_v48, %v2329_v28 }
  0xab   : > { %1271 = vperm.xlu1 %2009, %v2299_v24   ;;  %v730_v14 = vadd.f32 %v722_v9, %v702_v10  ;;  %v731_v15 = vadd.f32 %v722_v9, %v703_v11 }
  0xad   : > { %v2412_v12 = vpop.permute.xlu0 %947 }
  0xaf   : > { %2011 = vset.pattern.permute.xlu1 %v2107_v16  ;;  %v746_v13 = vpop.permute.xlu1 %745 }
  0xb0   : > { %v772_v17 = vmul.f32 %v2356_v44, %v746_v13  ;;  %v773_v21 = vmul.f32 %v2359_v45, %v746_v13  ;;  %1363 = vperm.xlu1 %2011, %v2292_v23   ;;  %v2431_v23 = vsub.s32 6, %v2318_v26  ;;  %v728_v13 = vadd.f32 %v2373_v54, %v700_v52 }
  0xb1   : > { %v2418_v7 = vpop.permute.xlu0 %955 }
  0xb2   : > { %v780_v22 = vadd.f32 %v772_v17, %v730_v14  ;;  %v781_v29 = vadd.f32 %v773_v21, %v731_v15  ;;  %v729_v14 = vadd.f32 %v2373_v54, %v701_v53 }
  0xb3   : > { %v844_v33 = vpop.permute.xlu1 %843 }
  0xb4   : > { %1367 = vperm.xlu1 %2011, %v2270_v19   ;;  %v965_v19 = vrot.slane %v2379_v57, %v2422_v34  ;;  %v876_v15 = vmul.f32 %v871_v32, %v844_v33  ;;  %v841_v47 = vadd.f32 %v833_v39, %v781_v29 }
  0xb5   : > { %v2424_v36 = vpop.permute.xlu0 %1153 }
  0xb6   : > { %v2456_v50 = vrot.slane %v965_v19, %v2336_v31 }
  0xb8   : > { %2012 = vset.pattern.permute.xlu1 %v2108_v18  ;;  %v800_v40 = vpop.permute.xlu1 %799  ;;  %v865_v18 = vrot.slane %v2379_v57, %v2427_v37 }
  0xb9   : > { %1325 = vperm.xlu1 %2012, %v2277_v20   ;;  %v2438_v42 = vpop.permute.xlu0 %1161  ;;  %v915_v20 = vrot.slane %v2379_v57, %v2431_v23  ;;  %v724_v57 = vadd.f32 %v2342_v35, %v696_v46  ;;  %v827_v35 = vmul.f32 %v2396_v0, %v2388_v61  ;;  %v840_v46 = vadd.f32 %v832_v38, %v780_v22 }
  0xba   : > { %v875_v59 = vrot.slane %v865_v18, %v2333_v30  ;;  %v831_v18 = vmul.f32 %v2396_v0, %v800_v40 }
  0xbb   : > { %v925_v4 = vrot.slane %v915_v20, %v2329_v28 }
  0xbc   : > { %v877_v17 = vmul.f32 %v875_v59, %v844_v33 }
  0xbd   : > { %2013 = vset.pattern.permute.xlu1 %v2107_v16  ;;  %v894_v51 = vpop.permute.xlu1 %893 }
  0xbe   : > { %v734_v60 = vpop.permute.xlu0 %733  ;;  %1371 = vperm.xlu1 %2013, %v2299_v24   ;;  %v826_v24 = vmul.f32 %v2393_v63, %v2388_v61  ;;  %v830_v61 = vmul.f32 %v2393_v63, %v800_v40  ;;  %v926_v33 = vmul.f32 %v921_v56, %v894_v51  ;;  %v927_v53 = vmul.f32 %v925_v4, %v894_v51 }
  0xbf   : > { %v766_v2 = vmul.f32 %v2356_v44, %v734_v60  ;;  %v767_v16 = vmul.f32 %v2359_v45, %v734_v60 }
  0xc1   : > { %v774_v9 = vadd.f32 %v766_v2, %v724_v57  ;;  %v775_v10 = vadd.f32 %v767_v16, %v725_v1  ;;  %v898_v11 = vpop.permute.xlu1 %897 }
  0xc2   : > { %v742_v58 = vpop.permute.xlu0 %741  ;;  %2015 = vset.pattern.permute.xlu1 %v2105_v3  ;;  %v928_v60 = vmul.f32 %v921_v56, %v898_v11  ;;  %v929_v3 = vmul.f32 %v925_v4, %v898_v11 }
  0xc3   : > { %v834_v21 = vadd.f32 %v826_v24, %v774_v9  ;;  %v835_v41 = vadd.f32 %v827_v35, %v775_v10  ;;  %v770_v19 = vmul.f32 %v2356_v44, %v742_v58  ;;  %v771_v43 = vmul.f32 %v2359_v45, %v742_v58 }
  0xc5   : > { %v778_v48 = vadd.f32 %v770_v19, %v728_v13  ;;  %v779_v20 = vadd.f32 %v771_v43, %v729_v14  ;;  %v884_v54 = vadd.f32 %v876_v15, %v834_v21  ;;  %v885_v52 = vadd.f32 %v877_v17, %v835_v41 }
  0xc6   : > { %v848_v57 = vpop.permute.xlu0 %847  ;;  %v856_v1 = vpop.permute.xlu1 %855 }
  0xc7   : > { %v878_v2 = vmul.f32 %v871_v32, %v848_v57  ;;  %v879_v44 = vmul.f32 %v875_v59, %v848_v57  ;;  %v882_v16 = vmul.f32 %v871_v32, %v856_v1  ;;  %v883_v45 = vmul.f32 %v875_v59, %v856_v1  ;;  %v1472_v57 = vld [vmem:[%s2868_s11] sm:$0xff]  ;;  %v1474_v1 = vld [vmem:[%s2868_s11 + $0x10] sm:$0xff] }
  0xc8   : > { %v838_v24 = vadd.f32 %v830_v61, %v778_v48  ;;  %v839_v63 = vadd.f32 %v831_v18, %v779_v20  ;;  %v934_v35 = vadd.f32 %v926_v33, %v884_v54  ;;  %v935_v0 = vadd.f32 %v927_v53, %v885_v52  ;;  %1478 = vperm.xlu1 %2015, %v1472_v57  }
  0xc9   : > { %v886_v22 = vadd.f32 %v878_v2, %v2404_v6  ;;  %v887_v29 = vadd.f32 %v879_v44, %v2406_v8  ;;  %v890_v40 = vadd.f32 %v882_v16, %v840_v46  ;;  %v891_v38 = vadd.f32 %v883_v45, %v841_v47  ;;  %v1473_v2 = vld [vmem:[%s2868_s11 + $0x8] sm:$0xff]  ;;  %1488 = vperm.xlu0 %2016, %v1474_v1   ;;  %v1475_v45 = vld [vmem:[%s2868_s11 + $0x18] sm:$0xf] }
  0xca   : > { %v852_v39 = vpop.permute.xlu0 %851  ;;  %v1662_v44 = vld [vmem:[%s2869_s12 + $0x8] sm:$0xff] }
  0xcb   : > { %v2487_v51 = vadd.f32 %v928_v60, %v886_v22  ;;  %v2489_v9 = vadd.f32 %v929_v3, %v887_v29  ;;  %v944_v10 = vpop.permute.xlu1 %943  ;;  %v880_v14 = vmul.f32 %v871_v32, %v852_v39  ;;  %v881_v15 = vmul.f32 %v875_v59, %v852_v39  ;;  %v1663_v22 = vld [vmem:[%s2869_s12 + $0x10] sm:$0xff]  ;;  %v1713_v29 = vld [vmem:[#allocation2] sm:$0x1] }
  0xcc   : > { %v976_v11 = vmul.f32 %v2453_v49, %v944_v10  ;;  %v977_v13 = vmul.f32 %v2456_v50, %v944_v10  ;;  %v2873_v3 = vmov 0.0   ;;  %1483 = vperm.xlu1 %2015, %v1473_v2  }
  0xcd   : > { %v888_v8 = vadd.f32 %v880_v14, %v838_v24  ;;  %v889_v21 = vadd.f32 %v881_v15, %v839_v63  ;;  %1580 = vmatprep.mubr.f32.mxu0 %v2873_v3  ;;  %1592 = vmatprep.mubr.f32.mxu1 %v2873_v3  ;;  %v1664_v24 = vld [vmem:[%s2869_s12 + $0x18] sm:$0xf] }
  0xce   : > { %v2493_v17 = vadd.f32 %v976_v11, %v934_v35  ;;  %v2495_v58 = vadd.f32 %v977_v13, %v935_v0  ;;  %1672 = vperm.xlu0 %2016, %v1662_v44   ;;  %v1661_v35 = vld [vmem:[%s2869_s12] sm:$0xff]  ;;  %v2557_v10 = vpop.permute.xlu0 %1267 }
  0xcf   : > { %v996_v11 = vld [vmem:[%s618_s20] sm:$0xff] }
  0xd0   : > { %v902_v6 = vpop.permute.xlu1 %901  ;;  %1493 = vperm.xlu1 %2015, %v1475_v45   ;;  %v1021_v14 = vrot.slane %v996_v11, %v2326_v27  ;;  %v1025_v15 = vrot.slane %v996_v11, %v2377_v55 }
  0xd1   : > { %v930_v41 = vmul.f32 %v921_v56, %v902_v6  ;;  %v931_v19 = vmul.f32 %v925_v4, %v902_v6  ;;  %v1206_v6 = vld [vmem:[%s628_s24] sm:$0xff] }
  0xd2   : > { %1682 = vperm.xlu0 %2016, %v1664_v24   ;;  %v1031_v57 = vrot.slane %v1021_v14, %v2326_v27  ;;  %v2581_v1 = vrot.slane %v1025_v15, %v2326_v27  ;;  %v1331_v2 = vrot.slane %v1206_v6, %v2329_v28 }
  0xd3   : > { %v938_v43 = vadd.f32 %v930_v41, %v888_v8  ;;  %v939_v61 = vadd.f32 %v931_v19, %v889_v21  ;;  %v1171_v8 = vrot.slane %v996_v11, %v2336_v31  ;;  %v1175_v21 = vrot.slane %v996_v11, %v2422_v34 }
  0xd4   : > { %v906_v18 = vpop.permute.xlu1 %905  ;;  %1667 = vperm.xlu1 %2015, %v1661_v35   ;;  %v1071_v41 = vrot.slane %v996_v11, %v2333_v30  ;;  %v1075_v19 = vrot.slane %v996_v11, %v2427_v37 }
  0xd5   : > { %v932_v46 = vmul.f32 %v921_v56, %v906_v18  ;;  %v933_v47 = vmul.f32 %v925_v4, %v906_v18  ;;  %v1276_v18 = vpop.permute.xlu0 %1275  ;;  %v2586_v44 = vrot.slane %v1171_v8, %v2336_v31  ;;  %v2589_v45 = vrot.slane %v1175_v21, %v2336_v31 }
  0xd6   : > { %v2592_v24 = vrot.slane %v1071_v41, %v2333_v30  ;;  %v1036_v41 = vmul.f32 %v1031_v57, %v2390_v62 }
  0xd7   : > { %v2497_v48 = vadd.f32 %v932_v46, %v890_v40  ;;  %v2499_v20 = vadd.f32 %v933_v47, %v891_v38  ;;  %v1121_v47 = vrot.slane %v996_v11, %v2329_v28 }
  0xd8   : > { %1677 = vperm.xlu1 %2015, %v1663_v22  }
  0xd9   : > { %v2501_v32 = vpop.permute.xlu1 %1004 }
  0xdc   : > { %1716 = vperm.xlu1 %2015, %v1713_v29   ;;  %v1385_v29 = vrot.slane %v1206_v6, %v2422_v34  ;;  %v1108_v34 = vpop.permute.xlu0 %1107 }
  0xde   : > { %v952_v59 = vpop.permute.xlu1 %951 }
  0xdf   : > { %v980_v54 = vmul.f32 %v2453_v49, %v952_v59  ;;  %v981_v52 = vmul.f32 %v2456_v50, %v952_v59  ;;  %v1125_v59 = vrot.slane %v996_v11, %v2431_v23  ;;  %v2606_v11 = vrot.slane %v1121_v47, %v2329_v28 }
  0xe0   : > { %v1040_v47 = vmul.f32 %v1031_v57, %v2402_v5 }
  0xe1   : > { %v2505_v33 = vadd.f32 %v980_v54, %v938_v43  ;;  %v2507_v53 = vadd.f32 %v981_v52, %v939_v61  ;;  %v1281_v43 = vrot.slane %v1206_v6, %v2333_v30  ;;  %v1285_v61 = vrot.slane %v1206_v6, %v2427_v37 }
  0xe2   : > { %v1231_v54 = vrot.slane %v1206_v6, %v2326_v27  ;;  %v1235_v52 = vrot.slane %v1206_v6, %v2377_v55  ;;  %v1335_v37 = vrot.slane %v1206_v6, %v2431_v23  ;;  %v2595_v55 = vrot.slane %v1075_v19, %v2333_v30 }
  0xe3   : > { %v2509_v60 = vpop.permute.xlu1 %1053  ;;  %v2598_v35 = vrot.slane %v1281_v43, %v2333_v30  ;;  %v2601_v22 = vrot.slane %v1285_v61, %v2333_v30  ;;  %v1381_v23 = vrot.slane %v1206_v6, %v2336_v31  ;;  %v2609_v14 = vrot.slane %v1125_v59, %v2329_v28 }
  0xe4   : > { %v2612_v15 = vrot.slane %v1231_v54, %v2326_v27  ;;  %v2615_v8 = vrot.slane %v1235_v52, %v2326_v27  ;;  %v978_v19 = vmul.f32 %v2453_v49, %v2412_v12  ;;  %v2623_v6 = vrot.slane %v1331_v2, %v2329_v28 }
  0xe5   : > { %v2626_v43 = vrot.slane %v1335_v37, %v2329_v28  ;;  %v1037_v61 = vmul.f32 %v2581_v1, %v2390_v62  ;;  %v1041_v59 = vmul.f32 %v2581_v1, %v2402_v5  ;;  %v979_v54 = vmul.f32 %v2456_v50, %v2412_v12 }
  0xe6   : > { %v982_v52 = vmul.f32 %v2453_v49, %v2418_v7  ;;  %v1038_v2 = vmul.f32 %v1031_v57, %v2501_v32  ;;  %v2639_v25 = vrot.slane %v1381_v23, %v2336_v31  ;;  %v2642_v28 = vrot.slane %v1385_v29, %v2336_v31 }
  0xe7   : > { %v2513_v56 = vpop.permute.xlu1 %1057  ;;  %v983_v62 = vmul.f32 %v2456_v50, %v2418_v7  ;;  %v1186_v5 = vmul.f32 %v2586_v44, %v2424_v36  ;;  %v1187_v12 = vmul.f32 %v2589_v45, %v2424_v36  ;;  %v1039_v49 = vmul.f32 %v2581_v1, %v2501_v32  ;;  %v1116_v50 = vpop.permute.xlu0 %1115 }
  0xe8   : > { %v2654_v37 = vmul.f32 %v2586_v44, %v2438_v42  ;;  %v2658_v31 = vmul.f32 %v2589_v45, %v2438_v42  ;;  %v986_v23 = vadd.f32 %v978_v19, %v2487_v51  ;;  %v1088_v7 = vmul.f32 %v2592_v24, %v2513_v56 }
  0xe9   : > { %v987_v36 = vadd.f32 %v979_v54, %v2489_v9  ;;  %v2668_v32 = vmul.f32 %v2598_v35, %v2557_v10  ;;  %v1086_v3 = vmul.f32 %v2592_v24, %v2509_v60  ;;  %v1089_v42 = vmul.f32 %v2595_v55, %v2513_v56 }
  0xea   : > { %2882 = vst [vmem:[#allocation6_spill] sm:$0xff] %v2658_v31  ;;  %v1046_v26 = vadd.f32 %v1038_v2, %v986_v23  ;;  %v2676_v51 = vmul.f32 %v2601_v22, %v2557_v10  ;;  %v1044_v19 = vadd.f32 %v1036_v41, %v2493_v17  ;;  %v1087_v9 = vmul.f32 %v2595_v55, %v2509_v60 }
  0xeb   : > { %v1047_v54 = vadd.f32 %v1039_v49, %v987_v36  ;;  %v1045_v30 = vadd.f32 %v1037_v61, %v2495_v58  ;;  %v2683_v27 = vmul.f32 %v2598_v35, %v1276_v18  ;;  %v2688_v56 = vmul.f32 %v2601_v22, %v1276_v18  ;;  %v1314_v41 = vpop.permute.xlu0 %1313 }
  0xec   : > { %v2515_v4 = vpop.permute.xlu1 %1014  ;;  %v1096_v2 = vadd.f32 %v1088_v7, %v1046_v26  ;;  %v1138_v10 = vmul.f32 %v2606_v11, %v1108_v34  ;;  %v1094_v49 = vadd.f32 %v1086_v3, %v1044_v19  ;;  %v1139_v61 = vmul.f32 %v2609_v14, %v1108_v34 }
  0xed   : > { %2883 = vst [vmem:[#allocation7_spill] sm:$0xff] %v2683_v27  ;;  %2884 = vst [vmem:[#allocation8_spill] sm:$0xff] %v2688_v56  ;;  %v1097_v58 = vadd.f32 %v1089_v42, %v1047_v54  ;;  %v1042_v23 = vmul.f32 %v1031_v57, %v2515_v4  ;;  %v1095_v36 = vadd.f32 %v1087_v9, %v1045_v30 }
  0xee   : > { %v990_v27 = vadd.f32 %v982_v52, %v2497_v48  ;;  %v991_v18 = vadd.f32 %v983_v62, %v2499_v20  ;;  %v1043_v26 = vmul.f32 %v2581_v1, %v2515_v4  ;;  %v1143_v56 = vmul.f32 %v2609_v14, %v1116_v50 }
  0xef   : > { %v1346_v3 = vmul.f32 %v2623_v6, %v1314_v41  ;;  %v1146_v42 = vadd.f32 %v1138_v10, %v1096_v2  ;;  %v1048_v34 = vadd.f32 %v1040_v47, %v2505_v33  ;;  %v1049_v30 = vadd.f32 %v1041_v59, %v2507_v53 }
  0xf0   : > { %v1147_v57 = vadd.f32 %v1139_v61, %v1097_v58  ;;  %v1050_v48 = vadd.f32 %v1042_v23, %v990_v27  ;;  %v1051_v52 = vadd.f32 %v1043_v26, %v991_v18 }
  0xf1   : > { %v2529_v16 = vpop.permute.xlu1 %1103 }
  0xf2   : > { %v1136_v31 = vmul.f32 %v2606_v11, %v2529_v16  ;;  %v1137_v17 = vmul.f32 %v2609_v14, %v2529_v16  ;;  %v1142_v16 = vmul.f32 %v2606_v11, %v1116_v50 }
  0xf4   : > { %v1144_v7 = vadd.f32 %v1136_v31, %v1094_v49  ;;  %v1145_v19 = vadd.f32 %v1137_v17, %v1095_v36 }
  0xf6   : > { %v2537_v63 = vpop.permute.xlu1 %1061  ;;  %v1194_v47 = vadd.f32 %v1186_v5, %v1144_v7 }
  0xf7   : > { %v1090_v20 = vmul.f32 %v2592_v24, %v2537_v63  ;;  %v1091_v59 = vmul.f32 %v2595_v55, %v2537_v63 }
  0xf9   : > { %v1098_v9 = vadd.f32 %v1090_v20, %v1048_v34  ;;  %v1099_v61 = vadd.f32 %v1091_v59, %v1049_v30 }
  0xfa   : > { %v2542_v0 = vpop.permute.xlu1 %1065 }
  0xfb   : > { %v1092_v4 = vmul.f32 %v2592_v24, %v2542_v0  ;;  %v1093_v62 = vmul.f32 %v2595_v55, %v2542_v0  ;;  %v1195_v0 = vadd.f32 %v1187_v12, %v1145_v19 }
  0xfd   : > { %v1100_v54 = vadd.f32 %v1092_v4, %v1050_v48  ;;  %v1101_v5 = vadd.f32 %v1093_v62, %v1051_v52 }
  0xff   : > { %v2547_v40 = vpop.permute.xlu1 %1157 }
 0x100   : > { %v1188_v27 = vmul.f32 %v2586_v44, %v2547_v40  ;;  %v1189_v53 = vmul.f32 %v2589_v45, %v2547_v40 }
 0x102   : > { %v1196_v17 = vadd.f32 %v1188_v27, %v1146_v42  ;;  %v1197_v49 = vadd.f32 %v1189_v53, %v1147_v57  ;;  %v1151_v42 = vadd.f32 %v1143_v56, %v1101_v5 }
 0x104   : > { %v2549_v38 = vpop.permute.xlu1 %1111 }
 0x105   : > { %v1140_v24 = vmul.f32 %v2606_v11, %v2549_v38  ;;  %v1322_v11 = vpop.permute.xlu0 %1321  ;;  %v1141_v63 = vmul.f32 %v2609_v14, %v2549_v38  ;;  %v1150_v14 = vadd.f32 %v1142_v16, %v1100_v54 }
 0x106   : > { %v2736_v18 = vmul.f32 %v2623_v6, %v1322_v11  ;;  %v2741_v38 = vmul.f32 %v2626_v43, %v1322_v11 }
 0x107   : > { %v1148_v58 = vadd.f32 %v1140_v24, %v1098_v9  ;;  %v1149_v19 = vadd.f32 %v1141_v63, %v1099_v61 }
 0x109   : > { %v2551_v39 = vpop.permute.xlu1 %1209  ;;  %v1198_v34 = vadd.f32 %v2654_v37, %v1148_v58 }
 0x10a   : > { %v1246_v31 = vmul.f32 %v2612_v15, %v2551_v39  ;;  %v1247_v33 = vmul.f32 %v2615_v8, %v2551_v39 }
 0x10c   : > { %v1254_v55 = vadd.f32 %v1246_v31, %v1194_v47  ;;  %v1255_v12 = vadd.f32 %v1247_v33, %v1195_v0  ;;  %v2885_v0 = vld [vmem:[#allocation6_spill] sm:$0xff] }
 0x10d   : > { %v2563_v13 = vpop.permute.xlu1 %1214 }
 0x10e   : > { %v1248_v2 = vmul.f32 %v2612_v15, %v2563_v13  ;;  %v1249_v40 = vmul.f32 %v2615_v8, %v2563_v13 }
 0x110   : > { %v1256_v13 = vadd.f32 %v1248_v2, %v1196_v17  ;;  %v1257_v26 = vadd.f32 %v1249_v40, %v1197_v49  ;;  %v2886_v49 = vld [vmem:[#allocation7_spill] sm:$0xff] }
 0x112   : > { %v2573_v46 = vpop.permute.xlu1 %1165  ;;  %v1307_v37 = vadd.f32 %v2676_v51, %v1257_v26 }
 0x113   : > { %v1192_v7 = vmul.f32 %v2586_v44, %v2573_v46 }
 0x115   : > { %v1200_v16 = vadd.f32 %v1192_v7, %v1150_v14 }
 0x117   : > { %v2617_v21 = vpop.permute.xlu1 %1263 }
 0x118   : > { %v1296_v50 = vmul.f32 %v2598_v35, %v2617_v21  ;;  %v1297_v39 = vmul.f32 %v2601_v22, %v2617_v21  ;;  %v1347_v21 = vmul.f32 %v2626_v43, %v1314_v41  ;;  %v1193_v41 = vmul.f32 %v2589_v45, %v2573_v46 }
 0x119   : > { %v1306_v45 = vadd.f32 %v2668_v32, %v1256_v13 }
 0x11a   : > { %v1304_v23 = vadd.f32 %v1296_v50, %v1254_v55  ;;  %v1305_v36 = vadd.f32 %v1297_v39, %v1255_v12  ;;  %v1201_v62 = vadd.f32 %v1193_v41, %v1151_v42  ;;  %v1199_v50 = vadd.f32 %v2885_v0, %v1149_v19 }
 0x11c   : > { %v2663_v29 = vpop.permute.xlu1 %1219  ;;  %v1354_v44 = vadd.f32 %v1346_v3, %v1304_v23  ;;  %v1355_v4 = vadd.f32 %v1347_v21, %v1305_v36 }
 0x11d   : > { %v1250_v31 = vmul.f32 %v2612_v15, %v2663_v29  ;;  %v1251_v33 = vmul.f32 %v2615_v8, %v2663_v29 }
 0x11f   : > { %v1258_v11 = vadd.f32 %v1250_v31, %v1198_v34  ;;  %v1259_v5 = vadd.f32 %v1251_v33, %v1199_v50 }
 0x120   : > { %v2693_v60 = vpop.permute.xlu1 %1224 }
 0x121   : > { %v1252_v30 = vmul.f32 %v2612_v15, %v2693_v60  ;;  %v1253_v46 = vmul.f32 %v2615_v8, %v2693_v60  ;;  %v1376_v15 = vpop.permute.xlu0 %1375 }
 0x122   : > { %v1402_v63 = vmul.f32 %v2639_v25, %v1376_v15  ;;  %v1403_v55 = vmul.f32 %v2642_v28, %v1376_v15 }
 0x123   : > { %v1260_v27 = vadd.f32 %v1252_v30, %v1200_v16  ;;  %v1261_v39 = vadd.f32 %v1253_v46, %v1201_v62 }
 0x125   : > { %v1318_v1 = vpop.permute.xlu1 %1317 }
 0x126   : > { %v1348_v57 = vmul.f32 %v2623_v6, %v1318_v1  ;;  %v1349_v48 = vmul.f32 %v2626_v43, %v1318_v1 }
 0x128   : > { %v1356_v53 = vadd.f32 %v1348_v57, %v1306_v45  ;;  %v1357_v24 = vadd.f32 %v1349_v48, %v1307_v37 }
 0x12a   : > { %v1272_v10 = vpop.permute.xlu1 %1271 }
 0x12b   : > { %v1300_v9 = vmul.f32 %v2598_v35, %v1272_v10  ;;  %v1301_v8 = vmul.f32 %v2601_v22, %v1272_v10  ;;  %v1310_v22 = vadd.f32 %v2886_v49, %v1260_v27  ;;  %v2887_v10 = vld [vmem:[#allocation8_spill] sm:$0xff] }
 0x12c   : > { %v1311_v58 = vadd.f32 %v2887_v10, %v1261_v39  ;;  %v1470_v10 = vld [vmem:[%s2867_s10 + $0x10] sm:$0xff] }
 0x12d   : > { %v1308_v23 = vadd.f32 %v1300_v9, %v1258_v11  ;;  %v1309_v36 = vadd.f32 %v1301_v8, %v1259_v5 }
 0x12f   : > { %v1364_v20 = vpop.permute.xlu1 %1363  ;;  %v1358_v34 = vadd.f32 %v2736_v18, %v1308_v23  ;;  %v1359_v30 = vadd.f32 %v2741_v38, %v1309_v36 }
 0x130   : > { %v1396_v52 = vmul.f32 %v2639_v25, %v1364_v20  ;;  %v1397_v56 = vmul.f32 %v2642_v28, %v1364_v20 }
 0x132   : > { %v2758_v1 = vadd.f32 %v1396_v52, %v1354_v44  ;;  %v2760_v3 = vadd.f32 %v1397_v56, %v1355_v4 }
 0x133   : > { %v1368_v47 = vpop.permute.xlu1 %1367 }
 0x134   : > { %v1412_v60 = vsub.f32 0.0, %v2758_v1  ;;  %v1413_v32 = vsub.f32 0.0, %v2760_v3  ;;  %v1398_v51 = vmul.f32 %v2639_v25, %v1368_v47  ;;  %v1399_v59 = vmul.f32 %v2642_v28, %v1368_v47 }
 0x136   : > { %v1420_v29 = vmul.f32 1.442695, %v1412_v60  ;;  %v1422_v54 = vmul.f32 1.442695, %v1413_v32  ;;  %v2771_v2 = vadd.f32 %v1398_v51, %v1356_v53  ;;  %v2773_v40 = vadd.f32 %v1399_v59, %v1357_v24 }
 0x138   : > { %2017 = vpow2.f32 %v1420_v29  ;;  %v1414_v12 = vsub.f32 0.0, %v2771_v2  ;;  %v1415_v17 = vsub.f32 0.0, %v2773_v40  ;;  %v1326_v35 = vpop.permute.xlu1 %1325 }
 0x139   : > { %2019 = vpow2.f32 %v1422_v54  ;;  %v1352_v21 = vmul.f32 %v2623_v6, %v1326_v35  ;;  %v1353_v61 = vmul.f32 %v2626_v43, %v1326_v35 }
 0x13a   : > { %v1424_v13 = vmul.f32 1.442695, %v1414_v12  ;;  %v1426_v26 = vmul.f32 1.442695, %v1415_v17 }
 0x13b   : > { %v1360_v7 = vadd.f32 %v1352_v21, %v1310_v22  ;;  %v1361_v14 = vadd.f32 %v1353_v61, %v1311_v58  ;;  %v1468_v22 = vld [vmem:[%s2867_s10] sm:$0xff]  ;;  %v2888_v58 = vmov 0.0   ;;  %v1469_v21 = vld [vmem:[%s2867_s10 + $0x8] sm:$0xff]  ;;  %v1471_v61 = vld [vmem:[%s2867_s10 + $0x18] sm:$0xf] }
 0x13c   : > { %2021 = vpow2.f32 %v1424_v13 }
 0x13d   : > { %2023 = vpow2.f32 %v1426_v26  ;;  %v2783_v42 = vadd.f32 %v1402_v63, %v1360_v7  ;;  %v2785_v19 = vadd.f32 %v1403_v55, %v1361_v14  ;;  %v1372_v41 = vpop.permute.xlu1 %1371 }
 0x13e   : > { %v1400_v6 = vmul.f32 %v2639_v25, %v1372_v41  ;;  %v1401_v43 = vmul.f32 %v2642_v28, %v1372_v41 }
 0x13f   : > { %v1418_v57 = vsub.f32 0.0, %v2783_v42  ;;  %v1419_v48 = vsub.f32 0.0, %v2785_v19 }
 0x140   : > { %v1408_v20 = vadd.f32 %v1400_v6, %v1358_v34  ;;  %v1409_v44 = vadd.f32 %v1401_v43, %v1359_v30 }
 0x141   : > { %v1432_v4 = vmul.f32 1.442695, %v1418_v57  ;;  %v1434_v52 = vmul.f32 1.442695, %v1419_v48 }
 0x142   : > { %v2018_v56 = vpop.eup %2017  ;;  %v1416_v16 = vsub.f32 0.0, %v1408_v20  ;;  %v1417_v46 = vsub.f32 0.0, %v1409_v44 }
 0x143   : > { %v2020_v45 = vpop.eup %2019  ;;  %v1436_v37 = vadd.f32 1.0, %v2018_v56  ;;  %2025 = vpow2.f32 %v1432_v4 }
 0x144   : > { %v1437_v18 = vadd.f32 1.0, %v2020_v45  ;;  %2027 = vpow2.f32 %v1434_v52  ;;  %v1428_v38 = vmul.f32 1.442695, %v1416_v16  ;;  %v1430_v25 = vmul.f32 1.442695, %v1417_v46 }
 0x145   : > { %2029 = vrcp.f32 %v1436_v37 }
 0x146   : > { %v2022_v28 = vpop.eup %2021  ;;  %2031 = vrcp.f32 %v1437_v18 }
 0x147   : > { %v2024_v62 = vpop.eup %2023  ;;  %v1438_v31 = vadd.f32 1.0, %v2022_v28  ;;  %2033 = vpow2.f32 %v1428_v38  ;;  %v1479_v23 = vpop.permute.xlu1 %1478 }
 0x148   : > { %v1439_v33 = vadd.f32 1.0, %v2024_v62  ;;  %2035 = vpow2.f32 %v1430_v25  ;;  %v1489_v13 = vpop.permute.xlu0 %1488 }
 0x149   : > { %2037 = vrcp.f32 %v1438_v31 }
 0x14a   : > { %2039 = vrcp.f32 %v1439_v33 }
 0x14b   : > { %v1484_v36 = vpop.permute.xlu1 %1483 }
 0x14d   : > { %v2026_v27 = vpop.eup %2025 }
 0x14e   : > { %v2028_v53 = vpop.eup %2027  ;;  %v1442_v24 = vadd.f32 1.0, %v2026_v27 }
 0x14f   : > { %v2030_v47 = vpop.eup %2029  ;;  %v1443_v60 = vadd.f32 1.0, %v2028_v53  ;;  %v1494_v6 = vpop.permute.xlu1 %1493 }
 0x150   : > { %v2032_v32 = vpop.eup %2031  ;;  %2041 = vrcp.f32 %v1442_v24  ;;  %v1460_v9 = vmul.f32 %v2030_v47, %v2758_v1 }
 0x151   : > { %v2034_v51 = vpop.eup %2033  ;;  %2043 = vrcp.f32 %v1443_v60  ;;  %v1461_v29 = vmul.f32 %v2032_v32, %v2760_v3 }
 0x152   : > { %v2036_v59 = vpop.eup %2035  ;;  %v1440_v15 = vadd.f32 1.0, %v2034_v51 }
 0x153   : > { %v2038_v0 = vpop.eup %2037  ;;  %v1441_v50 = vadd.f32 1.0, %v2036_v59 }
 0x154   : > { %v2040_v39 = vpop.eup %2039  ;;  %2045 = vrcp.f32 %v1440_v15  ;;  %v1462_v8 = vmul.f32 %v2038_v0, %v2771_v2 }
 0x155   : > { %2047 = vrcp.f32 %v1441_v50  ;;  %v1463_v54 = vmul.f32 %v2040_v39, %v2773_v40 }
 0x156   : > { %v1941_v11 = vpack.c.bf16 %v1462_v8, %v1460_v9 }
 0x157   : > { %v1939_v5 = vpack.c.bf16 %v1463_v54, %v1461_v29 }
 0x159   : > { %1940 = vmatprep.subr.bf16.mxu0 %v1939_v5  ;;  %1949 = vmatprep.subr.bf16.mxu1 %v1939_v5 }
 0x15a   : > { %1942 = vmatpush1.bf16.msra.mxu0 %v1941_v11  ;;  %1951 = vmatpush1.bf16.msra.mxu1 %v1941_v11  ;;  %v2042_v63 = vpop.eup %2041 }
 0x15b   : > { %v2044_v55 = vpop.eup %2043  ;;  %v1466_v1 = vmul.f32 %v2042_v63, %v2783_v42 }
 0x15c   : > { %v1467_v2 = vmul.f32 %v2044_v55, %v2785_v19 }
 0x15e   : > { %v2046_v12 = vpop.eup %2045 }
 0x15f   : > { %v2048_v17 = vpop.eup %2047  ;;  %v1464_v35 = vmul.f32 %v2046_v12, %v1408_v20 }
 0x160   : > { %v1465_v49 = vmul.f32 %v2048_v17, %v1409_v44 }
 0x161   : > { %v1946_v3 = vpack.c.bf16 %v1466_v1, %v1464_v35  ;;  %v1673_v35 = vpop.permute.xlu0 %1672 }
 0x162   : > { %v1943_v40 = vpack.c.bf16 %v1467_v2, %v1465_v49  ;;  %v1668_v49 = vpop.permute.xlu1 %1667 }
 0x164   : > { %1945 = vmatprep.subr.msk.bf16.mxu0 %vm1944_vm2, %v1943_v40  ;;  %1950 = vmatprep.subr.msk.bf16.mxu1 %vm1944_vm2, %v1943_v40 }
 0x165   : > { %1948 = vmatpush1.bf16.msk.msra.mxu0 %vm1944_vm2, %v1946_v3  ;;  %1952 = vmatpush1.bf16.msk.msra.mxu1 %vm1944_vm2, %v1946_v3 }
 0x168   : > { %1929 = vmatmul.mubr.msk.f32.vlgmr.msra.gmra.mrb[0].mxu0 %vm1496_vm3, %v1468_v22  ;;  %1931 = vmatmul.mubr.msk.f32.vlgmr.msra.gmra.mrb[0].mxu1 %vm1496_vm3, %v1470_v10 }
 0x169   : > { %1586 = vmatprep.mubr.f32.mxu0 %v2888_v58  ;;  %1598 = vmatprep.mubr.f32.mxu1 %v2888_v58 }
 0x16c   : > { %1930 = vmatmul.mubr.msk.f32.gmra.mrb[2].mxu0 %vm1496_vm3, %v1469_v21  ;;  %1932 = vmatmul.mubr.msk.f32.gmra.mrb[2].mxu1 %vm1496_vm3, %v1471_v61 }
 0x23b   : > { %v1582_v26 = vpop.f32.mrb[0].mxu0  ;;  %v1594_v7 = vpop.f32.mrb[0].mxu1 }
 0x23c   : > { %v2814_v14 = vadd.f32 %v1582_v26, %v1479_v23  ;;  %v2816_v42 = vadd.f32 %v1594_v7, %v1489_v13  ;;  %v1584_v19 = vpop.f32.mrb[1].mxu0  ;;  %v1596_v41 = vpop.f32.mrb[1].mxu1 }
 0x23d   : > { %v2818_v34 = vadd.f32 %v1584_v19, %v1479_v23  ;;  %v2820_v30 = vadd.f32 %v1596_v41, %v1489_v13 }
 0x23e   : > { %v1605_v43 = vsub.f32 0.0, %v2814_v14  ;;  %v1609_v57 = vsub.f32 0.0, %v2816_v42 }
 0x23f   : > { %v1606_v48 = vsub.f32 0.0, %v2818_v34  ;;  %v1610_v20 = vsub.f32 0.0, %v2820_v30  ;;  %v1588_v44 = vpop.f32.mrb[2].mxu0  ;;  %v1600_v4 = vpop.f32.mrb[2].mxu1 }
 0x240   : > { %v1613_v52 = vmul.f32 1.442695, %v1605_v43  ;;  %v1621_v56 = vmul.f32 1.442695, %v1609_v57  ;;  %v1589_v16 = vadd.f32 %v1588_v44, %v1484_v36  ;;  %v1601_v46 = vadd.f32 %v1600_v4, %v1494_v6  ;;  %v1590_v45 = vpop.f32.mrb[3].mxu0  ;;  %v1602_v37 = vpop.f32.mrb[3].mxu1 }
 0x241   : > { %v1615_v18 = vmul.f32 1.442695, %v1606_v48  ;;  %v1623_v38 = vmul.f32 1.442695, %v1610_v20  ;;  %v1591_v25 = vadd.f32 %v1590_v45, %v1484_v36  ;;  %v1603_v28 = vadd.f32 %v1602_v37, %v1494_v6  ;;  %v1683_v6 = vpop.permute.xlu0 %1682  ;;  %v1678_v43 = vpop.permute.xlu1 %1677 }
 0x242   : > { %2049 = vpow2.f32 %v1613_v52  ;;  %v1607_v62 = vsub.f32 0.0, %v1589_v16  ;;  %v1611_v31 = vsub.f32 0.0, %v1601_v46 }
 0x243   : > { %2051 = vpow2.f32 %v1621_v56  ;;  %v1608_v33 = vsub.f32 0.0, %v1591_v25  ;;  %v1612_v27 = vsub.f32 0.0, %v1603_v28 }
 0x244   : > { %2053 = vpow2.f32 %v1615_v18  ;;  %v1617_v53 = vmul.f32 1.442695, %v1607_v62  ;;  %v1625_v24 = vmul.f32 1.442695, %v1611_v31 }
 0x245   : > { %2055 = vpow2.f32 %v1623_v38  ;;  %v1619_v47 = vmul.f32 1.442695, %v1608_v33  ;;  %v1627_v60 = vmul.f32 1.442695, %v1612_v27  ;;  %v1717_v27 = vpop.permute.xlu1 %1716 }
 0x246   : > { %2057 = vpow2.f32 %v1617_v53  ;;  %v1725_v53 = vld [vmem:[%s637_s22] sm:$0x3] }
 0x247   : > { %2059 = vpow2.f32 %v1625_v24  ;;  %v2111_v24 = vmov 1966171168  }
 0x248   : > { %2061 = vpow2.f32 %v1619_v47  ;;  %v1743_v47 = vunpack.c.l.s4 %v2111_v24 }
 0x249   : > { %2063 = vpow2.f32 %v1627_v60 }
 0x24c   : > { %v2050_v32 = vpop.eup %2049 }
 0x24d   : > { %v2052_v51 = vpop.eup %2051  ;;  %v1629_v59 = vadd.f32 1.0, %v2050_v32 }
 0x24e   : > { %v2054_v15 = vpop.eup %2053  ;;  %v1633_v0 = vadd.f32 1.0, %v2052_v51  ;;  %v2889_v51 = vld [vmem:[#allocation4_spill] sm:$0xff] }
 0x24f   : > { %v2056_v50 = vpop.eup %2055  ;;  %2065 = vrcp.f32 %v1629_v59  ;;  %v1630_v39 = vadd.f32 1.0, %v2054_v15  ;;  %v1722_v59 = vrot.slane %v1717_v27, %v2889_v51 }
 0x250   : > { %v2058_v9 = vpop.eup %2057  ;;  %2067 = vrcp.f32 %v1633_v0  ;;  %v1634_v8 = vadd.f32 1.0, %v2056_v50  ;;  %v1730_v50 = vrot.slane %v1725_v53, %v2889_v51 }
 0x251   : > { %v2060_v29 = vpop.eup %2059  ;;  %2069 = vrcp.f32 %v1630_v39  ;;  %v1631_v54 = vadd.f32 1.0, %v2058_v9  ;;  %v1744_v39 = vunpack.c.0.s8 %v1743_v47 }
 0x252   : > { %v2062_v11 = vpop.eup %2061  ;;  %2071 = vrcp.f32 %v1634_v8  ;;  %v1635_v5 = vadd.f32 1.0, %v2060_v29  ;;  %v2890_v29 = vld [vmem:[#allocation5_spill] sm:$0xff] }
 0x253   : > { %v2064_v63 = vpop.eup %2063  ;;  %2073 = vrcp.f32 %v1631_v54  ;;  %v1632_v55 = vadd.f32 1.0, %v2062_v11  ;;  %v1734_v54 = vrot.slane %v1725_v53, %v2890_v29 }
 0x254   : > { %2075 = vrcp.f32 %v1635_v5  ;;  %v1636_v12 = vadd.f32 1.0, %v2064_v63  ;;  %v2891_v63 = vld [vmem:[#allocation3_spill] sm:$0xff] }
 0x255   : > { %2077 = vrcp.f32 %v1632_v55  ;;  %v1747_v55 = vsub.s32 %v1744_v39, %v2891_v63 }
 0x256   : > { %2079 = vrcp.f32 %v1636_v12 }
 0x259   : > { %v2066_v17 = vpop.eup %2065 }
 0x25a   : > { %v2068_v1 = vpop.eup %2067  ;;  %v1653_v40 = vmul.f32 %v2066_v17, %v2814_v14 }
 0x25b   : > { %v2070_v2 = vpop.eup %2069  ;;  %v1657_v58 = vmul.f32 %v2068_v1, %v2816_v42 }
 0x25c   : > { %v2072_v3 = vpop.eup %2071  ;;  %v1654_v21 = vmul.f32 %v2070_v2, %v2818_v34  ;;  %v1685_v26 = vmul.f32 %v1668_v49, %v1653_v40 }
 0x25d   : > { %v2074_v22 = vpop.eup %2073  ;;  %v1658_v7 = vmul.f32 %v2072_v3, %v2820_v30  ;;  %v1689_v48 = vmul.f32 %v1678_v43, %v1657_v58 }
 0x25e   : > { %v2076_v10 = vpop.eup %2075  ;;  %v1655_v61 = vmul.f32 %v2074_v22, %v1589_v16  ;;  %v1686_v20 = vmul.f32 %v1668_v49, %v1654_v21 }
 0x25f   : > { %v2078_v23 = vpop.eup %2077  ;;  %v1659_v36 = vmul.f32 %v2076_v10, %v1601_v46  ;;  %v1690_v4 = vmul.f32 %v1678_v43, %v1658_v7 }
 0x260   : > { %v2080_v13 = vpop.eup %2079  ;;  %v1687_v19 = vmul.f32 %v1673_v35, %v1655_v61  ;;  %v1656_v41 = vmul.f32 %v2078_v23, %v1591_v25 }
 0x261   : > { %v1660_v57 = vmul.f32 %v2080_v13, %v1603_v28  ;;  %v1691_v14 = vmul.f32 %v1683_v6, %v1659_v36 }
 0x262   : > { %v1693_v42 = vadd.f32 %v1687_v19, %v1685_v26  ;;  %v1688_v44 = vmul.f32 %v1673_v35, %v1656_v41  ;;  %v2892_v35 = vlaneseq }
 0x263   : > { %v1692_v34 = vmul.f32 %v1683_v6, %v1660_v57  ;;  %v1695_v16 = vsel %vm1509_vm0, %v1691_v14, 0.0 }
 0x264   : > { %v1703_v52 = vadd.f32 %v1688_v44, %v1686_v20  ;;  %v1694_v56 = vadd.f32 %v1693_v42, %v1689_v48  ;;  %vm1759_vm4 = vcmp.lt.s32.totalorder %v2892_v35, 256 }
 0x265   : > { %v1705_v45 = vsel %vm1509_vm0, %v1692_v34, 0.0 }
 0x266   : > { %v1696_v46 = vadd.f32 %v1695_v16, %v1694_v56  ;;  %v1704_v30 = vadd.f32 %v1703_v52, %v1690_v4 }
 0x268   : > { %v1697_v37 = vrot.slane %v1696_v46, 4  ;;  %v1706_v18 = vadd.f32 %v1705_v45, %v1704_v30 }
 0x26a   : > { %v1698_v38 = vadd.f32 %v1697_v37, %v1696_v46  ;;  %v1707_v25 = vrot.slane %v1706_v18, 4 }
 0x26c   : > { %v1699_v28 = vrot.slane %v1698_v38, 2  ;;  %v1708_v62 = vadd.f32 %v1707_v25, %v1706_v18 }
 0x26e   : > { %v1700_v31 = vadd.f32 %v1699_v28, %v1698_v38  ;;  %v1709_v33 = vrot.slane %v1708_v62, 2 }
 0x270   : > { %v1701_v60 = vrot.slane %v1700_v31, 1  ;;  %v1710_v32 = vadd.f32 %v1709_v33, %v1708_v62 }
 0x272   : > { %v1702_v15 = vadd.f32 %v1701_v60, %v1700_v31  ;;  %v1711_v0 = vrot.slane %v1710_v32, 1 }
 0x274   : > { %v1712_v9 = vadd.f32 %v1711_v0, %v1710_v32  ;;  %v1723_v8 = vadd.f32 %v1722_v59, %v1702_v15 }
 0x276   : > { %v1724_v11 = vadd.f32 %v1722_v59, %v1712_v9  ;;  %v1737_v5 = vmul.f32 %v1730_v50, %v1723_v8 }
 0x278   : > { %v1738_v12 = vmul.f32 %v1734_v54, %v1724_v11 }
 0x27a   : > { %v1741_v17 = vcombine.low %v1737_v5, %v1738_v12 }
 0x27c   : > { %v1748_v1 = vrot.slane %v1741_v17, %v1747_v55 }
 0x27e   : > { %v1755_v2 = vrot.slane %v1748_v1, %v1747_v55 }
 0x280   : > { %1761 = vst.msk [vmem:[%s646_s25] sm:$0x3] %vm1759_vm4, %v1755_v2 }
 0x281 PF: > { %s26_s17 = sadd.s32 1, %s2103_s17   ;;  %s2893_s15 = smov %s2099_s16 }
 0x282   : > { %p23_p5 = scmp.ge.s32.totalorder %s26_s17, 4   ;;  %s2894_s16 = smov %s2896_s13 }
 0x284   :  { %25 = sbr.rel (!%p23_p5) target bundleno = 3 (0x3), region = 118 }

</bundles_post_ra>
